<compile_context>
chip_gen: v5e
topology: v5e:2x2
jax: 0.10.0
libtpu: 0.0.40
codegen_flags: <defaults>
</compile_context>

<pallas_src>
import jax
import jax.numpy as jnp
from jax import lax
from jax.experimental import pallas as pl
from jax.experimental.pallas import tpu as pltpu


# (name, kernel_h, kernel_w, stride) -- fixed by the PyTorch module.
_CONV_CFG = (
    ("conv1", 8, 8, 4),
    ("conv2", 4, 4, 2),
    ("conv3", 3, 3, 1),
    ("conv4", 7, 7, 1),
)


def _pick_tm(m, target=512):
    """Evenly balanced M tile (multiple of 8).  m<=target -> single block."""
    if m <= target:
        return m
    nblocks = -(-m // target)
    tm = -(-m // nblocks)
    return ((tm + 7) // 8) * 8


# ----------------------------------------------------------------------------
# Pallas kernels
# ----------------------------------------------------------------------------
def _matmul_relu_kernel(a_ref, w_ref, o_ref):
    # a: (TM, K) bf16 cols, w: (K, OC) bf16 weights -> bf16 relu output.
    acc = jnp.dot(a_ref[...], w_ref[...], preferred_element_type=jnp.float32)
    o_ref[...] = jnp.maximum(acc, 0.0).astype(o_ref.dtype)


def matmul_relu(a, w):
    """relu(a @ w): M-tiled, weight resident, bf16 MXU, bf16 out."""
    m, k = a.shape
    k2, n = w.shape
    assert k == k2
    tm = _pick_tm(m)
    return pl.pallas_call(
        _matmul_relu_kernel,
        out_shape=jax.ShapeDtypeStruct((m, n), jnp.bfloat16),
        grid=(pl.cdiv(m, tm),),
        in_specs=[pl.BlockSpec((tm, k), lambda i: (i, 0)),
                  pl.BlockSpec((k, n), lambda i: (0, 0))],
        out_specs=pl.BlockSpec((tm, n), lambda i: (i, 0)),
        compiler_params=pltpu.CompilerParams(
            dimension_semantics=("parallel",)),
    )(a, w)


def _conv4_head_kernel(cols_ref, w4_ref, wc_ref, o_ref):
    # Single K shot: cols (B, 3136) bf16, w4 half (3136, 512) bf16.
    feats = jnp.maximum(
        jnp.dot(cols_ref[...], w4_ref[...], preferred_element_type=jnp.float32),
        0.0)                                              # (B, 512) ReLU, f32
    # Half 0 -> [value, 0, 0]; half 1 -> [0, adv0, adv1]  (bias added in XLA).
    head = jnp.dot(feats.astype(jnp.bfloat16), wc_ref[...],
                   preferred_element_type=jnp.float32)    # (B, 3)
    o_ref[0] = head.astype(o_ref.dtype)


def conv4_dueling_partials(cols, w4, w_comb):
    """Fused conv4-as-GEMM + ReLU + per-half head matmul.

    Grid runs over the two 512-channel halves of conv4's 1024 outputs as a
    'parallel' axis (value-half / advantage-half), sharding the 6.4 MB weight
    stream across v7x's two TensorCores.  Returns (2, B, 3) partial heads.
    """
    m, k = cols.shape
    n = w4.shape[1]
    assert n % 2 == 0 and w_comb.shape == (n, 3)
    half = n // 2
    return pl.pallas_call(
        _conv4_head_kernel,
        out_shape=jax.ShapeDtypeStruct((2, m, 3), jnp.float32),
        grid=(2,),
        in_specs=[pl.BlockSpec((m, k), lambda j: (0, 0)),
                  pl.BlockSpec((k, half), lambda j: (0, j)),
                  pl.BlockSpec((half, 3), lambda j: (j, 0))],
        out_specs=pl.BlockSpec((1, m, 3), lambda j: (j, 0, 0)),
        compiler_params=pltpu.CompilerParams(
            dimension_semantics=("parallel",)),
    )(cols, w4, w_comb)


# ----------------------------------------------------------------------------
# Glue: im2col for 'valid' strided conv (NHWC), patch order = (kh, kw, c_in)
# ----------------------------------------------------------------------------
# TODO(synk): move this patch extraction in-kernel (VMEM-resident activations).
def im2col(x_nhwc, kh, kw, stride):
    n, h, w, c = x_nhwc.shape
    oh = (h - kh) // stride + 1
    ow = (w - kw) // stride + 1
    patches = []
    for i in range(kh):
        for j in range(kw):
            patches.append(
                x_nhwc[:, i:i + stride * oh:stride, j:j + stride * ow:stride, :])
    p = jnp.stack(patches, axis=3)                        # (n, oh, ow, kh*kw, c)
    cols = p.reshape(n * oh * ow, kh * kw * c)
    return cols, (n, oh, ow)


# ----------------------------------------------------------------------------
# One-time weight preparation (hoisted out of the per-call path)
# ----------------------------------------------------------------------------
def prepare_params(params):
    prep = {}
    for name, _, _, _ in _CONV_CFG:
        w = params[name]                                  # (OC, IC, KH, KW)
        oc, ic, kh, kw = w.shape
        w_mat = jnp.transpose(w, (2, 3, 1, 0)).reshape(kh * kw * ic, oc)
        prep[name + "_w"] = w_mat.astype(jnp.bfloat16)    # (K, OC) bf16, no pad

    c = params["conv4"].shape[0]                          # 1024
    wv, bv = params["value_w"], params["value_b"]         # (1, 512), (1,)
    wa, ba = params["adv_w"], params["adv_b"]             # (2, 512), (2,)
    # Combined head weight: col 0 = value (channels [:512]),
    # cols 1:3 = advantage (channels [512:]).  Row-split by half in the kernel.
    w_comb = jnp.zeros((c, 3), jnp.float32)
    w_comb = w_comb.at[: c // 2, 0:1].set(wv.T)
    w_comb = w_comb.at[c // 2:, 1:3].set(wa.T)
    prep["w_comb"] = w_comb.astype(jnp.bfloat16)
    prep["b_comb"] = jnp.concatenate([bv, ba]).astype(jnp.float32)   # (3,)
    return prep


# ----------------------------------------------------------------------------
# D3QAgent forward (Pallas)
# ----------------------------------------------------------------------------
def d3q_forward(x_nchw, prep):
    # NCHW -> NHWC, bf16 up front (identical to rounding at the MXU input).
    x = jnp.transpose(x_nchw, (0, 2, 3, 1)).astype(jnp.bfloat16)

    # conv1..conv3: im2col + fused matmul+ReLU Pallas kernel (bf16 in/out)
    for name, kh, kw, stride in _CONV_CFG[:3]:
        w_mat = prep[name + "_w"]
        cols, (n, oh, ow) = im2col(x, kh, kw, stride)
        y = matmul_relu(cols, w_mat)
        x = y.reshape(n, oh, ow, w_mat.shape[1])

    # conv4: 7x7 kernel over the full 7x7 conv3 map -> im2col is a reshape.
    n, oh3, ow3, c3 = x.shape
    assert (oh3, ow3) == (7, 7), (oh3, ow3)
    cols4 = x.reshape(n, oh3 * ow3 * c3)                  # (N, 3136), (kh,kw,ic)

    # Fused conv4 + ReLU + per-half dueling head (features never leave VMEM).
    partials = conv4_dueling_partials(cols4, prep["conv4_w"], prep["w_comb"])
    head = partials[0] + partials[1] + prep["b_comb"]     # (N, 3)
    value = head[:, 0:1]
    adv = head[:, 1:3]
    q = adv + value - jnp.mean(adv, axis=-1, keepdims=True)
    return q.reshape(n, 1, 1, 2)                          # matches torch permute


# ----------------------------------------------------------------------------
# Pure-JAX reference (f32, HIGHEST precision) for correctness check
# ----------------------------------------------------------------------------
def reference_forward(x_nchw, params):
    x = x_nchw
    for name, _, _, stride in _CONV_CFG:
        x = lax.conv_general_dilated(
            x, params[name], (stride, stride), "VALID",
            dimension_numbers=("NCHW", "OIHW", "NCHW"),
            precision=lax.Precision.HIGHEST)
        x = jnp.maximum(x, 0.0)
    conv_value, conv_adv = x[:, :512], x[:, 512:]
    cv = jnp.transpose(conv_value, (0, 2, 3, 1))
    ca = jnp.transpose(conv_adv, (0, 2, 3, 1))
    value = jnp.einsum("nhwc,oc->nhwo", cv, params["value_w"],
                       precision=lax.Precision.HIGHEST) + params["value_b"]
    adv = jnp.einsum("nhwc,oc->nhwo", ca, params["adv_w"],
                     precision=lax.Precision.HIGHEST) + params["adv_b"]
    adv_mean = jnp.mean(adv, axis=-1, keepdims=True)
    return adv + value - adv_mean


# ----------------------------------------------------------------------------
# Deterministic parameter init (PyTorch-default-like uniform +-1/sqrt(fan_in))
# ----------------------------------------------------------------------------
def init_params(key):
    def uinit(k, shape, fan_in):
        bound = 1.0 / jnp.sqrt(fan_in)
        return jax.random.uniform(k, shape, jnp.float32, -bound, bound)

    ks = jax.random.split(key, 8)
    return {
        "conv1": uinit(ks[0], (32, 4, 8, 8), 4 * 8 * 8),
        "conv2": uinit(ks[1], (64, 32, 4, 4), 32 * 4 * 4),
        "conv3": uinit(ks[2], (64, 64, 3, 3), 64 * 3 * 3),
        "conv4": uinit(ks[3], (1024, 64, 7, 7), 64 * 7 * 7),
        "value_w": uinit(ks[4], (1, 512), 512),
        "value_b": uinit(ks[5], (1,), 512),
        "adv_w": uinit(ks[6], (2, 512), 512),
        "adv_b": uinit(ks[7], (2,), 512),
    }


if __name__ == "__main__":
    key = jax.random.PRNGKey(0)
    kp, kx = jax.random.split(key)
    params = init_params(kp)
    prep = prepare_params(params)

    # 84x84 is the minimum spatial size the 4-conv 'valid' stack admits
    # (8/4, 4/2, 3/1, 7/1) -> conv4 output is 1x1.  batch=2, 4 stacked frames.
    x = jax.random.uniform(kx, (2, 4, 84, 84), jnp.float32)

    fwd = jax.jit(d3q_forward)
    q = jax.block_until_ready(fwd(x, prep))

    q_ref = reference_forward(x, params)
    err = float(jnp.max(jnp.abs(q - q_ref)))
    scale = float(jnp.max(jnp.abs(q_ref)))
    assert q.shape == (2, 1, 1, 2), q.shape
    assert err <= max(1e-2, 2e-2 * scale), \
        f"mismatch vs reference: abs err = {err}, ref scale = {scale}"

    print("KERNEL_OK")
</pallas_src>

<mosaic_0001>
module attributes {stable_mosaic.version = 11 : i64} {
  func.func @_matmul_relu_kernel(%arg0: i32, %arg1: memref<400x256xbf16, #tpu.memory_space<vmem>>, %arg2: memref<256x32xbf16, #tpu.memory_space<vmem>>, %arg3: memref<400x32xbf16, #tpu.memory_space<vmem>>) attributes {dimension_semantics = [#tpu.dimension_semantics<parallel>], iteration_bounds = array<i64: 2>, scalar_prefetch = 0 : i64, scratch_operands = 0 : i64, tpu.core_type = #tpu.core_type<tc>, window_params = [{transform_indices = @transform_0, window_bounds = array<i64: 400, 256>}, {pipeline_mode = #tpu.pipeline_mode<synchronous>, transform_indices = @transform_1, window_bounds = array<i64: 256, 32>}, {transform_indices = @transform_2, window_bounds = array<i64: 400, 32>}]} {
    %c0 = arith.constant 0 : index
    %c0_0 = arith.constant 0 : index
    %0 = vector.load %arg1[%c0, %c0_0] : memref<400x256xbf16, #tpu.memory_space<vmem>>, vector<400x256xbf16>
    %c0_1 = arith.constant 0 : index
    %c0_2 = arith.constant 0 : index
    %1 = vector.load %arg2[%c0_1, %c0_2] : memref<256x32xbf16, #tpu.memory_space<vmem>>, vector<256x32xbf16>
    %cst = arith.constant dense<0.000000e+00> : vector<400x32xf32>
    %2 = tpu.matmul %0, %1, %cst {dimension_numbers = #tpu.dot_dimension_numbers<[1], [0], [0], [1], [0, 0, 1, 1], [], []>} : vector<400x256xbf16>, vector<256x32xbf16>, vector<400x32xf32> -> vector<400x32xf32>
    %cst_3 = arith.constant 0.000000e+00 : f32
    %3 = vector.broadcast %cst_3 : f32 to vector<400x32xf32>
    %4 = arith.maximumf %2, %3 : vector<400x32xf32>
    %5 = arith.truncf %4 : vector<400x32xf32> to vector<400x32xbf16>
    %c0_4 = arith.constant 0 : index
    %c0_5 = arith.constant 0 : index
    %6 = vector.load %arg3[%c0_4, %c0_5] : memref<400x32xbf16, #tpu.memory_space<vmem>>, vector<400x32xbf16>
    tpu.vector_store %arg3[%c0_4, %c0_5], %5 {strides = array<i32>} : memref<400x32xbf16, #tpu.memory_space<vmem>>, vector<400x32xbf16>,
    return
  }
  func.func @transform_0(%arg0: i32) -> (i32, i32) {
    %c0_i32 = arith.constant 0 : i32
    %c0_i32_0 = arith.constant 0 : i32
    return %arg0, %c0_i32 : i32, i32
  }
  func.func @transform_1(%arg0: i32) -> (i32, i32) {
    %c0_i32 = arith.constant 0 : i32
    %c0_i32_0 = arith.constant 0 : i32
    %c0_i32_1 = arith.constant 0 : i32
    return %c0_i32, %c0_i32_0 : i32, i32
  }
  func.func @transform_2(%arg0: i32) -> (i32, i32) {
    %c0_i32 = arith.constant 0 : i32
    %c0_i32_0 = arith.constant 0 : i32
    return %arg0, %c0_i32 : i32, i32
  }
}

module attributes {stable_mosaic.version = 11 : i64} {
  func.func @_matmul_relu_kernel(%arg0: i32, %arg1: memref<162x512xbf16, #tpu.memory_space<vmem>>, %arg2: memref<512x64xbf16, #tpu.memory_space<vmem>>, %arg3: memref<162x64xbf16, #tpu.memory_space<vmem>>) attributes {dimension_semantics = [#tpu.dimension_semantics<parallel>], iteration_bounds = array<i64: 1>, scalar_prefetch = 0 : i64, scratch_operands = 0 : i64, tpu.core_type = #tpu.core_type<tc>, window_params = [{transform_indices = @transform_0, window_bounds = array<i64: 162, 512>}, {pipeline_mode = #tpu.pipeline_mode<synchronous>, transform_indices = @transform_1, window_bounds = array<i64: 512, 64>}, {transform_indices = @transform_2, window_bounds = array<i64: 162, 64>}]} {
    %c0 = arith.constant 0 : index
    %c0_0 = arith.constant 0 : index
    %0 = vector.load %arg1[%c0, %c0_0] : memref<162x512xbf16, #tpu.memory_space<vmem>>, vector<162x512xbf16>
    %c0_1 = arith.constant 0 : index
    %c0_2 = arith.constant 0 : index
    %1 = vector.load %arg2[%c0_1, %c0_2] : memref<512x64xbf16, #tpu.memory_space<vmem>>, vector<512x64xbf16>
    %cst = arith.constant dense<0.000000e+00> : vector<162x64xf32>
    %2 = tpu.matmul %0, %1, %cst {dimension_numbers = #tpu.dot_dimension_numbers<[1], [0], [0], [1], [0, 0, 1, 1], [], []>} : vector<162x512xbf16>, vector<512x64xbf16>, vector<162x64xf32> -> vector<162x64xf32>
    %cst_3 = arith.constant 0.000000e+00 : f32
    %3 = vector.broadcast %cst_3 : f32 to vector<162x64xf32>
    %4 = arith.maximumf %2, %3 : vector<162x64xf32>
    %5 = arith.truncf %4 : vector<162x64xf32> to vector<162x64xbf16>
    %c0_4 = arith.constant 0 : index
    %c0_5 = arith.constant 0 : index
    %6 = vector.load %arg3[%c0_4, %c0_5] : memref<162x64xbf16, #tpu.memory_space<vmem>>, vector<162x64xbf16>
    tpu.vector_store %arg3[%c0_4, %c0_5], %5 {strides = array<i32>} : memref<162x64xbf16, #tpu.memory_space<vmem>>, vector<162x64xbf16>,
    return
  }
  func.func @transform_0(%arg0: i32) -> (i32, i32) {
    %c0_i32 = arith.constant 0 : i32
    %c0_i32_0 = arith.constant 0 : i32
    return %arg0, %c0_i32 : i32, i32
  }
  func.func @transform_1(%arg0: i32) -> (i32, i32) {
    %c0_i32 = arith.constant 0 : i32
    %c0_i32_0 = arith.constant 0 : i32
    %c0_i32_1 = arith.constant 0 : i32
    return %c0_i32, %c0_i32_0 : i32, i32
  }
  func.func @transform_2(%arg0: i32) -> (i32, i32) {
    %c0_i32 = arith.constant 0 : i32
    %c0_i32_0 = arith.constant 0 : i32
    return %arg0, %c0_i32 : i32, i32
  }
}

module attributes {stable_mosaic.version = 11 : i64} {
  func.func @_matmul_relu_kernel(%arg0: i32, %arg1: memref<98x576xbf16, #tpu.memory_space<vmem>>, %arg2: memref<576x64xbf16, #tpu.memory_space<vmem>>, %arg3: memref<98x64xbf16, #tpu.memory_space<vmem>>) attributes {dimension_semantics = [#tpu.dimension_semantics<parallel>], iteration_bounds = array<i64: 1>, scalar_prefetch = 0 : i64, scratch_operands = 0 : i64, tpu.core_type = #tpu.core_type<tc>, window_params = [{transform_indices = @transform_0, window_bounds = array<i64: 98, 576>}, {pipeline_mode = #tpu.pipeline_mode<synchronous>, transform_indices = @transform_1, window_bounds = array<i64: 576, 64>}, {transform_indices = @transform_2, window_bounds = array<i64: 98, 64>}]} {
    %c0 = arith.constant 0 : index
    %c0_0 = arith.constant 0 : index
    %0 = vector.load %arg1[%c0, %c0_0] : memref<98x576xbf16, #tpu.memory_space<vmem>>, vector<98x576xbf16>
    %c0_1 = arith.constant 0 : index
    %c0_2 = arith.constant 0 : index
    %1 = vector.load %arg2[%c0_1, %c0_2] : memref<576x64xbf16, #tpu.memory_space<vmem>>, vector<576x64xbf16>
    %cst = arith.constant dense<0.000000e+00> : vector<98x64xf32>
    %2 = tpu.matmul %0, %1, %cst {dimension_numbers = #tpu.dot_dimension_numbers<[1], [0], [0], [1], [0, 0, 1, 1], [], []>} : vector<98x576xbf16>, vector<576x64xbf16>, vector<98x64xf32> -> vector<98x64xf32>
    %cst_3 = arith.constant 0.000000e+00 : f32
    %3 = vector.broadcast %cst_3 : f32 to vector<98x64xf32>
    %4 = arith.maximumf %2, %3 : vector<98x64xf32>
    %5 = arith.truncf %4 : vector<98x64xf32> to vector<98x64xbf16>
    %c0_4 = arith.constant 0 : index
    %c0_5 = arith.constant 0 : index
    %6 = vector.load %arg3[%c0_4, %c0_5] : memref<98x64xbf16, #tpu.memory_space<vmem>>, vector<98x64xbf16>
    tpu.vector_store %arg3[%c0_4, %c0_5], %5 {strides = array<i32>} : memref<98x64xbf16, #tpu.memory_space<vmem>>, vector<98x64xbf16>,
    return
  }
  func.func @transform_0(%arg0: i32) -> (i32, i32) {
    %c0_i32 = arith.constant 0 : i32
    %c0_i32_0 = arith.constant 0 : i32
    return %arg0, %c0_i32 : i32, i32
  }
  func.func @transform_1(%arg0: i32) -> (i32, i32) {
    %c0_i32 = arith.constant 0 : i32
    %c0_i32_0 = arith.constant 0 : i32
    %c0_i32_1 = arith.constant 0 : i32
    return %c0_i32, %c0_i32_0 : i32, i32
  }
  func.func @transform_2(%arg0: i32) -> (i32, i32) {
    %c0_i32 = arith.constant 0 : i32
    %c0_i32_0 = arith.constant 0 : i32
    return %arg0, %c0_i32 : i32, i32
  }
}

module attributes {stable_mosaic.version = 11 : i64} {
  func.func @_conv4_head_kernel(%arg0: i32, %arg1: memref<2x3136xbf16, #tpu.memory_space<vmem>>, %arg2: memref<3136x512xbf16, #tpu.memory_space<vmem>>, %arg3: memref<512x3xbf16, #tpu.memory_space<vmem>>, %arg4: memref<1x2x3xf32, #tpu.memory_space<vmem>>) attributes {dimension_semantics = [#tpu.dimension_semantics<parallel>], iteration_bounds = array<i64: 2>, scalar_prefetch = 0 : i64, scratch_operands = 0 : i64, tpu.core_type = #tpu.core_type<tc>, window_params = [{pipeline_mode = #tpu.pipeline_mode<synchronous>, transform_indices = @transform_0, window_bounds = array<i64: 2, 3136>}, {transform_indices = @transform_1, window_bounds = array<i64: 3136, 512>}, {transform_indices = @transform_2, window_bounds = array<i64: 512, 3>}, {transform_indices = @transform_3, window_bounds = array<i64: 1, 2, 3>}]} {
    %c0 = arith.constant 0 : index
    %c0_0 = arith.constant 0 : index
    %0 = vector.load %arg1[%c0, %c0_0] : memref<2x3136xbf16, #tpu.memory_space<vmem>>, vector<2x3136xbf16>
    %c0_1 = arith.constant 0 : index
    %c0_2 = arith.constant 0 : index
    %1 = vector.load %arg2[%c0_1, %c0_2] : memref<3136x512xbf16, #tpu.memory_space<vmem>>, vector<3136x512xbf16>
    %cst = arith.constant dense<0.000000e+00> : vector<2x512xf32>
    %2 = tpu.matmul %0, %1, %cst {dimension_numbers = #tpu.dot_dimension_numbers<[1], [0], [0], [1], [0, 0, 1, 1], [], []>} : vector<2x3136xbf16>, vector<3136x512xbf16>, vector<2x512xf32> -> vector<2x512xf32>
    %cst_3 = arith.constant 0.000000e+00 : f32
    %3 = vector.broadcast %cst_3 : f32 to vector<2x512xf32>
    %4 = arith.maximumf %2, %3 : vector<2x512xf32>
    %5 = arith.truncf %4 : vector<2x512xf32> to vector<2x512xbf16>
    %c0_4 = arith.constant 0 : index
    %c0_5 = arith.constant 0 : index
    %6 = vector.load %arg3[%c0_4, %c0_5] : memref<512x3xbf16, #tpu.memory_space<vmem>>, vector<512x3xbf16>
    %cst_6 = arith.constant dense<0.000000e+00> : vector<2x3xf32>
    %7 = tpu.matmul %5, %6, %cst_6 {dimension_numbers = #tpu.dot_dimension_numbers<[1], [0], [0], [1], [0, 0, 1, 1], [], []>} : vector<2x512xbf16>, vector<512x3xbf16>, vector<2x3xf32> -> vector<2x3xf32>
    %c0_7 = arith.constant 0 : index
    %c0_8 = arith.constant 0 : index
    %c0_9 = arith.constant 0 : index
    %8 = vector.load %arg4[%c0_7, %c0_8, %c0_9] : memref<1x2x3xf32, #tpu.memory_space<vmem>>, vector<1x2x3xf32>
    %9 = vector.shape_cast %8 : vector<1x2x3xf32> to vector<2x3xf32>
    %10 = vector.shape_cast %7 : vector<2x3xf32> to vector<1x2x3xf32>
    tpu.vector_store %arg4[%c0_7, %c0_8, %c0_9], %10 {strides = array<i32>} : memref<1x2x3xf32, #tpu.memory_space<vmem>>, vector<1x2x3xf32>,
    return
  }
  func.func @transform_0(%arg0: i32) -> (i32, i32) {
    %c0_i32 = arith.constant 0 : i32
    %c0_i32_0 = arith.constant 0 : i32
    %c0_i32_1 = arith.constant 0 : i32
    return %c0_i32, %c0_i32_0 : i32, i32
  }
  func.func @transform_1(%arg0: i32) -> (i32, i32) {
    %c0_i32 = arith.constant 0 : i32
    %c0_i32_0 = arith.constant 0 : i32
    return %c0_i32, %arg0 : i32, i32
  }
  func.func @transform_2(%arg0: i32) -> (i32, i32) {
    %c0_i32 = arith.constant 0 : i32
    %c0_i32_0 = arith.constant 0 : i32
    return %arg0, %c0_i32 : i32, i32
  }
  func.func @transform_3(%arg0: i32) -> (i32, i32, i32) {
    %c0_i32 = arith.constant 0 : i32
    %c0_i32_0 = arith.constant 0 : i32
    %c0_i32_1 = arith.constant 0 : i32
    return %arg0, %c0_i32, %c0_i32_0 : i32, i32, i32
  }
}

</mosaic_0001>

<bundles_post_ra>
// kernel: d3q_forward.4
= control target key start
LH: loop header
LB: loop body
LE: loop exit
PB: predicated region body
PF: predicated region fallthrough
CT: control target
= control target key end

     0   :  { %s1441_s9 = smov 0   ;;  %s1720_s0 = inlined_call_operand.vmem [shape: bf16[800,256], index: 0, kind: input, shape index: {}]   ;;  %s1721_s1 = inlined_call_operand.vmem [shape: bf16[256,32], index: 1, kind: input, shape index: {}]   ;;  %s1722_s2 = inlined_call_operand.vmem [shape: bf16[800,32], index: 2, kind: output, shape index: {}]  }
   0x1 LB: > { %s1053_s10 = sadd.s32 4294967295, %s1424_s9   ;;  %p1057_p0 = scmp.ge.s32.totalorder %s1424_s9, 1  ;;  %s1424_s9 = sphi %s1441_s9, %s12_s9  }
   0x2   : > { %p114_p1 = scmp.lt.s32.totalorder %s1424_s9, 3 }
   0x4   : > { %p115_p2 = pnand %p1057_p0, %p114_p1 }
   0x5   : > { %s137_s23 = smul.u32 (!%p115_p2), 50, %s1053_s10 }
   0x6   : > { %118 = sbr.rel (%p115_p2) target bundleno = 382 (0x17e), region = 28 }
   0x7   : > { %p138_p3 = scmp.lt.s32.totalorder (!%p115_p2), %s137_s23, 99 }
   0xb   : > { %v1385_v0 = vld [vmem:[%s1721_s1 + $0x38] sm:$0xff]  ;;  %v1384_v2 = vld [vmem:[%s1721_s1 + $0x30] sm:$0xff]  ;;  %v1383_v4 = vld [vmem:[%s1721_s1 + $0x28] sm:$0xff]  ;;  %s1724_s23 = smov (!%p138_p3, %s137_s23), 99  ;;  %vm946_vm0 = vcmask 257024  }
   0xc   : > { %v1393_v1 = vld [vmem:[%s1721_s1 + $0x78] sm:$0xff]  ;;  %578 = vmatpush.bf16.msra.mxu0 %v1385_v0  ;;  %1394 = vmatpush.bf16.msra.mxu2 %v1385_v0  ;;  %v1392_v3 = vld [vmem:[%s1721_s1 + $0x70] sm:$0xff]  ;;  %v1391_v5 = vld [vmem:[%s1721_s1 + $0x68] sm:$0xff]  ;;  %s1327_s8 = sshll.u32 %s1724_s23, 3  ;;  %s1060_s21 = sshll.u32 %s1724_s23, 2 }
   0xd   : > { %712 = vmatpush.bf16.msra.mxu1 %v1393_v1  ;;  %1402 = vmatpush.bf16.msra.mxu3 %v1393_v1  ;;  %v1382_v6 = vld [vmem:[%s1721_s1 + $0x20] sm:$0xff]  ;;  %v1381_v8 = vld [vmem:[%s1721_s1 + $0x18] sm:$0xff]  ;;  %v1380_v10 = vld [vmem:[%s1721_s1 + $0x10] sm:$0xff]  ;;  %s1494_s14 = scalar_lea.vmem %s1720_s0, %s1327_s8  ;;  %s1581_s25 = scalar_lea.vmem %s1722_s2, %s1060_s21 }
   0xe   : > { %v1390_v7 = vld [vmem:[%s1721_s1 + $0x60] sm:$0xff]  ;;  %v1389_v9 = vld [vmem:[%s1721_s1 + $0x58] sm:$0xff]  ;;  %v1388_v11 = vld [vmem:[%s1721_s1 + $0x50] sm:$0xff] }
   0xf   : > { %v1379_v12 = vld [vmem:[%s1721_s1 + $0x8] sm:$0xff]  ;;  %v1378_v14 = vld [vmem:[%s1721_s1] sm:$0xff]  ;;  %v1354_v22 = vld [vmem:[%s1494_s14 + $0xd4] sm:$0xf] }
  0x10   : > { %579 = vmatpush.bf16.msra.mxu0 %v1384_v2  ;;  %1395 = vmatpush.bf16.msra.mxu2 %v1384_v2  ;;  %v1387_v13 = vld [vmem:[%s1721_s1 + $0x48] sm:$0xff]  ;;  %v1386_v15 = vld [vmem:[%s1721_s1 + $0x40] sm:$0xff]  ;;  %v1169_v23 = vld [vmem:[%s1494_s14 + $0xd8] sm:$0xf0] }
  0x11   : > { %713 = vmatpush.bf16.msra.mxu1 %v1392_v3  ;;  %1403 = vmatpush.bf16.msra.mxu3 %v1392_v3  ;;  %v1063_v16 = vld [vmem:[%s1494_s14] sm:$0xf]  ;;  %v1329_v17 = vld [vmem:[%s1494_s14 + $0x4] sm:$0xf0]  ;;  %v1328_v20 = vld [vmem:[%s1494_s14 + $0x4] sm:$0xf]  ;;  %v1172_v27 = vor.u32 %v1354_v22, %v1169_v23 }
  0x12   : > { %v1159_v18 = vld [vmem:[%s1494_s14 + $0xc0] sm:$0xf]  ;;  %v1353_v19 = vld [vmem:[%s1494_s14 + $0xc4] sm:$0xf0]  ;;  %v1065_v21 = vld [vmem:[%s1494_s14 + $0x8] sm:$0xf0]  ;;  %v1064_v24 = vor.u32 %v1329_v17, %v1063_v16 }
  0x13   : > { %v1160_v25 = vor.u32 %v1353_v19, %v1159_v18  ;;  %v1068_v26 = vor.u32 %v1328_v20, %v1065_v21  ;;  %v1071_v28 = vld [vmem:[%s1494_s14 + $0x10] sm:$0xf]  ;;  %v1331_v29 = vld [vmem:[%s1494_s14 + $0x14] sm:$0xf0]  ;;  %v1330_v32 = vld [vmem:[%s1494_s14 + $0x14] sm:$0xf] }
  0x14   : > { %580 = vmatpush.bf16.msra.mxu0 %v1383_v4  ;;  %1396 = vmatpush.bf16.msra.mxu2 %v1383_v4  ;;  %v1167_v30 = vld [vmem:[%s1494_s14 + $0xd0] sm:$0xf]  ;;  %v1355_v31 = vld [vmem:[%s1494_s14 + $0xd4] sm:$0xf0]  ;;  %v1073_v33 = vld [vmem:[%s1494_s14 + $0x18] sm:$0xf0]  ;;  %v1072_v36 = vor.u32 %v1331_v29, %v1071_v28 }
  0x15   : > { %714 = vmatpush.bf16.msra.mxu1 %v1391_v5  ;;  %1404 = vmatpush.bf16.msra.mxu3 %v1391_v5  ;;  %v1356_v34 = vld [vmem:[%s1494_s14 + $0xe4] sm:$0xf]  ;;  %v1177_v35 = vld [vmem:[%s1494_s14 + $0xe8] sm:$0xf0]  ;;  %v1168_v37 = vor.u32 %v1355_v31, %v1167_v30  ;;  %v1076_v38 = vor.u32 %v1330_v32, %v1073_v33  ;;  %v1079_v40 = vld [vmem:[%s1494_s14 + $0x20] sm:$0xf] }
  0x16   : > { %v1180_v39 = vor.u32 %v1356_v34, %v1177_v35  ;;  %v1333_v41 = vld [vmem:[%s1494_s14 + $0x24] sm:$0xf0]  ;;  %v1175_v42 = vld [vmem:[%s1494_s14 + $0xe0] sm:$0xf]  ;;  %v1332_v44 = vld [vmem:[%s1494_s14 + $0x24] sm:$0xf] }
  0x17   : > { %v1357_v43 = vld [vmem:[%s1494_s14 + $0xe4] sm:$0xf0]  ;;  %v1081_v45 = vld [vmem:[%s1494_s14 + $0x28] sm:$0xf0]  ;;  %v1358_v46 = vld [vmem:[%s1494_s14 + $0xf4] sm:$0xf]  ;;  %v1080_v48 = vor.u32 %v1333_v41, %v1079_v40 }
  0x18   : > { %581 = vmatpush.bf16.msra.mxu0 %v1382_v6  ;;  %1397 = vmatpush.bf16.msra.mxu2 %v1382_v6  ;;  %v1185_v47 = vld [vmem:[%s1494_s14 + $0xf8] sm:$0xf0]  ;;  %v1176_v49 = vor.u32 %v1357_v43, %v1175_v42  ;;  %v1084_v50 = vor.u32 %v1332_v44, %v1081_v45  ;;  %v1087_v52 = vld [vmem:[%s1494_s14 + $0x30] sm:$0xf]  ;;  %v1335_v53 = vld [vmem:[%s1494_s14 + $0x34] sm:$0xf0] }
  0x19   : > { %715 = vmatpush.bf16.msra.mxu1 %v1390_v7  ;;  %1405 = vmatpush.bf16.msra.mxu3 %v1390_v7  ;;  %v1188_v51 = vor.u32 %v1358_v46, %v1185_v47  ;;  %v1183_v54 = vld [vmem:[%s1494_s14 + $0xf0] sm:$0xf]  ;;  %v1359_v55 = vld [vmem:[%s1494_s14 + $0xf4] sm:$0xf0]  ;;  %v1334_v56 = vld [vmem:[%s1494_s14 + $0x34] sm:$0xf]  ;;  %v1088_v60 = vor.u32 %v1335_v53, %v1087_v52 }
  0x1a   : > { %v1089_v57 = vld [vmem:[%s1494_s14 + $0x38] sm:$0xf0]  ;;  %v1360_v58 = vld [vmem:[%s1494_s14 + $0x104] sm:$0xf]  ;;  %v1193_v59 = vld [vmem:[%s1494_s14 + $0x108] sm:$0xf0]  ;;  %v1184_v61 = vor.u32 %v1359_v55, %v1183_v54 }
  0x1b   : > { %v1092_v62 = vor.u32 %v1334_v56, %v1089_v57  ;;  %v1196_v63 = vor.u32 %v1360_v58, %v1193_v59  ;;  %v1095_v0 = vld [vmem:[%s1494_s14 + $0x40] sm:$0xf]  ;;  %v1337_v1 = vld [vmem:[%s1494_s14 + $0x44] sm:$0xf0]  ;;  %v1336_v4 = vld [vmem:[%s1494_s14 + $0x44] sm:$0xf] }
  0x1c   : > { %582 = vmatpush.bf16.msra.mxu0 %v1381_v8  ;;  %1398 = vmatpush.bf16.msra.mxu2 %v1381_v8  ;;  %v1191_v2 = vld [vmem:[%s1494_s14 + $0x100] sm:$0xf]  ;;  %v1361_v3 = vld [vmem:[%s1494_s14 + $0x104] sm:$0xf0]  ;;  %v1097_v5 = vld [vmem:[%s1494_s14 + $0x48] sm:$0xf0]  ;;  %v1096_v8 = vor.u32 %v1337_v1, %v1095_v0 }
  0x1d   : > { %716 = vmatpush.bf16.msra.mxu1 %v1389_v9  ;;  %1406 = vmatpush.bf16.msra.mxu3 %v1389_v9  ;;  %v1362_v6 = vld [vmem:[%s1494_s14 + $0x114] sm:$0xf]  ;;  %v1201_v7 = vld [vmem:[%s1494_s14 + $0x118] sm:$0xf0]  ;;  %v1192_v9 = vor.u32 %v1361_v3, %v1191_v2  ;;  %v1364_v18 = vld [vmem:[%s1494_s14 + $0x124] sm:$0xf] }
  0x1e   : > { %v1338_v16 = vld [vmem:[%s1494_s14 + $0x54] sm:$0xf]  ;;  %v1105_v17 = vld [vmem:[%s1494_s14 + $0x58] sm:$0xf0]  ;;  %v1209_v19 = vld [vmem:[%s1494_s14 + $0x128] sm:$0xf0] }
  0x1f   : > { %v1108_v22 = vor.u32 %v1338_v16, %v1105_v17  ;;  %v1212_v23 = vor.u32 %v1364_v18, %v1209_v19  ;;  %v1340_v28 = vld [vmem:[%s1494_s14 + $0x64] sm:$0xf]  ;;  %v1113_v29 = vld [vmem:[%s1494_s14 + $0x68] sm:$0xf0]  ;;  %v1366_v30 = vld [vmem:[%s1494_s14 + $0x134] sm:$0xf] }
  0x20   : > { %583 = vmatpush.bf16.msra.mxu0 %v1380_v10  ;;  %1399 = vmatpush.bf16.msra.mxu2 %v1380_v10  ;;  %v1100_v10 = vor.u32 %v1336_v4, %v1097_v5  ;;  %v1217_v31 = vld [vmem:[%s1494_s14 + $0x138] sm:$0xf0]  ;;  %v1116_v34 = vor.u32 %v1340_v28, %v1113_v29  ;;  %v1342_v40 = vld [vmem:[%s1494_s14 + $0x74] sm:$0xf]  ;;  %v1368_v42 = vld [vmem:[%s1494_s14 + $0x144] sm:$0xf] }
  0x21   : > { %717 = vmatpush.bf16.msra.mxu1 %v1388_v11  ;;  %1407 = vmatpush.bf16.msra.mxu3 %v1388_v11  ;;  %v1204_v11 = vor.u32 %v1362_v6, %v1201_v7  ;;  %v1220_v35 = vor.u32 %v1366_v30, %v1217_v31  ;;  %v1121_v41 = vld [vmem:[%s1494_s14 + $0x78] sm:$0xf0]  ;;  %v1225_v43 = vld [vmem:[%s1494_s14 + $0x148] sm:$0xf0]  ;;  %v1344_v52 = vld [vmem:[%s1494_s14 + $0x84] sm:$0xf] }
  0x22   : > { %v1124_v46 = vor.u32 %v1342_v40, %v1121_v41  ;;  %v1228_v47 = vor.u32 %v1368_v42, %v1225_v43  ;;  %v1129_v53 = vld [vmem:[%s1494_s14 + $0x88] sm:$0xf0]  ;;  %v1370_v54 = vld [vmem:[%s1494_s14 + $0x154] sm:$0xf]  ;;  %v1233_v55 = vld [vmem:[%s1494_s14 + $0x158] sm:$0xf0] }
  0x23   : > { %v1132_v59 = vor.u32 %v1344_v52, %v1129_v53  ;;  %v1135_v6 = vld [vmem:[%s1494_s14 + $0x90] sm:$0xf]  ;;  %v1347_v7 = vld [vmem:[%s1494_s14 + $0x94] sm:$0xf0]  ;;  %v1348_v40 = vld [vmem:[%s1494_s14 + $0xa4] sm:$0xf] }
  0x24   : > { %584 = vmatpush.bf16.msra.mxu0 %v1379_v12  ;;  %1400 = vmatpush.bf16.msra.mxu2 %v1379_v12  ;;  %v1103_v12 = vld [vmem:[%s1494_s14 + $0x50] sm:$0xf]  ;;  %v1136_v17 = vor.u32 %v1347_v7, %v1135_v6  ;;  %v1145_v41 = vld [vmem:[%s1494_s14 + $0xa8] sm:$0xf0]  ;;  %v1374_v42 = vld [vmem:[%s1494_s14 + $0x174] sm:$0xf] }
  0x25   : > { %718 = vmatpush.bf16.msra.mxu1 %v1387_v13  ;;  %1408 = vmatpush.bf16.msra.mxu3 %v1387_v13  ;;  %v1339_v13 = vld [vmem:[%s1494_s14 + $0x54] sm:$0xf0]  ;;  %v1249_v43 = vld [vmem:[%s1494_s14 + $0x178] sm:$0xf0]  ;;  %v1247_v6 = vld [vmem:[%s1494_s14 + $0x170] sm:$0xf] }
  0x26   : > { %v1104_v20 = vor.u32 %v1339_v13, %v1103_v12  ;;  %v1137_v12 = vld [vmem:[%s1494_s14 + $0x98] sm:$0xf0]  ;;  %v1372_v13 = vld [vmem:[%s1494_s14 + $0x164] sm:$0xf]  ;;  %v1252_v52 = vor.u32 %v1374_v42, %v1249_v43  ;;  %v1375_v7 = vld [vmem:[%s1494_s14 + $0x174] sm:$0xf0] }
  0x28   : > { %585 = vmatpush.bf16.msra.mxu0 %v1378_v14  ;;  %1401 = vmatpush.bf16.msra.mxu2 %v1378_v14  ;;  %v1199_v14 = vld [vmem:[%s1494_s14 + $0x110] sm:$0xf] }
  0x29   : > { %719 = vmatpush.bf16.msra.mxu1 %v1386_v15  ;;  %1409 = vmatpush.bf16.msra.mxu3 %v1386_v15  ;;  %v1363_v15 = vld [vmem:[%s1494_s14 + $0x114] sm:$0xf0] }
  0x2a   : > { %v1200_v21 = vor.u32 %v1363_v15, %v1199_v14  ;;  %v1241_v14 = vld [vmem:[%s1494_s14 + $0x168] sm:$0xf0] }
  0x2b   : > { %586 = vmatmul.bf16.vlgmr.msra.gmra.mxu0 %v1064_v24  ;;  %646 = vmatmul.bf16.vlgmr.msra.gmra.mxu2 %v1160_v25  ;;  %v1111_v24 = vld [vmem:[%s1494_s14 + $0x60] sm:$0xf]  ;;  %v1341_v25 = vld [vmem:[%s1494_s14 + $0x64] sm:$0xf0] }
  0x2c   : > { %720 = vmatmul.bf16.vlgmr.msra.gmra.mxu1 %v1068_v26  ;;  %785 = vmatmul.bf16.vlgmr.msra.gmra.mxu3 %v1172_v27  ;;  %v1207_v26 = vld [vmem:[%s1494_s14 + $0x120] sm:$0xf]  ;;  %v1365_v27 = vld [vmem:[%s1494_s14 + $0x124] sm:$0xf0]  ;;  %v1112_v32 = vor.u32 %v1341_v25, %v1111_v24 }
  0x2d   : > { %v1208_v33 = vor.u32 %v1365_v27, %v1207_v26 }
  0x3b   : > { %591 = vmatmul.bf16.gmra.mxu0 %v1072_v36  ;;  %651 = vmatmul.bf16.gmra.mxu2 %v1168_v37  ;;  %v1119_v36 = vld [vmem:[%s1494_s14 + $0x70] sm:$0xf]  ;;  %v1343_v37 = vld [vmem:[%s1494_s14 + $0x74] sm:$0xf0] }
  0x3c   : > { %725 = vmatmul.bf16.gmra.mxu1 %v1076_v38  ;;  %790 = vmatmul.bf16.gmra.mxu3 %v1180_v39  ;;  %v1215_v38 = vld [vmem:[%s1494_s14 + $0x130] sm:$0xf]  ;;  %v1367_v39 = vld [vmem:[%s1494_s14 + $0x134] sm:$0xf0]  ;;  %v1120_v44 = vor.u32 %v1343_v37, %v1119_v36  ;;  %v1349_v36 = vld [vmem:[%s1494_s14 + $0xa4] sm:$0xf0] }
  0x3d   : > { %v1216_v45 = vor.u32 %v1367_v39, %v1215_v38  ;;  %v1239_v37 = vld [vmem:[%s1494_s14 + $0x160] sm:$0xf]  ;;  %v1373_v38 = vld [vmem:[%s1494_s14 + $0x164] sm:$0xf0] }
  0x4b   : > { %596 = vmatmul.bf16.gmra.mxu0 %v1080_v48  ;;  %656 = vmatmul.bf16.gmra.mxu2 %v1176_v49  ;;  %v1127_v48 = vld [vmem:[%s1494_s14 + $0x80] sm:$0xf]  ;;  %v1345_v49 = vld [vmem:[%s1494_s14 + $0x84] sm:$0xf0] }
  0x4c   : > { %730 = vmatmul.bf16.gmra.mxu1 %v1084_v50  ;;  %795 = vmatmul.bf16.gmra.mxu3 %v1188_v51  ;;  %v1223_v50 = vld [vmem:[%s1494_s14 + $0x140] sm:$0xf]  ;;  %v1369_v51 = vld [vmem:[%s1494_s14 + $0x144] sm:$0xf0]  ;;  %v1128_v56 = vor.u32 %v1345_v49, %v1127_v48  ;;  %v1240_v48 = vor.u32 %v1373_v38, %v1239_v37 }
  0x4d   : > { %v1224_v57 = vor.u32 %v1369_v51, %v1223_v50  ;;  %v1148_v51 = vor.u32 %v1348_v40, %v1145_v41  ;;  %v1255_v38 = vld [vmem:[%s1494_s14 + $0x180] sm:$0xf]  ;;  %v1352_v40 = vld [vmem:[%s1494_s14 + $0xc4] sm:$0xf]  ;;  %v1161_v41 = vld [vmem:[%s1494_s14 + $0xc8] sm:$0xf0] }
  0x5b   : > { %601 = vmatmul.bf16.gmra.mxu0 %v1088_v60  ;;  %661 = vmatmul.bf16.gmra.mxu2 %v1184_v61  ;;  %v1236_v60 = vor.u32 %v1370_v54, %v1233_v55 }
  0x5c   : > { %735 = vmatmul.bf16.gmra.mxu1 %v1092_v62  ;;  %800 = vmatmul.bf16.gmra.mxu3 %v1196_v63 }
  0x6b   : > { %606 = vmatmul.bf16.gmra.mxu0 %v1096_v8  ;;  %666 = vmatmul.bf16.gmra.mxu2 %v1192_v9  ;;  %v1231_v8 = vld [vmem:[%s1494_s14 + $0x150] sm:$0xf] }
  0x6c   : > { %740 = vmatmul.bf16.gmra.mxu1 %v1100_v10  ;;  %805 = vmatmul.bf16.gmra.mxu3 %v1204_v11  ;;  %v1371_v10 = vld [vmem:[%s1494_s14 + $0x154] sm:$0xf0]  ;;  %v1346_v11 = vld [vmem:[%s1494_s14 + $0x94] sm:$0xf] }
  0x6d   : > { %v1232_v18 = vor.u32 %v1371_v10, %v1231_v8  ;;  %v1153_v10 = vld [vmem:[%s1494_s14 + $0xb8] sm:$0xf0] }
  0x7b   : > { %611 = vmatmul.bf16.gmra.mxu0 %v1104_v20  ;;  %671 = vmatmul.bf16.gmra.mxu2 %v1200_v21  ;;  %v1140_v21 = vor.u32 %v1346_v11, %v1137_v12  ;;  %v1376_v11 = vld [vmem:[%s1494_s14 + $0x184] sm:$0xf]  ;;  %v1257_v12 = vld [vmem:[%s1494_s14 + $0x188] sm:$0xf0] }
  0x7c   : > { %745 = vmatmul.bf16.gmra.mxu1 %v1108_v22  ;;  %810 = vmatmul.bf16.gmra.mxu3 %v1212_v23  ;;  %v1244_v22 = vor.u32 %v1372_v13, %v1241_v14 }
  0x8b   : > { %616 = vmatmul.bf16.gmra.mxu0 %v1112_v32  ;;  %676 = vmatmul.bf16.gmra.mxu2 %v1208_v33 }
  0x8c   : > { %750 = vmatmul.bf16.gmra.mxu1 %v1116_v34  ;;  %815 = vmatmul.bf16.gmra.mxu3 %v1220_v35  ;;  %v1143_v34 = vld [vmem:[%s1494_s14 + $0xa0] sm:$0xf] }
  0x9b   : > { %621 = vmatmul.bf16.gmra.mxu0 %v1120_v44  ;;  %681 = vmatmul.bf16.gmra.mxu2 %v1216_v45 }
  0x9c   : > { %755 = vmatmul.bf16.gmra.mxu1 %v1124_v46  ;;  %820 = vmatmul.bf16.gmra.mxu3 %v1228_v47  ;;  %v1144_v47 = vor.u32 %v1349_v36, %v1143_v34 }
  0xa8   : > { %v587_v58 = vpop.f32.mrf.mxu0 }
  0xa9   : > { %v721_v61 = vpop.f32.mrf.mxu1 }
  0xaa   : > { %v722_v62 = vadd.f32 %v721_v61, %v587_v58 }
  0xab   : > { %626 = vmatmul.bf16.gmra.mxu0 %v1128_v56  ;;  %686 = vmatmul.bf16.gmra.mxu2 %v1224_v57 }
  0xac   : > { %v846_v63 = vmax.f32 %v722_v62, 0.0  ;;  %760 = vmatmul.bf16.gmra.mxu1 %v1132_v59  ;;  %825 = vmatmul.bf16.gmra.mxu3 %v1236_v60 }
  0xae   : > { %v896_v0 = vpack.c.bf16 %v846_v63, %v846_v63  ;;  %v1583_v1 = vpop.f32.mrf.mxu2 }
  0xaf   : > { %v786_v2 = vpop.f32.mrf.mxu3 }
  0xb0   : > { %947 = vst.msk [vmem:[%s1581_s25] sm:$0xf] %vm946_vm0, %v896_v0  ;;  %v589_v3 = vpop.f32.mrf.mxu0 }
  0xb1   : > { %v723_v4 = vpop.f32.mrf.mxu1 }
  0xb2   : > { %v724_v5 = vadd.f32 %v723_v4, %v589_v3  ;;  %v1151_v3 = vld [vmem:[%s1494_s14 + $0xb0] sm:$0xf] }
  0xb4   : > { %v847_v9 = vmax.f32 %v724_v5, 0.0  ;;  %v1351_v5 = vld [vmem:[%s1494_s14 + $0xb4] sm:$0xf0] }
  0xb6   : > { %v897_v15 = vpack.c.bf16 %v847_v9, %v847_v9  ;;  %v1595_v16 = vpop.f32.mrf.mxu2  ;;  %v1350_v9 = vld [vmem:[%s1494_s14 + $0xb4] sm:$0xf] }
  0xb7   : > { %v788_v19 = vpop.f32.mrf.mxu3 }
  0xb8   : > { %948 = vst.msk [vmem:[%s1581_s25 + $0x4] sm:$0xf] %vm946_vm0, %v897_v15  ;;  %v592_v20 = vpop.f32.mrf.mxu0 }
  0xb9   : > { %v726_v23 = vpop.f32.mrf.mxu1 }
  0xba   : > { %v727_v24 = vadd.f32 %v726_v23, %v592_v20 }
  0xbb   : > { %631 = vmatmul.bf16.gmra.mxu0 %v1136_v17  ;;  %691 = vmatmul.bf16.gmra.mxu2 %v1232_v18  ;;  %v1152_v17 = vor.u32 %v1351_v5, %v1151_v3  ;;  %v1248_v18 = vor.u32 %v1375_v7, %v1247_v6 }
  0xbc   : > { %v848_v25 = vmax.f32 %v727_v24, 0.0  ;;  %765 = vmatmul.bf16.gmra.mxu1 %v1140_v21  ;;  %830 = vmatmul.bf16.gmra.mxu3 %v1244_v22  ;;  %v1156_v21 = vor.u32 %v1350_v9, %v1153_v10  ;;  %v1260_v22 = vor.u32 %v1376_v11, %v1257_v12 }
  0xbe   : > { %v898_v26 = vpack.c.bf16 %v848_v25, %v848_v25  ;;  %v652_v27 = vpop.f32.mrf.mxu2 }
  0xbf   : > { %v787_v28 = vadd.f32 %v786_v2, %v652_v27  ;;  %v791_v29 = vpop.f32.mrf.mxu3 }
  0xc0   : > { %949 = vst.msk [vmem:[%s1581_s25 + $0x8] sm:$0xf] %vm946_vm0, %v898_v26  ;;  %v594_v30 = vpop.f32.mrf.mxu0 }
  0xc1   : > { %v872_v31 = vmax.f32 %v787_v28, 0.0  ;;  %v728_v32 = vpop.f32.mrf.mxu1 }
  0xc2   : > { %v729_v33 = vadd.f32 %v728_v32, %v594_v30 }
  0xc3   : > { %v922_v35 = vpack.c.bf16 %v872_v31, %v872_v31 }
  0xc4   : > { %v849_v39 = vmax.f32 %v729_v33, 0.0 }
  0xc5   : > { %973 = vst.msk [vmem:[%s1581_s25 + $0x68] sm:$0xf] %vm946_vm0, %v922_v35 }
  0xc6   : > { %v899_v44 = vpack.c.bf16 %v849_v39, %v849_v39  ;;  %v654_v45 = vpop.f32.mrf.mxu2  ;;  %v1377_v39 = vld [vmem:[%s1494_s14 + $0x184] sm:$0xf0] }
  0xc7   : > { %v789_v46 = vadd.f32 %v788_v19, %v654_v45  ;;  %v793_v49 = vpop.f32.mrf.mxu3  ;;  %v1256_v45 = vor.u32 %v1377_v39, %v1255_v38 }
  0xc8   : > { %950 = vst.msk [vmem:[%s1581_s25 + $0xc] sm:$0xf] %vm946_vm0, %v899_v44  ;;  %v597_v50 = vpop.f32.mrf.mxu0 }
  0xc9   : > { %v873_v53 = vmax.f32 %v789_v46, 0.0  ;;  %v731_v54 = vpop.f32.mrf.mxu1 }
  0xca   : > { %v732_v55 = vadd.f32 %v731_v54, %v597_v50 }
  0xcb   : > { %v923_v56 = vpack.c.bf16 %v873_v53, %v873_v53  ;;  %636 = vmatmul.bf16.gmra.mxu0 %v1144_v47  ;;  %696 = vmatmul.bf16.gmra.mxu2 %v1240_v48  ;;  %v1164_v48 = vor.u32 %v1352_v40, %v1161_v41 }
  0xcc   : > { %v850_v57 = vmax.f32 %v732_v55, 0.0  ;;  %770 = vmatmul.bf16.gmra.mxu1 %v1148_v51  ;;  %835 = vmatmul.bf16.gmra.mxu3 %v1252_v52 }
  0xcd   : > { %974 = vst.msk [vmem:[%s1581_s25 + $0x6c] sm:$0xf] %vm946_vm0, %v923_v56 }
  0xce   : > { %v900_v58 = vpack.c.bf16 %v850_v57, %v850_v57  ;;  %v657_v59 = vpop.f32.mrf.mxu2 }
  0xcf   : > { %v792_v60 = vadd.f32 %v791_v29, %v657_v59  ;;  %v796_v61 = vpop.f32.mrf.mxu3 }
  0xd0   : > { %951 = vst.msk [vmem:[%s1581_s25 + $0x10] sm:$0xf] %vm946_vm0, %v900_v58  ;;  %v599_v62 = vpop.f32.mrf.mxu0 }
  0xd1   : > { %v874_v63 = vmax.f32 %v792_v60, 0.0  ;;  %v733_v0 = vpop.f32.mrf.mxu1 }
  0xd2   : > { %v734_v2 = vadd.f32 %v733_v0, %v599_v62 }
  0xd3   : > { %v924_v4 = vpack.c.bf16 %v874_v63, %v874_v63 }
  0xd4   : > { %v851_v8 = vmax.f32 %v734_v2, 0.0 }
  0xd5   : > { %975 = vst.msk [vmem:[%s1581_s25 + $0x70] sm:$0xf] %vm946_vm0, %v924_v4 }
  0xd6   : > { %v901_v13 = vpack.c.bf16 %v851_v8, %v851_v8  ;;  %v659_v14 = vpop.f32.mrf.mxu2 }
  0xd7   : > { %v794_v15 = vadd.f32 %v793_v49, %v659_v14  ;;  %v798_v19 = vpop.f32.mrf.mxu3 }
  0xd8   : > { %952 = vst.msk [vmem:[%s1581_s25 + $0x14] sm:$0xf] %vm946_vm0, %v901_v13  ;;  %v602_v20 = vpop.f32.mrf.mxu0 }
  0xd9   : > { %v875_v23 = vmax.f32 %v794_v15, 0.0  ;;  %v736_v24 = vpop.f32.mrf.mxu1 }
  0xda   : > { %v737_v25 = vadd.f32 %v736_v24, %v602_v20 }
  0xdb   : > { %v925_v26 = vpack.c.bf16 %v875_v23, %v875_v23  ;;  %641 = vmatmul.bf16.gmra.mxu0 %v1152_v17  ;;  %701 = vmatmul.bf16.gmra.mxu2 %v1248_v18 }
  0xdc   : > { %v852_v27 = vmax.f32 %v737_v25, 0.0  ;;  %775 = vmatmul.bf16.gmra.mxu1 %v1156_v21  ;;  %840 = vmatmul.bf16.gmra.mxu3 %v1260_v22 }
  0xdd   : > { %976 = vst.msk [vmem:[%s1581_s25 + $0x74] sm:$0xf] %vm946_vm0, %v925_v26 }
  0xde   : > { %v902_v28 = vpack.c.bf16 %v852_v27, %v852_v27  ;;  %v662_v29 = vpop.f32.mrf.mxu2 }
  0xdf   : > { %v797_v30 = vadd.f32 %v796_v61, %v662_v29  ;;  %v801_v31 = vpop.f32.mrf.mxu3 }
  0xe0   : > { %953 = vst.msk [vmem:[%s1581_s25 + $0x18] sm:$0xf] %vm946_vm0, %v902_v28  ;;  %v604_v32 = vpop.f32.mrf.mxu0 }
  0xe1   : > { %v876_v33 = vmax.f32 %v797_v30, 0.0  ;;  %v738_v34 = vpop.f32.mrf.mxu1 }
  0xe2   : > { %v739_v35 = vadd.f32 %v738_v34, %v604_v32 }
  0xe3   : > { %v926_v36 = vpack.c.bf16 %v876_v33, %v876_v33 }
  0xe4   : > { %v853_v37 = vmax.f32 %v739_v35, 0.0 }
  0xe5   : > { %977 = vst.msk [vmem:[%s1581_s25 + $0x78] sm:$0xf] %vm946_vm0, %v926_v36 }
  0xe6   : > { %v903_v42 = vpack.c.bf16 %v853_v37, %v853_v37  ;;  %v664_v43 = vpop.f32.mrf.mxu2 }
  0xe7   : > { %v799_v44 = vadd.f32 %v798_v19, %v664_v43  ;;  %v803_v46 = vpop.f32.mrf.mxu3 }
  0xe8   : > { %954 = vst.msk [vmem:[%s1581_s25 + $0x1c] sm:$0xf] %vm946_vm0, %v903_v42  ;;  %v607_v47 = vpop.f32.mrf.mxu0 }
  0xe9   : > { %v877_v49 = vmax.f32 %v799_v44, 0.0  ;;  %v741_v50 = vpop.f32.mrf.mxu1 }
  0xea   : > { %v742_v51 = vadd.f32 %v741_v50, %v607_v47 }
  0xeb   : > { %v927_v52 = vpack.c.bf16 %v877_v49, %v877_v49  ;;  %706 = vmatmul.bf16.gmra.mxu2 %v1256_v45 }
  0xec   : > { %v854_v53 = vmax.f32 %v742_v51, 0.0  ;;  %780 = vmatmul.bf16.gmra.mxu1 %v1164_v48 }
  0xed   : > { %978 = vst.msk [vmem:[%s1581_s25 + $0x7c] sm:$0xf] %vm946_vm0, %v927_v52 }
  0xee   : > { %v904_v54 = vpack.c.bf16 %v854_v53, %v854_v53  ;;  %v667_v55 = vpop.f32.mrf.mxu2 }
  0xef   : > { %v802_v56 = vadd.f32 %v801_v31, %v667_v55  ;;  %v806_v57 = vpop.f32.mrf.mxu3 }
  0xf0   : > { %955 = vst.msk [vmem:[%s1581_s25 + $0x20] sm:$0xf] %vm946_vm0, %v904_v54  ;;  %v609_v58 = vpop.f32.mrf.mxu0 }
  0xf1   : > { %v878_v59 = vmax.f32 %v802_v56, 0.0  ;;  %v743_v60 = vpop.f32.mrf.mxu1 }
  0xf2   : > { %v744_v61 = vadd.f32 %v743_v60, %v609_v58 }
  0xf3   : > { %v928_v62 = vpack.c.bf16 %v878_v59, %v878_v59 }
  0xf4   : > { %v855_v63 = vmax.f32 %v744_v61, 0.0 }
  0xf5   : > { %979 = vst.msk [vmem:[%s1581_s25 + $0x80] sm:$0xf] %vm946_vm0, %v928_v62 }
  0xf6   : > { %v905_v0 = vpack.c.bf16 %v855_v63, %v855_v63  ;;  %v669_v2 = vpop.f32.mrf.mxu2 }
  0xf7   : > { %v804_v3 = vadd.f32 %v803_v46, %v669_v2  ;;  %v808_v4 = vpop.f32.mrf.mxu3 }
  0xf8   : > { %956 = vst.msk [vmem:[%s1581_s25 + $0x24] sm:$0xf] %vm946_vm0, %v905_v0  ;;  %v612_v5 = vpop.f32.mrf.mxu0 }
  0xf9   : > { %v879_v6 = vmax.f32 %v804_v3, 0.0  ;;  %v746_v7 = vpop.f32.mrf.mxu1 }
  0xfa   : > { %v747_v8 = vadd.f32 %v746_v7, %v612_v5 }
  0xfb   : > { %v929_v9 = vpack.c.bf16 %v879_v6, %v879_v6 }
  0xfc   : > { %v856_v10 = vmax.f32 %v747_v8, 0.0 }
  0xfd   : > { %980 = vst.msk [vmem:[%s1581_s25 + $0x84] sm:$0xf] %vm946_vm0, %v929_v9 }
  0xfe   : > { %v906_v11 = vpack.c.bf16 %v856_v10, %v856_v10  ;;  %v672_v12 = vpop.f32.mrf.mxu2 }
  0xff   : > { %v807_v13 = vadd.f32 %v806_v57, %v672_v12  ;;  %v811_v14 = vpop.f32.mrf.mxu3 }
 0x100   : > { %957 = vst.msk [vmem:[%s1581_s25 + $0x28] sm:$0xf] %vm946_vm0, %v906_v11  ;;  %v614_v15 = vpop.f32.mrf.mxu0 }
 0x101   : > { %v880_v17 = vmax.f32 %v807_v13, 0.0  ;;  %v748_v18 = vpop.f32.mrf.mxu1 }
 0x102   : > { %v749_v19 = vadd.f32 %v748_v18, %v614_v15 }
 0x103   : > { %v930_v20 = vpack.c.bf16 %v880_v17, %v880_v17 }
 0x104   : > { %v857_v21 = vmax.f32 %v749_v19, 0.0 }
 0x105   : > { %981 = vst.msk [vmem:[%s1581_s25 + $0x88] sm:$0xf] %vm946_vm0, %v930_v20 }
 0x106   : > { %v907_v22 = vpack.c.bf16 %v857_v21, %v857_v21  ;;  %v674_v23 = vpop.f32.mrf.mxu2 }
 0x107   : > { %v809_v24 = vadd.f32 %v808_v4, %v674_v23  ;;  %v813_v25 = vpop.f32.mrf.mxu3 }
 0x108   : > { %958 = vst.msk [vmem:[%s1581_s25 + $0x2c] sm:$0xf] %vm946_vm0, %v907_v22  ;;  %v617_v26 = vpop.f32.mrf.mxu0 }
 0x109   : > { %v881_v27 = vmax.f32 %v809_v24, 0.0  ;;  %v751_v28 = vpop.f32.mrf.mxu1 }
 0x10a   : > { %v752_v29 = vadd.f32 %v751_v28, %v617_v26 }
 0x10b   : > { %v931_v30 = vpack.c.bf16 %v881_v27, %v881_v27 }
 0x10c   : > { %v858_v31 = vmax.f32 %v752_v29, 0.0 }
 0x10d   : > { %982 = vst.msk [vmem:[%s1581_s25 + $0x8c] sm:$0xf] %vm946_vm0, %v931_v30 }
 0x10e   : > { %v908_v32 = vpack.c.bf16 %v858_v31, %v858_v31  ;;  %v677_v33 = vpop.f32.mrf.mxu2 }
 0x10f   : > { %v812_v34 = vadd.f32 %v811_v14, %v677_v33  ;;  %v816_v35 = vpop.f32.mrf.mxu3 }
 0x110   : > { %959 = vst.msk [vmem:[%s1581_s25 + $0x30] sm:$0xf] %vm946_vm0, %v908_v32  ;;  %v619_v36 = vpop.f32.mrf.mxu0 }
 0x111   : > { %v882_v37 = vmax.f32 %v812_v34, 0.0  ;;  %v753_v38 = vpop.f32.mrf.mxu1 }
 0x112   : > { %v754_v39 = vadd.f32 %v753_v38, %v619_v36 }
 0x113   : > { %v932_v40 = vpack.c.bf16 %v882_v37, %v882_v37 }
 0x114   : > { %v859_v41 = vmax.f32 %v754_v39, 0.0 }
 0x115   : > { %983 = vst.msk [vmem:[%s1581_s25 + $0x90] sm:$0xf] %vm946_vm0, %v932_v40 }
 0x116   : > { %v909_v42 = vpack.c.bf16 %v859_v41, %v859_v41  ;;  %v679_v43 = vpop.f32.mrf.mxu2 }
 0x117   : > { %v814_v44 = vadd.f32 %v813_v25, %v679_v43  ;;  %v818_v45 = vpop.f32.mrf.mxu3 }
 0x118   : > { %960 = vst.msk [vmem:[%s1581_s25 + $0x34] sm:$0xf] %vm946_vm0, %v909_v42  ;;  %v622_v46 = vpop.f32.mrf.mxu0 }
 0x119   : > { %v883_v47 = vmax.f32 %v814_v44, 0.0  ;;  %v756_v48 = vpop.f32.mrf.mxu1 }
 0x11a   : > { %v757_v49 = vadd.f32 %v756_v48, %v622_v46 }
 0x11b   : > { %v933_v50 = vpack.c.bf16 %v883_v47, %v883_v47 }
 0x11c   : > { %v860_v51 = vmax.f32 %v757_v49, 0.0 }
 0x11d   : > { %984 = vst.msk [vmem:[%s1581_s25 + $0x94] sm:$0xf] %vm946_vm0, %v933_v50 }
 0x11e   : > { %v910_v52 = vpack.c.bf16 %v860_v51, %v860_v51  ;;  %v682_v53 = vpop.f32.mrf.mxu2 }
 0x11f   : > { %v817_v54 = vadd.f32 %v816_v35, %v682_v53  ;;  %v821_v55 = vpop.f32.mrf.mxu3 }
 0x120   : > { %961 = vst.msk [vmem:[%s1581_s25 + $0x38] sm:$0xf] %vm946_vm0, %v910_v52  ;;  %v624_v56 = vpop.f32.mrf.mxu0 }
 0x121   : > { %v884_v57 = vmax.f32 %v817_v54, 0.0  ;;  %v758_v58 = vpop.f32.mrf.mxu1 }
 0x122   : > { %v759_v59 = vadd.f32 %v758_v58, %v624_v56 }
 0x123   : > { %v934_v60 = vpack.c.bf16 %v884_v57, %v884_v57 }
 0x124   : > { %v861_v61 = vmax.f32 %v759_v59, 0.0 }
 0x125   : > { %985 = vst.msk [vmem:[%s1581_s25 + $0x98] sm:$0xf] %vm946_vm0, %v934_v60 }
 0x126   : > { %v911_v62 = vpack.c.bf16 %v861_v61, %v861_v61  ;;  %v684_v63 = vpop.f32.mrf.mxu2 }
 0x127   : > { %v819_v0 = vadd.f32 %v818_v45, %v684_v63  ;;  %v823_v2 = vpop.f32.mrf.mxu3 }
 0x128   : > { %962 = vst.msk [vmem:[%s1581_s25 + $0x3c] sm:$0xf] %vm946_vm0, %v911_v62  ;;  %v627_v3 = vpop.f32.mrf.mxu0 }
 0x129   : > { %v885_v4 = vmax.f32 %v819_v0, 0.0  ;;  %v761_v5 = vpop.f32.mrf.mxu1 }
 0x12a   : > { %v762_v6 = vadd.f32 %v761_v5, %v627_v3 }
 0x12b   : > { %v935_v7 = vpack.c.bf16 %v885_v4, %v885_v4 }
 0x12c   : > { %v862_v8 = vmax.f32 %v762_v6, 0.0 }
 0x12d   : > { %986 = vst.msk [vmem:[%s1581_s25 + $0x9c] sm:$0xf] %vm946_vm0, %v935_v7 }
 0x12e   : > { %v912_v9 = vpack.c.bf16 %v862_v8, %v862_v8  ;;  %v687_v10 = vpop.f32.mrf.mxu2 }
 0x12f   : > { %v822_v11 = vadd.f32 %v821_v55, %v687_v10  ;;  %v826_v13 = vpop.f32.mrf.mxu3 }
 0x130   : > { %963 = vst.msk [vmem:[%s1581_s25 + $0x40] sm:$0xf] %vm946_vm0, %v912_v9  ;;  %v629_v12 = vpop.f32.mrf.mxu0 }
 0x131   : > { %v886_v14 = vmax.f32 %v822_v11, 0.0  ;;  %v763_v15 = vpop.f32.mrf.mxu1 }
 0x132   : > { %v764_v17 = vadd.f32 %v763_v15, %v629_v12 }
 0x133   : > { %v936_v18 = vpack.c.bf16 %v886_v14, %v886_v14 }
 0x134   : > { %v863_v19 = vmax.f32 %v764_v17, 0.0 }
 0x135   : > { %987 = vst.msk [vmem:[%s1581_s25 + $0xa0] sm:$0xf] %vm946_vm0, %v936_v18 }
 0x136   : > { %v913_v20 = vpack.c.bf16 %v863_v19, %v863_v19  ;;  %v689_v21 = vpop.f32.mrf.mxu2 }
 0x137   : > { %v824_v22 = vadd.f32 %v823_v2, %v689_v21  ;;  %v828_v27 = vpop.f32.mrf.mxu3 }
 0x138   : > { %964 = vst.msk [vmem:[%s1581_s25 + $0x44] sm:$0xf] %vm946_vm0, %v913_v20  ;;  %v632_v23 = vpop.f32.mrf.mxu0 }
 0x139   : > { %v887_v24 = vmax.f32 %v824_v22, 0.0  ;;  %v766_v25 = vpop.f32.mrf.mxu1 }
 0x13a   : > { %v767_v26 = vadd.f32 %v766_v25, %v632_v23 }
 0x13b   : > { %v937_v28 = vpack.c.bf16 %v887_v24, %v887_v24 }
 0x13c   : > { %v864_v29 = vmax.f32 %v767_v26, 0.0 }
 0x13d   : > { %988 = vst.msk [vmem:[%s1581_s25 + $0xa4] sm:$0xf] %vm946_vm0, %v937_v28 }
 0x13e   : > { %v914_v30 = vpack.c.bf16 %v864_v29, %v864_v29  ;;  %v692_v31 = vpop.f32.mrf.mxu2 }
 0x13f   : > { %v827_v32 = vadd.f32 %v826_v13, %v692_v31  ;;  %v831_v39 = vpop.f32.mrf.mxu3 }
 0x140   : > { %965 = vst.msk [vmem:[%s1581_s25 + $0x48] sm:$0xf] %vm946_vm0, %v914_v30  ;;  %v634_v33 = vpop.f32.mrf.mxu0 }
 0x141   : > { %v888_v34 = vmax.f32 %v827_v32, 0.0  ;;  %v768_v35 = vpop.f32.mrf.mxu1 }
 0x142   : > { %v769_v36 = vadd.f32 %v768_v35, %v634_v33 }
 0x143   : > { %v938_v37 = vpack.c.bf16 %v888_v34, %v888_v34 }
 0x144   : > { %v865_v38 = vmax.f32 %v769_v36, 0.0 }
 0x145   : > { %989 = vst.msk [vmem:[%s1581_s25 + $0xa8] sm:$0xf] %vm946_vm0, %v938_v37 }
 0x146   : > { %v915_v40 = vpack.c.bf16 %v865_v38, %v865_v38  ;;  %v694_v41 = vpop.f32.mrf.mxu2 }
 0x147   : > { %v829_v42 = vadd.f32 %v828_v27, %v694_v41  ;;  %v833_v51 = vpop.f32.mrf.mxu3 }
 0x148   : > { %966 = vst.msk [vmem:[%s1581_s25 + $0x4c] sm:$0xf] %vm946_vm0, %v915_v40  ;;  %v637_v43 = vpop.f32.mrf.mxu0 }
 0x149   : > { %v889_v44 = vmax.f32 %v829_v42, 0.0  ;;  %v771_v45 = vpop.f32.mrf.mxu1 }
 0x14a   : > { %v772_v46 = vadd.f32 %v771_v45, %v637_v43 }
 0x14b   : > { %v939_v47 = vpack.c.bf16 %v889_v44, %v889_v44 }
 0x14c   : > { %v866_v48 = vmax.f32 %v772_v46, 0.0 }
 0x14d   : > { %990 = vst.msk [vmem:[%s1581_s25 + $0xac] sm:$0xf] %vm946_vm0, %v939_v47 }
 0x14e   : > { %v916_v49 = vpack.c.bf16 %v866_v48, %v866_v48  ;;  %v697_v50 = vpop.f32.mrf.mxu2 }
 0x14f   : > { %v832_v52 = vadd.f32 %v831_v39, %v697_v50  ;;  %v836_v62 = vpop.f32.mrf.mxu3 }
 0x150   : > { %967 = vst.msk [vmem:[%s1581_s25 + $0x50] sm:$0xf] %vm946_vm0, %v916_v49  ;;  %v639_v53 = vpop.f32.mrf.mxu0 }
 0x151   : > { %v890_v54 = vmax.f32 %v832_v52, 0.0  ;;  %v773_v55 = vpop.f32.mrf.mxu1 }
 0x152   : > { %v774_v56 = vadd.f32 %v773_v55, %v639_v53 }
 0x153   : > { %v940_v57 = vpack.c.bf16 %v890_v54, %v890_v54 }
 0x154   : > { %v867_v58 = vmax.f32 %v774_v56, 0.0 }
 0x155   : > { %991 = vst.msk [vmem:[%s1581_s25 + $0xb0] sm:$0xf] %vm946_vm0, %v940_v57 }
 0x156   : > { %v917_v59 = vpack.c.bf16 %v867_v58, %v867_v58  ;;  %v699_v60 = vpop.f32.mrf.mxu2 }
 0x157   : > { %v834_v61 = vadd.f32 %v833_v51, %v699_v60  ;;  %v838_v12 = vpop.f32.mrf.mxu3 }
 0x158   : > { %968 = vst.msk [vmem:[%s1581_s25 + $0x54] sm:$0xf] %vm946_vm0, %v917_v59  ;;  %v642_v63 = vpop.f32.mrf.mxu0 }
 0x159   : > { %v891_v0 = vmax.f32 %v834_v61, 0.0  ;;  %v776_v2 = vpop.f32.mrf.mxu1 }
 0x15a   : > { %v777_v3 = vadd.f32 %v776_v2, %v642_v63 }
 0x15b   : > { %v941_v4 = vpack.c.bf16 %v891_v0, %v891_v0 }
 0x15c   : > { %v868_v5 = vmax.f32 %v777_v3, 0.0 }
 0x15d   : > { %992 = vst.msk [vmem:[%s1581_s25 + $0xb4] sm:$0xf] %vm946_vm0, %v941_v4 }
 0x15e   : > { %v918_v6 = vpack.c.bf16 %v868_v5, %v868_v5  ;;  %v702_v7 = vpop.f32.mrf.mxu2 }
 0x15f   : > { %v837_v8 = vadd.f32 %v836_v62, %v702_v7  ;;  %v841_v24 = vpop.f32.mrf.mxu3 }
 0x160   : > { %969 = vst.msk [vmem:[%s1581_s25 + $0x58] sm:$0xf] %vm946_vm0, %v918_v6  ;;  %v644_v9 = vpop.f32.mrf.mxu0 }
 0x161   : > { %v892_v10 = vmax.f32 %v837_v8, 0.0  ;;  %v778_v11 = vpop.f32.mrf.mxu1 }
 0x162   : > { %v779_v13 = vadd.f32 %v778_v11, %v644_v9 }
 0x163   : > { %v942_v14 = vpack.c.bf16 %v892_v10, %v892_v10 }
 0x164   : > { %v869_v15 = vmax.f32 %v779_v13, 0.0 }
 0x165   : > { %993 = vst.msk [vmem:[%s1581_s25 + $0xb8] sm:$0xf] %vm946_vm0, %v942_v14 }
 0x166   : > { %v919_v17 = vpack.c.bf16 %v869_v15, %v869_v15  ;;  %v704_v18 = vpop.f32.mrf.mxu2 }
 0x167   : > { %v839_v19 = vadd.f32 %v838_v12, %v704_v18 }
 0x168   : > { %970 = vst.msk [vmem:[%s1581_s25 + $0x5c] sm:$0xf] %vm946_vm0, %v919_v17 }
 0x169   : > { %v893_v20 = vmax.f32 %v839_v19, 0.0  ;;  %v781_v21 = vpop.f32.mrf.mxu1 }
 0x16a   : > { %v782_v22 = vadd.f32 %v781_v21, %v1583_v1  ;;  %v843_v1 = vpop.f32.mrf.mxu3 }
 0x16b   : > { %v943_v23 = vpack.c.bf16 %v893_v20, %v893_v20 }
 0x16c   : > { %v870_v25 = vmax.f32 %v782_v22, 0.0 }
 0x16d   : > { %994 = vst.msk [vmem:[%s1581_s25 + $0xbc] sm:$0xf] %vm946_vm0, %v943_v23 }
 0x16e   : > { %v920_v26 = vpack.c.bf16 %v870_v25, %v870_v25  ;;  %v707_v27 = vpop.f32.mrf.mxu2 }
 0x16f   : > { %v842_v28 = vadd.f32 %v841_v24, %v707_v27 }
 0x170   : > { %971 = vst.msk [vmem:[%s1581_s25 + $0x60] sm:$0xf] %vm946_vm0, %v920_v26 }
 0x171   : > { %v894_v29 = vmax.f32 %v842_v28, 0.0  ;;  %v783_v30 = vpop.f32.mrf.mxu1 }
 0x172   : > { %v784_v31 = vadd.f32 %v783_v30, %v1595_v16 }
 0x173   : > { %v944_v32 = vpack.c.bf16 %v894_v29, %v894_v29 }
 0x174   : > { %v871_v33 = vmax.f32 %v784_v31, 0.0 }
 0x175   : > { %995 = vst.msk [vmem:[%s1581_s25 + $0xc0] sm:$0xf] %vm946_vm0, %v944_v32 }
 0x176   : > { %v921_v34 = vpack.c.bf16 %v871_v33, %v871_v33  ;;  %v709_v35 = vpop.f32.mrf.mxu2 }
 0x177   : > { %v844_v36 = vadd.f32 %v843_v1, %v709_v35 }
 0x178   : > { %972 = vst.msk [vmem:[%s1581_s25 + $0x64] sm:$0xf] %vm946_vm0, %v921_v34 }
 0x179   : > { %v895_v37 = vmax.f32 %v844_v36, 0.0 }
 0x17b   : > { %v945_v38 = vpack.c.bf16 %v895_v37, %v895_v37 }
 0x17d   : > { %996 = vst.msk [vmem:[%s1581_s25 + $0xc4] sm:$0xf] %vm946_vm0, %v945_v38 }
 0x17e PF: > { %s12_s9 = sadd.s32 1, %s1424_s9  }
 0x17f   : > { %p9_p4 = scmp.ge.s32.totalorder %s12_s9, 4  }
 0x181   :  { %11 = sbr.rel (!%p9_p4) target bundleno = 1 (0x1), region = 58 }

// kernel: d3q_forward.5
= control target key start
LH: loop header
LB: loop body
LE: loop exit
PB: predicated region body
PF: predicated region fallthrough
CT: control target
= control target key end

     0   :  { %vm817_vm0 = vcmask 519168   ;;  %vm838_vm1 = vcmask 516096   ;;  %s1644_s1 = inlined_call_operand.vmem [shape: bf16[512,64], index: 1, kind: input, shape index: {}]   ;;  %s1645_s0 = inlined_call_operand.vmem [shape: bf16[162,512], index: 0, kind: input, shape index: {}]   ;;  %s1646_s2 = inlined_call_operand.vmem [shape: bf16[162,64], index: 2, kind: output, shape index: {}]  }
   0x1   :  { %v1179_v0 = vld [vmem:[%s1644_s1 + $0x38] sm:$0xff]  ;;  %v1178_v4 = vld [vmem:[%s1644_s1 + $0x30] sm:$0xff]  ;;  %v1177_v8 = vld [vmem:[%s1644_s1 + $0x28] sm:$0xff] }
   0x2   :  { %v1187_v1 = vld [vmem:[%s1644_s1 + $0x78] sm:$0xff]  ;;  %523 = vmatpush.bf16.msra.mxu0 %v1179_v0  ;;  %v1186_v5 = vld [vmem:[%s1644_s1 + $0x70] sm:$0xff]  ;;  %v1185_v9 = vld [vmem:[%s1644_s1 + $0x68] sm:$0xff] }
   0x3   :  { %v1195_v2 = vld [vmem:[%s1644_s1 + $0xb8] sm:$0xff]  ;;  %586 = vmatpush.bf16.msra.mxu1 %v1187_v1  ;;  %v1194_v6 = vld [vmem:[%s1644_s1 + $0xb0] sm:$0xff]  ;;  %v1193_v10 = vld [vmem:[%s1644_s1 + $0xa8] sm:$0xff] }
   0x4   :  { %v1203_v3 = vld [vmem:[%s1644_s1 + $0xf8] sm:$0xff]  ;;  %649 = vmatpush.bf16.msra.mxu2 %v1195_v2  ;;  %v1202_v7 = vld [vmem:[%s1644_s1 + $0xf0] sm:$0xff]  ;;  %v1201_v11 = vld [vmem:[%s1644_s1 + $0xe8] sm:$0xff] }
   0x5   :  { %712 = vmatpush.bf16.msra.mxu3 %v1203_v3  ;;  %v1176_v12 = vld [vmem:[%s1644_s1 + $0x20] sm:$0xff]  ;;  %v1175_v16 = vld [vmem:[%s1644_s1 + $0x18] sm:$0xff]  ;;  %v1174_v20 = vld [vmem:[%s1644_s1 + $0x10] sm:$0xff] }
   0x6   :  { %524 = vmatpush.bf16.msra.mxu0 %v1178_v4  ;;  %v1184_v13 = vld [vmem:[%s1644_s1 + $0x60] sm:$0xff]  ;;  %v1183_v17 = vld [vmem:[%s1644_s1 + $0x58] sm:$0xff]  ;;  %v1182_v21 = vld [vmem:[%s1644_s1 + $0x50] sm:$0xff] }
   0x7   :  { %587 = vmatpush.bf16.msra.mxu1 %v1186_v5  ;;  %v1192_v14 = vld [vmem:[%s1644_s1 + $0xa0] sm:$0xff]  ;;  %v1191_v18 = vld [vmem:[%s1644_s1 + $0x98] sm:$0xff]  ;;  %v1190_v22 = vld [vmem:[%s1644_s1 + $0x90] sm:$0xff] }
   0x8   :  { %650 = vmatpush.bf16.msra.mxu2 %v1194_v6  ;;  %v1200_v15 = vld [vmem:[%s1644_s1 + $0xe0] sm:$0xff]  ;;  %v1199_v19 = vld [vmem:[%s1644_s1 + $0xd8] sm:$0xff]  ;;  %v1198_v23 = vld [vmem:[%s1644_s1 + $0xd0] sm:$0xff] }
   0x9   :  { %713 = vmatpush.bf16.msra.mxu3 %v1202_v7  ;;  %v1173_v24 = vld [vmem:[%s1644_s1 + $0x8] sm:$0xff]  ;;  %v1172_v28 = vld [vmem:[%s1644_s1] sm:$0xff]  ;;  %v1134_v33 = vld [vmem:[%s1645_s0 + $0xc] sm:$0xf0] }
   0xa   :  { %525 = vmatpush.bf16.msra.mxu0 %v1177_v8  ;;  %v1181_v25 = vld [vmem:[%s1644_s1 + $0x48] sm:$0xff]  ;;  %v1180_v29 = vld [vmem:[%s1644_s1 + $0x40] sm:$0xff]  ;;  %v848_v35 = vld [vmem:[%s1645_s0 + $0x10] sm:$0xf0] }
   0xb   :  { %588 = vmatpush.bf16.msra.mxu1 %v1185_v9  ;;  %v1189_v26 = vld [vmem:[%s1644_s1 + $0x88] sm:$0xff]  ;;  %v1188_v30 = vld [vmem:[%s1644_s1 + $0x80] sm:$0xff]  ;;  %v1135_v37 = vld [vmem:[%s1645_s0 + $0x14] sm:$0xf0] }
   0xc   :  { %651 = vmatpush.bf16.msra.mxu2 %v1193_v10  ;;  %v1197_v27 = vld [vmem:[%s1644_s1 + $0xc8] sm:$0xff]  ;;  %v1196_v31 = vld [vmem:[%s1644_s1 + $0xc0] sm:$0xff]  ;;  %v856_v39 = vld [vmem:[%s1645_s0 + $0x18] sm:$0xf0] }
   0xd   :  { %714 = vmatpush.bf16.msra.mxu3 %v1201_v11  ;;  %v846_v32 = vld [vmem:[%s1645_s0] sm:$0xf]  ;;  %v1132_v34 = vld [vmem:[%s1645_s0 + $0x4] sm:$0xf]  ;;  %v854_v36 = vld [vmem:[%s1645_s0 + $0x8] sm:$0xf] }
   0xe   :  { %526 = vmatpush.bf16.msra.mxu0 %v1176_v12  ;;  %v1133_v38 = vld [vmem:[%s1645_s0 + $0xc] sm:$0xf]  ;;  %v847_v40 = vor.u32 %v1134_v33, %v846_v32  ;;  %v851_v41 = vor.u32 %v1132_v34, %v848_v35  ;;  %v855_v42 = vor.u32 %v1135_v37, %v854_v36  ;;  %v862_v44 = vld [vmem:[%s1645_s0 + $0x20] sm:$0xf]  ;;  %v1138_v45 = vld [vmem:[%s1645_s0 + $0x2c] sm:$0xf0] }
   0xf   :  { %589 = vmatpush.bf16.msra.mxu1 %v1184_v13  ;;  %v859_v43 = vor.u32 %v1133_v38, %v856_v39  ;;  %v1136_v46 = vld [vmem:[%s1645_s0 + $0x24] sm:$0xf]  ;;  %v864_v47 = vld [vmem:[%s1645_s0 + $0x30] sm:$0xf0]  ;;  %v870_v48 = vld [vmem:[%s1645_s0 + $0x28] sm:$0xf]  ;;  %v863_v52 = vor.u32 %v1138_v45, %v862_v44 }
  0x10   :  { %652 = vmatpush.bf16.msra.mxu2 %v1192_v14  ;;  %v1139_v49 = vld [vmem:[%s1645_s0 + $0x34] sm:$0xf0]  ;;  %v1137_v50 = vld [vmem:[%s1645_s0 + $0x2c] sm:$0xf]  ;;  %v872_v51 = vld [vmem:[%s1645_s0 + $0x38] sm:$0xf0]  ;;  %v867_v53 = vor.u32 %v1136_v46, %v864_v47 }
  0x11   :  { %715 = vmatpush.bf16.msra.mxu3 %v1200_v15  ;;  %v871_v54 = vor.u32 %v1139_v49, %v870_v48  ;;  %v875_v55 = vor.u32 %v1137_v50, %v872_v51  ;;  %v878_v56 = vld [vmem:[%s1645_s0 + $0x40] sm:$0xf]  ;;  %v1142_v57 = vld [vmem:[%s1645_s0 + $0x4c] sm:$0xf0]  ;;  %v1140_v58 = vld [vmem:[%s1645_s0 + $0x44] sm:$0xf] }
  0x12   :  { %527 = vmatpush.bf16.msra.mxu0 %v1175_v16  ;;  %v880_v59 = vld [vmem:[%s1645_s0 + $0x50] sm:$0xf0]  ;;  %v886_v60 = vld [vmem:[%s1645_s0 + $0x48] sm:$0xf]  ;;  %v1143_v61 = vld [vmem:[%s1645_s0 + $0x54] sm:$0xf0]  ;;  %v879_v0 = vor.u32 %v1142_v57, %v878_v56 }
  0x13   :  { %590 = vmatpush.bf16.msra.mxu1 %v1183_v17  ;;  %v1141_v62 = vld [vmem:[%s1645_s0 + $0x4c] sm:$0xf]  ;;  %v888_v63 = vld [vmem:[%s1645_s0 + $0x58] sm:$0xf0]  ;;  %v883_v1 = vor.u32 %v1140_v58, %v880_v59  ;;  %v887_v2 = vor.u32 %v1143_v61, %v886_v60  ;;  %v894_v4 = vld [vmem:[%s1645_s0 + $0x60] sm:$0xf] }
  0x14   :  { %653 = vmatpush.bf16.msra.mxu2 %v1191_v18  ;;  %v891_v3 = vor.u32 %v1141_v62, %v888_v63  ;;  %v1146_v5 = vld [vmem:[%s1645_s0 + $0x6c] sm:$0xf0]  ;;  %v1144_v6 = vld [vmem:[%s1645_s0 + $0x64] sm:$0xf]  ;;  %v896_v7 = vld [vmem:[%s1645_s0 + $0x70] sm:$0xf0] }
  0x15   :  { %716 = vmatpush.bf16.msra.mxu3 %v1199_v19  ;;  %v902_v8 = vld [vmem:[%s1645_s0 + $0x68] sm:$0xf]  ;;  %v1147_v9 = vld [vmem:[%s1645_s0 + $0x74] sm:$0xf0]  ;;  %v1145_v10 = vld [vmem:[%s1645_s0 + $0x6c] sm:$0xf]  ;;  %v895_v12 = vor.u32 %v1146_v5, %v894_v4  ;;  %v899_v13 = vor.u32 %v1144_v6, %v896_v7 }
  0x16   :  { %528 = vmatpush.bf16.msra.mxu0 %v1174_v20  ;;  %v904_v11 = vld [vmem:[%s1645_s0 + $0x78] sm:$0xf0]  ;;  %v903_v14 = vor.u32 %v1147_v9, %v902_v8  ;;  %v910_v16 = vld [vmem:[%s1645_s0 + $0x80] sm:$0xf]  ;;  %v1150_v17 = vld [vmem:[%s1645_s0 + $0x8c] sm:$0xf0] }
  0x17   :  { %591 = vmatpush.bf16.msra.mxu1 %v1182_v21  ;;  %v907_v15 = vor.u32 %v1145_v10, %v904_v11  ;;  %v1148_v18 = vld [vmem:[%s1645_s0 + $0x84] sm:$0xf]  ;;  %v912_v19 = vld [vmem:[%s1645_s0 + $0x90] sm:$0xf0]  ;;  %v918_v20 = vld [vmem:[%s1645_s0 + $0x88] sm:$0xf] }
  0x18   :  { %654 = vmatpush.bf16.msra.mxu2 %v1190_v22  ;;  %v1151_v21 = vld [vmem:[%s1645_s0 + $0x94] sm:$0xf0]  ;;  %v1149_v22 = vld [vmem:[%s1645_s0 + $0x8c] sm:$0xf]  ;;  %v934_v32 = vld [vmem:[%s1645_s0 + $0xa8] sm:$0xf] }
  0x19   :  { %717 = vmatpush.bf16.msra.mxu3 %v1198_v23  ;;  %v920_v23 = vld [vmem:[%s1645_s0 + $0x98] sm:$0xf0]  ;;  %v1155_v33 = vld [vmem:[%s1645_s0 + $0xb4] sm:$0xf0]  ;;  %v1153_v34 = vld [vmem:[%s1645_s0 + $0xac] sm:$0xf] }
  0x1a   :  { %529 = vmatpush.bf16.msra.mxu0 %v1173_v24  ;;  %v911_v24 = vor.u32 %v1150_v17, %v910_v16  ;;  %v936_v35 = vld [vmem:[%s1645_s0 + $0xb8] sm:$0xf0]  ;;  %v935_v38 = vor.u32 %v1155_v33, %v934_v32  ;;  %v950_v44 = vld [vmem:[%s1645_s0 + $0xc8] sm:$0xf]  ;;  %v1159_v45 = vld [vmem:[%s1645_s0 + $0xd4] sm:$0xf0] }
  0x1b   :  { %592 = vmatpush.bf16.msra.mxu1 %v1181_v25  ;;  %v915_v25 = vor.u32 %v1148_v18, %v912_v19  ;;  %v939_v39 = vor.u32 %v1153_v34, %v936_v35  ;;  %v1157_v46 = vld [vmem:[%s1645_s0 + $0xcc] sm:$0xf]  ;;  %v952_v47 = vld [vmem:[%s1645_s0 + $0xd8] sm:$0xf0]  ;;  %v951_v50 = vor.u32 %v1159_v45, %v950_v44  ;;  %v966_v56 = vld [vmem:[%s1645_s0 + $0xe8] sm:$0xf] }
  0x1c   :  { %655 = vmatpush.bf16.msra.mxu2 %v1189_v26  ;;  %v919_v26 = vor.u32 %v1151_v21, %v918_v20  ;;  %v955_v51 = vor.u32 %v1157_v46, %v952_v47  ;;  %v1163_v57 = vld [vmem:[%s1645_s0 + $0xf4] sm:$0xf0]  ;;  %v1161_v58 = vld [vmem:[%s1645_s0 + $0xec] sm:$0xf]  ;;  %v968_v59 = vld [vmem:[%s1645_s0 + $0xf8] sm:$0xf0] }
  0x1d   :  { %718 = vmatpush.bf16.msra.mxu3 %v1197_v27  ;;  %v923_v27 = vor.u32 %v1149_v22, %v920_v23  ;;  %v967_v62 = vor.u32 %v1163_v57, %v966_v56  ;;  %v971_v63 = vor.u32 %v1161_v58, %v968_v59  ;;  %v982_v4 = vld [vmem:[%s1645_s0 + $0x108] sm:$0xf]  ;;  %v1167_v5 = vld [vmem:[%s1645_s0 + $0x114] sm:$0xf0]  ;;  %v1165_v6 = vld [vmem:[%s1645_s0 + $0x10c] sm:$0xf] }
  0x1e   :  { %530 = vmatpush.bf16.msra.mxu0 %v1172_v28  ;;  %v926_v28 = vld [vmem:[%s1645_s0 + $0xa0] sm:$0xf]  ;;  %v984_v7 = vld [vmem:[%s1645_s0 + $0x118] sm:$0xf0]  ;;  %v1170_v22 = vld [vmem:[%s1645_s0 + $0x12c] sm:$0xf0] }
  0x1f   :  { %593 = vmatpush.bf16.msra.mxu1 %v1180_v29  ;;  %v1154_v29 = vld [vmem:[%s1645_s0 + $0xac] sm:$0xf0]  ;;  %v990_v21 = vld [vmem:[%s1645_s0 + $0x120] sm:$0xf]  ;;  %v1168_v23 = vld [vmem:[%s1645_s0 + $0x124] sm:$0xf] }
  0x20   :  { %656 = vmatpush.bf16.msra.mxu2 %v1188_v30  ;;  %v1152_v30 = vld [vmem:[%s1645_s0 + $0xa4] sm:$0xf]  ;;  %v927_v36 = vor.u32 %v1154_v29, %v926_v28  ;;  %v1169_v28 = vld [vmem:[%s1645_s0 + $0x12c] sm:$0xf]  ;;  %v1000_v29 = vld [vmem:[%s1645_s0 + $0x138] sm:$0xf0]  ;;  %v991_v34 = vor.u32 %v1170_v22, %v990_v21 }
  0x21   :  { %719 = vmatpush.bf16.msra.mxu3 %v1196_v31  ;;  %531 = vmatmul.bf16.vlgmr.msra.gmra.mxu0 %v847_v40  ;;  %v928_v31 = vld [vmem:[%s1645_s0 + $0xb0] sm:$0xf0]  ;;  %v942_v40 = vld [vmem:[%s1645_s0 + $0xc0] sm:$0xf] }
  0x22   :  { %594 = vmatmul.bf16.vlgmr.msra.gmra.mxu1 %v851_v41  ;;  %v931_v37 = vor.u32 %v1152_v30, %v928_v31  ;;  %v1158_v41 = vld [vmem:[%s1645_s0 + $0xcc] sm:$0xf0] }
  0x23   :  { %657 = vmatmul.bf16.vlgmr.msra.gmra.mxu2 %v855_v42  ;;  %v1156_v42 = vld [vmem:[%s1645_s0 + $0xc4] sm:$0xf]  ;;  %v943_v48 = vor.u32 %v1158_v41, %v942_v40  ;;  %v1003_v40 = vor.u32 %v1169_v28, %v1000_v29 }
  0x24   :  { %720 = vmatmul.bf16.vlgmr.msra.gmra.mxu3 %v859_v43  ;;  %v944_v43 = vld [vmem:[%s1645_s0 + $0xd0] sm:$0xf0] }
  0x25   :  { %v947_v49 = vor.u32 %v1156_v42, %v944_v43 }
  0x31   :  { %536 = vmatmul.bf16.gmra.mxu0 %v863_v52  ;;  %v958_v52 = vld [vmem:[%s1645_s0 + $0xe0] sm:$0xf] }
  0x32   :  { %599 = vmatmul.bf16.gmra.mxu1 %v867_v53  ;;  %v1162_v53 = vld [vmem:[%s1645_s0 + $0xec] sm:$0xf0] }
  0x33   :  { %662 = vmatmul.bf16.gmra.mxu2 %v871_v54  ;;  %v1160_v54 = vld [vmem:[%s1645_s0 + $0xe4] sm:$0xf]  ;;  %v959_v60 = vor.u32 %v1162_v53, %v958_v52 }
  0x34   :  { %725 = vmatmul.bf16.gmra.mxu3 %v875_v55  ;;  %v960_v55 = vld [vmem:[%s1645_s0 + $0xf0] sm:$0xf0] }
  0x35   :  { %v963_v61 = vor.u32 %v1160_v54, %v960_v55 }
  0x41   :  { %541 = vmatmul.bf16.gmra.mxu0 %v879_v0  ;;  %v974_v0 = vld [vmem:[%s1645_s0 + $0x100] sm:$0xf] }
  0x42   :  { %604 = vmatmul.bf16.gmra.mxu1 %v883_v1  ;;  %v1166_v1 = vld [vmem:[%s1645_s0 + $0x10c] sm:$0xf0] }
  0x43   :  { %667 = vmatmul.bf16.gmra.mxu2 %v887_v2  ;;  %v1164_v2 = vld [vmem:[%s1645_s0 + $0x104] sm:$0xf]  ;;  %v975_v8 = vor.u32 %v1166_v1, %v974_v0 }
  0x44   :  { %730 = vmatmul.bf16.gmra.mxu3 %v891_v3  ;;  %v976_v3 = vld [vmem:[%s1645_s0 + $0x110] sm:$0xf0] }
  0x45   :  { %v979_v9 = vor.u32 %v1164_v2, %v976_v3 }
  0x51   :  { %546 = vmatmul.bf16.gmra.mxu0 %v895_v12  ;;  %v983_v12 = vor.u32 %v1167_v5, %v982_v4 }
  0x52   :  { %609 = vmatmul.bf16.gmra.mxu1 %v899_v13  ;;  %v987_v13 = vor.u32 %v1165_v6, %v984_v7 }
  0x53   :  { %672 = vmatmul.bf16.gmra.mxu2 %v903_v14 }
  0x54   :  { %735 = vmatmul.bf16.gmra.mxu3 %v907_v15 }
  0x61   :  { %551 = vmatmul.bf16.gmra.mxu0 %v911_v24 }
  0x62   :  { %614 = vmatmul.bf16.gmra.mxu1 %v915_v25  ;;  %v992_v25 = vld [vmem:[%s1645_s0 + $0x130] sm:$0xf0] }
  0x63   :  { %677 = vmatmul.bf16.gmra.mxu2 %v919_v26  ;;  %v998_v26 = vld [vmem:[%s1645_s0 + $0x128] sm:$0xf]  ;;  %v995_v35 = vor.u32 %v1168_v23, %v992_v25 }
  0x64   :  { %740 = vmatmul.bf16.gmra.mxu3 %v923_v27  ;;  %v1171_v27 = vld [vmem:[%s1645_s0 + $0x134] sm:$0xf0] }
  0x71   :  { %556 = vmatmul.bf16.gmra.mxu0 %v927_v36 }
  0x72   :  { %619 = vmatmul.bf16.gmra.mxu1 %v931_v37 }
  0x73   :  { %682 = vmatmul.bf16.gmra.mxu2 %v935_v38 }
  0x74   :  { %745 = vmatmul.bf16.gmra.mxu3 %v939_v39  ;;  %v999_v39 = vor.u32 %v1171_v27, %v998_v26 }
  0x81   :  { %561 = vmatmul.bf16.gmra.mxu0 %v943_v48 }
  0x82   :  { %624 = vmatmul.bf16.gmra.mxu1 %v947_v49 }
  0x83   :  { %687 = vmatmul.bf16.gmra.mxu2 %v951_v50  ;;  %v51_v50 = vld [vmem:[%s1645_s0 + $0x140] sm:$0x11] }
  0x84   :  { %750 = vmatmul.bf16.gmra.mxu3 %v955_v51  ;;  %v52_v51 = vld [vmem:[%s1645_s0 + $0x148] sm:$0x11]  ;;  %v239_v53 = vunpack.c.l.b16 %v51_v50  ;;  %v240_v54 = vunpack.c.h.b16 %v51_v50 }
  0x85   :  { %v241_v56 = vunpack.c.l.b16 %v52_v51  ;;  %v242_v57 = vunpack.c.h.b16 %v52_v51 }
  0x87   :  { %v285_v3 = vpack.c.b16 %v241_v56, %v241_v56  ;;  %v286_v4 = vpack.c.b16 %v242_v57, %v242_v57 }
  0x91   :  { %566 = vmatmul.bf16.gmra.mxu0 %v959_v60 }
  0x92   :  { %629 = vmatmul.bf16.gmra.mxu1 %v963_v61 }
  0x93   :  { %692 = vmatmul.bf16.gmra.mxu2 %v967_v62  ;;  %v283_v62 = vpack.c.b16 %v239_v53, %v239_v53 }
  0x94   :  { %755 = vmatmul.bf16.gmra.mxu3 %v971_v63  ;;  %v284_v63 = vpack.c.b16 %v240_v54, %v240_v54 }
  0x9e   :  { %v532_v10 = vpop.f32.mrf.mxu0 }
  0x9f   :  { %v595_v11 = vpop.f32.mrf.mxu1 }
  0xa0   :  { %v596_v14 = vadd.f32 %v595_v11, %v532_v10 }
  0xa1   :  { %571 = vmatmul.bf16.gmra.mxu0 %v975_v8 }
  0xa2   :  { %634 = vmatmul.bf16.gmra.mxu1 %v979_v9 }
  0xa3   :  { %697 = vmatmul.bf16.gmra.mxu2 %v983_v12 }
  0xa4   :  { %760 = vmatmul.bf16.gmra.mxu3 %v987_v13 }
  0xa6   :  { %v658_v15 = vpop.f32.mrf.mxu2  ;;  %v534_v18 = vpop.f32.mrf.mxu0 }
  0xa7   :  { %v721_v16 = vpop.f32.mrf.mxu3  ;;  %v659_v17 = vadd.f32 %v658_v15, %v596_v14  ;;  %v597_v19 = vpop.f32.mrf.mxu1 }
  0xa8   :  { %v598_v31 = vadd.f32 %v597_v19, %v534_v18 }
  0xa9   :  { %v722_v20 = vadd.f32 %v721_v16, %v659_v17 }
  0xab   :  { %v775_v24 = vmax.f32 %v722_v20, 0.0 }
  0xad   :  { %v796_v30 = vpack.c.bf16 %v775_v24, %v775_v24 }
  0xae   :  { %v660_v32 = vpop.f32.mrf.mxu2  ;;  %v537_v37 = vpop.f32.mrf.mxu0 }
  0xaf   :  { %v723_v33 = vpop.f32.mrf.mxu3  ;;  %818 = vst.msk [vmem:[%s1646_s2] sm:$0xf] %vm817_vm0, %v796_v30  ;;  %v661_v36 = vadd.f32 %v660_v32, %v598_v31  ;;  %v600_v38 = vpop.f32.mrf.mxu1 }
  0xb0   :  { %v601_v43 = vadd.f32 %v600_v38, %v537_v37 }
  0xb1   :  { %v724_v41 = vadd.f32 %v723_v33, %v661_v36  ;;  %576 = vmatmul.bf16.gmra.mxu0 %v991_v34 }
  0xb2   :  { %639 = vmatmul.bf16.gmra.mxu1 %v995_v35 }
  0xb3   :  { %v776_v42 = vmax.f32 %v724_v41, 0.0  ;;  %702 = vmatmul.bf16.gmra.mxu2 %v999_v39 }
  0xb4   :  { %765 = vmatmul.bf16.gmra.mxu3 %v1003_v40 }
  0xb5   :  { %v797_v44 = vpack.c.bf16 %v776_v42, %v776_v42 }
  0xb6   :  { %v663_v45 = vpop.f32.mrf.mxu2  ;;  %v539_v48 = vpop.f32.mrf.mxu0 }
  0xb7   :  { %v726_v46 = vpop.f32.mrf.mxu3  ;;  %819 = vst.msk [vmem:[%s1646_s2 + $0x4] sm:$0xf] %vm817_vm0, %v797_v44  ;;  %v664_v47 = vadd.f32 %v663_v45, %v601_v43  ;;  %v602_v49 = vpop.f32.mrf.mxu1 }
  0xb8   :  { %v603_v59 = vadd.f32 %v602_v49, %v539_v48 }
  0xb9   :  { %v727_v52 = vadd.f32 %v726_v46, %v664_v47 }
  0xbb   :  { %v777_v55 = vmax.f32 %v727_v52, 0.0 }
  0xbd   :  { %v798_v58 = vpack.c.bf16 %v777_v55, %v777_v55 }
  0xbe   :  { %v665_v60 = vpop.f32.mrf.mxu2  ;;  %v542_v1 = vpop.f32.mrf.mxu0 }
  0xbf   :  { %v728_v61 = vpop.f32.mrf.mxu3  ;;  %820 = vst.msk [vmem:[%s1646_s2 + $0x8] sm:$0xf] %vm817_vm0, %v798_v58  ;;  %v666_v0 = vadd.f32 %v665_v60, %v603_v59  ;;  %v605_v2 = vpop.f32.mrf.mxu1 }
  0xc0   :  { %v606_v7 = vadd.f32 %v605_v2, %v542_v1 }
  0xc1   :  { %v729_v5 = vadd.f32 %v728_v61, %v666_v0  ;;  %581 = vmatmul.bf16.gmra.mxu0 %v283_v62 }
  0xc2   :  { %644 = vmatmul.bf16.gmra.mxu1 %v284_v63 }
  0xc3   :  { %v778_v6 = vmax.f32 %v729_v5, 0.0  ;;  %707 = vmatmul.bf16.gmra.mxu2 %v285_v3 }
  0xc4   :  { %770 = vmatmul.bf16.gmra.mxu3 %v286_v4 }
  0xc5   :  { %v799_v8 = vpack.c.bf16 %v778_v6, %v778_v6 }
  0xc6   :  { %v668_v9 = vpop.f32.mrf.mxu2  ;;  %v544_v12 = vpop.f32.mrf.mxu0 }
  0xc7   :  { %v731_v10 = vpop.f32.mrf.mxu3  ;;  %821 = vst.msk [vmem:[%s1646_s2 + $0xc] sm:$0xf] %vm817_vm0, %v799_v8  ;;  %v669_v11 = vadd.f32 %v668_v9, %v606_v7  ;;  %v607_v13 = vpop.f32.mrf.mxu1 }
  0xc8   :  { %v608_v17 = vadd.f32 %v607_v13, %v544_v12 }
  0xc9   :  { %v732_v14 = vadd.f32 %v731_v10, %v669_v11 }
  0xcb   :  { %v779_v15 = vmax.f32 %v732_v14, 0.0 }
  0xcd   :  { %v800_v16 = vpack.c.bf16 %v779_v15, %v779_v15 }
  0xce   :  { %v670_v18 = vpop.f32.mrf.mxu2  ;;  %v547_v21 = vpop.f32.mrf.mxu0 }
  0xcf   :  { %v733_v19 = vpop.f32.mrf.mxu3  ;;  %822 = vst.msk [vmem:[%s1646_s2 + $0x10] sm:$0xf] %vm817_vm0, %v800_v16  ;;  %v671_v20 = vadd.f32 %v670_v18, %v608_v17  ;;  %v610_v22 = vpop.f32.mrf.mxu1 }
  0xd0   :  { %v611_v25 = vadd.f32 %v610_v22, %v547_v21 }
  0xd1   :  { %v734_v23 = vadd.f32 %v733_v19, %v671_v20 }
  0xd3   :  { %v780_v24 = vmax.f32 %v734_v23, 0.0 }
  0xd5   :  { %v801_v26 = vpack.c.bf16 %v780_v24, %v780_v24 }
  0xd6   :  { %v673_v27 = vpop.f32.mrf.mxu2  ;;  %v549_v30 = vpop.f32.mrf.mxu0 }
  0xd7   :  { %v736_v28 = vpop.f32.mrf.mxu3  ;;  %823 = vst.msk [vmem:[%s1646_s2 + $0x14] sm:$0xf] %vm817_vm0, %v801_v26  ;;  %v674_v29 = vadd.f32 %v673_v27, %v611_v25  ;;  %v612_v31 = vpop.f32.mrf.mxu1 }
  0xd8   :  { %v613_v35 = vadd.f32 %v612_v31, %v549_v30 }
  0xd9   :  { %v737_v32 = vadd.f32 %v736_v28, %v674_v29 }
  0xdb   :  { %v781_v33 = vmax.f32 %v737_v32, 0.0 }
  0xdd   :  { %v802_v34 = vpack.c.bf16 %v781_v33, %v781_v33 }
  0xde   :  { %v675_v36 = vpop.f32.mrf.mxu2  ;;  %v552_v39 = vpop.f32.mrf.mxu0 }
  0xdf   :  { %v738_v37 = vpop.f32.mrf.mxu3  ;;  %824 = vst.msk [vmem:[%s1646_s2 + $0x18] sm:$0xf] %vm817_vm0, %v802_v34  ;;  %v676_v38 = vadd.f32 %v675_v36, %v613_v35  ;;  %v615_v40 = vpop.f32.mrf.mxu1 }
  0xe0   :  { %v616_v43 = vadd.f32 %v615_v40, %v552_v39 }
  0xe1   :  { %v739_v41 = vadd.f32 %v738_v37, %v676_v38 }
  0xe3   :  { %v782_v42 = vmax.f32 %v739_v41, 0.0 }
  0xe5   :  { %v803_v44 = vpack.c.bf16 %v782_v42, %v782_v42 }
  0xe6   :  { %v678_v45 = vpop.f32.mrf.mxu2  ;;  %v554_v48 = vpop.f32.mrf.mxu0 }
  0xe7   :  { %v741_v46 = vpop.f32.mrf.mxu3  ;;  %825 = vst.msk [vmem:[%s1646_s2 + $0x1c] sm:$0xf] %vm817_vm0, %v803_v44  ;;  %v679_v47 = vadd.f32 %v678_v45, %v616_v43  ;;  %v617_v49 = vpop.f32.mrf.mxu1 }
  0xe8   :  { %v618_v53 = vadd.f32 %v617_v49, %v554_v48 }
  0xe9   :  { %v742_v50 = vadd.f32 %v741_v46, %v679_v47 }
  0xeb   :  { %v783_v51 = vmax.f32 %v742_v50, 0.0 }
  0xed   :  { %v804_v52 = vpack.c.bf16 %v783_v51, %v783_v51 }
  0xee   :  { %v680_v54 = vpop.f32.mrf.mxu2  ;;  %v557_v57 = vpop.f32.mrf.mxu0 }
  0xef   :  { %v743_v55 = vpop.f32.mrf.mxu3  ;;  %826 = vst.msk [vmem:[%s1646_s2 + $0x20] sm:$0xf] %vm817_vm0, %v804_v52  ;;  %v681_v56 = vadd.f32 %v680_v54, %v618_v53  ;;  %v620_v58 = vpop.f32.mrf.mxu1 }
  0xf0   :  { %v621_v61 = vadd.f32 %v620_v58, %v557_v57 }
  0xf1   :  { %v744_v59 = vadd.f32 %v743_v55, %v681_v56 }
  0xf3   :  { %v784_v60 = vmax.f32 %v744_v59, 0.0 }
  0xf5   :  { %v805_v62 = vpack.c.bf16 %v784_v60, %v784_v60 }
  0xf6   :  { %v683_v63 = vpop.f32.mrf.mxu2  ;;  %v559_v2 = vpop.f32.mrf.mxu0 }
  0xf7   :  { %v746_v0 = vpop.f32.mrf.mxu3  ;;  %827 = vst.msk [vmem:[%s1646_s2 + $0x24] sm:$0xf] %vm817_vm0, %v805_v62  ;;  %v684_v1 = vadd.f32 %v683_v63, %v621_v61  ;;  %v622_v3 = vpop.f32.mrf.mxu1 }
  0xf8   :  { %v623_v7 = vadd.f32 %v622_v3, %v559_v2 }
  0xf9   :  { %v747_v4 = vadd.f32 %v746_v0, %v684_v1 }
  0xfb   :  { %v785_v5 = vmax.f32 %v747_v4, 0.0 }
  0xfd   :  { %v806_v6 = vpack.c.bf16 %v785_v5, %v785_v5 }
  0xfe   :  { %v685_v8 = vpop.f32.mrf.mxu2  ;;  %v562_v11 = vpop.f32.mrf.mxu0 }
  0xff   :  { %v748_v9 = vpop.f32.mrf.mxu3  ;;  %828 = vst.msk [vmem:[%s1646_s2 + $0x28] sm:$0xf] %vm817_vm0, %v806_v6  ;;  %v686_v10 = vadd.f32 %v685_v8, %v623_v7  ;;  %v625_v12 = vpop.f32.mrf.mxu1 }
 0x100   :  { %v626_v15 = vadd.f32 %v625_v12, %v562_v11 }
 0x101   :  { %v749_v13 = vadd.f32 %v748_v9, %v686_v10 }
 0x103   :  { %v786_v14 = vmax.f32 %v749_v13, 0.0 }
 0x105   :  { %v807_v16 = vpack.c.bf16 %v786_v14, %v786_v14 }
 0x106   :  { %v688_v17 = vpop.f32.mrf.mxu2  ;;  %v564_v20 = vpop.f32.mrf.mxu0 }
 0x107   :  { %v751_v18 = vpop.f32.mrf.mxu3  ;;  %829 = vst.msk [vmem:[%s1646_s2 + $0x2c] sm:$0xf] %vm817_vm0, %v807_v16  ;;  %v689_v19 = vadd.f32 %v688_v17, %v626_v15  ;;  %v627_v21 = vpop.f32.mrf.mxu1 }
 0x108   :  { %v628_v25 = vadd.f32 %v627_v21, %v564_v20 }
 0x109   :  { %v752_v22 = vadd.f32 %v751_v18, %v689_v19 }
 0x10b   :  { %v787_v23 = vmax.f32 %v752_v22, 0.0 }
 0x10d   :  { %v808_v24 = vpack.c.bf16 %v787_v23, %v787_v23 }
 0x10e   :  { %v690_v26 = vpop.f32.mrf.mxu2  ;;  %v567_v29 = vpop.f32.mrf.mxu0 }
 0x10f   :  { %v753_v27 = vpop.f32.mrf.mxu3  ;;  %830 = vst.msk [vmem:[%s1646_s2 + $0x30] sm:$0xf] %vm817_vm0, %v808_v24  ;;  %v691_v28 = vadd.f32 %v690_v26, %v628_v25  ;;  %v630_v30 = vpop.f32.mrf.mxu1 }
 0x110   :  { %v631_v33 = vadd.f32 %v630_v30, %v567_v29 }
 0x111   :  { %v754_v31 = vadd.f32 %v753_v27, %v691_v28 }
 0x113   :  { %v788_v32 = vmax.f32 %v754_v31, 0.0 }
 0x115   :  { %v809_v34 = vpack.c.bf16 %v788_v32, %v788_v32 }
 0x116   :  { %v693_v35 = vpop.f32.mrf.mxu2  ;;  %v569_v38 = vpop.f32.mrf.mxu0 }
 0x117   :  { %v756_v36 = vpop.f32.mrf.mxu3  ;;  %831 = vst.msk [vmem:[%s1646_s2 + $0x34] sm:$0xf] %vm817_vm0, %v809_v34  ;;  %v694_v37 = vadd.f32 %v693_v35, %v631_v33  ;;  %v632_v39 = vpop.f32.mrf.mxu1 }
 0x118   :  { %v633_v43 = vadd.f32 %v632_v39, %v569_v38 }
 0x119   :  { %v757_v40 = vadd.f32 %v756_v36, %v694_v37 }
 0x11b   :  { %v789_v41 = vmax.f32 %v757_v40, 0.0 }
 0x11d   :  { %v810_v42 = vpack.c.bf16 %v789_v41, %v789_v41 }
 0x11e   :  { %v695_v44 = vpop.f32.mrf.mxu2  ;;  %v572_v47 = vpop.f32.mrf.mxu0 }
 0x11f   :  { %v758_v45 = vpop.f32.mrf.mxu3  ;;  %832 = vst.msk [vmem:[%s1646_s2 + $0x38] sm:$0xf] %vm817_vm0, %v810_v42  ;;  %v696_v46 = vadd.f32 %v695_v44, %v633_v43  ;;  %v635_v48 = vpop.f32.mrf.mxu1 }
 0x120   :  { %v636_v51 = vadd.f32 %v635_v48, %v572_v47 }
 0x121   :  { %v759_v49 = vadd.f32 %v758_v45, %v696_v46 }
 0x123   :  { %v790_v50 = vmax.f32 %v759_v49, 0.0 }
 0x125   :  { %v811_v52 = vpack.c.bf16 %v790_v50, %v790_v50 }
 0x126   :  { %v698_v53 = vpop.f32.mrf.mxu2  ;;  %v574_v56 = vpop.f32.mrf.mxu0 }
 0x127   :  { %v761_v54 = vpop.f32.mrf.mxu3  ;;  %833 = vst.msk [vmem:[%s1646_s2 + $0x3c] sm:$0xf] %vm817_vm0, %v811_v52  ;;  %v699_v55 = vadd.f32 %v698_v53, %v636_v51  ;;  %v637_v57 = vpop.f32.mrf.mxu1 }
 0x128   :  { %v638_v61 = vadd.f32 %v637_v57, %v574_v56 }
 0x129   :  { %v762_v58 = vadd.f32 %v761_v54, %v699_v55 }
 0x12b   :  { %v791_v59 = vmax.f32 %v762_v58, 0.0 }
 0x12d   :  { %v812_v60 = vpack.c.bf16 %v791_v59, %v791_v59 }
 0x12e   :  { %v700_v62 = vpop.f32.mrf.mxu2  ;;  %v577_v1 = vpop.f32.mrf.mxu0 }
 0x12f   :  { %v763_v63 = vpop.f32.mrf.mxu3  ;;  %834 = vst.msk [vmem:[%s1646_s2 + $0x40] sm:$0xf] %vm817_vm0, %v812_v60  ;;  %v701_v0 = vadd.f32 %v700_v62, %v638_v61  ;;  %v640_v2 = vpop.f32.mrf.mxu1 }
 0x130   :  { %v641_v5 = vadd.f32 %v640_v2, %v577_v1 }
 0x131   :  { %v764_v3 = vadd.f32 %v763_v63, %v701_v0 }
 0x133   :  { %v792_v4 = vmax.f32 %v764_v3, 0.0 }
 0x135   :  { %v813_v6 = vpack.c.bf16 %v792_v4, %v792_v4 }
 0x136   :  { %v703_v7 = vpop.f32.mrf.mxu2  ;;  %v579_v10 = vpop.f32.mrf.mxu0 }
 0x137   :  { %v766_v8 = vpop.f32.mrf.mxu3  ;;  %835 = vst.msk [vmem:[%s1646_s2 + $0x44] sm:$0xf] %vm817_vm0, %v813_v6  ;;  %v704_v9 = vadd.f32 %v703_v7, %v641_v5  ;;  %v642_v11 = vpop.f32.mrf.mxu1 }
 0x138   :  { %v643_v15 = vadd.f32 %v642_v11, %v579_v10 }
 0x139   :  { %v767_v12 = vadd.f32 %v766_v8, %v704_v9 }
 0x13b   :  { %v793_v13 = vmax.f32 %v767_v12, 0.0 }
 0x13d   :  { %v814_v14 = vpack.c.bf16 %v793_v13, %v793_v13 }
 0x13e   :  { %v705_v16 = vpop.f32.mrf.mxu2  ;;  %v582_v19 = vpop.f32.mrf.mxu0 }
 0x13f   :  { %v768_v17 = vpop.f32.mrf.mxu3  ;;  %836 = vst.msk [vmem:[%s1646_s2 + $0x48] sm:$0xf] %vm817_vm0, %v814_v14  ;;  %v706_v18 = vadd.f32 %v705_v16, %v643_v15  ;;  %v645_v20 = vpop.f32.mrf.mxu1 }
 0x140   :  { %v646_v23 = vadd.f32 %v645_v20, %v582_v19 }
 0x141   :  { %v769_v21 = vadd.f32 %v768_v17, %v706_v18 }
 0x143   :  { %v794_v22 = vmax.f32 %v769_v21, 0.0 }
 0x145   :  { %v815_v24 = vpack.c.bf16 %v794_v22, %v794_v22 }
 0x146   :  { %v708_v25 = vpop.f32.mrf.mxu2  ;;  %v584_v28 = vpop.f32.mrf.mxu0 }
 0x147   :  { %v771_v26 = vpop.f32.mrf.mxu3  ;;  %837 = vst.msk [vmem:[%s1646_s2 + $0x4c] sm:$0xf] %vm817_vm0, %v815_v24  ;;  %v709_v27 = vadd.f32 %v708_v25, %v646_v23  ;;  %v647_v29 = vpop.f32.mrf.mxu1 }
 0x149   :  { %v772_v30 = vadd.f32 %v771_v26, %v709_v27 }
 0x14b   :  { %v795_v31 = vmax.f32 %v772_v30, 0.0 }
 0x14d   :  { %v816_v32 = vpack.c.bf16 %v795_v31, %v795_v31 }
 0x14e   :  { %v710_v33 = vpop.f32.mrf.mxu2 }
 0x14f   :  { %v773_v34 = vpop.f32.mrf.mxu3  ;;  %839 = vst.msk [vmem:[%s1646_s2 + $0x50] sm:$0x1] %vm838_vm1, %v816_v32 }

// kernel: d3q_forward.6
= control target key start
LH: loop header
LB: loop body
LE: loop exit
PB: predicated region body
PF: predicated region fallthrough
CT: control target
= control target key end

     0   :  { %vm506_vm0 = vcmask 523264   ;;  %vm769_vm1 = vcmask 519168   ;;  %vm782_vm2 = vcmask 516096   ;;  %s1550_s1 = inlined_call_operand.vmem [shape: bf16[576,64], index: 1, kind: input, shape index: {}]   ;;  %s1551_s0 = inlined_call_operand.vmem [shape: bf16[98,576], index: 0, kind: input, shape index: {}]   ;;  %s1552_s2 = inlined_call_operand.vmem [shape: bf16[98,64], index: 2, kind: output, shape index: {}]  }
   0x1   :  { %v1096_v0 = vld [vmem:[%s1550_s1 + $0x38] sm:$0xff]  ;;  %v1095_v1 = vld [vmem:[%s1550_s1 + $0x30] sm:$0xff]  ;;  %v1094_v2 = vld [vmem:[%s1550_s1 + $0x28] sm:$0xff] }
   0x2   :  { %1125 = vmatpush.bf16.msra.mxu1 %v1096_v0  ;;  %1126 = vmatpush.bf16.msra.mxu2 %v1096_v0  ;;  %v1093_v3 = vld [vmem:[%s1550_s1 + $0x20] sm:$0xff]  ;;  %v1092_v4 = vld [vmem:[%s1550_s1 + $0x18] sm:$0xff]  ;;  %v1091_v5 = vld [vmem:[%s1550_s1 + $0x10] sm:$0xff] }
   0x3   :  { %1127 = vmatpush.bf16.msra.mxu3 %v1096_v0  ;;  %528 = vmatpush.bf16.msra.mxu0 %v1096_v0  ;;  %v1090_v6 = vld [vmem:[%s1550_s1 + $0x8] sm:$0xff]  ;;  %v1188_v7 = vld [vmem:[%s1551_s0 + $0xf0] sm:$0x11]  ;;  %v1089_v8 = vld [vmem:[%s1550_s1] sm:$0xff] }
   0x4   :  { %v830_v9 = vld [vmem:[%s1551_s0 + $0x50] sm:$0xf]  ;;  %v1071_v10 = vld [vmem:[%s1551_s0 + $0x60] sm:$0xf0]  ;;  %v870_v11 = vld [vmem:[%s1551_s0 + $0xa0] sm:$0xf]  ;;  %v222_v15 = vunpack.c.l.b16 %v1188_v7 }
   0x5   :  { %v1081_v12 = vld [vmem:[%s1551_s0 + $0xb0] sm:$0xf0]  ;;  %v790_v13 = vld [vmem:[%s1551_s0] sm:$0xf]  ;;  %v1120_v16 = vld [vmem:[%s1550_s1 + $0xf8] sm:$0xff]  ;;  %v831_v18 = vor.u32 %v1071_v10, %v830_v9 }
   0x6   :  { %1128 = vmatpush.bf16.msra.mxu1 %v1095_v1  ;;  %1129 = vmatpush.bf16.msra.mxu2 %v1095_v1  ;;  %v1061_v14 = vld [vmem:[%s1551_s0 + $0x10] sm:$0xf0]  ;;  %v1112_v17 = vld [vmem:[%s1550_s1 + $0xb8] sm:$0xff]  ;;  %v871_v19 = vor.u32 %v1081_v12, %v870_v11  ;;  %v257_v23 = vpack.c.b16 %v222_v15, %v222_v15  ;;  %v1118_v28 = vld [vmem:[%s1550_s1 + $0xe8] sm:$0xff] }
   0x7   :  { %1130 = vmatpush.bf16.msra.mxu3 %v1095_v1  ;;  %529 = vmatpush.bf16.msra.mxu0 %v1095_v1  ;;  %v791_v20 = vor.u32 %v1061_v14, %v790_v13  ;;  %v1104_v21 = vld [vmem:[%s1550_s1 + $0x78] sm:$0xff]  ;;  %v1119_v24 = vld [vmem:[%s1550_s1 + $0xf0] sm:$0xff]  ;;  %v1110_v29 = vld [vmem:[%s1550_s1 + $0xa8] sm:$0xff] }
   0x8   :  { %v1124_v22 = vld [vmem:[%s1550_s1 + $0x118] sm:$0xff]  ;;  %v1111_v25 = vld [vmem:[%s1550_s1 + $0xb0] sm:$0xff]  ;;  %v1102_v30 = vld [vmem:[%s1550_s1 + $0x68] sm:$0xff] }
   0x9   :  { %v1103_v26 = vld [vmem:[%s1550_s1 + $0x70] sm:$0xff]  ;;  %v1122_v31 = vld [vmem:[%s1550_s1 + $0x108] sm:$0xff]  ;;  %v1117_v32 = vld [vmem:[%s1550_s1 + $0xe0] sm:$0xff] }
   0xa   :  { %1131 = vmatpush.bf16.msra.mxu1 %v1094_v2  ;;  %1132 = vmatpush.bf16.msra.mxu2 %v1094_v2  ;;  %v1123_v27 = vld [vmem:[%s1550_s1 + $0x110] sm:$0xff]  ;;  %v1109_v33 = vld [vmem:[%s1550_s1 + $0xa0] sm:$0xff]  ;;  %v850_v35 = vld [vmem:[%s1551_s0 + $0x78] sm:$0xf] }
   0xb   :  { %1133 = vmatpush.bf16.msra.mxu3 %v1094_v2  ;;  %530 = vmatpush.bf16.msra.mxu0 %v1094_v2  ;;  %v1101_v34 = vld [vmem:[%s1550_s1 + $0x60] sm:$0xff]  ;;  %v1076_v36 = vld [vmem:[%s1551_s0 + $0x88] sm:$0xf0]  ;;  %v890_v37 = vld [vmem:[%s1551_s0 + $0xc8] sm:$0xf] }
   0xc   :  { %v1086_v38 = vld [vmem:[%s1551_s0 + $0xd8] sm:$0xf0]  ;;  %v810_v39 = vld [vmem:[%s1551_s0 + $0x28] sm:$0xf]  ;;  %v1121_v41 = vld [vmem:[%s1550_s1 + $0x100] sm:$0xff]  ;;  %v851_v44 = vor.u32 %v1076_v36, %v850_v35 }
   0xd   :  { %v1066_v40 = vld [vmem:[%s1551_s0 + $0x38] sm:$0xf0]  ;;  %v891_v45 = vor.u32 %v1086_v38, %v890_v37  ;;  %v1115_v48 = vld [vmem:[%s1550_s1 + $0xd0] sm:$0xff]  ;;  %v1114_v51 = vld [vmem:[%s1550_s1 + $0xc8] sm:$0xff] }
   0xe   :  { %1134 = vmatpush.bf16.msra.mxu1 %v1093_v3  ;;  %1135 = vmatpush.bf16.msra.mxu2 %v1093_v3  ;;  %v1116_v42 = vld [vmem:[%s1550_s1 + $0xd8] sm:$0xff]  ;;  %v811_v46 = vor.u32 %v1066_v40, %v810_v39  ;;  %v1107_v49 = vld [vmem:[%s1550_s1 + $0x90] sm:$0xff]  ;;  %v1106_v52 = vld [vmem:[%s1550_s1 + $0x88] sm:$0xff] }
   0xf   :  { %1136 = vmatpush.bf16.msra.mxu3 %v1093_v3  ;;  %531 = vmatpush.bf16.msra.mxu0 %v1093_v3  ;;  %v1108_v43 = vld [vmem:[%s1550_s1 + $0x98] sm:$0xff]  ;;  %v1099_v50 = vld [vmem:[%s1550_s1 + $0x50] sm:$0xff]  ;;  %v1098_v53 = vld [vmem:[%s1550_s1 + $0x48] sm:$0xff] }
  0x10   :  { %v1100_v47 = vld [vmem:[%s1550_s1 + $0x58] sm:$0xff]  ;;  %v1113_v54 = vld [vmem:[%s1550_s1 + $0xc0] sm:$0xff]  ;;  %v1060_v56 = vld [vmem:[%s1551_s0 + $0xc] sm:$0xf] }
  0x11   :  { %v1105_v55 = vld [vmem:[%s1550_s1 + $0x80] sm:$0xff]  ;;  %v792_v60 = vld [vmem:[%s1551_s0 + $0x14] sm:$0xf0]  ;;  %v798_v61 = vld [vmem:[%s1551_s0 + $0x8] sm:$0xf] }
  0x12   :  { %1137 = vmatpush.bf16.msra.mxu1 %v1092_v4  ;;  %1138 = vmatpush.bf16.msra.mxu2 %v1092_v4  ;;  %v800_v57 = vld [vmem:[%s1551_s0 + $0x1c] sm:$0xf0]  ;;  %v1059_v59 = vld [vmem:[%s1551_s0 + $0x4] sm:$0xf]  ;;  %v1062_v62 = vld [vmem:[%s1551_s0 + $0x18] sm:$0xf0] }
  0x13   :  { %1139 = vmatpush.bf16.msra.mxu3 %v1092_v4  ;;  %532 = vmatpush.bf16.msra.mxu0 %v1092_v4  ;;  %v1097_v58 = vld [vmem:[%s1550_s1 + $0x40] sm:$0xff]  ;;  %v803_v63 = vor.u32 %v1060_v56, %v800_v57  ;;  %v806_v0 = vld [vmem:[%s1551_s0 + $0x10] sm:$0xf]  ;;  %v795_v2 = vor.u32 %v1059_v59, %v792_v60  ;;  %v799_v3 = vor.u32 %v1062_v62, %v798_v61  ;;  %v826_v13 = vld [vmem:[%s1551_s0 + $0x38] sm:$0xf] }
  0x14   :  { %v1063_v1 = vld [vmem:[%s1551_s0 + $0x20] sm:$0xf0]  ;;  %v812_v9 = vld [vmem:[%s1551_s0 + $0x3c] sm:$0xf0]  ;;  %v818_v10 = vld [vmem:[%s1551_s0 + $0x30] sm:$0xf] }
  0x15   :  { %v807_v4 = vor.u32 %v1063_v1, %v806_v0  ;;  %v1067_v11 = vld [vmem:[%s1551_s0 + $0x40] sm:$0xf0]  ;;  %v1068_v14 = vld [vmem:[%s1551_s0 + $0x48] sm:$0xf0]  ;;  %v1077_v35 = vld [vmem:[%s1551_s0 + $0x90] sm:$0xf0] }
  0x16   :  { %1140 = vmatpush.bf16.msra.mxu1 %v1091_v5  ;;  %1141 = vmatpush.bf16.msra.mxu2 %v1091_v5  ;;  %v866_v37 = vld [vmem:[%s1551_s0 + $0x88] sm:$0xf]  ;;  %v1078_v38 = vld [vmem:[%s1551_s0 + $0x98] sm:$0xf0]  ;;  %v1084_v56 = vld [vmem:[%s1551_s0 + $0xcc] sm:$0xf] }
  0x17   :  { %1142 = vmatpush.bf16.msra.mxu3 %v1091_v5  ;;  %533 = vmatpush.bf16.msra.mxu0 %v1091_v5  ;;  %v1065_v5 = vld [vmem:[%s1551_s0 + $0x34] sm:$0xf]  ;;  %v892_v57 = vld [vmem:[%s1551_s0 + $0xdc] sm:$0xf0]  ;;  %v1087_v59 = vld [vmem:[%s1551_s0 + $0xe0] sm:$0xf0] }
  0x18   :  { %v906_v61 = vld [vmem:[%s1551_s0 + $0xd8] sm:$0xf]  ;;  %v1088_v62 = vld [vmem:[%s1551_s0 + $0xe8] sm:$0xf0] }
  0x19   :  { %v907_v1 = vor.u32 %v1088_v62, %v906_v61 }
  0x1a   :  { %1143 = vmatpush.bf16.msra.mxu1 %v1090_v6  ;;  %1144 = vmatpush.bf16.msra.mxu2 %v1090_v6 }
  0x1b   :  { %1145 = vmatpush.bf16.msra.mxu3 %v1090_v6  ;;  %534 = vmatpush.bf16.msra.mxu0 %v1090_v6  ;;  %v820_v6 = vld [vmem:[%s1551_s0 + $0x44] sm:$0xf0] }
  0x1c   :  { %v823_v12 = vor.u32 %v1065_v5, %v820_v6  ;;  %v223_v5 = vunpack.c.h.b16 %v1188_v7 }
  0x1e   :  { %1146 = vmatpush.bf16.msra.mxu1 %v1089_v8  ;;  %1147 = vmatpush.bf16.msra.mxu2 %v1089_v8 }
  0x1f   :  { %1148 = vmatpush.bf16.msra.mxu3 %v1089_v8  ;;  %535 = vmatpush.bf16.msra.mxu0 %v1089_v8  ;;  %v1064_v8 = vld [vmem:[%s1551_s0 + $0x2c] sm:$0xf] }
  0x20   :  { %v815_v15 = vor.u32 %v1064_v8, %v812_v9 }
  0x21   :  { %546 = vmatmul.bf16.vlgmr.msra.gmra.mxu1 %v831_v18  ;;  %556 = vmatmul.bf16.vlgmr.msra.gmra.mxu2 %v871_v19  ;;  %v1070_v18 = vld [vmem:[%s1551_s0 + $0x5c] sm:$0xf]  ;;  %v840_v19 = vld [vmem:[%s1551_s0 + $0x6c] sm:$0xf0] }
  0x22   :  { %614 = vmatpush.bf16.msrb.mxu2 %v1112_v17  ;;  %536 = vmatmul.bf16.vlgmr.msra.gmra.mxu0 %v791_v20  ;;  %v827_v17 = vor.u32 %v1068_v14, %v826_v13  ;;  %v1069_v20 = vld [vmem:[%s1551_s0 + $0x54] sm:$0xf] }
  0x23   :  { %657 = vmatpush.bf16.msrb.mxu3 %v1120_v16  ;;  %571 = vmatpush.bf16.msrb.mxu1 %v1104_v21  ;;  %v819_v16 = vor.u32 %v1067_v11, %v818_v10  ;;  %v832_v21 = vld [vmem:[%s1551_s0 + $0x64] sm:$0xf0]  ;;  %v258_v10 = vpack.c.b16 %v223_v5, %v223_v5 }
  0x24   :  { %704 = vmatpush.bf16.msrb.mxu0 %v1124_v22  ;;  %566 = vmatmul.bf16.vlgmr.msra.gmra.mxu3 %v257_v23  ;;  %v838_v22 = vld [vmem:[%s1551_s0 + $0x58] sm:$0xf]  ;;  %v1072_v23 = vld [vmem:[%s1551_s0 + $0x68] sm:$0xf0] }
  0x26   :  { %615 = vmatpush.bf16.msrb.mxu2 %v1111_v25  ;;  %v846_v25 = vld [vmem:[%s1551_s0 + $0x60] sm:$0xf] }
  0x27   :  { %658 = vmatpush.bf16.msrb.mxu3 %v1119_v24  ;;  %572 = vmatpush.bf16.msrb.mxu1 %v1103_v26  ;;  %v843_v24 = vor.u32 %v1070_v18, %v840_v19  ;;  %v1073_v26 = vld [vmem:[%s1551_s0 + $0x70] sm:$0xf0] }
  0x28   :  { %705 = vmatpush.bf16.msrb.mxu0 %v1123_v27  ;;  %v835_v27 = vor.u32 %v1069_v20, %v832_v21 }
  0x2a   :  { %616 = vmatpush.bf16.msrb.mxu2 %v1110_v29  ;;  %v847_v29 = vor.u32 %v1073_v26, %v846_v25 }
  0x2b   :  { %659 = vmatpush.bf16.msrb.mxu3 %v1118_v28  ;;  %573 = vmatpush.bf16.msrb.mxu1 %v1102_v30  ;;  %v839_v28 = vor.u32 %v1072_v23, %v838_v22  ;;  %v1075_v30 = vld [vmem:[%s1551_s0 + $0x84] sm:$0xf] }
  0x2c   :  { %706 = vmatpush.bf16.msrb.mxu0 %v1122_v31  ;;  %v860_v31 = vld [vmem:[%s1551_s0 + $0x94] sm:$0xf0] }
  0x2d   :  { %v863_v36 = vor.u32 %v1075_v30, %v860_v31 }
  0x2e   :  { %617 = vmatpush.bf16.msrb.mxu2 %v1109_v33  ;;  %v852_v33 = vld [vmem:[%s1551_s0 + $0x8c] sm:$0xf0] }
  0x2f   :  { %660 = vmatpush.bf16.msrb.mxu3 %v1117_v32  ;;  %574 = vmatpush.bf16.msrb.mxu1 %v1101_v34  ;;  %v1074_v32 = vld [vmem:[%s1551_s0 + $0x7c] sm:$0xf]  ;;  %v858_v34 = vld [vmem:[%s1551_s0 + $0x80] sm:$0xf] }
  0x30   :  { %707 = vmatpush.bf16.msrb.mxu0 %v1121_v41  ;;  %v855_v39 = vor.u32 %v1074_v32, %v852_v33  ;;  %v859_v40 = vor.u32 %v1077_v35, %v858_v34  ;;  %v867_v41 = vor.u32 %v1078_v38, %v866_v37 }
  0x31   :  { %551 = vmatmul.bf16.gmra.mxu1 %v851_v44  ;;  %561 = vmatmul.bf16.gmra.mxu2 %v891_v45  ;;  %v1079_v44 = vld [vmem:[%s1551_s0 + $0xa4] sm:$0xf]  ;;  %v872_v45 = vld [vmem:[%s1551_s0 + $0xb4] sm:$0xf0] }
  0x32   :  { %618 = vmatpush.bf16.msrb.mxu2 %v1108_v43  ;;  %541 = vmatmul.bf16.gmra.mxu0 %v811_v46  ;;  %v880_v43 = vld [vmem:[%s1551_s0 + $0xbc] sm:$0xf0]  ;;  %v878_v46 = vld [vmem:[%s1551_s0 + $0xa8] sm:$0xf] }
  0x33   :  { %661 = vmatpush.bf16.msrb.mxu3 %v1116_v42  ;;  %575 = vmatpush.bf16.msrb.mxu1 %v1100_v47  ;;  %v1080_v42 = vld [vmem:[%s1551_s0 + $0xac] sm:$0xf]  ;;  %v1082_v47 = vld [vmem:[%s1551_s0 + $0xb8] sm:$0xf0] }
  0x36   :  { %619 = vmatpush.bf16.msrb.mxu2 %v1107_v49  ;;  %v886_v49 = vld [vmem:[%s1551_s0 + $0xb0] sm:$0xf] }
  0x37   :  { %662 = vmatpush.bf16.msrb.mxu3 %v1115_v48  ;;  %576 = vmatpush.bf16.msrb.mxu1 %v1099_v50  ;;  %v883_v48 = vor.u32 %v1080_v42, %v880_v43  ;;  %v1083_v50 = vld [vmem:[%s1551_s0 + $0xc0] sm:$0xf0] }
  0x3a   :  { %620 = vmatpush.bf16.msrb.mxu2 %v1106_v52  ;;  %v879_v52 = vor.u32 %v1082_v47, %v878_v46 }
  0x3b   :  { %663 = vmatpush.bf16.msrb.mxu3 %v1114_v51  ;;  %577 = vmatpush.bf16.msrb.mxu1 %v1098_v53  ;;  %v875_v51 = vor.u32 %v1079_v44, %v872_v45  ;;  %v887_v53 = vor.u32 %v1083_v50, %v886_v49 }
  0x3e   :  { %621 = vmatpush.bf16.msrb.mxu2 %v1105_v55  ;;  %v900_v55 = vld [vmem:[%s1551_s0 + $0xe4] sm:$0xf0] }
  0x3f   :  { %664 = vmatpush.bf16.msrb.mxu3 %v1113_v54  ;;  %578 = vmatpush.bf16.msrb.mxu1 %v1097_v58  ;;  %v1085_v54 = vld [vmem:[%s1551_s0 + $0xd4] sm:$0xf]  ;;  %v898_v58 = vld [vmem:[%s1551_s0 + $0xd0] sm:$0xf] }
  0x40   :  { %v903_v60 = vor.u32 %v1085_v54, %v900_v55  ;;  %v899_v0 = vor.u32 %v1087_v59, %v898_v58 }
  0x41   :  { %622 = vmatmul.bf16.vlgmr.msrb.gmra.mxu2 %v799_v3 }
  0x42   :  { %665 = vmatmul.bf16.vlgmr.msrb.gmra.mxu3 %v803_v63  ;;  %579 = vmatmul.bf16.vlgmr.msrb.gmra.mxu1 %v795_v2  ;;  %v895_v63 = vor.u32 %v1084_v56, %v892_v57  ;;  %v49_v2 = vld [vmem:[%s1551_s0 + $0xf8] sm:$0x11] }
  0x43   :  { %1052 = vmatmul.msk.bf16.vlgmr.msrb.gmra.mxu0 %vm506_vm0, %v807_v4  ;;  %v225_v3 = vunpack.c.h.b16 %v49_v2  ;;  %v50_v4 = vld [vmem:[%s1551_s0 + $0x100] sm:$0x1]  ;;  %v224_v6 = vunpack.c.l.b16 %v49_v2 }
  0x44   :  { %v226_v8 = vunpack.c.l.b16 %v50_v4 }
  0x45   :  { %v260_v9 = vpack.c.b16 %v225_v3, %v225_v3  ;;  %v259_v11 = vpack.c.b16 %v224_v6, %v224_v6 }
  0x46   :  { %v261_v13 = vpack.c.b16 %v226_v8, %v226_v8 }
  0x51   :  { %627 = vmatmul.bf16.gmra.mxu2 %v819_v16 }
  0x52   :  { %670 = vmatmul.bf16.gmra.mxu3 %v823_v12  ;;  %584 = vmatmul.bf16.gmra.mxu1 %v815_v15 }
  0x53   :  { %1053 = vmatmul.msk.bf16.gmra.mxu0 %vm506_vm0, %v827_v17 }
  0x61   :  { %632 = vmatmul.bf16.gmra.mxu2 %v839_v28 }
  0x62   :  { %675 = vmatmul.bf16.gmra.mxu3 %v843_v24  ;;  %589 = vmatmul.bf16.gmra.mxu1 %v835_v27 }
  0x63   :  { %1054 = vmatmul.msk.bf16.gmra.mxu0 %vm506_vm0, %v847_v29 }
  0x71   :  { %637 = vmatmul.bf16.gmra.mxu2 %v859_v40 }
  0x72   :  { %680 = vmatmul.bf16.gmra.mxu3 %v863_v36  ;;  %594 = vmatmul.bf16.gmra.mxu1 %v855_v39 }
  0x73   :  { %1055 = vmatmul.msk.bf16.gmra.mxu0 %vm506_vm0, %v867_v41 }
  0x81   :  { %642 = vmatmul.bf16.gmra.mxu2 %v879_v52 }
  0x82   :  { %685 = vmatmul.bf16.gmra.mxu3 %v883_v48  ;;  %599 = vmatmul.bf16.gmra.mxu1 %v875_v51 }
  0x83   :  { %1056 = vmatmul.msk.bf16.gmra.mxu0 %vm506_vm0, %v887_v53 }
  0x91   :  { %647 = vmatmul.bf16.gmra.mxu2 %v899_v0 }
  0x92   :  { %690 = vmatmul.bf16.gmra.mxu3 %v903_v60  ;;  %604 = vmatmul.bf16.gmra.mxu1 %v895_v63 }
  0x93   :  { %1057 = vmatmul.msk.bf16.gmra.mxu0 %vm506_vm0, %v907_v1 }
  0x9e   :  { %v1471_v12 = vpop.f32.mrf.mxu1 }
  0x9f   :  { %v537_v14 = vpop.f32.mrf.mxu0 }
  0xa1   :  { %652 = vmatmul.bf16.gmra.mxu2 %v259_v11 }
  0xa2   :  { %695 = vmatmul.bf16.gmra.mxu3 %v260_v9  ;;  %609 = vmatmul.bf16.gmra.mxu1 %v258_v10 }
  0xa3   :  { %1058 = vmatmul.msk.bf16.gmra.mxu0 %vm506_vm0, %v261_v13 }
  0xa4   :  { %v1474_v15 = vpop.f32.mrf.mxu2 }
  0xa6   :  { %v1476_v16 = vpop.f32.mrf.mxu1 }
  0xa7   :  { %v1478_v17 = vpop.f32.mrf.mxu3  ;;  %v539_v7 = vpop.f32.mrf.mxu0 }
  0xac   :  { %v1480_v18 = vpop.f32.mrf.mxu2 }
  0xae   :  { %v1482_v19 = vpop.f32.mrf.mxu1 }
  0xaf   :  { %v569_v20 = vpop.f32.mrf.mxu3  ;;  %v542_v21 = vpop.f32.mrf.mxu0 }
  0xb4   :  { %v1484_v22 = vpop.f32.mrf.mxu2 }
  0xb6   :  { %v1486_v23 = vpop.f32.mrf.mxu1 }
  0xb7   :  { %v544_v24 = vpop.f32.mrf.mxu0 }
  0xbc   :  { %v1488_v25 = vpop.f32.mrf.mxu2 }
  0xbf   :  { %v580_v26 = vpop.f32.mrf.mxu1 }
  0xc0   :  { %v709_v27 = vpop.f32.mrf.mxu0  ;;  %v581_v29 = vadd.f32 %v580_v26, %v537_v14 }
  0xc4   :  { %v623_v30 = vpop.f32.mrf.mxu2 }
  0xc5   :  { %v666_v28 = vpop.f32.mrf.mxu3  ;;  %v624_v31 = vadd.f32 %v623_v30, %v581_v29 }
  0xc7   :  { %v582_v32 = vpop.f32.mrf.mxu1  ;;  %v667_v33 = vadd.f32 %v666_v28, %v624_v31 }
  0xc8   :  { %v711_v34 = vpop.f32.mrf.mxu0  ;;  %v583_v38 = vadd.f32 %v582_v32, %v539_v7 }
  0xc9   :  { %v710_v35 = vadd.f32 %v709_v27, %v667_v33 }
  0xcb   :  { %v743_v37 = vmax.f32 %v710_v35, 0.0 }
  0xcc   :  { %v625_v39 = vpop.f32.mrf.mxu2 }
  0xcd   :  { %v668_v36 = vpop.f32.mrf.mxu3  ;;  %v756_v40 = vpack.c.bf16 %v743_v37, %v743_v37  ;;  %v626_v41 = vadd.f32 %v625_v39, %v583_v38 }
  0xcf   :  { %v585_v42 = vpop.f32.mrf.mxu1  ;;  %770 = vst.msk [vmem:[%s1552_s2] sm:$0xf] %vm769_vm1, %v756_v40  ;;  %v669_v43 = vadd.f32 %v668_v36, %v626_v41 }
  0xd0   :  { %v714_v44 = vpop.f32.mrf.mxu0  ;;  %v586_v48 = vadd.f32 %v585_v42, %v542_v21 }
  0xd1   :  { %v712_v45 = vadd.f32 %v711_v34, %v669_v43 }
  0xd3   :  { %v744_v47 = vmax.f32 %v712_v45, 0.0 }
  0xd4   :  { %v628_v49 = vpop.f32.mrf.mxu2 }
  0xd5   :  { %v671_v46 = vpop.f32.mrf.mxu3  ;;  %v757_v50 = vpack.c.bf16 %v744_v47, %v744_v47  ;;  %v629_v51 = vadd.f32 %v628_v49, %v586_v48 }
  0xd7   :  { %v587_v52 = vpop.f32.mrf.mxu1  ;;  %771 = vst.msk [vmem:[%s1552_s2 + $0x4] sm:$0xf] %vm769_vm1, %v757_v50  ;;  %v672_v53 = vadd.f32 %v671_v46, %v629_v51 }
  0xd8   :  { %v716_v54 = vpop.f32.mrf.mxu0  ;;  %v588_v58 = vadd.f32 %v587_v52, %v544_v24 }
  0xd9   :  { %v715_v55 = vadd.f32 %v714_v44, %v672_v53 }
  0xdb   :  { %v745_v57 = vmax.f32 %v715_v55, 0.0 }
  0xdc   :  { %v630_v59 = vpop.f32.mrf.mxu2 }
  0xdd   :  { %v673_v56 = vpop.f32.mrf.mxu3  ;;  %v758_v60 = vpack.c.bf16 %v745_v57, %v745_v57  ;;  %v631_v61 = vadd.f32 %v630_v59, %v588_v58 }
  0xdf   :  { %v590_v62 = vpop.f32.mrf.mxu1  ;;  %772 = vst.msk [vmem:[%s1552_s2 + $0x8] sm:$0xf] %vm769_vm1, %v758_v60  ;;  %v674_v63 = vadd.f32 %v673_v56, %v631_v61 }
  0xe0   :  { %v719_v0 = vpop.f32.mrf.mxu0  ;;  %v591_v4 = vadd.f32 %v590_v62, %v1471_v12 }
  0xe1   :  { %v717_v1 = vadd.f32 %v716_v54, %v674_v63 }
  0xe3   :  { %v746_v3 = vmax.f32 %v717_v1, 0.0 }
  0xe4   :  { %v633_v5 = vpop.f32.mrf.mxu2 }
  0xe5   :  { %v676_v2 = vpop.f32.mrf.mxu3  ;;  %v759_v6 = vpack.c.bf16 %v746_v3, %v746_v3  ;;  %v634_v8 = vadd.f32 %v633_v5, %v591_v4 }
  0xe7   :  { %v592_v9 = vpop.f32.mrf.mxu1  ;;  %773 = vst.msk [vmem:[%s1552_s2 + $0xc] sm:$0xf] %vm769_vm1, %v759_v6  ;;  %v677_v10 = vadd.f32 %v676_v2, %v634_v8 }
  0xe8   :  { %v721_v11 = vpop.f32.mrf.mxu0  ;;  %v593_v20 = vadd.f32 %v592_v9, %v1476_v16 }
  0xe9   :  { %v720_v13 = vadd.f32 %v719_v0, %v677_v10 }
  0xeb   :  { %v747_v7 = vmax.f32 %v720_v13, 0.0 }
  0xec   :  { %v635_v21 = vpop.f32.mrf.mxu2 }
  0xed   :  { %v678_v14 = vpop.f32.mrf.mxu3  ;;  %v760_v24 = vpack.c.bf16 %v747_v7, %v747_v7  ;;  %v636_v26 = vadd.f32 %v635_v21, %v593_v20 }
  0xef   :  { %v595_v12 = vpop.f32.mrf.mxu1  ;;  %774 = vst.msk [vmem:[%s1552_s2 + $0x10] sm:$0xf] %vm769_vm1, %v760_v24  ;;  %v679_v27 = vadd.f32 %v678_v14, %v636_v26 }
  0xf0   :  { %v724_v28 = vpop.f32.mrf.mxu0  ;;  %v596_v32 = vadd.f32 %v595_v12, %v1482_v19 }
  0xf1   :  { %v722_v29 = vadd.f32 %v721_v11, %v679_v27 }
  0xf3   :  { %v748_v31 = vmax.f32 %v722_v29, 0.0 }
  0xf4   :  { %v638_v33 = vpop.f32.mrf.mxu2 }
  0xf5   :  { %v681_v30 = vpop.f32.mrf.mxu3  ;;  %v761_v34 = vpack.c.bf16 %v748_v31, %v748_v31  ;;  %v639_v35 = vadd.f32 %v638_v33, %v596_v32 }
  0xf7   :  { %v597_v16 = vpop.f32.mrf.mxu1  ;;  %775 = vst.msk [vmem:[%s1552_s2 + $0x14] sm:$0xf] %vm769_vm1, %v761_v34  ;;  %v682_v36 = vadd.f32 %v681_v30, %v639_v35 }
  0xf8   :  { %v726_v37 = vpop.f32.mrf.mxu0  ;;  %v598_v41 = vadd.f32 %v597_v16, %v1486_v23 }
  0xf9   :  { %v725_v38 = vadd.f32 %v724_v28, %v682_v36 }
  0xfb   :  { %v749_v40 = vmax.f32 %v725_v38, 0.0 }
  0xfc   :  { %v640_v42 = vpop.f32.mrf.mxu2 }
  0xfd   :  { %v683_v39 = vpop.f32.mrf.mxu3  ;;  %v762_v43 = vpack.c.bf16 %v749_v40, %v749_v40  ;;  %v641_v44 = vadd.f32 %v640_v42, %v598_v41 }
  0xff   :  { %v600_v19 = vpop.f32.mrf.mxu1  ;;  %776 = vst.msk [vmem:[%s1552_s2 + $0x18] sm:$0xf] %vm769_vm1, %v762_v43  ;;  %v684_v45 = vadd.f32 %v683_v39, %v641_v44 }
 0x100   :  { %v729_v46 = vpop.f32.mrf.mxu0  ;;  %v601_v50 = vadd.f32 %v600_v19, %v1474_v15 }
 0x101   :  { %v727_v47 = vadd.f32 %v726_v37, %v684_v45 }
 0x103   :  { %v750_v49 = vmax.f32 %v727_v47, 0.0 }
 0x104   :  { %v643_v51 = vpop.f32.mrf.mxu2 }
 0x105   :  { %v686_v48 = vpop.f32.mrf.mxu3  ;;  %v763_v52 = vpack.c.bf16 %v750_v49, %v750_v49  ;;  %v644_v53 = vadd.f32 %v643_v51, %v601_v50 }
 0x107   :  { %v602_v23 = vpop.f32.mrf.mxu1  ;;  %777 = vst.msk [vmem:[%s1552_s2 + $0x1c] sm:$0xf] %vm769_vm1, %v763_v52  ;;  %v687_v54 = vadd.f32 %v686_v48, %v644_v53 }
 0x108   :  { %v731_v55 = vpop.f32.mrf.mxu0  ;;  %v603_v59 = vadd.f32 %v602_v23, %v1480_v18 }
 0x109   :  { %v730_v56 = vadd.f32 %v729_v46, %v687_v54 }
 0x10b   :  { %v751_v58 = vmax.f32 %v730_v56, 0.0 }
 0x10c   :  { %v645_v60 = vpop.f32.mrf.mxu2 }
 0x10d   :  { %v688_v57 = vpop.f32.mrf.mxu3  ;;  %v764_v61 = vpack.c.bf16 %v751_v58, %v751_v58  ;;  %v646_v62 = vadd.f32 %v645_v60, %v603_v59 }
 0x10f   :  { %v605_v15 = vpop.f32.mrf.mxu1  ;;  %778 = vst.msk [vmem:[%s1552_s2 + $0x20] sm:$0xf] %vm769_vm1, %v764_v61  ;;  %v689_v63 = vadd.f32 %v688_v57, %v646_v62 }
 0x110   :  { %v734_v0 = vpop.f32.mrf.mxu0  ;;  %v606_v4 = vadd.f32 %v605_v15, %v1484_v22 }
 0x111   :  { %v732_v1 = vadd.f32 %v731_v55, %v689_v63 }
 0x113   :  { %v752_v3 = vmax.f32 %v732_v1, 0.0 }
 0x114   :  { %v648_v5 = vpop.f32.mrf.mxu2 }
 0x115   :  { %v691_v2 = vpop.f32.mrf.mxu3  ;;  %v765_v6 = vpack.c.bf16 %v752_v3, %v752_v3  ;;  %v649_v8 = vadd.f32 %v648_v5, %v606_v4 }
 0x117   :  { %v607_v18 = vpop.f32.mrf.mxu1  ;;  %779 = vst.msk [vmem:[%s1552_s2 + $0x24] sm:$0xf] %vm769_vm1, %v765_v6  ;;  %v692_v9 = vadd.f32 %v691_v2, %v649_v8 }
 0x118   :  { %v736_v10 = vpop.f32.mrf.mxu0  ;;  %v608_v7 = vadd.f32 %v607_v18, %v1488_v25 }
 0x119   :  { %v735_v11 = vadd.f32 %v734_v0, %v692_v9 }
 0x11b   :  { %v753_v14 = vmax.f32 %v735_v11, 0.0 }
 0x11c   :  { %v650_v20 = vpop.f32.mrf.mxu2 }
 0x11d   :  { %v693_v13 = vpop.f32.mrf.mxu3  ;;  %v766_v21 = vpack.c.bf16 %v753_v14, %v753_v14  ;;  %v651_v24 = vadd.f32 %v650_v20, %v608_v7 }
 0x11f   :  { %v610_v22 = vpop.f32.mrf.mxu1  ;;  %780 = vst.msk [vmem:[%s1552_s2 + $0x28] sm:$0xf] %vm769_vm1, %v766_v21  ;;  %v694_v26 = vadd.f32 %v693_v13, %v651_v24 }
 0x120   :  { %v739_v12 = vpop.f32.mrf.mxu0  ;;  %v611_v30 = vadd.f32 %v610_v22, %v1478_v17 }
 0x121   :  { %v737_v27 = vadd.f32 %v736_v10, %v694_v26 }
 0x123   :  { %v754_v29 = vmax.f32 %v737_v27, 0.0 }
 0x124   :  { %v653_v31 = vpop.f32.mrf.mxu2 }
 0x125   :  { %v696_v28 = vpop.f32.mrf.mxu3  ;;  %v767_v32 = vpack.c.bf16 %v754_v29, %v754_v29  ;;  %v654_v33 = vadd.f32 %v653_v31, %v611_v30 }
 0x127   :  { %v612_v25 = vpop.f32.mrf.mxu1  ;;  %781 = vst.msk [vmem:[%s1552_s2 + $0x2c] sm:$0xf] %vm769_vm1, %v767_v32  ;;  %v697_v34 = vadd.f32 %v696_v28, %v654_v33 }
 0x128   :  { %v741_v35 = vpop.f32.mrf.mxu0 }
 0x129   :  { %v740_v16 = vadd.f32 %v739_v12, %v697_v34 }
 0x12b   :  { %v755_v37 = vmax.f32 %v740_v16, 0.0 }
 0x12c   :  { %v655_v38 = vpop.f32.mrf.mxu2 }
 0x12d   :  { %v698_v36 = vpop.f32.mrf.mxu3  ;;  %v768_v39 = vpack.c.bf16 %v755_v37, %v755_v37 }
 0x12f   :  { %783 = vst.msk [vmem:[%s1552_s2 + $0x30] sm:$0x1] %vm782_vm2, %v768_v39 }

// kernel: d3q_forward.7
= control target key start
LH: loop header
LB: loop body
LE: loop exit
PB: predicated region body
PF: predicated region fallthrough
CT: control target
= control target key end

     0   :  { %s13310_s12 = smov 0   ;;  %s13312_s13 = smov 0   ;;  %s16037_s0 = inlined_call_operand.vmem [shape: bf16[2,3136], index: 0, kind: input, shape index: {}]   ;;  %s16038_s1 = inlined_call_operand.vmem [shape: bf16[3136,1024], index: 1, kind: input, shape index: {}]   ;;  %s16039_s2 = inlined_call_operand.vmem [shape: bf16[1024,3], index: 2, kind: input, shape index: {}]   ;;  %s16040_s3 = inlined_call_operand.vmem [shape: f32[2,2,3], index: 3, kind: output, shape index: {}]  }
   0x1   :  { %s13314_s14 = smov 0  }
   0x2 LB: > { %s13326_s15 = sadd.s32 4294967295, %s13272_s14   ;;  %s13329_s16 = sadd.s32 1, %s13272_s14   ;;  %s13272_s14 = sphi %s13314_s14, %s16049_s14   ;;  %s13268_s13 = sphi %s13312_s13, %s16048_s13   ;;  %s13264_s12 = sphi %s13310_s12, %s16047_s12  }
   0x3   : > { %s38_s17 = ssub.s32 %s13272_s14, %s13329_s16  ;;  %s41_s18 = sadd.s32 1, %s13268_s13 }
   0x4   : > { %p39_p0 = scmp.eq.s32.totalorder %s38_s17, 0  ;;  %p48_p1 = scmp.ne.s32.totalorder %s13268_s13, %s13264_s12 }
   0x5   : > { %p49_p2 = scmp.eq.s32.totalorder %s13272_s14, 0  ;;  %p9077_p4 = scmp.ge.s32.totalorder %s13272_s14, 2 }
   0x6   : > { %s13338_s19 = scalar_select %p39_p0, %s13268_s13, %s41_s18  }
   0x7   : > { %p50_p3 = por %p49_p2, %p48_p1  ;;  %129 = sbr.rel (%p9077_p4) target bundleno = 410 (0x19a), region = 20 }
   0xc   : > { %132 = sbr.rel (!%p50_p3) target bundleno = 410 (0x19a), region = 24  ;;  %s134_s20 = sand.u32 (%p50_p3), 1, %s13268_s13  }
   0xd   : > { %s12356_s21 = sshll.u32 (%p50_p3), %s13272_s14, 4  ;;  %s13343_s22 = smul.u32 (%p50_p3), 6272, %s134_s20 }
   0xe   : > { %s13348_s25 = scalar_lea.vmem (%p50_p3), %s16038_s1, %s12356_s21   ;;  %s13358_s29 = smov (%p50_p3), 0  }
   0xf   : > { %s136_s26 = scalar_lea.vmem (%p50_p3), [#allocation2], %s13343_s22   ;;  %s16042_s28 = smov (%p50_p3), %s13348_s25 }
  0x10   : > { %s16041_s27 = smov (%p50_p3), %s136_s26  ;;  %s13360_s30 = smov (%p50_p3), 0  }
  0x11 LB: >> { %v153_v0 = vld [vmem:[%s13280_s28] sm:$0xff]  ;;  %s937_s4 = sadd.s32 1, %s13284_s29  ;;  %s149_s30 = sadd.s32 1, %s13288_s30   ;;  %s13288_s30 = sphi %s13360_s30, %s149_s30   ;;  %s13284_s29 = sphi %s13358_s29, %s16045_s29   ;;  %s13280_s28 = sphi %s16042_s28, %s16044_s28   ;;  %s13276_s27 = sphi %s16041_s27, %s16043_s27  }
  0x12   : >> { %v155_v1 = vld [vmem:[%s13280_s28 + $0x20] sm:$0xff]  ;;  %154 = vst [vmem:[%s13276_s27] sm:$0xff] %v153_v0  ;;  %p938_p5 = scmp.ge.s32.totalorder %s937_s4, 2  ;;  %p146_p6 = scmp.ge.s32.totalorder %s149_s30, 2  }
  0x13   : >> { %v157_v2 = vld [vmem:[%s13280_s28 + $0x40] sm:$0xff]  ;;  %156 = vst [vmem:[%s13276_s27 + $0x10] sm:$0xff] %v155_v1 }
  0x14   : >> { %v159_v3 = vld [vmem:[%s13280_s28 + $0x60] sm:$0xff]  ;;  %158 = vst [vmem:[%s13276_s27 + $0x20] sm:$0xff] %v157_v2  ;;  %s16051_s4 = smov (%p938_p5, %s937_s4), 0 }
  0x15   : >> { %v161_v4 = vld [vmem:[%s13280_s28 + $0x80] sm:$0xff]  ;;  %160 = vst [vmem:[%s13276_s27 + $0x30] sm:$0xff] %v159_v3  ;;  %s9080_s5 = sshll.u32 %s16051_s4, 3  ;;  %s16045_s29 = smov %s16051_s4 }
  0x16   : >> { %v163_v5 = vld [vmem:[%s13280_s28 + $0xa0] sm:$0xff]  ;;  %162 = vst [vmem:[%s13276_s27 + $0x40] sm:$0xff] %v161_v4  ;;  %s13910_s6 = scalar_lea.vmem %s13348_s25, %s9080_s5   ;;  %s13914_s7 = scalar_lea.vmem %s136_s26, %s9080_s5 [#allocation2]  }
  0x17   : >> { %v165_v6 = vld [vmem:[%s13280_s28 + $0xc0] sm:$0xff]  ;;  %164 = vst [vmem:[%s13276_s27 + $0x50] sm:$0xff] %v163_v5 }
  0x18   : >> { %v167_v7 = vld [vmem:[%s13280_s28 + $0xe0] sm:$0xff]  ;;  %166 = vst [vmem:[%s13276_s27 + $0x60] sm:$0xff] %v165_v6 }
  0x19   : >> { %v169_v8 = vld [vmem:[%s13280_s28 + $0x100] sm:$0xff]  ;;  %168 = vst [vmem:[%s13276_s27 + $0x70] sm:$0xff] %v167_v7 }
  0x1a   : >> { %v171_v9 = vld [vmem:[%s13280_s28 + $0x120] sm:$0xff]  ;;  %170 = vst [vmem:[%s13276_s27 + $0x80] sm:$0xff] %v169_v8 }
  0x1b   : >> { %v173_v10 = vld [vmem:[%s13280_s28 + $0x140] sm:$0xff]  ;;  %172 = vst [vmem:[%s13276_s27 + $0x90] sm:$0xff] %v171_v9 }
  0x1c   : >> { %v175_v11 = vld [vmem:[%s13280_s28 + $0x160] sm:$0xff]  ;;  %174 = vst [vmem:[%s13276_s27 + $0xa0] sm:$0xff] %v173_v10 }
  0x1d   : >> { %v177_v12 = vld [vmem:[%s13280_s28 + $0x180] sm:$0xff]  ;;  %176 = vst [vmem:[%s13276_s27 + $0xb0] sm:$0xff] %v175_v11 }
  0x1e   : >> { %v179_v13 = vld [vmem:[%s13280_s28 + $0x1a0] sm:$0xff]  ;;  %178 = vst [vmem:[%s13276_s27 + $0xc0] sm:$0xff] %v177_v12 }
  0x1f   : >> { %v181_v14 = vld [vmem:[%s13280_s28 + $0x1c0] sm:$0xff]  ;;  %180 = vst [vmem:[%s13276_s27 + $0xd0] sm:$0xff] %v179_v13 }
  0x20   : >> { %v183_v15 = vld [vmem:[%s13280_s28 + $0x1e0] sm:$0xff]  ;;  %182 = vst [vmem:[%s13276_s27 + $0xe0] sm:$0xff] %v181_v14 }
  0x21   : >> { %v185_v16 = vld [vmem:[%s13280_s28 + $0x200] sm:$0xff]  ;;  %184 = vst [vmem:[%s13276_s27 + $0xf0] sm:$0xff] %v183_v15 }
  0x22   : >> { %v187_v17 = vld [vmem:[%s13280_s28 + $0x220] sm:$0xff]  ;;  %186 = vst [vmem:[%s13276_s27 + $0x100] sm:$0xff] %v185_v16 }
  0x23   : >> { %v189_v18 = vld [vmem:[%s13280_s28 + $0x240] sm:$0xff]  ;;  %188 = vst [vmem:[%s13276_s27 + $0x110] sm:$0xff] %v187_v17 }
  0x24   : >> { %v191_v19 = vld [vmem:[%s13280_s28 + $0x260] sm:$0xff]  ;;  %190 = vst [vmem:[%s13276_s27 + $0x120] sm:$0xff] %v189_v18 }
  0x25   : >> { %v193_v20 = vld [vmem:[%s13280_s28 + $0x280] sm:$0xff]  ;;  %192 = vst [vmem:[%s13276_s27 + $0x130] sm:$0xff] %v191_v19 }
  0x26   : >> { %v195_v21 = vld [vmem:[%s13280_s28 + $0x2a0] sm:$0xff]  ;;  %194 = vst [vmem:[%s13276_s27 + $0x140] sm:$0xff] %v193_v20 }
  0x27   : >> { %v197_v22 = vld [vmem:[%s13280_s28 + $0x2c0] sm:$0xff]  ;;  %196 = vst [vmem:[%s13276_s27 + $0x150] sm:$0xff] %v195_v21 }
  0x28   : >> { %v199_v23 = vld [vmem:[%s13280_s28 + $0x2e0] sm:$0xff]  ;;  %198 = vst [vmem:[%s13276_s27 + $0x160] sm:$0xff] %v197_v22 }
  0x29   : >> { %v201_v24 = vld [vmem:[%s13280_s28 + $0x300] sm:$0xff]  ;;  %200 = vst [vmem:[%s13276_s27 + $0x170] sm:$0xff] %v199_v23 }
  0x2a   : >> { %v203_v25 = vld [vmem:[%s13280_s28 + $0x320] sm:$0xff]  ;;  %202 = vst [vmem:[%s13276_s27 + $0x180] sm:$0xff] %v201_v24 }
  0x2b   : >> { %v205_v26 = vld [vmem:[%s13280_s28 + $0x340] sm:$0xff]  ;;  %204 = vst [vmem:[%s13276_s27 + $0x190] sm:$0xff] %v203_v25 }
  0x2c   : >> { %v207_v27 = vld [vmem:[%s13280_s28 + $0x360] sm:$0xff]  ;;  %206 = vst [vmem:[%s13276_s27 + $0x1a0] sm:$0xff] %v205_v26 }
  0x2d   : >> { %v209_v28 = vld [vmem:[%s13280_s28 + $0x380] sm:$0xff]  ;;  %208 = vst [vmem:[%s13276_s27 + $0x1b0] sm:$0xff] %v207_v27 }
  0x2e   : >> { %v211_v29 = vld [vmem:[%s13280_s28 + $0x3a0] sm:$0xff]  ;;  %210 = vst [vmem:[%s13276_s27 + $0x1c0] sm:$0xff] %v209_v28 }
  0x2f   : >> { %v213_v30 = vld [vmem:[%s13280_s28 + $0x3c0] sm:$0xff]  ;;  %212 = vst [vmem:[%s13276_s27 + $0x1d0] sm:$0xff] %v211_v29 }
  0x30   : >> { %v215_v31 = vld [vmem:[%s13280_s28 + $0x3e0] sm:$0xff]  ;;  %214 = vst [vmem:[%s13276_s27 + $0x1e0] sm:$0xff] %v213_v30 }
  0x31   : >> { %v217_v32 = vld [vmem:[%s13280_s28 + $0x400] sm:$0xff]  ;;  %216 = vst [vmem:[%s13276_s27 + $0x1f0] sm:$0xff] %v215_v31 }
  0x32   : >> { %v219_v33 = vld [vmem:[%s13280_s28 + $0x420] sm:$0xff]  ;;  %218 = vst [vmem:[%s13276_s27 + $0x200] sm:$0xff] %v217_v32 }
  0x33   : >> { %v221_v34 = vld [vmem:[%s13280_s28 + $0x440] sm:$0xff]  ;;  %220 = vst [vmem:[%s13276_s27 + $0x210] sm:$0xff] %v219_v33 }
  0x34   : >> { %v223_v35 = vld [vmem:[%s13280_s28 + $0x460] sm:$0xff]  ;;  %222 = vst [vmem:[%s13276_s27 + $0x220] sm:$0xff] %v221_v34 }
  0x35   : >> { %v225_v36 = vld [vmem:[%s13280_s28 + $0x480] sm:$0xff]  ;;  %224 = vst [vmem:[%s13276_s27 + $0x230] sm:$0xff] %v223_v35 }
  0x36   : >> { %v227_v37 = vld [vmem:[%s13280_s28 + $0x4a0] sm:$0xff]  ;;  %226 = vst [vmem:[%s13276_s27 + $0x240] sm:$0xff] %v225_v36 }
  0x37   : >> { %v229_v38 = vld [vmem:[%s13280_s28 + $0x4c0] sm:$0xff]  ;;  %228 = vst [vmem:[%s13276_s27 + $0x250] sm:$0xff] %v227_v37 }
  0x38   : >> { %v231_v39 = vld [vmem:[%s13280_s28 + $0x4e0] sm:$0xff]  ;;  %230 = vst [vmem:[%s13276_s27 + $0x260] sm:$0xff] %v229_v38 }
  0x39   : >> { %v233_v40 = vld [vmem:[%s13280_s28 + $0x500] sm:$0xff]  ;;  %232 = vst [vmem:[%s13276_s27 + $0x270] sm:$0xff] %v231_v39 }
  0x3a   : >> { %v235_v41 = vld [vmem:[%s13280_s28 + $0x520] sm:$0xff]  ;;  %234 = vst [vmem:[%s13276_s27 + $0x280] sm:$0xff] %v233_v40 }
  0x3b   : >> { %v237_v42 = vld [vmem:[%s13280_s28 + $0x540] sm:$0xff]  ;;  %236 = vst [vmem:[%s13276_s27 + $0x290] sm:$0xff] %v235_v41 }
  0x3c   : >> { %v239_v43 = vld [vmem:[%s13280_s28 + $0x560] sm:$0xff]  ;;  %238 = vst [vmem:[%s13276_s27 + $0x2a0] sm:$0xff] %v237_v42 }
  0x3d   : >> { %v241_v44 = vld [vmem:[%s13280_s28 + $0x580] sm:$0xff]  ;;  %240 = vst [vmem:[%s13276_s27 + $0x2b0] sm:$0xff] %v239_v43 }
  0x3e   : >> { %v243_v45 = vld [vmem:[%s13280_s28 + $0x5a0] sm:$0xff]  ;;  %242 = vst [vmem:[%s13276_s27 + $0x2c0] sm:$0xff] %v241_v44 }
  0x3f   : >> { %v245_v46 = vld [vmem:[%s13280_s28 + $0x5c0] sm:$0xff]  ;;  %244 = vst [vmem:[%s13276_s27 + $0x2d0] sm:$0xff] %v243_v45 }
  0x40   : >> { %v247_v47 = vld [vmem:[%s13280_s28 + $0x5e0] sm:$0xff]  ;;  %246 = vst [vmem:[%s13276_s27 + $0x2e0] sm:$0xff] %v245_v46 }
  0x41   : >> { %v249_v48 = vld [vmem:[%s13280_s28 + $0x600] sm:$0xff]  ;;  %248 = vst [vmem:[%s13276_s27 + $0x2f0] sm:$0xff] %v247_v47 }
  0x42   : >> { %v251_v49 = vld [vmem:[%s13280_s28 + $0x620] sm:$0xff]  ;;  %250 = vst [vmem:[%s13276_s27 + $0x300] sm:$0xff] %v249_v48 }
  0x43   : >> { %v253_v50 = vld [vmem:[%s13280_s28 + $0x640] sm:$0xff]  ;;  %252 = vst [vmem:[%s13276_s27 + $0x310] sm:$0xff] %v251_v49 }
  0x44   : >> { %v255_v51 = vld [vmem:[%s13280_s28 + $0x660] sm:$0xff]  ;;  %254 = vst [vmem:[%s13276_s27 + $0x320] sm:$0xff] %v253_v50 }
  0x45   : >> { %v257_v52 = vld [vmem:[%s13280_s28 + $0x680] sm:$0xff]  ;;  %256 = vst [vmem:[%s13276_s27 + $0x330] sm:$0xff] %v255_v51 }
  0x46   : >> { %v259_v53 = vld [vmem:[%s13280_s28 + $0x6a0] sm:$0xff]  ;;  %258 = vst [vmem:[%s13276_s27 + $0x340] sm:$0xff] %v257_v52 }
  0x47   : >> { %v261_v54 = vld [vmem:[%s13280_s28 + $0x6c0] sm:$0xff]  ;;  %260 = vst [vmem:[%s13276_s27 + $0x350] sm:$0xff] %v259_v53 }
  0x48   : >> { %v263_v55 = vld [vmem:[%s13280_s28 + $0x6e0] sm:$0xff]  ;;  %262 = vst [vmem:[%s13276_s27 + $0x360] sm:$0xff] %v261_v54 }
  0x49   : >> { %v265_v56 = vld [vmem:[%s13280_s28 + $0x700] sm:$0xff]  ;;  %264 = vst [vmem:[%s13276_s27 + $0x370] sm:$0xff] %v263_v55 }
  0x4a   : >> { %v267_v57 = vld [vmem:[%s13280_s28 + $0x720] sm:$0xff]  ;;  %266 = vst [vmem:[%s13276_s27 + $0x380] sm:$0xff] %v265_v56 }
  0x4b   : >> { %v269_v58 = vld [vmem:[%s13280_s28 + $0x740] sm:$0xff]  ;;  %268 = vst [vmem:[%s13276_s27 + $0x390] sm:$0xff] %v267_v57 }
  0x4c   : >> { %v271_v59 = vld [vmem:[%s13280_s28 + $0x760] sm:$0xff]  ;;  %270 = vst [vmem:[%s13276_s27 + $0x3a0] sm:$0xff] %v269_v58 }
  0x4d   : >> { %v273_v60 = vld [vmem:[%s13280_s28 + $0x780] sm:$0xff]  ;;  %272 = vst [vmem:[%s13276_s27 + $0x3b0] sm:$0xff] %v271_v59 }
  0x4e   : >> { %v275_v61 = vld [vmem:[%s13280_s28 + $0x7a0] sm:$0xff]  ;;  %274 = vst [vmem:[%s13276_s27 + $0x3c0] sm:$0xff] %v273_v60 }
  0x4f   : >> { %v277_v62 = vld [vmem:[%s13280_s28 + $0x7c0] sm:$0xff]  ;;  %276 = vst [vmem:[%s13276_s27 + $0x3d0] sm:$0xff] %v275_v61 }
  0x50   : >> { %v279_v63 = vld [vmem:[%s13280_s28 + $0x7e0] sm:$0xff]  ;;  %278 = vst [vmem:[%s13276_s27 + $0x3e0] sm:$0xff] %v277_v62 }
  0x51   : >> { %v281_v0 = vld [vmem:[%s13280_s28 + $0x800] sm:$0xff]  ;;  %280 = vst [vmem:[%s13276_s27 + $0x3f0] sm:$0xff] %v279_v63 }
  0x52   : >> { %v283_v1 = vld [vmem:[%s13280_s28 + $0x820] sm:$0xff]  ;;  %282 = vst [vmem:[%s13276_s27 + $0x400] sm:$0xff] %v281_v0 }
  0x53   : >> { %v285_v2 = vld [vmem:[%s13280_s28 + $0x840] sm:$0xff]  ;;  %284 = vst [vmem:[%s13276_s27 + $0x410] sm:$0xff] %v283_v1 }
  0x54   : >> { %v287_v3 = vld [vmem:[%s13280_s28 + $0x860] sm:$0xff]  ;;  %286 = vst [vmem:[%s13276_s27 + $0x420] sm:$0xff] %v285_v2 }
  0x55   : >> { %v289_v4 = vld [vmem:[%s13280_s28 + $0x880] sm:$0xff]  ;;  %288 = vst [vmem:[%s13276_s27 + $0x430] sm:$0xff] %v287_v3 }
  0x56   : >> { %v291_v5 = vld [vmem:[%s13280_s28 + $0x8a0] sm:$0xff]  ;;  %290 = vst [vmem:[%s13276_s27 + $0x440] sm:$0xff] %v289_v4 }
  0x57   : >> { %v293_v6 = vld [vmem:[%s13280_s28 + $0x8c0] sm:$0xff]  ;;  %292 = vst [vmem:[%s13276_s27 + $0x450] sm:$0xff] %v291_v5 }
  0x58   : >> { %v295_v7 = vld [vmem:[%s13280_s28 + $0x8e0] sm:$0xff]  ;;  %294 = vst [vmem:[%s13276_s27 + $0x460] sm:$0xff] %v293_v6 }
  0x59   : >> { %v297_v8 = vld [vmem:[%s13280_s28 + $0x900] sm:$0xff]  ;;  %296 = vst [vmem:[%s13276_s27 + $0x470] sm:$0xff] %v295_v7 }
  0x5a   : >> { %v299_v9 = vld [vmem:[%s13280_s28 + $0x920] sm:$0xff]  ;;  %298 = vst [vmem:[%s13276_s27 + $0x480] sm:$0xff] %v297_v8 }
  0x5b   : >> { %v301_v10 = vld [vmem:[%s13280_s28 + $0x940] sm:$0xff]  ;;  %300 = vst [vmem:[%s13276_s27 + $0x490] sm:$0xff] %v299_v9 }
  0x5c   : >> { %v303_v11 = vld [vmem:[%s13280_s28 + $0x960] sm:$0xff]  ;;  %302 = vst [vmem:[%s13276_s27 + $0x4a0] sm:$0xff] %v301_v10 }
  0x5d   : >> { %v305_v12 = vld [vmem:[%s13280_s28 + $0x980] sm:$0xff]  ;;  %304 = vst [vmem:[%s13276_s27 + $0x4b0] sm:$0xff] %v303_v11 }
  0x5e   : >> { %v307_v13 = vld [vmem:[%s13280_s28 + $0x9a0] sm:$0xff]  ;;  %306 = vst [vmem:[%s13276_s27 + $0x4c0] sm:$0xff] %v305_v12 }
  0x5f   : >> { %v309_v14 = vld [vmem:[%s13280_s28 + $0x9c0] sm:$0xff]  ;;  %308 = vst [vmem:[%s13276_s27 + $0x4d0] sm:$0xff] %v307_v13 }
  0x60   : >> { %v311_v15 = vld [vmem:[%s13280_s28 + $0x9e0] sm:$0xff]  ;;  %310 = vst [vmem:[%s13276_s27 + $0x4e0] sm:$0xff] %v309_v14 }
  0x61   : >> { %v313_v16 = vld [vmem:[%s13280_s28 + $0xa00] sm:$0xff]  ;;  %312 = vst [vmem:[%s13276_s27 + $0x4f0] sm:$0xff] %v311_v15 }
  0x62   : >> { %v315_v17 = vld [vmem:[%s13280_s28 + $0xa20] sm:$0xff]  ;;  %314 = vst [vmem:[%s13276_s27 + $0x500] sm:$0xff] %v313_v16 }
  0x63   : >> { %v317_v18 = vld [vmem:[%s13280_s28 + $0xa40] sm:$0xff]  ;;  %316 = vst [vmem:[%s13276_s27 + $0x510] sm:$0xff] %v315_v17 }
  0x64   : >> { %v319_v19 = vld [vmem:[%s13280_s28 + $0xa60] sm:$0xff]  ;;  %318 = vst [vmem:[%s13276_s27 + $0x520] sm:$0xff] %v317_v18 }
  0x65   : >> { %v321_v20 = vld [vmem:[%s13280_s28 + $0xa80] sm:$0xff]  ;;  %320 = vst [vmem:[%s13276_s27 + $0x530] sm:$0xff] %v319_v19 }
  0x66   : >> { %v323_v21 = vld [vmem:[%s13280_s28 + $0xaa0] sm:$0xff]  ;;  %322 = vst [vmem:[%s13276_s27 + $0x540] sm:$0xff] %v321_v20 }
  0x67   : >> { %v325_v22 = vld [vmem:[%s13280_s28 + $0xac0] sm:$0xff]  ;;  %324 = vst [vmem:[%s13276_s27 + $0x550] sm:$0xff] %v323_v21 }
  0x68   : >> { %v327_v23 = vld [vmem:[%s13280_s28 + $0xae0] sm:$0xff]  ;;  %326 = vst [vmem:[%s13276_s27 + $0x560] sm:$0xff] %v325_v22 }
  0x69   : >> { %v329_v24 = vld [vmem:[%s13280_s28 + $0xb00] sm:$0xff]  ;;  %328 = vst [vmem:[%s13276_s27 + $0x570] sm:$0xff] %v327_v23 }
  0x6a   : >> { %v331_v25 = vld [vmem:[%s13280_s28 + $0xb20] sm:$0xff]  ;;  %330 = vst [vmem:[%s13276_s27 + $0x580] sm:$0xff] %v329_v24 }
  0x6b   : >> { %v333_v26 = vld [vmem:[%s13280_s28 + $0xb40] sm:$0xff]  ;;  %332 = vst [vmem:[%s13276_s27 + $0x590] sm:$0xff] %v331_v25 }
  0x6c   : >> { %v335_v27 = vld [vmem:[%s13280_s28 + $0xb60] sm:$0xff]  ;;  %334 = vst [vmem:[%s13276_s27 + $0x5a0] sm:$0xff] %v333_v26 }
  0x6d   : >> { %v337_v28 = vld [vmem:[%s13280_s28 + $0xb80] sm:$0xff]  ;;  %336 = vst [vmem:[%s13276_s27 + $0x5b0] sm:$0xff] %v335_v27 }
  0x6e   : >> { %v339_v29 = vld [vmem:[%s13280_s28 + $0xba0] sm:$0xff]  ;;  %338 = vst [vmem:[%s13276_s27 + $0x5c0] sm:$0xff] %v337_v28 }
  0x6f   : >> { %v341_v30 = vld [vmem:[%s13280_s28 + $0xbc0] sm:$0xff]  ;;  %340 = vst [vmem:[%s13276_s27 + $0x5d0] sm:$0xff] %v339_v29 }
  0x70   : >> { %v343_v31 = vld [vmem:[%s13280_s28 + $0xbe0] sm:$0xff]  ;;  %342 = vst [vmem:[%s13276_s27 + $0x5e0] sm:$0xff] %v341_v30 }
  0x71   : >> { %v345_v32 = vld [vmem:[%s13280_s28 + $0xc00] sm:$0xff]  ;;  %344 = vst [vmem:[%s13276_s27 + $0x5f0] sm:$0xff] %v343_v31 }
  0x72   : >> { %v347_v33 = vld [vmem:[%s13280_s28 + $0xc20] sm:$0xff]  ;;  %346 = vst [vmem:[%s13276_s27 + $0x600] sm:$0xff] %v345_v32 }
  0x73   : >> { %v349_v34 = vld [vmem:[%s13280_s28 + $0xc40] sm:$0xff]  ;;  %348 = vst [vmem:[%s13276_s27 + $0x610] sm:$0xff] %v347_v33 }
  0x74   : >> { %v351_v35 = vld [vmem:[%s13280_s28 + $0xc60] sm:$0xff]  ;;  %350 = vst [vmem:[%s13276_s27 + $0x620] sm:$0xff] %v349_v34 }
  0x75   : >> { %v353_v36 = vld [vmem:[%s13280_s28 + $0xc80] sm:$0xff]  ;;  %352 = vst [vmem:[%s13276_s27 + $0x630] sm:$0xff] %v351_v35 }
  0x76   : >> { %v355_v37 = vld [vmem:[%s13280_s28 + $0xca0] sm:$0xff]  ;;  %354 = vst [vmem:[%s13276_s27 + $0x640] sm:$0xff] %v353_v36 }
  0x77   : >> { %v357_v38 = vld [vmem:[%s13280_s28 + $0xcc0] sm:$0xff]  ;;  %356 = vst [vmem:[%s13276_s27 + $0x650] sm:$0xff] %v355_v37 }
  0x78   : >> { %v359_v39 = vld [vmem:[%s13280_s28 + $0xce0] sm:$0xff]  ;;  %358 = vst [vmem:[%s13276_s27 + $0x660] sm:$0xff] %v357_v38 }
  0x79   : >> { %v361_v40 = vld [vmem:[%s13280_s28 + $0xd00] sm:$0xff]  ;;  %360 = vst [vmem:[%s13276_s27 + $0x670] sm:$0xff] %v359_v39 }
  0x7a   : >> { %v363_v41 = vld [vmem:[%s13280_s28 + $0xd20] sm:$0xff]  ;;  %362 = vst [vmem:[%s13276_s27 + $0x680] sm:$0xff] %v361_v40 }
  0x7b   : >> { %v365_v42 = vld [vmem:[%s13280_s28 + $0xd40] sm:$0xff]  ;;  %364 = vst [vmem:[%s13276_s27 + $0x690] sm:$0xff] %v363_v41 }
  0x7c   : >> { %v367_v43 = vld [vmem:[%s13280_s28 + $0xd60] sm:$0xff]  ;;  %366 = vst [vmem:[%s13276_s27 + $0x6a0] sm:$0xff] %v365_v42 }
  0x7d   : >> { %v369_v44 = vld [vmem:[%s13280_s28 + $0xd80] sm:$0xff]  ;;  %368 = vst [vmem:[%s13276_s27 + $0x6b0] sm:$0xff] %v367_v43 }
  0x7e   : >> { %v371_v45 = vld [vmem:[%s13280_s28 + $0xda0] sm:$0xff]  ;;  %370 = vst [vmem:[%s13276_s27 + $0x6c0] sm:$0xff] %v369_v44 }
  0x7f   : >> { %v373_v46 = vld [vmem:[%s13280_s28 + $0xdc0] sm:$0xff]  ;;  %372 = vst [vmem:[%s13276_s27 + $0x6d0] sm:$0xff] %v371_v45 }
  0x80   : >> { %v375_v47 = vld [vmem:[%s13280_s28 + $0xde0] sm:$0xff]  ;;  %374 = vst [vmem:[%s13276_s27 + $0x6e0] sm:$0xff] %v373_v46 }
  0x81   : >> { %v377_v48 = vld [vmem:[%s13280_s28 + $0xe00] sm:$0xff]  ;;  %376 = vst [vmem:[%s13276_s27 + $0x6f0] sm:$0xff] %v375_v47 }
  0x82   : >> { %v379_v49 = vld [vmem:[%s13280_s28 + $0xe20] sm:$0xff]  ;;  %378 = vst [vmem:[%s13276_s27 + $0x700] sm:$0xff] %v377_v48 }
  0x83   : >> { %v381_v50 = vld [vmem:[%s13280_s28 + $0xe40] sm:$0xff]  ;;  %380 = vst [vmem:[%s13276_s27 + $0x710] sm:$0xff] %v379_v49 }
  0x84   : >> { %v383_v51 = vld [vmem:[%s13280_s28 + $0xe60] sm:$0xff]  ;;  %382 = vst [vmem:[%s13276_s27 + $0x720] sm:$0xff] %v381_v50 }
  0x85   : >> { %v385_v52 = vld [vmem:[%s13280_s28 + $0xe80] sm:$0xff]  ;;  %384 = vst [vmem:[%s13276_s27 + $0x730] sm:$0xff] %v383_v51 }
  0x86   : >> { %v387_v53 = vld [vmem:[%s13280_s28 + $0xea0] sm:$0xff]  ;;  %386 = vst [vmem:[%s13276_s27 + $0x740] sm:$0xff] %v385_v52 }
  0x87   : >> { %v389_v54 = vld [vmem:[%s13280_s28 + $0xec0] sm:$0xff]  ;;  %388 = vst [vmem:[%s13276_s27 + $0x750] sm:$0xff] %v387_v53 }
  0x88   : >> { %v391_v55 = vld [vmem:[%s13280_s28 + $0xee0] sm:$0xff]  ;;  %390 = vst [vmem:[%s13276_s27 + $0x760] sm:$0xff] %v389_v54 }
  0x89   : >> { %v393_v56 = vld [vmem:[%s13280_s28 + $0xf00] sm:$0xff]  ;;  %392 = vst [vmem:[%s13276_s27 + $0x770] sm:$0xff] %v391_v55 }
  0x8a   : >> { %v395_v57 = vld [vmem:[%s13280_s28 + $0xf20] sm:$0xff]  ;;  %394 = vst [vmem:[%s13276_s27 + $0x780] sm:$0xff] %v393_v56 }
  0x8b   : >> { %v397_v58 = vld [vmem:[%s13280_s28 + $0xf40] sm:$0xff]  ;;  %396 = vst [vmem:[%s13276_s27 + $0x790] sm:$0xff] %v395_v57 }
  0x8c   : >> { %v399_v59 = vld [vmem:[%s13280_s28 + $0xf60] sm:$0xff]  ;;  %398 = vst [vmem:[%s13276_s27 + $0x7a0] sm:$0xff] %v397_v58 }
  0x8d   : >> { %v401_v60 = vld [vmem:[%s13280_s28 + $0xf80] sm:$0xff]  ;;  %400 = vst [vmem:[%s13276_s27 + $0x7b0] sm:$0xff] %v399_v59 }
  0x8e   : >> { %v403_v61 = vld [vmem:[%s13280_s28 + $0xfa0] sm:$0xff]  ;;  %402 = vst [vmem:[%s13276_s27 + $0x7c0] sm:$0xff] %v401_v60 }
  0x8f   : >> { %v405_v62 = vld [vmem:[%s13280_s28 + $0xfc0] sm:$0xff]  ;;  %404 = vst [vmem:[%s13276_s27 + $0x7d0] sm:$0xff] %v403_v61 }
  0x90   : >> { %v407_v63 = vld [vmem:[%s13280_s28 + $0xfe0] sm:$0xff]  ;;  %406 = vst [vmem:[%s13276_s27 + $0x7e0] sm:$0xff] %v405_v62 }
  0x91   : >> { %v409_v0 = vld [vmem:[%s13280_s28 + $0x1000] sm:$0xff]  ;;  %408 = vst [vmem:[%s13276_s27 + $0x7f0] sm:$0xff] %v407_v63 }
  0x92   : >> { %v411_v1 = vld [vmem:[%s13280_s28 + $0x1020] sm:$0xff]  ;;  %410 = vst [vmem:[%s13276_s27 + $0x800] sm:$0xff] %v409_v0 }
  0x93   : >> { %v413_v2 = vld [vmem:[%s13280_s28 + $0x1040] sm:$0xff]  ;;  %412 = vst [vmem:[%s13276_s27 + $0x810] sm:$0xff] %v411_v1 }
  0x94   : >> { %v415_v3 = vld [vmem:[%s13280_s28 + $0x1060] sm:$0xff]  ;;  %414 = vst [vmem:[%s13276_s27 + $0x820] sm:$0xff] %v413_v2 }
  0x95   : >> { %v417_v4 = vld [vmem:[%s13280_s28 + $0x1080] sm:$0xff]  ;;  %416 = vst [vmem:[%s13276_s27 + $0x830] sm:$0xff] %v415_v3 }
  0x96   : >> { %v419_v5 = vld [vmem:[%s13280_s28 + $0x10a0] sm:$0xff]  ;;  %418 = vst [vmem:[%s13276_s27 + $0x840] sm:$0xff] %v417_v4 }
  0x97   : >> { %v421_v6 = vld [vmem:[%s13280_s28 + $0x10c0] sm:$0xff]  ;;  %420 = vst [vmem:[%s13276_s27 + $0x850] sm:$0xff] %v419_v5 }
  0x98   : >> { %v423_v7 = vld [vmem:[%s13280_s28 + $0x10e0] sm:$0xff]  ;;  %422 = vst [vmem:[%s13276_s27 + $0x860] sm:$0xff] %v421_v6 }
  0x99   : >> { %v425_v8 = vld [vmem:[%s13280_s28 + $0x1100] sm:$0xff]  ;;  %424 = vst [vmem:[%s13276_s27 + $0x870] sm:$0xff] %v423_v7 }
  0x9a   : >> { %v427_v9 = vld [vmem:[%s13280_s28 + $0x1120] sm:$0xff]  ;;  %426 = vst [vmem:[%s13276_s27 + $0x880] sm:$0xff] %v425_v8 }
  0x9b   : >> { %v429_v10 = vld [vmem:[%s13280_s28 + $0x1140] sm:$0xff]  ;;  %428 = vst [vmem:[%s13276_s27 + $0x890] sm:$0xff] %v427_v9 }
  0x9c   : >> { %v431_v11 = vld [vmem:[%s13280_s28 + $0x1160] sm:$0xff]  ;;  %430 = vst [vmem:[%s13276_s27 + $0x8a0] sm:$0xff] %v429_v10 }
  0x9d   : >> { %v433_v12 = vld [vmem:[%s13280_s28 + $0x1180] sm:$0xff]  ;;  %432 = vst [vmem:[%s13276_s27 + $0x8b0] sm:$0xff] %v431_v11 }
  0x9e   : >> { %v435_v13 = vld [vmem:[%s13280_s28 + $0x11a0] sm:$0xff]  ;;  %434 = vst [vmem:[%s13276_s27 + $0x8c0] sm:$0xff] %v433_v12 }
  0x9f   : >> { %v437_v14 = vld [vmem:[%s13280_s28 + $0x11c0] sm:$0xff]  ;;  %436 = vst [vmem:[%s13276_s27 + $0x8d0] sm:$0xff] %v435_v13 }
  0xa0   : >> { %v439_v15 = vld [vmem:[%s13280_s28 + $0x11e0] sm:$0xff]  ;;  %438 = vst [vmem:[%s13276_s27 + $0x8e0] sm:$0xff] %v437_v14 }
  0xa1   : >> { %v441_v16 = vld [vmem:[%s13280_s28 + $0x1200] sm:$0xff]  ;;  %440 = vst [vmem:[%s13276_s27 + $0x8f0] sm:$0xff] %v439_v15 }
  0xa2   : >> { %v443_v17 = vld [vmem:[%s13280_s28 + $0x1220] sm:$0xff]  ;;  %442 = vst [vmem:[%s13276_s27 + $0x900] sm:$0xff] %v441_v16 }
  0xa3   : >> { %v445_v18 = vld [vmem:[%s13280_s28 + $0x1240] sm:$0xff]  ;;  %444 = vst [vmem:[%s13276_s27 + $0x910] sm:$0xff] %v443_v17 }
  0xa4   : >> { %v447_v19 = vld [vmem:[%s13280_s28 + $0x1260] sm:$0xff]  ;;  %446 = vst [vmem:[%s13276_s27 + $0x920] sm:$0xff] %v445_v18 }
  0xa5   : >> { %v449_v20 = vld [vmem:[%s13280_s28 + $0x1280] sm:$0xff]  ;;  %448 = vst [vmem:[%s13276_s27 + $0x930] sm:$0xff] %v447_v19 }
  0xa6   : >> { %v451_v21 = vld [vmem:[%s13280_s28 + $0x12a0] sm:$0xff]  ;;  %450 = vst [vmem:[%s13276_s27 + $0x940] sm:$0xff] %v449_v20 }
  0xa7   : >> { %v453_v22 = vld [vmem:[%s13280_s28 + $0x12c0] sm:$0xff]  ;;  %452 = vst [vmem:[%s13276_s27 + $0x950] sm:$0xff] %v451_v21 }
  0xa8   : >> { %v455_v23 = vld [vmem:[%s13280_s28 + $0x12e0] sm:$0xff]  ;;  %454 = vst [vmem:[%s13276_s27 + $0x960] sm:$0xff] %v453_v22 }
  0xa9   : >> { %v457_v24 = vld [vmem:[%s13280_s28 + $0x1300] sm:$0xff]  ;;  %456 = vst [vmem:[%s13276_s27 + $0x970] sm:$0xff] %v455_v23 }
  0xaa   : >> { %v459_v25 = vld [vmem:[%s13280_s28 + $0x1320] sm:$0xff]  ;;  %458 = vst [vmem:[%s13276_s27 + $0x980] sm:$0xff] %v457_v24 }
  0xab   : >> { %v461_v26 = vld [vmem:[%s13280_s28 + $0x1340] sm:$0xff]  ;;  %460 = vst [vmem:[%s13276_s27 + $0x990] sm:$0xff] %v459_v25 }
  0xac   : >> { %v463_v27 = vld [vmem:[%s13280_s28 + $0x1360] sm:$0xff]  ;;  %462 = vst [vmem:[%s13276_s27 + $0x9a0] sm:$0xff] %v461_v26 }
  0xad   : >> { %v465_v28 = vld [vmem:[%s13280_s28 + $0x1380] sm:$0xff]  ;;  %464 = vst [vmem:[%s13276_s27 + $0x9b0] sm:$0xff] %v463_v27 }
  0xae   : >> { %v467_v29 = vld [vmem:[%s13280_s28 + $0x13a0] sm:$0xff]  ;;  %466 = vst [vmem:[%s13276_s27 + $0x9c0] sm:$0xff] %v465_v28 }
  0xaf   : >> { %v469_v30 = vld [vmem:[%s13280_s28 + $0x13c0] sm:$0xff]  ;;  %468 = vst [vmem:[%s13276_s27 + $0x9d0] sm:$0xff] %v467_v29 }
  0xb0   : >> { %v471_v31 = vld [vmem:[%s13280_s28 + $0x13e0] sm:$0xff]  ;;  %470 = vst [vmem:[%s13276_s27 + $0x9e0] sm:$0xff] %v469_v30 }
  0xb1   : >> { %v473_v32 = vld [vmem:[%s13280_s28 + $0x1400] sm:$0xff]  ;;  %472 = vst [vmem:[%s13276_s27 + $0x9f0] sm:$0xff] %v471_v31 }
  0xb2   : >> { %v475_v33 = vld [vmem:[%s13280_s28 + $0x1420] sm:$0xff]  ;;  %474 = vst [vmem:[%s13276_s27 + $0xa00] sm:$0xff] %v473_v32 }
  0xb3   : >> { %v477_v34 = vld [vmem:[%s13280_s28 + $0x1440] sm:$0xff]  ;;  %476 = vst [vmem:[%s13276_s27 + $0xa10] sm:$0xff] %v475_v33 }
  0xb4   : >> { %v479_v35 = vld [vmem:[%s13280_s28 + $0x1460] sm:$0xff]  ;;  %478 = vst [vmem:[%s13276_s27 + $0xa20] sm:$0xff] %v477_v34 }
  0xb5   : >> { %v481_v36 = vld [vmem:[%s13280_s28 + $0x1480] sm:$0xff]  ;;  %480 = vst [vmem:[%s13276_s27 + $0xa30] sm:$0xff] %v479_v35 }
  0xb6   : >> { %v483_v37 = vld [vmem:[%s13280_s28 + $0x14a0] sm:$0xff]  ;;  %482 = vst [vmem:[%s13276_s27 + $0xa40] sm:$0xff] %v481_v36 }
  0xb7   : >> { %v485_v38 = vld [vmem:[%s13280_s28 + $0x14c0] sm:$0xff]  ;;  %484 = vst [vmem:[%s13276_s27 + $0xa50] sm:$0xff] %v483_v37 }
  0xb8   : >> { %v487_v39 = vld [vmem:[%s13280_s28 + $0x14e0] sm:$0xff]  ;;  %486 = vst [vmem:[%s13276_s27 + $0xa60] sm:$0xff] %v485_v38 }
  0xb9   : >> { %v489_v40 = vld [vmem:[%s13280_s28 + $0x1500] sm:$0xff]  ;;  %488 = vst [vmem:[%s13276_s27 + $0xa70] sm:$0xff] %v487_v39 }
  0xba   : >> { %v491_v41 = vld [vmem:[%s13280_s28 + $0x1520] sm:$0xff]  ;;  %490 = vst [vmem:[%s13276_s27 + $0xa80] sm:$0xff] %v489_v40 }
  0xbb   : >> { %v493_v42 = vld [vmem:[%s13280_s28 + $0x1540] sm:$0xff]  ;;  %492 = vst [vmem:[%s13276_s27 + $0xa90] sm:$0xff] %v491_v41 }
  0xbc   : >> { %v495_v43 = vld [vmem:[%s13280_s28 + $0x1560] sm:$0xff]  ;;  %494 = vst [vmem:[%s13276_s27 + $0xaa0] sm:$0xff] %v493_v42 }
  0xbd   : >> { %v497_v44 = vld [vmem:[%s13280_s28 + $0x1580] sm:$0xff]  ;;  %496 = vst [vmem:[%s13276_s27 + $0xab0] sm:$0xff] %v495_v43 }
  0xbe   : >> { %v499_v45 = vld [vmem:[%s13280_s28 + $0x15a0] sm:$0xff]  ;;  %498 = vst [vmem:[%s13276_s27 + $0xac0] sm:$0xff] %v497_v44 }
  0xbf   : >> { %v501_v46 = vld [vmem:[%s13280_s28 + $0x15c0] sm:$0xff]  ;;  %500 = vst [vmem:[%s13276_s27 + $0xad0] sm:$0xff] %v499_v45 }
  0xc0   : >> { %v503_v47 = vld [vmem:[%s13280_s28 + $0x15e0] sm:$0xff]  ;;  %502 = vst [vmem:[%s13276_s27 + $0xae0] sm:$0xff] %v501_v46 }
  0xc1   : >> { %v505_v48 = vld [vmem:[%s13280_s28 + $0x1600] sm:$0xff]  ;;  %504 = vst [vmem:[%s13276_s27 + $0xaf0] sm:$0xff] %v503_v47 }
  0xc2   : >> { %v507_v49 = vld [vmem:[%s13280_s28 + $0x1620] sm:$0xff]  ;;  %506 = vst [vmem:[%s13276_s27 + $0xb00] sm:$0xff] %v505_v48 }
  0xc3   : >> { %v509_v50 = vld [vmem:[%s13280_s28 + $0x1640] sm:$0xff]  ;;  %508 = vst [vmem:[%s13276_s27 + $0xb10] sm:$0xff] %v507_v49 }
  0xc4   : >> { %v511_v51 = vld [vmem:[%s13280_s28 + $0x1660] sm:$0xff]  ;;  %510 = vst [vmem:[%s13276_s27 + $0xb20] sm:$0xff] %v509_v50 }
  0xc5   : >> { %v513_v52 = vld [vmem:[%s13280_s28 + $0x1680] sm:$0xff]  ;;  %512 = vst [vmem:[%s13276_s27 + $0xb30] sm:$0xff] %v511_v51 }
  0xc6   : >> { %v515_v53 = vld [vmem:[%s13280_s28 + $0x16a0] sm:$0xff]  ;;  %514 = vst [vmem:[%s13276_s27 + $0xb40] sm:$0xff] %v513_v52 }
  0xc7   : >> { %v517_v54 = vld [vmem:[%s13280_s28 + $0x16c0] sm:$0xff]  ;;  %516 = vst [vmem:[%s13276_s27 + $0xb50] sm:$0xff] %v515_v53 }
  0xc8   : >> { %v519_v55 = vld [vmem:[%s13280_s28 + $0x16e0] sm:$0xff]  ;;  %518 = vst [vmem:[%s13276_s27 + $0xb60] sm:$0xff] %v517_v54 }
  0xc9   : >> { %v521_v56 = vld [vmem:[%s13280_s28 + $0x1700] sm:$0xff]  ;;  %520 = vst [vmem:[%s13276_s27 + $0xb70] sm:$0xff] %v519_v55 }
  0xca   : >> { %v523_v57 = vld [vmem:[%s13280_s28 + $0x1720] sm:$0xff]  ;;  %522 = vst [vmem:[%s13276_s27 + $0xb80] sm:$0xff] %v521_v56 }
  0xcb   : >> { %v525_v58 = vld [vmem:[%s13280_s28 + $0x1740] sm:$0xff]  ;;  %524 = vst [vmem:[%s13276_s27 + $0xb90] sm:$0xff] %v523_v57 }
  0xcc   : >> { %v527_v59 = vld [vmem:[%s13280_s28 + $0x1760] sm:$0xff]  ;;  %526 = vst [vmem:[%s13276_s27 + $0xba0] sm:$0xff] %v525_v58 }
  0xcd   : >> { %v529_v60 = vld [vmem:[%s13280_s28 + $0x1780] sm:$0xff]  ;;  %528 = vst [vmem:[%s13276_s27 + $0xbb0] sm:$0xff] %v527_v59 }
  0xce   : >> { %v531_v61 = vld [vmem:[%s13280_s28 + $0x17a0] sm:$0xff]  ;;  %530 = vst [vmem:[%s13276_s27 + $0xbc0] sm:$0xff] %v529_v60 }
  0xcf   : >> { %v533_v62 = vld [vmem:[%s13280_s28 + $0x17c0] sm:$0xff]  ;;  %532 = vst [vmem:[%s13276_s27 + $0xbd0] sm:$0xff] %v531_v61 }
  0xd0   : >> { %v535_v63 = vld [vmem:[%s13280_s28 + $0x17e0] sm:$0xff]  ;;  %534 = vst [vmem:[%s13276_s27 + $0xbe0] sm:$0xff] %v533_v62 }
  0xd1   : >> { %v537_v0 = vld [vmem:[%s13280_s28 + $0x1800] sm:$0xff]  ;;  %536 = vst [vmem:[%s13276_s27 + $0xbf0] sm:$0xff] %v535_v63 }
  0xd2   : >> { %v539_v1 = vld [vmem:[%s13280_s28 + $0x1820] sm:$0xff]  ;;  %538 = vst [vmem:[%s13276_s27 + $0xc00] sm:$0xff] %v537_v0 }
  0xd3   : >> { %v541_v2 = vld [vmem:[%s13280_s28 + $0x1840] sm:$0xff]  ;;  %540 = vst [vmem:[%s13276_s27 + $0xc10] sm:$0xff] %v539_v1 }
  0xd4   : >> { %v543_v3 = vld [vmem:[%s13280_s28 + $0x1860] sm:$0xff]  ;;  %542 = vst [vmem:[%s13276_s27 + $0xc20] sm:$0xff] %v541_v2 }
  0xd5   : >> { %v545_v4 = vld [vmem:[%s13280_s28 + $0x1880] sm:$0xff]  ;;  %544 = vst [vmem:[%s13276_s27 + $0xc30] sm:$0xff] %v543_v3 }
  0xd6   : >> { %v547_v5 = vld [vmem:[%s13280_s28 + $0x18a0] sm:$0xff]  ;;  %546 = vst [vmem:[%s13276_s27 + $0xc40] sm:$0xff] %v545_v4 }
  0xd7   : >> { %v549_v6 = vld [vmem:[%s13280_s28 + $0x18c0] sm:$0xff]  ;;  %548 = vst [vmem:[%s13276_s27 + $0xc50] sm:$0xff] %v547_v5 }
  0xd8   : >> { %v551_v7 = vld [vmem:[%s13280_s28 + $0x18e0] sm:$0xff]  ;;  %550 = vst [vmem:[%s13276_s27 + $0xc60] sm:$0xff] %v549_v6 }
  0xd9   : >> { %v553_v8 = vld [vmem:[%s13280_s28 + $0x1900] sm:$0xff]  ;;  %552 = vst [vmem:[%s13276_s27 + $0xc70] sm:$0xff] %v551_v7 }
  0xda   : >> { %v555_v9 = vld [vmem:[%s13280_s28 + $0x1920] sm:$0xff]  ;;  %554 = vst [vmem:[%s13276_s27 + $0xc80] sm:$0xff] %v553_v8 }
  0xdb   : >> { %v557_v10 = vld [vmem:[%s13280_s28 + $0x1940] sm:$0xff]  ;;  %556 = vst [vmem:[%s13276_s27 + $0xc90] sm:$0xff] %v555_v9 }
  0xdc   : >> { %v559_v11 = vld [vmem:[%s13280_s28 + $0x1960] sm:$0xff]  ;;  %558 = vst [vmem:[%s13276_s27 + $0xca0] sm:$0xff] %v557_v10 }
  0xdd   : >> { %v561_v12 = vld [vmem:[%s13280_s28 + $0x1980] sm:$0xff]  ;;  %560 = vst [vmem:[%s13276_s27 + $0xcb0] sm:$0xff] %v559_v11 }
  0xde   : >> { %v563_v13 = vld [vmem:[%s13280_s28 + $0x19a0] sm:$0xff]  ;;  %562 = vst [vmem:[%s13276_s27 + $0xcc0] sm:$0xff] %v561_v12 }
  0xdf   : >> { %v565_v14 = vld [vmem:[%s13280_s28 + $0x19c0] sm:$0xff]  ;;  %564 = vst [vmem:[%s13276_s27 + $0xcd0] sm:$0xff] %v563_v13 }
  0xe0   : >> { %v567_v15 = vld [vmem:[%s13280_s28 + $0x19e0] sm:$0xff]  ;;  %566 = vst [vmem:[%s13276_s27 + $0xce0] sm:$0xff] %v565_v14 }
  0xe1   : >> { %v569_v16 = vld [vmem:[%s13280_s28 + $0x1a00] sm:$0xff]  ;;  %568 = vst [vmem:[%s13276_s27 + $0xcf0] sm:$0xff] %v567_v15 }
  0xe2   : >> { %v571_v17 = vld [vmem:[%s13280_s28 + $0x1a20] sm:$0xff]  ;;  %570 = vst [vmem:[%s13276_s27 + $0xd00] sm:$0xff] %v569_v16 }
  0xe3   : >> { %v573_v18 = vld [vmem:[%s13280_s28 + $0x1a40] sm:$0xff]  ;;  %572 = vst [vmem:[%s13276_s27 + $0xd10] sm:$0xff] %v571_v17 }
  0xe4   : >> { %v575_v19 = vld [vmem:[%s13280_s28 + $0x1a60] sm:$0xff]  ;;  %574 = vst [vmem:[%s13276_s27 + $0xd20] sm:$0xff] %v573_v18 }
  0xe5   : >> { %v577_v20 = vld [vmem:[%s13280_s28 + $0x1a80] sm:$0xff]  ;;  %576 = vst [vmem:[%s13276_s27 + $0xd30] sm:$0xff] %v575_v19 }
  0xe6   : >> { %v579_v21 = vld [vmem:[%s13280_s28 + $0x1aa0] sm:$0xff]  ;;  %578 = vst [vmem:[%s13276_s27 + $0xd40] sm:$0xff] %v577_v20 }
  0xe7   : >> { %v581_v22 = vld [vmem:[%s13280_s28 + $0x1ac0] sm:$0xff]  ;;  %580 = vst [vmem:[%s13276_s27 + $0xd50] sm:$0xff] %v579_v21 }
  0xe8   : >> { %v583_v23 = vld [vmem:[%s13280_s28 + $0x1ae0] sm:$0xff]  ;;  %582 = vst [vmem:[%s13276_s27 + $0xd60] sm:$0xff] %v581_v22 }
  0xe9   : >> { %v585_v24 = vld [vmem:[%s13280_s28 + $0x1b00] sm:$0xff]  ;;  %584 = vst [vmem:[%s13276_s27 + $0xd70] sm:$0xff] %v583_v23 }
  0xea   : >> { %v587_v25 = vld [vmem:[%s13280_s28 + $0x1b20] sm:$0xff]  ;;  %586 = vst [vmem:[%s13276_s27 + $0xd80] sm:$0xff] %v585_v24 }
  0xeb   : >> { %v589_v26 = vld [vmem:[%s13280_s28 + $0x1b40] sm:$0xff]  ;;  %588 = vst [vmem:[%s13276_s27 + $0xd90] sm:$0xff] %v587_v25 }
  0xec   : >> { %v591_v27 = vld [vmem:[%s13280_s28 + $0x1b60] sm:$0xff]  ;;  %590 = vst [vmem:[%s13276_s27 + $0xda0] sm:$0xff] %v589_v26 }
  0xed   : >> { %v593_v28 = vld [vmem:[%s13280_s28 + $0x1b80] sm:$0xff]  ;;  %592 = vst [vmem:[%s13276_s27 + $0xdb0] sm:$0xff] %v591_v27 }
  0xee   : >> { %v595_v29 = vld [vmem:[%s13280_s28 + $0x1ba0] sm:$0xff]  ;;  %594 = vst [vmem:[%s13276_s27 + $0xdc0] sm:$0xff] %v593_v28 }
  0xef   : >> { %v597_v30 = vld [vmem:[%s13280_s28 + $0x1bc0] sm:$0xff]  ;;  %596 = vst [vmem:[%s13276_s27 + $0xdd0] sm:$0xff] %v595_v29 }
  0xf0   : >> { %v599_v31 = vld [vmem:[%s13280_s28 + $0x1be0] sm:$0xff]  ;;  %598 = vst [vmem:[%s13276_s27 + $0xde0] sm:$0xff] %v597_v30 }
  0xf1   : >> { %v601_v32 = vld [vmem:[%s13280_s28 + $0x1c00] sm:$0xff]  ;;  %600 = vst [vmem:[%s13276_s27 + $0xdf0] sm:$0xff] %v599_v31 }
  0xf2   : >> { %v603_v33 = vld [vmem:[%s13280_s28 + $0x1c20] sm:$0xff]  ;;  %602 = vst [vmem:[%s13276_s27 + $0xe00] sm:$0xff] %v601_v32 }
  0xf3   : >> { %v605_v34 = vld [vmem:[%s13280_s28 + $0x1c40] sm:$0xff]  ;;  %604 = vst [vmem:[%s13276_s27 + $0xe10] sm:$0xff] %v603_v33 }
  0xf4   : >> { %v607_v35 = vld [vmem:[%s13280_s28 + $0x1c60] sm:$0xff]  ;;  %606 = vst [vmem:[%s13276_s27 + $0xe20] sm:$0xff] %v605_v34 }
  0xf5   : >> { %v609_v36 = vld [vmem:[%s13280_s28 + $0x1c80] sm:$0xff]  ;;  %608 = vst [vmem:[%s13276_s27 + $0xe30] sm:$0xff] %v607_v35 }
  0xf6   : >> { %v611_v37 = vld [vmem:[%s13280_s28 + $0x1ca0] sm:$0xff]  ;;  %610 = vst [vmem:[%s13276_s27 + $0xe40] sm:$0xff] %v609_v36 }
  0xf7   : >> { %v613_v38 = vld [vmem:[%s13280_s28 + $0x1cc0] sm:$0xff]  ;;  %612 = vst [vmem:[%s13276_s27 + $0xe50] sm:$0xff] %v611_v37 }
  0xf8   : >> { %v615_v39 = vld [vmem:[%s13280_s28 + $0x1ce0] sm:$0xff]  ;;  %614 = vst [vmem:[%s13276_s27 + $0xe60] sm:$0xff] %v613_v38 }
  0xf9   : >> { %v617_v40 = vld [vmem:[%s13280_s28 + $0x1d00] sm:$0xff]  ;;  %616 = vst [vmem:[%s13276_s27 + $0xe70] sm:$0xff] %v615_v39 }
  0xfa   : >> { %v619_v41 = vld [vmem:[%s13280_s28 + $0x1d20] sm:$0xff]  ;;  %618 = vst [vmem:[%s13276_s27 + $0xe80] sm:$0xff] %v617_v40 }
  0xfb   : >> { %v621_v42 = vld [vmem:[%s13280_s28 + $0x1d40] sm:$0xff]  ;;  %620 = vst [vmem:[%s13276_s27 + $0xe90] sm:$0xff] %v619_v41 }
  0xfc   : >> { %v623_v43 = vld [vmem:[%s13280_s28 + $0x1d60] sm:$0xff]  ;;  %622 = vst [vmem:[%s13276_s27 + $0xea0] sm:$0xff] %v621_v42 }
  0xfd   : >> { %v625_v44 = vld [vmem:[%s13280_s28 + $0x1d80] sm:$0xff]  ;;  %624 = vst [vmem:[%s13276_s27 + $0xeb0] sm:$0xff] %v623_v43 }
  0xfe   : >> { %v627_v45 = vld [vmem:[%s13280_s28 + $0x1da0] sm:$0xff]  ;;  %626 = vst [vmem:[%s13276_s27 + $0xec0] sm:$0xff] %v625_v44 }
  0xff   : >> { %v629_v46 = vld [vmem:[%s13280_s28 + $0x1dc0] sm:$0xff]  ;;  %628 = vst [vmem:[%s13276_s27 + $0xed0] sm:$0xff] %v627_v45 }
 0x100   : >> { %v631_v47 = vld [vmem:[%s13280_s28 + $0x1de0] sm:$0xff]  ;;  %630 = vst [vmem:[%s13276_s27 + $0xee0] sm:$0xff] %v629_v46 }
 0x101   : >> { %v633_v48 = vld [vmem:[%s13280_s28 + $0x1e00] sm:$0xff]  ;;  %632 = vst [vmem:[%s13276_s27 + $0xef0] sm:$0xff] %v631_v47 }
 0x102   : >> { %v635_v49 = vld [vmem:[%s13280_s28 + $0x1e20] sm:$0xff]  ;;  %634 = vst [vmem:[%s13276_s27 + $0xf00] sm:$0xff] %v633_v48 }
 0x103   : >> { %v637_v50 = vld [vmem:[%s13280_s28 + $0x1e40] sm:$0xff]  ;;  %636 = vst [vmem:[%s13276_s27 + $0xf10] sm:$0xff] %v635_v49 }
 0x104   : >> { %v639_v51 = vld [vmem:[%s13280_s28 + $0x1e60] sm:$0xff]  ;;  %638 = vst [vmem:[%s13276_s27 + $0xf20] sm:$0xff] %v637_v50 }
 0x105   : >> { %v641_v52 = vld [vmem:[%s13280_s28 + $0x1e80] sm:$0xff]  ;;  %640 = vst [vmem:[%s13276_s27 + $0xf30] sm:$0xff] %v639_v51 }
 0x106   : >> { %v643_v53 = vld [vmem:[%s13280_s28 + $0x1ea0] sm:$0xff]  ;;  %642 = vst [vmem:[%s13276_s27 + $0xf40] sm:$0xff] %v641_v52 }
 0x107   : >> { %v645_v54 = vld [vmem:[%s13280_s28 + $0x1ec0] sm:$0xff]  ;;  %644 = vst [vmem:[%s13276_s27 + $0xf50] sm:$0xff] %v643_v53 }
 0x108   : >> { %v647_v55 = vld [vmem:[%s13280_s28 + $0x1ee0] sm:$0xff]  ;;  %646 = vst [vmem:[%s13276_s27 + $0xf60] sm:$0xff] %v645_v54 }
 0x109   : >> { %v649_v56 = vld [vmem:[%s13280_s28 + $0x1f00] sm:$0xff]  ;;  %648 = vst [vmem:[%s13276_s27 + $0xf70] sm:$0xff] %v647_v55 }
 0x10a   : >> { %v651_v57 = vld [vmem:[%s13280_s28 + $0x1f20] sm:$0xff]  ;;  %650 = vst [vmem:[%s13276_s27 + $0xf80] sm:$0xff] %v649_v56 }
 0x10b   : >> { %v653_v58 = vld [vmem:[%s13280_s28 + $0x1f40] sm:$0xff]  ;;  %652 = vst [vmem:[%s13276_s27 + $0xf90] sm:$0xff] %v651_v57 }
 0x10c   : >> { %v655_v59 = vld [vmem:[%s13280_s28 + $0x1f60] sm:$0xff]  ;;  %654 = vst [vmem:[%s13276_s27 + $0xfa0] sm:$0xff] %v653_v58 }
 0x10d   : >> { %v657_v60 = vld [vmem:[%s13280_s28 + $0x1f80] sm:$0xff]  ;;  %656 = vst [vmem:[%s13276_s27 + $0xfb0] sm:$0xff] %v655_v59 }
 0x10e   : >> { %v659_v61 = vld [vmem:[%s13280_s28 + $0x1fa0] sm:$0xff]  ;;  %658 = vst [vmem:[%s13276_s27 + $0xfc0] sm:$0xff] %v657_v60 }
 0x10f   : >> { %v661_v62 = vld [vmem:[%s13280_s28 + $0x1fc0] sm:$0xff]  ;;  %660 = vst [vmem:[%s13276_s27 + $0xfd0] sm:$0xff] %v659_v61 }
 0x110   : >> { %v663_v63 = vld [vmem:[%s13280_s28 + $0x1fe0] sm:$0xff]  ;;  %662 = vst [vmem:[%s13276_s27 + $0xfe0] sm:$0xff] %v661_v62 }
 0x111   : >> { %v665_v0 = vld [vmem:[%s13280_s28 + $0x2000] sm:$0xff]  ;;  %664 = vst [vmem:[%s13276_s27 + $0xff0] sm:$0xff] %v663_v63 }
 0x112   : >> { %v667_v1 = vld [vmem:[%s13280_s28 + $0x2020] sm:$0xff]  ;;  %666 = vst [vmem:[%s13276_s27 + $0x1000] sm:$0xff] %v665_v0 }
 0x113   : >> { %v669_v2 = vld [vmem:[%s13280_s28 + $0x2040] sm:$0xff]  ;;  %668 = vst [vmem:[%s13276_s27 + $0x1010] sm:$0xff] %v667_v1 }
 0x114   : >> { %v671_v3 = vld [vmem:[%s13280_s28 + $0x2060] sm:$0xff]  ;;  %670 = vst [vmem:[%s13276_s27 + $0x1020] sm:$0xff] %v669_v2 }
 0x115   : >> { %v673_v4 = vld [vmem:[%s13280_s28 + $0x2080] sm:$0xff]  ;;  %672 = vst [vmem:[%s13276_s27 + $0x1030] sm:$0xff] %v671_v3 }
 0x116   : >> { %v675_v5 = vld [vmem:[%s13280_s28 + $0x20a0] sm:$0xff]  ;;  %674 = vst [vmem:[%s13276_s27 + $0x1040] sm:$0xff] %v673_v4 }
 0x117   : >> { %v677_v6 = vld [vmem:[%s13280_s28 + $0x20c0] sm:$0xff]  ;;  %676 = vst [vmem:[%s13276_s27 + $0x1050] sm:$0xff] %v675_v5 }
 0x118   : >> { %v679_v7 = vld [vmem:[%s13280_s28 + $0x20e0] sm:$0xff]  ;;  %678 = vst [vmem:[%s13276_s27 + $0x1060] sm:$0xff] %v677_v6 }
 0x119   : >> { %v681_v8 = vld [vmem:[%s13280_s28 + $0x2100] sm:$0xff]  ;;  %680 = vst [vmem:[%s13276_s27 + $0x1070] sm:$0xff] %v679_v7 }
 0x11a   : >> { %v683_v9 = vld [vmem:[%s13280_s28 + $0x2120] sm:$0xff]  ;;  %682 = vst [vmem:[%s13276_s27 + $0x1080] sm:$0xff] %v681_v8 }
 0x11b   : >> { %v685_v10 = vld [vmem:[%s13280_s28 + $0x2140] sm:$0xff]  ;;  %684 = vst [vmem:[%s13276_s27 + $0x1090] sm:$0xff] %v683_v9 }
 0x11c   : >> { %v687_v11 = vld [vmem:[%s13280_s28 + $0x2160] sm:$0xff]  ;;  %686 = vst [vmem:[%s13276_s27 + $0x10a0] sm:$0xff] %v685_v10 }
 0x11d   : >> { %v689_v12 = vld [vmem:[%s13280_s28 + $0x2180] sm:$0xff]  ;;  %688 = vst [vmem:[%s13276_s27 + $0x10b0] sm:$0xff] %v687_v11 }
 0x11e   : >> { %v691_v13 = vld [vmem:[%s13280_s28 + $0x21a0] sm:$0xff]  ;;  %690 = vst [vmem:[%s13276_s27 + $0x10c0] sm:$0xff] %v689_v12 }
 0x11f   : >> { %v693_v14 = vld [vmem:[%s13280_s28 + $0x21c0] sm:$0xff]  ;;  %692 = vst [vmem:[%s13276_s27 + $0x10d0] sm:$0xff] %v691_v13 }
 0x120   : >> { %v695_v15 = vld [vmem:[%s13280_s28 + $0x21e0] sm:$0xff]  ;;  %694 = vst [vmem:[%s13276_s27 + $0x10e0] sm:$0xff] %v693_v14 }
 0x121   : >> { %v697_v16 = vld [vmem:[%s13280_s28 + $0x2200] sm:$0xff]  ;;  %696 = vst [vmem:[%s13276_s27 + $0x10f0] sm:$0xff] %v695_v15 }
 0x122   : >> { %v699_v17 = vld [vmem:[%s13280_s28 + $0x2220] sm:$0xff]  ;;  %698 = vst [vmem:[%s13276_s27 + $0x1100] sm:$0xff] %v697_v16 }
 0x123   : >> { %v701_v18 = vld [vmem:[%s13280_s28 + $0x2240] sm:$0xff]  ;;  %700 = vst [vmem:[%s13276_s27 + $0x1110] sm:$0xff] %v699_v17 }
 0x124   : >> { %v703_v19 = vld [vmem:[%s13280_s28 + $0x2260] sm:$0xff]  ;;  %702 = vst [vmem:[%s13276_s27 + $0x1120] sm:$0xff] %v701_v18 }
 0x125   : >> { %v705_v20 = vld [vmem:[%s13280_s28 + $0x2280] sm:$0xff]  ;;  %704 = vst [vmem:[%s13276_s27 + $0x1130] sm:$0xff] %v703_v19 }
 0x126   : >> { %v707_v21 = vld [vmem:[%s13280_s28 + $0x22a0] sm:$0xff]  ;;  %706 = vst [vmem:[%s13276_s27 + $0x1140] sm:$0xff] %v705_v20 }
 0x127   : >> { %v709_v22 = vld [vmem:[%s13280_s28 + $0x22c0] sm:$0xff]  ;;  %708 = vst [vmem:[%s13276_s27 + $0x1150] sm:$0xff] %v707_v21 }
 0x128   : >> { %v711_v23 = vld [vmem:[%s13280_s28 + $0x22e0] sm:$0xff]  ;;  %710 = vst [vmem:[%s13276_s27 + $0x1160] sm:$0xff] %v709_v22 }
 0x129   : >> { %v713_v24 = vld [vmem:[%s13280_s28 + $0x2300] sm:$0xff]  ;;  %712 = vst [vmem:[%s13276_s27 + $0x1170] sm:$0xff] %v711_v23 }
 0x12a   : >> { %v715_v25 = vld [vmem:[%s13280_s28 + $0x2320] sm:$0xff]  ;;  %714 = vst [vmem:[%s13276_s27 + $0x1180] sm:$0xff] %v713_v24 }
 0x12b   : >> { %v717_v26 = vld [vmem:[%s13280_s28 + $0x2340] sm:$0xff]  ;;  %716 = vst [vmem:[%s13276_s27 + $0x1190] sm:$0xff] %v715_v25 }
 0x12c   : >> { %v719_v27 = vld [vmem:[%s13280_s28 + $0x2360] sm:$0xff]  ;;  %718 = vst [vmem:[%s13276_s27 + $0x11a0] sm:$0xff] %v717_v26 }
 0x12d   : >> { %v721_v28 = vld [vmem:[%s13280_s28 + $0x2380] sm:$0xff]  ;;  %720 = vst [vmem:[%s13276_s27 + $0x11b0] sm:$0xff] %v719_v27 }
 0x12e   : >> { %v723_v29 = vld [vmem:[%s13280_s28 + $0x23a0] sm:$0xff]  ;;  %722 = vst [vmem:[%s13276_s27 + $0x11c0] sm:$0xff] %v721_v28 }
 0x12f   : >> { %v725_v30 = vld [vmem:[%s13280_s28 + $0x23c0] sm:$0xff]  ;;  %724 = vst [vmem:[%s13276_s27 + $0x11d0] sm:$0xff] %v723_v29 }
 0x130   : >> { %v727_v31 = vld [vmem:[%s13280_s28 + $0x23e0] sm:$0xff]  ;;  %726 = vst [vmem:[%s13276_s27 + $0x11e0] sm:$0xff] %v725_v30 }
 0x131   : >> { %v729_v32 = vld [vmem:[%s13280_s28 + $0x2400] sm:$0xff]  ;;  %728 = vst [vmem:[%s13276_s27 + $0x11f0] sm:$0xff] %v727_v31 }
 0x132   : >> { %v731_v33 = vld [vmem:[%s13280_s28 + $0x2420] sm:$0xff]  ;;  %730 = vst [vmem:[%s13276_s27 + $0x1200] sm:$0xff] %v729_v32 }
 0x133   : >> { %v733_v34 = vld [vmem:[%s13280_s28 + $0x2440] sm:$0xff]  ;;  %732 = vst [vmem:[%s13276_s27 + $0x1210] sm:$0xff] %v731_v33 }
 0x134   : >> { %v735_v35 = vld [vmem:[%s13280_s28 + $0x2460] sm:$0xff]  ;;  %734 = vst [vmem:[%s13276_s27 + $0x1220] sm:$0xff] %v733_v34 }
 0x135   : >> { %v737_v36 = vld [vmem:[%s13280_s28 + $0x2480] sm:$0xff]  ;;  %736 = vst [vmem:[%s13276_s27 + $0x1230] sm:$0xff] %v735_v35 }
 0x136   : >> { %v739_v37 = vld [vmem:[%s13280_s28 + $0x24a0] sm:$0xff]  ;;  %738 = vst [vmem:[%s13276_s27 + $0x1240] sm:$0xff] %v737_v36 }
 0x137   : >> { %v741_v38 = vld [vmem:[%s13280_s28 + $0x24c0] sm:$0xff]  ;;  %740 = vst [vmem:[%s13276_s27 + $0x1250] sm:$0xff] %v739_v37 }
 0x138   : >> { %v743_v39 = vld [vmem:[%s13280_s28 + $0x24e0] sm:$0xff]  ;;  %742 = vst [vmem:[%s13276_s27 + $0x1260] sm:$0xff] %v741_v38 }
 0x139   : >> { %v745_v40 = vld [vmem:[%s13280_s28 + $0x2500] sm:$0xff]  ;;  %744 = vst [vmem:[%s13276_s27 + $0x1270] sm:$0xff] %v743_v39 }
 0x13a   : >> { %v747_v41 = vld [vmem:[%s13280_s28 + $0x2520] sm:$0xff]  ;;  %746 = vst [vmem:[%s13276_s27 + $0x1280] sm:$0xff] %v745_v40 }
 0x13b   : >> { %v749_v42 = vld [vmem:[%s13280_s28 + $0x2540] sm:$0xff]  ;;  %748 = vst [vmem:[%s13276_s27 + $0x1290] sm:$0xff] %v747_v41 }
 0x13c   : >> { %v751_v43 = vld [vmem:[%s13280_s28 + $0x2560] sm:$0xff]  ;;  %750 = vst [vmem:[%s13276_s27 + $0x12a0] sm:$0xff] %v749_v42 }
 0x13d   : >> { %v753_v44 = vld [vmem:[%s13280_s28 + $0x2580] sm:$0xff]  ;;  %752 = vst [vmem:[%s13276_s27 + $0x12b0] sm:$0xff] %v751_v43 }
 0x13e   : >> { %v755_v45 = vld [vmem:[%s13280_s28 + $0x25a0] sm:$0xff]  ;;  %754 = vst [vmem:[%s13276_s27 + $0x12c0] sm:$0xff] %v753_v44 }
 0x13f   : >> { %v757_v46 = vld [vmem:[%s13280_s28 + $0x25c0] sm:$0xff]  ;;  %756 = vst [vmem:[%s13276_s27 + $0x12d0] sm:$0xff] %v755_v45 }
 0x140   : >> { %v759_v47 = vld [vmem:[%s13280_s28 + $0x25e0] sm:$0xff]  ;;  %758 = vst [vmem:[%s13276_s27 + $0x12e0] sm:$0xff] %v757_v46 }
 0x141   : >> { %v761_v48 = vld [vmem:[%s13280_s28 + $0x2600] sm:$0xff]  ;;  %760 = vst [vmem:[%s13276_s27 + $0x12f0] sm:$0xff] %v759_v47 }
 0x142   : >> { %v763_v49 = vld [vmem:[%s13280_s28 + $0x2620] sm:$0xff]  ;;  %762 = vst [vmem:[%s13276_s27 + $0x1300] sm:$0xff] %v761_v48 }
 0x143   : >> { %v765_v50 = vld [vmem:[%s13280_s28 + $0x2640] sm:$0xff]  ;;  %764 = vst [vmem:[%s13276_s27 + $0x1310] sm:$0xff] %v763_v49 }
 0x144   : >> { %v767_v51 = vld [vmem:[%s13280_s28 + $0x2660] sm:$0xff]  ;;  %766 = vst [vmem:[%s13276_s27 + $0x1320] sm:$0xff] %v765_v50 }
 0x145   : >> { %v769_v52 = vld [vmem:[%s13280_s28 + $0x2680] sm:$0xff]  ;;  %768 = vst [vmem:[%s13276_s27 + $0x1330] sm:$0xff] %v767_v51 }
 0x146   : >> { %v771_v53 = vld [vmem:[%s13280_s28 + $0x26a0] sm:$0xff]  ;;  %770 = vst [vmem:[%s13276_s27 + $0x1340] sm:$0xff] %v769_v52 }
 0x147   : >> { %v773_v54 = vld [vmem:[%s13280_s28 + $0x26c0] sm:$0xff]  ;;  %772 = vst [vmem:[%s13276_s27 + $0x1350] sm:$0xff] %v771_v53 }
 0x148   : >> { %v775_v55 = vld [vmem:[%s13280_s28 + $0x26e0] sm:$0xff]  ;;  %774 = vst [vmem:[%s13276_s27 + $0x1360] sm:$0xff] %v773_v54 }
 0x149   : >> { %v777_v56 = vld [vmem:[%s13280_s28 + $0x2700] sm:$0xff]  ;;  %776 = vst [vmem:[%s13276_s27 + $0x1370] sm:$0xff] %v775_v55 }
 0x14a   : >> { %v779_v57 = vld [vmem:[%s13280_s28 + $0x2720] sm:$0xff]  ;;  %778 = vst [vmem:[%s13276_s27 + $0x1380] sm:$0xff] %v777_v56 }
 0x14b   : >> { %v781_v58 = vld [vmem:[%s13280_s28 + $0x2740] sm:$0xff]  ;;  %780 = vst [vmem:[%s13276_s27 + $0x1390] sm:$0xff] %v779_v57 }
 0x14c   : >> { %v783_v59 = vld [vmem:[%s13280_s28 + $0x2760] sm:$0xff]  ;;  %782 = vst [vmem:[%s13276_s27 + $0x13a0] sm:$0xff] %v781_v58 }
 0x14d   : >> { %v785_v60 = vld [vmem:[%s13280_s28 + $0x2780] sm:$0xff]  ;;  %784 = vst [vmem:[%s13276_s27 + $0x13b0] sm:$0xff] %v783_v59 }
 0x14e   : >> { %v787_v61 = vld [vmem:[%s13280_s28 + $0x27a0] sm:$0xff]  ;;  %786 = vst [vmem:[%s13276_s27 + $0x13c0] sm:$0xff] %v785_v60 }
 0x14f   : >> { %v789_v62 = vld [vmem:[%s13280_s28 + $0x27c0] sm:$0xff]  ;;  %788 = vst [vmem:[%s13276_s27 + $0x13d0] sm:$0xff] %v787_v61 }
 0x150   : >> { %v791_v63 = vld [vmem:[%s13280_s28 + $0x27e0] sm:$0xff]  ;;  %790 = vst [vmem:[%s13276_s27 + $0x13e0] sm:$0xff] %v789_v62 }
 0x151   : >> { %v793_v0 = vld [vmem:[%s13280_s28 + $0x2800] sm:$0xff]  ;;  %792 = vst [vmem:[%s13276_s27 + $0x13f0] sm:$0xff] %v791_v63 }
 0x152   : >> { %v795_v1 = vld [vmem:[%s13280_s28 + $0x2820] sm:$0xff]  ;;  %794 = vst [vmem:[%s13276_s27 + $0x1400] sm:$0xff] %v793_v0 }
 0x153   : >> { %v797_v2 = vld [vmem:[%s13280_s28 + $0x2840] sm:$0xff]  ;;  %796 = vst [vmem:[%s13276_s27 + $0x1410] sm:$0xff] %v795_v1 }
 0x154   : >> { %v799_v3 = vld [vmem:[%s13280_s28 + $0x2860] sm:$0xff]  ;;  %798 = vst [vmem:[%s13276_s27 + $0x1420] sm:$0xff] %v797_v2 }
 0x155   : >> { %v801_v4 = vld [vmem:[%s13280_s28 + $0x2880] sm:$0xff]  ;;  %800 = vst [vmem:[%s13276_s27 + $0x1430] sm:$0xff] %v799_v3 }
 0x156   : >> { %v803_v5 = vld [vmem:[%s13280_s28 + $0x28a0] sm:$0xff]  ;;  %802 = vst [vmem:[%s13276_s27 + $0x1440] sm:$0xff] %v801_v4 }
 0x157   : >> { %v805_v6 = vld [vmem:[%s13280_s28 + $0x28c0] sm:$0xff]  ;;  %804 = vst [vmem:[%s13276_s27 + $0x1450] sm:$0xff] %v803_v5 }
 0x158   : >> { %v807_v7 = vld [vmem:[%s13280_s28 + $0x28e0] sm:$0xff]  ;;  %806 = vst [vmem:[%s13276_s27 + $0x1460] sm:$0xff] %v805_v6 }
 0x159   : >> { %v809_v8 = vld [vmem:[%s13280_s28 + $0x2900] sm:$0xff]  ;;  %808 = vst [vmem:[%s13276_s27 + $0x1470] sm:$0xff] %v807_v7 }
 0x15a   : >> { %v811_v9 = vld [vmem:[%s13280_s28 + $0x2920] sm:$0xff]  ;;  %810 = vst [vmem:[%s13276_s27 + $0x1480] sm:$0xff] %v809_v8 }
 0x15b   : >> { %v813_v10 = vld [vmem:[%s13280_s28 + $0x2940] sm:$0xff]  ;;  %812 = vst [vmem:[%s13276_s27 + $0x1490] sm:$0xff] %v811_v9 }
 0x15c   : >> { %v815_v11 = vld [vmem:[%s13280_s28 + $0x2960] sm:$0xff]  ;;  %814 = vst [vmem:[%s13276_s27 + $0x14a0] sm:$0xff] %v813_v10 }
 0x15d   : >> { %v817_v12 = vld [vmem:[%s13280_s28 + $0x2980] sm:$0xff]  ;;  %816 = vst [vmem:[%s13276_s27 + $0x14b0] sm:$0xff] %v815_v11 }
 0x15e   : >> { %v819_v13 = vld [vmem:[%s13280_s28 + $0x29a0] sm:$0xff]  ;;  %818 = vst [vmem:[%s13276_s27 + $0x14c0] sm:$0xff] %v817_v12 }
 0x15f   : >> { %v821_v14 = vld [vmem:[%s13280_s28 + $0x29c0] sm:$0xff]  ;;  %820 = vst [vmem:[%s13276_s27 + $0x14d0] sm:$0xff] %v819_v13 }
 0x160   : >> { %v823_v15 = vld [vmem:[%s13280_s28 + $0x29e0] sm:$0xff]  ;;  %822 = vst [vmem:[%s13276_s27 + $0x14e0] sm:$0xff] %v821_v14 }
 0x161   : >> { %v825_v16 = vld [vmem:[%s13280_s28 + $0x2a00] sm:$0xff]  ;;  %824 = vst [vmem:[%s13276_s27 + $0x14f0] sm:$0xff] %v823_v15 }
 0x162   : >> { %v827_v17 = vld [vmem:[%s13280_s28 + $0x2a20] sm:$0xff]  ;;  %826 = vst [vmem:[%s13276_s27 + $0x1500] sm:$0xff] %v825_v16 }
 0x163   : >> { %v829_v18 = vld [vmem:[%s13280_s28 + $0x2a40] sm:$0xff]  ;;  %828 = vst [vmem:[%s13276_s27 + $0x1510] sm:$0xff] %v827_v17 }
 0x164   : >> { %v831_v19 = vld [vmem:[%s13280_s28 + $0x2a60] sm:$0xff]  ;;  %830 = vst [vmem:[%s13276_s27 + $0x1520] sm:$0xff] %v829_v18 }
 0x165   : >> { %v833_v20 = vld [vmem:[%s13280_s28 + $0x2a80] sm:$0xff]  ;;  %832 = vst [vmem:[%s13276_s27 + $0x1530] sm:$0xff] %v831_v19 }
 0x166   : >> { %v835_v21 = vld [vmem:[%s13280_s28 + $0x2aa0] sm:$0xff]  ;;  %834 = vst [vmem:[%s13276_s27 + $0x1540] sm:$0xff] %v833_v20 }
 0x167   : >> { %v837_v22 = vld [vmem:[%s13280_s28 + $0x2ac0] sm:$0xff]  ;;  %836 = vst [vmem:[%s13276_s27 + $0x1550] sm:$0xff] %v835_v21 }
 0x168   : >> { %v839_v23 = vld [vmem:[%s13280_s28 + $0x2ae0] sm:$0xff]  ;;  %838 = vst [vmem:[%s13276_s27 + $0x1560] sm:$0xff] %v837_v22 }
 0x169   : >> { %v841_v24 = vld [vmem:[%s13280_s28 + $0x2b00] sm:$0xff]  ;;  %840 = vst [vmem:[%s13276_s27 + $0x1570] sm:$0xff] %v839_v23 }
 0x16a   : >> { %v843_v25 = vld [vmem:[%s13280_s28 + $0x2b20] sm:$0xff]  ;;  %842 = vst [vmem:[%s13276_s27 + $0x1580] sm:$0xff] %v841_v24 }
 0x16b   : >> { %v845_v26 = vld [vmem:[%s13280_s28 + $0x2b40] sm:$0xff]  ;;  %844 = vst [vmem:[%s13276_s27 + $0x1590] sm:$0xff] %v843_v25 }
 0x16c   : >> { %v847_v27 = vld [vmem:[%s13280_s28 + $0x2b60] sm:$0xff]  ;;  %846 = vst [vmem:[%s13276_s27 + $0x15a0] sm:$0xff] %v845_v26 }
 0x16d   : >> { %v849_v28 = vld [vmem:[%s13280_s28 + $0x2b80] sm:$0xff]  ;;  %848 = vst [vmem:[%s13276_s27 + $0x15b0] sm:$0xff] %v847_v27 }
 0x16e   : >> { %v851_v29 = vld [vmem:[%s13280_s28 + $0x2ba0] sm:$0xff]  ;;  %850 = vst [vmem:[%s13276_s27 + $0x15c0] sm:$0xff] %v849_v28 }
 0x16f   : >> { %v853_v30 = vld [vmem:[%s13280_s28 + $0x2bc0] sm:$0xff]  ;;  %852 = vst [vmem:[%s13276_s27 + $0x15d0] sm:$0xff] %v851_v29 }
 0x170   : >> { %v855_v31 = vld [vmem:[%s13280_s28 + $0x2be0] sm:$0xff]  ;;  %854 = vst [vmem:[%s13276_s27 + $0x15e0] sm:$0xff] %v853_v30 }
 0x171   : >> { %v857_v32 = vld [vmem:[%s13280_s28 + $0x2c00] sm:$0xff]  ;;  %856 = vst [vmem:[%s13276_s27 + $0x15f0] sm:$0xff] %v855_v31 }
 0x172   : >> { %v859_v33 = vld [vmem:[%s13280_s28 + $0x2c20] sm:$0xff]  ;;  %858 = vst [vmem:[%s13276_s27 + $0x1600] sm:$0xff] %v857_v32 }
 0x173   : >> { %v861_v34 = vld [vmem:[%s13280_s28 + $0x2c40] sm:$0xff]  ;;  %860 = vst [vmem:[%s13276_s27 + $0x1610] sm:$0xff] %v859_v33 }
 0x174   : >> { %v863_v35 = vld [vmem:[%s13280_s28 + $0x2c60] sm:$0xff]  ;;  %862 = vst [vmem:[%s13276_s27 + $0x1620] sm:$0xff] %v861_v34 }
 0x175   : >> { %v865_v36 = vld [vmem:[%s13280_s28 + $0x2c80] sm:$0xff]  ;;  %864 = vst [vmem:[%s13276_s27 + $0x1630] sm:$0xff] %v863_v35 }
 0x176   : >> { %v867_v37 = vld [vmem:[%s13280_s28 + $0x2ca0] sm:$0xff]  ;;  %866 = vst [vmem:[%s13276_s27 + $0x1640] sm:$0xff] %v865_v36 }
 0x177   : >> { %v869_v38 = vld [vmem:[%s13280_s28 + $0x2cc0] sm:$0xff]  ;;  %868 = vst [vmem:[%s13276_s27 + $0x1650] sm:$0xff] %v867_v37 }
 0x178   : >> { %v871_v39 = vld [vmem:[%s13280_s28 + $0x2ce0] sm:$0xff]  ;;  %870 = vst [vmem:[%s13276_s27 + $0x1660] sm:$0xff] %v869_v38 }
 0x179   : >> { %v873_v40 = vld [vmem:[%s13280_s28 + $0x2d00] sm:$0xff]  ;;  %872 = vst [vmem:[%s13276_s27 + $0x1670] sm:$0xff] %v871_v39 }
 0x17a   : >> { %v875_v41 = vld [vmem:[%s13280_s28 + $0x2d20] sm:$0xff]  ;;  %874 = vst [vmem:[%s13276_s27 + $0x1680] sm:$0xff] %v873_v40 }
 0x17b   : >> { %v877_v42 = vld [vmem:[%s13280_s28 + $0x2d40] sm:$0xff]  ;;  %876 = vst [vmem:[%s13276_s27 + $0x1690] sm:$0xff] %v875_v41 }
 0x17c   : >> { %v879_v43 = vld [vmem:[%s13280_s28 + $0x2d60] sm:$0xff]  ;;  %878 = vst [vmem:[%s13276_s27 + $0x16a0] sm:$0xff] %v877_v42 }
 0x17d   : >> { %v881_v44 = vld [vmem:[%s13280_s28 + $0x2d80] sm:$0xff]  ;;  %880 = vst [vmem:[%s13276_s27 + $0x16b0] sm:$0xff] %v879_v43 }
 0x17e   : >> { %v883_v45 = vld [vmem:[%s13280_s28 + $0x2da0] sm:$0xff]  ;;  %882 = vst [vmem:[%s13276_s27 + $0x16c0] sm:$0xff] %v881_v44 }
 0x17f   : >> { %v885_v46 = vld [vmem:[%s13280_s28 + $0x2dc0] sm:$0xff]  ;;  %884 = vst [vmem:[%s13276_s27 + $0x16d0] sm:$0xff] %v883_v45 }
 0x180   : >> { %v887_v47 = vld [vmem:[%s13280_s28 + $0x2de0] sm:$0xff]  ;;  %886 = vst [vmem:[%s13276_s27 + $0x16e0] sm:$0xff] %v885_v46 }
 0x181   : >> { %v889_v48 = vld [vmem:[%s13280_s28 + $0x2e00] sm:$0xff]  ;;  %888 = vst [vmem:[%s13276_s27 + $0x16f0] sm:$0xff] %v887_v47 }
 0x182   : >> { %v891_v49 = vld [vmem:[%s13280_s28 + $0x2e20] sm:$0xff]  ;;  %890 = vst [vmem:[%s13276_s27 + $0x1700] sm:$0xff] %v889_v48 }
 0x183   : >> { %v893_v50 = vld [vmem:[%s13280_s28 + $0x2e40] sm:$0xff]  ;;  %892 = vst [vmem:[%s13276_s27 + $0x1710] sm:$0xff] %v891_v49 }
 0x184   : >> { %v895_v51 = vld [vmem:[%s13280_s28 + $0x2e60] sm:$0xff]  ;;  %894 = vst [vmem:[%s13276_s27 + $0x1720] sm:$0xff] %v893_v50 }
 0x185   : >> { %v897_v52 = vld [vmem:[%s13280_s28 + $0x2e80] sm:$0xff]  ;;  %896 = vst [vmem:[%s13276_s27 + $0x1730] sm:$0xff] %v895_v51 }
 0x186   : >> { %v899_v53 = vld [vmem:[%s13280_s28 + $0x2ea0] sm:$0xff]  ;;  %898 = vst [vmem:[%s13276_s27 + $0x1740] sm:$0xff] %v897_v52 }
 0x187   : >> { %v901_v54 = vld [vmem:[%s13280_s28 + $0x2ec0] sm:$0xff]  ;;  %900 = vst [vmem:[%s13276_s27 + $0x1750] sm:$0xff] %v899_v53 }
 0x188   : >> { %v903_v55 = vld [vmem:[%s13280_s28 + $0x2ee0] sm:$0xff]  ;;  %902 = vst [vmem:[%s13276_s27 + $0x1760] sm:$0xff] %v901_v54 }
 0x189   : >> { %v905_v56 = vld [vmem:[%s13280_s28 + $0x2f00] sm:$0xff]  ;;  %904 = vst [vmem:[%s13276_s27 + $0x1770] sm:$0xff] %v903_v55 }
 0x18a   : >> { %v907_v57 = vld [vmem:[%s13280_s28 + $0x2f20] sm:$0xff]  ;;  %906 = vst [vmem:[%s13276_s27 + $0x1780] sm:$0xff] %v905_v56 }
 0x18b   : >> { %v909_v58 = vld [vmem:[%s13280_s28 + $0x2f40] sm:$0xff]  ;;  %908 = vst [vmem:[%s13276_s27 + $0x1790] sm:$0xff] %v907_v57 }
 0x18c   : >> { %v911_v59 = vld [vmem:[%s13280_s28 + $0x2f60] sm:$0xff]  ;;  %910 = vst [vmem:[%s13276_s27 + $0x17a0] sm:$0xff] %v909_v58 }
 0x18d   : >> { %v913_v60 = vld [vmem:[%s13280_s28 + $0x2f80] sm:$0xff]  ;;  %912 = vst [vmem:[%s13276_s27 + $0x17b0] sm:$0xff] %v911_v59 }
 0x18e   : >> { %v915_v61 = vld [vmem:[%s13280_s28 + $0x2fa0] sm:$0xff]  ;;  %914 = vst [vmem:[%s13276_s27 + $0x17c0] sm:$0xff] %v913_v60 }
 0x18f   : >> { %v917_v62 = vld [vmem:[%s13280_s28 + $0x2fc0] sm:$0xff]  ;;  %916 = vst [vmem:[%s13276_s27 + $0x17d0] sm:$0xff] %v915_v61 }
 0x190   : >> { %v919_v63 = vld [vmem:[%s13280_s28 + $0x2fe0] sm:$0xff]  ;;  %918 = vst [vmem:[%s13276_s27 + $0x17e0] sm:$0xff] %v917_v62 }
 0x191   : >> { %v921_v0 = vld [vmem:[%s13280_s28 + $0x3000] sm:$0xff]  ;;  %920 = vst [vmem:[%s13276_s27 + $0x17f0] sm:$0xff] %v919_v63 }
 0x192   : >> { %v923_v1 = vld [vmem:[%s13280_s28 + $0x3020] sm:$0xff]  ;;  %922 = vst [vmem:[%s13276_s27 + $0x1800] sm:$0xff] %v921_v0 }
 0x193   : >> { %v925_v2 = vld [vmem:[%s13280_s28 + $0x3040] sm:$0xff]  ;;  %924 = vst [vmem:[%s13276_s27 + $0x1810] sm:$0xff] %v923_v1 }
 0x194   : >> { %v927_v3 = vld [vmem:[%s13280_s28 + $0x3060] sm:$0xff]  ;;  %926 = vst [vmem:[%s13276_s27 + $0x1820] sm:$0xff] %v925_v2 }
 0x195   : >> { %v929_v4 = vld [vmem:[%s13280_s28 + $0x3080] sm:$0xff]  ;;  %928 = vst [vmem:[%s13276_s27 + $0x1830] sm:$0xff] %v927_v3  ;;  %148 = sbr.rel (!%p146_p6) target bundleno = 17 (0x11), region = 109 }
 0x196   : >> { %v931_v5 = vld [vmem:[%s13280_s28 + $0x30a0] sm:$0xff]  ;;  %930 = vst [vmem:[%s13276_s27 + $0x1840] sm:$0xff] %v929_v4 }
 0x197   : >> { %v933_v6 = vld [vmem:[%s13280_s28 + $0x30c0] sm:$0xff]  ;;  %932 = vst [vmem:[%s13276_s27 + $0x1850] sm:$0xff] %v931_v5 }
 0x198   : >> { %v935_v7 = vld [vmem:[%s13280_s28 + $0x30e0] sm:$0xff]  ;;  %934 = vst [vmem:[%s13276_s27 + $0x1860] sm:$0xff] %v933_v6  ;;  %s16044_s28 = smov %s13910_s6 }
 0x199   : >> { %936 = vst [vmem:[%s13276_s27 + $0x1870] sm:$0xff] %v935_v7  ;;  %s16043_s27 = smov %s13914_s7 }
 0x19a PF: > { %p9082_p7 = scmp.ge.s32.totalorder %s13272_s14, 1  ;;  %p2553_p8 = scmp.lt.s32.totalorder %s13272_s14, 3 }
 0x19c   : > { %p2554_p9 = pnand %p9082_p7, %p2553_p8 }
 0x19d   : > { %s2560_s8 = sand.u32 (!%p2554_p9), 1, %s13264_s12   ;;  %s9083_s23 = sshll.u32 (!%p2554_p9), %s13326_s15, 6 }
 0x19e   : > { %2557 = sbr.rel (%p2554_p9) target bundleno = 1494 (0x5d6), region = 65  ;;  %p15939_p10 = scmp.lt.s32.totalorder (!%p2554_p9), %s9083_s23, 127 }
 0x19f   : > { %s13174_s9 = smul.u32 (!%p2554_p9), 6272, %s2560_s8  ;;  %p2594_p11 = scmp.lt.s32.totalorder (!%p2554_p9), %s13326_s15, 1 }
 0x1a1   : > { %s14184_s10 = scalar_lea.vmem (!%p2554_p9), [#allocation2], %s13174_s9 }
 0x1a3   : > { %v9200_v8 = vld [vmem:[%s14184_s10 + $0xe0] sm:$0xf]  ;;  %v12387_v9 = vld [vmem:[%s14184_s10 + $0xec] sm:$0xf0]  ;;  %vm7364_vm0 = vcmask 523264   ;;  %s16053_s23 = smov (!%p15939_p10, %s9083_s23), 127 }
 0x1a4   : > { %v9328_v10 = vld [vmem:[%s14184_s10 + $0x1e0] sm:$0xf]  ;;  %v9201_v11 = vor.u32 %v12387_v9, %v9200_v8  ;;  %v12419_v12 = vld [vmem:[%s14184_s10 + $0x1ec] sm:$0xf0]  ;;  %s9084_s25 = sshll.u32 %s16053_s23, 2  ;;  %s16055_s15 = smov (!%p2594_p11, %s13326_s15), 1 }
 0x1a5   : > { %v9456_v13 = vld [vmem:[%s14184_s10 + $0x2e0] sm:$0xf]  ;;  %v12451_v14 = vld [vmem:[%s14184_s10 + $0x2ec] sm:$0xf0]  ;;  %v9329_v15 = vor.u32 %v12419_v12, %v9328_v10  ;;  %s15978_s28 = scalar_lea.vmem %s16039_s2, %s9084_s25  ;;  %s9085_s29 = sshll.u32 %s16055_s15, 1  ;;  %vm8983_vm1 = vcmask 17408  }
 0x1a6   : > { %v9457_v16 = vor.u32 %v12451_v14, %v9456_v13  ;;  %v9584_v17 = vld [vmem:[%s14184_s10 + $0x3e0] sm:$0xf]  ;;  %v12483_v18 = vld [vmem:[%s14184_s10 + $0x3ec] sm:$0xf0]  ;;  %7367 = vmatpush.bf16.msra.mxu0 %v9201_v11  ;;  %s2597_s5 = scalar_lea.vmem %s16040_s3, %s9085_s29 }
 0x1a7   : > { %v9184_v19 = vld [vmem:[%s14184_s10 + $0xc0] sm:$0xf]  ;;  %v9585_v20 = vor.u32 %v12483_v18, %v9584_v17  ;;  %v12383_v21 = vld [vmem:[%s14184_s10 + $0xcc] sm:$0xf0]  ;;  %7380 = vmatpush.bf16.msra.mxu1 %v9329_v15 }
 0x1a8   : > { %v9312_v22 = vld [vmem:[%s14184_s10 + $0x1c0] sm:$0xf]  ;;  %v12415_v23 = vld [vmem:[%s14184_s10 + $0x1cc] sm:$0xf0]  ;;  %7393 = vmatpush.bf16.msra.mxu2 %v9457_v16  ;;  %v9185_v24 = vor.u32 %v12383_v21, %v9184_v19 }
 0x1a9   : > { %v9313_v25 = vor.u32 %v12415_v23, %v9312_v22  ;;  %v9440_v26 = vld [vmem:[%s14184_s10 + $0x2c0] sm:$0xf]  ;;  %v12447_v27 = vld [vmem:[%s14184_s10 + $0x2cc] sm:$0xf0]  ;;  %7406 = vmatpush.bf16.msra.mxu3 %v9585_v20 }
 0x1aa   : > { %v9568_v28 = vld [vmem:[%s14184_s10 + $0x3c0] sm:$0xf]  ;;  %v9441_v29 = vor.u32 %v12447_v27, %v9440_v26  ;;  %v12479_v30 = vld [vmem:[%s14184_s10 + $0x3cc] sm:$0xf0]  ;;  %7368 = vmatpush.bf16.msra.mxu0 %v9185_v24 }
 0x1ab   : > { %v9168_v31 = vld [vmem:[%s14184_s10 + $0xa0] sm:$0xf]  ;;  %v12379_v32 = vld [vmem:[%s14184_s10 + $0xac] sm:$0xf0]  ;;  %v9569_v33 = vor.u32 %v12479_v30, %v9568_v28  ;;  %7381 = vmatpush.bf16.msra.mxu1 %v9313_v25 }
 0x1ac   : > { %v9296_v34 = vld [vmem:[%s14184_s10 + $0x1a0] sm:$0xf]  ;;  %v12411_v35 = vld [vmem:[%s14184_s10 + $0x1ac] sm:$0xf0]  ;;  %v9169_v37 = vor.u32 %v12379_v32, %v9168_v31  ;;  %7394 = vmatpush.bf16.msra.mxu2 %v9441_v29 }
 0x1ad   : > { %v9424_v36 = vld [vmem:[%s14184_s10 + $0x2a0] sm:$0xf]  ;;  %v12443_v38 = vld [vmem:[%s14184_s10 + $0x2ac] sm:$0xf0]  ;;  %v9297_v41 = vor.u32 %v12411_v35, %v9296_v34  ;;  %7407 = vmatpush.bf16.msra.mxu3 %v9569_v33 }
 0x1ae   : > { %v9552_v39 = vld [vmem:[%s14184_s10 + $0x3a0] sm:$0xf]  ;;  %v12475_v40 = vld [vmem:[%s14184_s10 + $0x3ac] sm:$0xf0]  ;;  %v9425_v42 = vor.u32 %v12443_v38, %v9424_v36  ;;  %7369 = vmatpush.bf16.msra.mxu0 %v9169_v37 }
 0x1af   : > { %v9152_v43 = vld [vmem:[%s14184_s10 + $0x80] sm:$0xf]  ;;  %v12375_v44 = vld [vmem:[%s14184_s10 + $0x8c] sm:$0xf0]  ;;  %v9553_v46 = vor.u32 %v12475_v40, %v9552_v39  ;;  %7382 = vmatpush.bf16.msra.mxu1 %v9297_v41 }
 0x1b0   : > { %v9280_v45 = vld [vmem:[%s14184_s10 + $0x180] sm:$0xf]  ;;  %v12407_v47 = vld [vmem:[%s14184_s10 + $0x18c] sm:$0xf0]  ;;  %v9153_v52 = vor.u32 %v12375_v44, %v9152_v43  ;;  %7395 = vmatpush.bf16.msra.mxu2 %v9425_v42 }
 0x1b1   : > { %v9408_v48 = vld [vmem:[%s14184_s10 + $0x280] sm:$0xf]  ;;  %v12439_v49 = vld [vmem:[%s14184_s10 + $0x28c] sm:$0xf0]  ;;  %v9281_v53 = vor.u32 %v12407_v47, %v9280_v45  ;;  %7408 = vmatpush.bf16.msra.mxu3 %v9553_v46 }
 0x1b2   : > { %v9536_v50 = vld [vmem:[%s14184_s10 + $0x380] sm:$0xf]  ;;  %v12471_v51 = vld [vmem:[%s14184_s10 + $0x38c] sm:$0xf0]  ;;  %v9409_v54 = vor.u32 %v12439_v49, %v9408_v48  ;;  %7370 = vmatpush.bf16.msra.mxu0 %v9153_v52 }
 0x1b3   : > { %v9136_v55 = vld [vmem:[%s14184_s10 + $0x60] sm:$0xf]  ;;  %v12371_v56 = vld [vmem:[%s14184_s10 + $0x6c] sm:$0xf0]  ;;  %v9537_v58 = vor.u32 %v12471_v51, %v9536_v50  ;;  %7383 = vmatpush.bf16.msra.mxu1 %v9281_v53 }
 0x1b4   : > { %v9264_v57 = vld [vmem:[%s14184_s10 + $0x160] sm:$0xf]  ;;  %v12403_v59 = vld [vmem:[%s14184_s10 + $0x16c] sm:$0xf0]  ;;  %v9137_v0 = vor.u32 %v12371_v56, %v9136_v55  ;;  %7396 = vmatpush.bf16.msra.mxu2 %v9409_v54 }
 0x1b5   : > { %v9392_v60 = vld [vmem:[%s14184_s10 + $0x260] sm:$0xf]  ;;  %v12435_v61 = vld [vmem:[%s14184_s10 + $0x26c] sm:$0xf0]  ;;  %v9265_v1 = vor.u32 %v12403_v59, %v9264_v57  ;;  %7409 = vmatpush.bf16.msra.mxu3 %v9537_v58 }
 0x1b6   : > { %v9520_v62 = vld [vmem:[%s14184_s10 + $0x360] sm:$0xf]  ;;  %v12467_v63 = vld [vmem:[%s14184_s10 + $0x36c] sm:$0xf0]  ;;  %v9393_v2 = vor.u32 %v12435_v61, %v9392_v60  ;;  %7371 = vmatpush.bf16.msra.mxu0 %v9137_v0 }
 0x1b7   : > { %v9120_v3 = vld [vmem:[%s14184_s10 + $0x40] sm:$0xf]  ;;  %v12367_v4 = vld [vmem:[%s14184_s10 + $0x4c] sm:$0xf0]  ;;  %v9521_v6 = vor.u32 %v12467_v63, %v9520_v62  ;;  %7384 = vmatpush.bf16.msra.mxu1 %v9265_v1 }
 0x1b8   : > { %v9248_v5 = vld [vmem:[%s14184_s10 + $0x140] sm:$0xf]  ;;  %v12399_v7 = vld [vmem:[%s14184_s10 + $0x14c] sm:$0xf0]  ;;  %v9121_v12 = vor.u32 %v12367_v4, %v9120_v3  ;;  %7397 = vmatpush.bf16.msra.mxu2 %v9393_v2  ;;  %v2599_v3 = vld [vmem:[%s16037_s0] sm:$0xff] }
 0x1b9   : > { %v9376_v8 = vld [vmem:[%s14184_s10 + $0x240] sm:$0xf]  ;;  %v12431_v9 = vld [vmem:[%s14184_s10 + $0x24c] sm:$0xf0]  ;;  %v9249_v13 = vor.u32 %v12399_v7, %v9248_v5  ;;  %7410 = vmatpush.bf16.msra.mxu3 %v9521_v6  ;;  %3388 = vst [vmem:[#allocation1] ss:$9 sm:$0xff] %v2599_v3 }
 0x1ba   : > { %v9504_v10 = vld [vmem:[%s14184_s10 + $0x340] sm:$0xf]  ;;  %v12463_v11 = vld [vmem:[%s14184_s10 + $0x34c] sm:$0xf0]  ;;  %v9377_v14 = vor.u32 %v12431_v9, %v9376_v8  ;;  %7372 = vmatpush.bf16.msra.mxu0 %v9121_v12 }
 0x1bb   : > { %v9104_v15 = vld [vmem:[%s14184_s10 + $0x20] sm:$0xf]  ;;  %v12363_v16 = vld [vmem:[%s14184_s10 + $0x2c] sm:$0xf0]  ;;  %v9505_v18 = vor.u32 %v12463_v11, %v9504_v10  ;;  %7385 = vmatpush.bf16.msra.mxu1 %v9249_v13 }
 0x1bc   : > { %v9232_v17 = vld [vmem:[%s14184_s10 + $0x120] sm:$0xf]  ;;  %v12395_v19 = vld [vmem:[%s14184_s10 + $0x12c] sm:$0xf0]  ;;  %v9105_v24 = vor.u32 %v12363_v16, %v9104_v15  ;;  %7398 = vmatpush.bf16.msra.mxu2 %v9377_v14 }
 0x1bd   : > { %v9360_v20 = vld [vmem:[%s14184_s10 + $0x220] sm:$0xf]  ;;  %v12427_v21 = vld [vmem:[%s14184_s10 + $0x22c] sm:$0xf0]  ;;  %v9233_v27 = vor.u32 %v12395_v19, %v9232_v17  ;;  %7411 = vmatpush.bf16.msra.mxu3 %v9505_v18 }
 0x1be   : > { %v9488_v22 = vld [vmem:[%s14184_s10 + $0x320] sm:$0xf]  ;;  %v12459_v23 = vld [vmem:[%s14184_s10 + $0x32c] sm:$0xf0]  ;;  %v9361_v28 = vor.u32 %v12427_v21, %v9360_v20  ;;  %7373 = vmatpush.bf16.msra.mxu0 %v9105_v24 }
 0x1bf   : > { %v9088_v25 = vld [vmem:[%s14184_s10] sm:$0xf]  ;;  %v12359_v26 = vld [vmem:[%s14184_s10 + $0xc] sm:$0xf0]  ;;  %v9489_v32 = vor.u32 %v12459_v23, %v9488_v22  ;;  %7386 = vmatpush.bf16.msra.mxu1 %v9233_v27 }
 0x1c0   : > { %v9216_v29 = vld [vmem:[%s14184_s10 + $0x100] sm:$0xf]  ;;  %v12391_v30 = vld [vmem:[%s14184_s10 + $0x10c] sm:$0xf0]  ;;  %v9089_v39 = vor.u32 %v12359_v26, %v9088_v25  ;;  %7399 = vmatpush.bf16.msra.mxu2 %v9361_v28 }
 0x1c1   : > { %v9344_v31 = vld [vmem:[%s14184_s10 + $0x200] sm:$0xf]  ;;  %v12423_v33 = vld [vmem:[%s14184_s10 + $0x20c] sm:$0xf0]  ;;  %v9217_v43 = vor.u32 %v12391_v30, %v9216_v29  ;;  %7412 = vmatpush.bf16.msra.mxu3 %v9489_v32  ;;  %v14291_v29 = vld [vmem:[#allocation1] sm:$0xff] }
 0x1c2   : > { %v9472_v34 = vld [vmem:[%s14184_s10 + $0x300] sm:$0xf]  ;;  %v12455_v35 = vld [vmem:[%s14184_s10 + $0x30c] sm:$0xf0]  ;;  %v9345_v44 = vor.u32 %v12423_v33, %v9344_v31  ;;  %7374 = vmatpush.bf16.msra.mxu0 %v9089_v39 }
 0x1c3   : > { %v9712_v36 = vld [vmem:[%s14184_s10 + $0x4e0] sm:$0xf]  ;;  %v12515_v37 = vld [vmem:[%s14184_s10 + $0x4ec] sm:$0xf0]  ;;  %v9473_v47 = vor.u32 %v12455_v35, %v9472_v34  ;;  %7387 = vmatpush.bf16.msra.mxu1 %v9217_v43 }
 0x1c4   : > { %v9840_v38 = vld [vmem:[%s14184_s10 + $0x5e0] sm:$0xf]  ;;  %v12547_v40 = vld [vmem:[%s14184_s10 + $0x5ec] sm:$0xf0]  ;;  %v9713_v48 = vor.u32 %v12515_v37, %v9712_v36  ;;  %7400 = vmatpush.bf16.msra.mxu2 %v9345_v44 }
 0x1c5   : > { %v9968_v41 = vld [vmem:[%s14184_s10 + $0x6e0] sm:$0xf]  ;;  %v12579_v42 = vld [vmem:[%s14184_s10 + $0x6ec] sm:$0xf0]  ;;  %v9841_v49 = vor.u32 %v12547_v40, %v9840_v38  ;;  %7413 = vmatpush.bf16.msra.mxu3 %v9473_v47  ;;  %7375 = vmatmul.bf16.vlgmr.msra.gmra.mxu0 %v14291_v29 }
 0x1c6   : > { %v10096_v45 = vld [vmem:[%s14184_s10 + $0x7e0] sm:$0xf]  ;;  %v12611_v46 = vld [vmem:[%s14184_s10 + $0x7ec] sm:$0xf0]  ;;  %v9969_v50 = vor.u32 %v12579_v42, %v9968_v41  ;;  %7419 = vmatpush.bf16.msrb.mxu0 %v9713_v48 }
 0x1c7   : > { %v9696_v51 = vld [vmem:[%s14184_s10 + $0x4c0] sm:$0xf]  ;;  %v12511_v52 = vld [vmem:[%s14184_s10 + $0x4cc] sm:$0xf0]  ;;  %v10097_v54 = vor.u32 %v12611_v46, %v10096_v45  ;;  %7432 = vmatpush.bf16.msrb.mxu1 %v9841_v49 }
 0x1c8   : > { %v9824_v53 = vld [vmem:[%s14184_s10 + $0x5c0] sm:$0xf]  ;;  %v12543_v55 = vld [vmem:[%s14184_s10 + $0x5cc] sm:$0xf0]  ;;  %v9697_v60 = vor.u32 %v12511_v52, %v9696_v51  ;;  %7445 = vmatpush.bf16.msrb.mxu2 %v9969_v50 }
 0x1c9   : > { %v9952_v56 = vld [vmem:[%s14184_s10 + $0x6c0] sm:$0xf]  ;;  %v12575_v57 = vld [vmem:[%s14184_s10 + $0x6cc] sm:$0xf0]  ;;  %v9825_v63 = vor.u32 %v12543_v55, %v9824_v53  ;;  %7458 = vmatpush.bf16.msrb.mxu3 %v10097_v54 }
 0x1ca   : > { %v10080_v58 = vld [vmem:[%s14184_s10 + $0x7c0] sm:$0xf]  ;;  %v12607_v59 = vld [vmem:[%s14184_s10 + $0x7cc] sm:$0xf0]  ;;  %v9953_v0 = vor.u32 %v12575_v57, %v9952_v56  ;;  %7420 = vmatpush.bf16.msrb.mxu0 %v9697_v60 }
 0x1cb   : > { %v9680_v61 = vld [vmem:[%s14184_s10 + $0x4a0] sm:$0xf]  ;;  %v12507_v62 = vld [vmem:[%s14184_s10 + $0x4ac] sm:$0xf0]  ;;  %v10081_v4 = vor.u32 %v12607_v59, %v10080_v58  ;;  %7433 = vmatpush.bf16.msrb.mxu1 %v9825_v63 }
 0x1cc   : > { %v9808_v1 = vld [vmem:[%s14184_s10 + $0x5a0] sm:$0xf]  ;;  %v12539_v2 = vld [vmem:[%s14184_s10 + $0x5ac] sm:$0xf0]  ;;  %v9681_v9 = vor.u32 %v12507_v62, %v9680_v61  ;;  %7446 = vmatpush.bf16.msrb.mxu2 %v9953_v0 }
 0x1cd   : > { %v9936_v5 = vld [vmem:[%s14184_s10 + $0x6a0] sm:$0xf]  ;;  %v12571_v6 = vld [vmem:[%s14184_s10 + $0x6ac] sm:$0xf0]  ;;  %v9809_v10 = vor.u32 %v12539_v2, %v9808_v1  ;;  %7459 = vmatpush.bf16.msrb.mxu3 %v10081_v4 }
 0x1ce   : > { %v10064_v7 = vld [vmem:[%s14184_s10 + $0x7a0] sm:$0xf]  ;;  %v12603_v8 = vld [vmem:[%s14184_s10 + $0x7ac] sm:$0xf0]  ;;  %v9937_v11 = vor.u32 %v12571_v6, %v9936_v5  ;;  %7421 = vmatpush.bf16.msrb.mxu0 %v9681_v9  ;;  %v14334_v9 = vld [vmem:[#allocation1 + $0x3f] sm:$0xff] }
 0x1cf   : > { %v9664_v12 = vld [vmem:[%s14184_s10 + $0x480] sm:$0xf]  ;;  %v12503_v13 = vld [vmem:[%s14184_s10 + $0x48c] sm:$0xf0]  ;;  %v10065_v15 = vor.u32 %v12603_v8, %v10064_v7  ;;  %7434 = vmatpush.bf16.msrb.mxu1 %v9809_v10  ;;  %v14336_v10 = vld [vmem:[#allocation1 + $0x2d] sm:$0xff] }
 0x1d0   : > { %v9792_v14 = vld [vmem:[%s14184_s10 + $0x580] sm:$0xf]  ;;  %v12535_v16 = vld [vmem:[%s14184_s10 + $0x58c] sm:$0xf0]  ;;  %v9665_v22 = vor.u32 %v12503_v13, %v9664_v12  ;;  %7447 = vmatpush.bf16.msrb.mxu2 %v9937_v11 }
 0x1d1   : > { %v9920_v17 = vld [vmem:[%s14184_s10 + $0x680] sm:$0xf]  ;;  %v12567_v18 = vld [vmem:[%s14184_s10 + $0x68c] sm:$0xf0]  ;;  %v9793_v26 = vor.u32 %v12535_v16, %v9792_v14  ;;  %7460 = vmatpush.bf16.msrb.mxu3 %v10065_v15 }
 0x1d2   : > { %v10048_v19 = vld [vmem:[%s14184_s10 + $0x780] sm:$0xf]  ;;  %v12599_v20 = vld [vmem:[%s14184_s10 + $0x78c] sm:$0xf0]  ;;  %v9921_v27 = vor.u32 %v12567_v18, %v9920_v17  ;;  %7422 = vmatpush.bf16.msrb.mxu0 %v9665_v22 }
 0x1d3   : > { %v9648_v21 = vld [vmem:[%s14184_s10 + $0x460] sm:$0xf]  ;;  %v12499_v23 = vld [vmem:[%s14184_s10 + $0x46c] sm:$0xf0]  ;;  %v10049_v31 = vor.u32 %v12599_v20, %v10048_v19  ;;  %7435 = vmatpush.bf16.msrb.mxu1 %v9793_v26 }
 0x1d4   : > { %v9776_v24 = vld [vmem:[%s14184_s10 + $0x560] sm:$0xf]  ;;  %v12531_v25 = vld [vmem:[%s14184_s10 + $0x56c] sm:$0xf0]  ;;  %v9649_v37 = vor.u32 %v12499_v23, %v9648_v21  ;;  %7448 = vmatpush.bf16.msrb.mxu2 %v9921_v27 }
 0x1d5   : > { %v14289_v28 = vld [vmem:[#allocation1 + $0x12] sm:$0xff]  ;;  %v14293_v30 = vld [vmem:[#allocation1 + $0x1b] sm:$0xff]  ;;  %v9904_v32 = vld [vmem:[%s14184_s10 + $0x660] sm:$0xf]  ;;  %v9777_v38 = vor.u32 %v12531_v25, %v9776_v24  ;;  %7461 = vmatpush.bf16.msrb.mxu3 %v10049_v31 }
 0x1d6   : > { %v12563_v33 = vld [vmem:[%s14184_s10 + $0x66c] sm:$0xf0]  ;;  %7401 = vmatmul.bf16.vlgmr.msra.gmra.mxu2 %v14289_v28  ;;  %v14298_v34 = vld [vmem:[#allocation1 + $0x9] sm:$0xff]  ;;  %7414 = vmatmul.bf16.vlgmr.msra.gmra.mxu3 %v14293_v30 }
 0x1d7   : > { %v10032_v35 = vld [vmem:[%s14184_s10 + $0x760] sm:$0xf]  ;;  %v12595_v36 = vld [vmem:[%s14184_s10 + $0x76c] sm:$0xf0]  ;;  %7388 = vmatmul.bf16.vlgmr.msra.gmra.mxu1 %v14298_v34  ;;  %v9905_v39 = vor.u32 %v12563_v33, %v9904_v32  ;;  %7423 = vmatpush.bf16.msrb.mxu0 %v9649_v37 }
 0x1d8   : > { %v9632_v40 = vld [vmem:[%s14184_s10 + $0x440] sm:$0xf]  ;;  %v12495_v41 = vld [vmem:[%s14184_s10 + $0x44c] sm:$0xf0]  ;;  %v10033_v43 = vor.u32 %v12595_v36, %v10032_v35  ;;  %7436 = vmatpush.bf16.msrb.mxu1 %v9777_v38 }
 0x1d9   : > { %v9760_v42 = vld [vmem:[%s14184_s10 + $0x540] sm:$0xf]  ;;  %v12527_v44 = vld [vmem:[%s14184_s10 + $0x54c] sm:$0xf0]  ;;  %v9633_v49 = vor.u32 %v12495_v41, %v9632_v40  ;;  %7449 = vmatpush.bf16.msrb.mxu2 %v9905_v39 }
 0x1da   : > { %v9888_v45 = vld [vmem:[%s14184_s10 + $0x640] sm:$0xf]  ;;  %v12559_v46 = vld [vmem:[%s14184_s10 + $0x64c] sm:$0xf0]  ;;  %v9761_v51 = vor.u32 %v12527_v44, %v9760_v42  ;;  %7462 = vmatpush.bf16.msrb.mxu3 %v10033_v43 }
 0x1db   : > { %v10016_v47 = vld [vmem:[%s14184_s10 + $0x740] sm:$0xf]  ;;  %v12591_v48 = vld [vmem:[%s14184_s10 + $0x74c] sm:$0xf0]  ;;  %v9889_v52 = vor.u32 %v12559_v46, %v9888_v45  ;;  %7424 = vmatpush.bf16.msrb.mxu0 %v9633_v49 }
 0x1dc   : > { %v9616_v50 = vld [vmem:[%s14184_s10 + $0x420] sm:$0xf]  ;;  %v12491_v53 = vld [vmem:[%s14184_s10 + $0x42c] sm:$0xf0]  ;;  %v10017_v56 = vor.u32 %v12591_v48, %v10016_v47  ;;  %7437 = vmatpush.bf16.msrb.mxu1 %v9761_v51 }
 0x1dd   : > { %v9744_v54 = vld [vmem:[%s14184_s10 + $0x520] sm:$0xf]  ;;  %v12523_v55 = vld [vmem:[%s14184_s10 + $0x52c] sm:$0xf0]  ;;  %v9617_v63 = vor.u32 %v12491_v53, %v9616_v50  ;;  %7450 = vmatpush.bf16.msrb.mxu2 %v9889_v52 }
 0x1de   : > { %v9872_v57 = vld [vmem:[%s14184_s10 + $0x620] sm:$0xf]  ;;  %v12555_v58 = vld [vmem:[%s14184_s10 + $0x62c] sm:$0xf0]  ;;  %v9745_v6 = vor.u32 %v12523_v55, %v9744_v54  ;;  %7463 = vmatpush.bf16.msrb.mxu3 %v10017_v56 }
 0x1df   : > { %v10000_v59 = vld [vmem:[%s14184_s10 + $0x720] sm:$0xf]  ;;  %v12587_v60 = vld [vmem:[%s14184_s10 + $0x72c] sm:$0xf0]  ;;  %v9873_v7 = vor.u32 %v12555_v58, %v9872_v57  ;;  %7425 = vmatpush.bf16.msrb.mxu0 %v9617_v63 }
 0x1e0   : > { %v9600_v61 = vld [vmem:[%s14184_s10 + $0x400] sm:$0xf]  ;;  %v12487_v62 = vld [vmem:[%s14184_s10 + $0x40c] sm:$0xf0]  ;;  %v10001_v11 = vor.u32 %v12587_v60, %v10000_v59  ;;  %7438 = vmatpush.bf16.msrb.mxu1 %v9745_v6 }
 0x1e1   : > { %v9728_v0 = vld [vmem:[%s14184_s10 + $0x500] sm:$0xf]  ;;  %v12519_v1 = vld [vmem:[%s14184_s10 + $0x50c] sm:$0xf0]  ;;  %v9601_v17 = vor.u32 %v12487_v62, %v9600_v61  ;;  %7451 = vmatpush.bf16.msrb.mxu2 %v9873_v7 }
 0x1e2   : > { %v9856_v2 = vld [vmem:[%s14184_s10 + $0x600] sm:$0xf]  ;;  %v12551_v3 = vld [vmem:[%s14184_s10 + $0x60c] sm:$0xf0]  ;;  %v9729_v21 = vor.u32 %v12519_v1, %v9728_v0  ;;  %7464 = vmatpush.bf16.msrb.mxu3 %v10001_v11 }
 0x1e3   : > { %v14327_v4 = vld [vmem:[#allocation1 + $0x36] sm:$0xff]  ;;  %v2600_v5 = vld [vmem:[%s16037_s0 + $0x8] sm:$0xff]  ;;  %v9857_v22 = vor.u32 %v12551_v3, %v9856_v2  ;;  %7426 = vmatpush.bf16.msrb.mxu0 %v9601_v17 }
 0x1e4   : > { %v14332_v8 = vld [vmem:[#allocation1 + $0x24] sm:$0xff]  ;;  %v12583_v13 = vld [vmem:[%s14184_s10 + $0x70c] sm:$0xf0]  ;;  %7439 = vmatpush.bf16.msrb.mxu1 %v9729_v21 }
 0x1e5   : > { %v9984_v12 = vld [vmem:[%s14184_s10 + $0x700] sm:$0xf]  ;;  %3398 = vst [vmem:[#allocation1] ss:$9 sm:$0xff] %v2600_v5  ;;  %v12643_v15 = vld [vmem:[%s14184_s10 + $0x8ec] sm:$0xf0]  ;;  %7452 = vmatpush.bf16.msrb.mxu2 %v9857_v22 }
 0x1e6   : > { %v10224_v14 = vld [vmem:[%s14184_s10 + $0x8e0] sm:$0xf]  ;;  %v12675_v18 = vld [vmem:[%s14184_s10 + $0x9ec] sm:$0xf0]  ;;  %v9985_v25 = vor.u32 %v12583_v13, %v9984_v12  ;;  %7427 = vmatmul.bf16.vlgmr.msrb.gmra.mxu0 %v14332_v8 }
 0x1e7   : > { %v10352_v16 = vld [vmem:[%s14184_s10 + $0x9e0] sm:$0xf]  ;;  %v12707_v20 = vld [vmem:[%s14184_s10 + $0xaec] sm:$0xf0]  ;;  %v10225_v26 = vor.u32 %v12643_v15, %v10224_v14  ;;  %7440 = vmatmul.bf16.vlgmr.msrb.gmra.mxu1 %v14336_v10 }
 0x1e8   : > { %v10480_v19 = vld [vmem:[%s14184_s10 + $0xae0] sm:$0xf]  ;;  %v12739_v24 = vld [vmem:[%s14184_s10 + $0xbec] sm:$0xf0]  ;;  %v10353_v27 = vor.u32 %v12675_v18, %v10352_v16  ;;  %7465 = vmatpush.bf16.msrb.mxu3 %v9985_v25  ;;  %7453 = vmatmul.bf16.vlgmr.msrb.gmra.mxu2 %v14327_v4 }
 0x1e9   : > { %v10608_v23 = vld [vmem:[%s14184_s10 + $0xbe0] sm:$0xf]  ;;  %v10481_v31 = vor.u32 %v12707_v20, %v10480_v19  ;;  %v12639_v33 = vld [vmem:[%s14184_s10 + $0x8cc] sm:$0xf0]  ;;  %7471 = vmatpush.bf16.msra.mxu0 %v10225_v26 }
 0x1ea   : > { %v10208_v32 = vld [vmem:[%s14184_s10 + $0x8c0] sm:$0xf]  ;;  %v10609_v36 = vor.u32 %v12739_v24, %v10608_v23  ;;  %v12671_v37 = vld [vmem:[%s14184_s10 + $0x9cc] sm:$0xf0]  ;;  %7484 = vmatpush.bf16.msra.mxu1 %v10353_v27 }
 0x1eb   : > { %v10336_v35 = vld [vmem:[%s14184_s10 + $0x9c0] sm:$0xf]  ;;  %v12703_v39 = vld [vmem:[%s14184_s10 + $0xacc] sm:$0xf0]  ;;  %v10209_v42 = vor.u32 %v12639_v33, %v10208_v32  ;;  %7497 = vmatpush.bf16.msra.mxu2 %v10481_v31  ;;  %7466 = vmatmul.bf16.vlgmr.msrb.gmra.mxu3 %v14334_v9 }
 0x1ec   : > { %v10464_v38 = vld [vmem:[%s14184_s10 + $0xac0] sm:$0xf]  ;;  %v12735_v41 = vld [vmem:[%s14184_s10 + $0xbcc] sm:$0xf0]  ;;  %v10337_v43 = vor.u32 %v12671_v37, %v10336_v35  ;;  %7510 = vmatpush.bf16.msra.mxu3 %v10609_v36 }
 0x1ed   : > { %v10592_v40 = vld [vmem:[%s14184_s10 + $0xbc0] sm:$0xf]  ;;  %v10465_v44 = vor.u32 %v12703_v39, %v10464_v38  ;;  %v12635_v46 = vld [vmem:[%s14184_s10 + $0x8ac] sm:$0xf0]  ;;  %7472 = vmatpush.bf16.msra.mxu0 %v10209_v42 }
 0x1ee   : > { %v10192_v45 = vld [vmem:[%s14184_s10 + $0x8a0] sm:$0xf]  ;;  %v10593_v48 = vor.u32 %v12735_v41, %v10592_v40  ;;  %v12667_v49 = vld [vmem:[%s14184_s10 + $0x9ac] sm:$0xf0]  ;;  %7485 = vmatpush.bf16.msra.mxu1 %v10337_v43 }
 0x1ef   : > { %v10320_v47 = vld [vmem:[%s14184_s10 + $0x9a0] sm:$0xf]  ;;  %v12699_v51 = vld [vmem:[%s14184_s10 + $0xaac] sm:$0xf0]  ;;  %v10193_v54 = vor.u32 %v12635_v46, %v10192_v45  ;;  %7498 = vmatpush.bf16.msra.mxu2 %v10465_v44 }
 0x1f0   : > { %v10448_v50 = vld [vmem:[%s14184_s10 + $0xaa0] sm:$0xf]  ;;  %v12731_v53 = vld [vmem:[%s14184_s10 + $0xbac] sm:$0xf0]  ;;  %v10321_v55 = vor.u32 %v12667_v49, %v10320_v47  ;;  %7511 = vmatpush.bf16.msra.mxu3 %v10593_v48 }
 0x1f1   : > { %v10576_v52 = vld [vmem:[%s14184_s10 + $0xba0] sm:$0xf]  ;;  %v10449_v56 = vor.u32 %v12699_v51, %v10448_v50  ;;  %v12631_v58 = vld [vmem:[%s14184_s10 + $0x88c] sm:$0xf0]  ;;  %7473 = vmatpush.bf16.msra.mxu0 %v10193_v54 }
 0x1f2   : > { %v10176_v57 = vld [vmem:[%s14184_s10 + $0x880] sm:$0xf]  ;;  %v10577_v60 = vor.u32 %v12731_v53, %v10576_v52  ;;  %v12663_v61 = vld [vmem:[%s14184_s10 + $0x98c] sm:$0xf0]  ;;  %7486 = vmatpush.bf16.msra.mxu1 %v10321_v55 }
 0x1f3   : > { %v10304_v59 = vld [vmem:[%s14184_s10 + $0x980] sm:$0xf]  ;;  %v12695_v63 = vld [vmem:[%s14184_s10 + $0xa8c] sm:$0xf0]  ;;  %v10177_v2 = vor.u32 %v12631_v58, %v10176_v57  ;;  %7499 = vmatpush.bf16.msra.mxu2 %v10449_v56 }
 0x1f4   : > { %v10432_v62 = vld [vmem:[%s14184_s10 + $0xa80] sm:$0xf]  ;;  %v12727_v1 = vld [vmem:[%s14184_s10 + $0xb8c] sm:$0xf0]  ;;  %v10305_v3 = vor.u32 %v12663_v61, %v10304_v59  ;;  %7512 = vmatpush.bf16.msra.mxu3 %v10577_v60 }
 0x1f5   : > { %v10560_v0 = vld [vmem:[%s14184_s10 + $0xb80] sm:$0xf]  ;;  %v10433_v5 = vor.u32 %v12695_v63, %v10432_v62  ;;  %v12627_v7 = vld [vmem:[%s14184_s10 + $0x86c] sm:$0xf0]  ;;  %7474 = vmatpush.bf16.msra.mxu0 %v10177_v2 }
 0x1f6   : > { %v10160_v6 = vld [vmem:[%s14184_s10 + $0x860] sm:$0xf]  ;;  %v10561_v12 = vor.u32 %v12727_v1, %v10560_v0  ;;  %v12659_v13 = vld [vmem:[%s14184_s10 + $0x96c] sm:$0xf0]  ;;  %7487 = vmatpush.bf16.msra.mxu1 %v10305_v3 }
 0x1f7   : > { %v10288_v11 = vld [vmem:[%s14184_s10 + $0x960] sm:$0xf]  ;;  %v12691_v15 = vld [vmem:[%s14184_s10 + $0xa6c] sm:$0xf0]  ;;  %v10161_v18 = vor.u32 %v12627_v7, %v10160_v6  ;;  %7500 = vmatpush.bf16.msra.mxu2 %v10433_v5 }
 0x1f8   : > { %v10416_v14 = vld [vmem:[%s14184_s10 + $0xa60] sm:$0xf]  ;;  %v12723_v17 = vld [vmem:[%s14184_s10 + $0xb6c] sm:$0xf0]  ;;  %v10289_v19 = vor.u32 %v12659_v13, %v10288_v11  ;;  %7513 = vmatpush.bf16.msra.mxu3 %v10561_v12 }
 0x1f9   : > { %v10544_v16 = vld [vmem:[%s14184_s10 + $0xb60] sm:$0xf]  ;;  %v10417_v20 = vor.u32 %v12691_v15, %v10416_v14  ;;  %v12623_v22 = vld [vmem:[%s14184_s10 + $0x84c] sm:$0xf0]  ;;  %7475 = vmatpush.bf16.msra.mxu0 %v10161_v18 }
 0x1fa   : > { %v10144_v21 = vld [vmem:[%s14184_s10 + $0x840] sm:$0xf]  ;;  %v10545_v24 = vor.u32 %v12723_v17, %v10544_v16  ;;  %v12655_v25 = vld [vmem:[%s14184_s10 + $0x94c] sm:$0xf0]  ;;  %7488 = vmatpush.bf16.msra.mxu1 %v10289_v19 }
 0x1fb   : > { %v10272_v23 = vld [vmem:[%s14184_s10 + $0x940] sm:$0xf]  ;;  %v12687_v27 = vld [vmem:[%s14184_s10 + $0xa4c] sm:$0xf0]  ;;  %v10145_v33 = vor.u32 %v12623_v22, %v10144_v21  ;;  %7501 = vmatpush.bf16.msra.mxu2 %v10417_v20  ;;  %v14422_v20 = vld [vmem:[#allocation1] sm:$0xff] }
 0x1fc   : > { %v10400_v26 = vld [vmem:[%s14184_s10 + $0xa40] sm:$0xf]  ;;  %v12719_v32 = vld [vmem:[%s14184_s10 + $0xb4c] sm:$0xf0]  ;;  %v10273_v35 = vor.u32 %v12655_v25, %v10272_v23  ;;  %7514 = vmatpush.bf16.msra.mxu3 %v10545_v24 }
 0x1fd   : > { %v10528_v31 = vld [vmem:[%s14184_s10 + $0xb40] sm:$0xf]  ;;  %v10401_v36 = vor.u32 %v12687_v27, %v10400_v26  ;;  %v12619_v38 = vld [vmem:[%s14184_s10 + $0x82c] sm:$0xf0]  ;;  %7476 = vmatpush.bf16.msra.mxu0 %v10145_v33 }
 0x1fe   : > { %v10128_v37 = vld [vmem:[%s14184_s10 + $0x820] sm:$0xf]  ;;  %v10529_v40 = vor.u32 %v12719_v32, %v10528_v31  ;;  %v12651_v41 = vld [vmem:[%s14184_s10 + $0x92c] sm:$0xf0]  ;;  %7489 = vmatpush.bf16.msra.mxu1 %v10273_v35 }
 0x1ff   : > { %v10256_v39 = vld [vmem:[%s14184_s10 + $0x920] sm:$0xf]  ;;  %v12683_v43 = vld [vmem:[%s14184_s10 + $0xa2c] sm:$0xf0]  ;;  %v10129_v46 = vor.u32 %v12619_v38, %v10128_v37  ;;  %7502 = vmatpush.bf16.msra.mxu2 %v10401_v36 }
 0x200   : > { %v10384_v42 = vld [vmem:[%s14184_s10 + $0xa20] sm:$0xf]  ;;  %v12715_v45 = vld [vmem:[%s14184_s10 + $0xb2c] sm:$0xf0]  ;;  %v10257_v49 = vor.u32 %v12651_v41, %v10256_v39  ;;  %7515 = vmatpush.bf16.msra.mxu3 %v10529_v40 }
 0x201   : > { %v10512_v44 = vld [vmem:[%s14184_s10 + $0xb20] sm:$0xf]  ;;  %v12615_v48 = vld [vmem:[%s14184_s10 + $0x80c] sm:$0xf0]  ;;  %v10385_v50 = vor.u32 %v12683_v43, %v10384_v42  ;;  %7477 = vmatpush.bf16.msra.mxu0 %v10129_v46 }
 0x202   : > { %v10112_v47 = vld [vmem:[%s14184_s10 + $0x800] sm:$0xf]  ;;  %v12647_v52 = vld [vmem:[%s14184_s10 + $0x90c] sm:$0xf0]  ;;  %v10513_v54 = vor.u32 %v12715_v45, %v10512_v44  ;;  %7490 = vmatpush.bf16.msra.mxu1 %v10257_v49 }
 0x203   : > { %v10240_v51 = vld [vmem:[%s14184_s10 + $0x900] sm:$0xf]  ;;  %v12679_v55 = vld [vmem:[%s14184_s10 + $0xa0c] sm:$0xf0]  ;;  %v10113_v61 = vor.u32 %v12615_v48, %v10112_v47  ;;  %7503 = vmatpush.bf16.msra.mxu2 %v10385_v50 }
 0x204   : > { %v10368_v53 = vld [vmem:[%s14184_s10 + $0xa00] sm:$0xf]  ;;  %v12711_v57 = vld [vmem:[%s14184_s10 + $0xb0c] sm:$0xf0]  ;;  %v10241_v1 = vor.u32 %v12647_v52, %v10240_v51  ;;  %7516 = vmatpush.bf16.msra.mxu3 %v10513_v54 }
 0x205   : > { %v10496_v56 = vld [vmem:[%s14184_s10 + $0xb00] sm:$0xf]  ;;  %v12771_v59 = vld [vmem:[%s14184_s10 + $0xcec] sm:$0xf0]  ;;  %v10369_v2 = vor.u32 %v12679_v55, %v10368_v53  ;;  %7478 = vmatpush.bf16.msra.mxu0 %v10113_v61 }
 0x206   : > { %v10736_v58 = vld [vmem:[%s14184_s10 + $0xce0] sm:$0xf]  ;;  %v12803_v62 = vld [vmem:[%s14184_s10 + $0xdec] sm:$0xf0]  ;;  %v10497_v6 = vor.u32 %v12711_v57, %v10496_v56  ;;  %7491 = vmatpush.bf16.msra.mxu1 %v10241_v1 }
 0x207   : > { %v10864_v60 = vld [vmem:[%s14184_s10 + $0xde0] sm:$0xf]  ;;  %v12835_v0 = vld [vmem:[%s14184_s10 + $0xeec] sm:$0xf0]  ;;  %v10737_v7 = vor.u32 %v12771_v59, %v10736_v58  ;;  %7504 = vmatpush.bf16.msra.mxu2 %v10369_v2 }
 0x208   : > { %v10992_v63 = vld [vmem:[%s14184_s10 + $0xee0] sm:$0xf]  ;;  %v12867_v5 = vld [vmem:[%s14184_s10 + $0xfec] sm:$0xf0]  ;;  %v10865_v11 = vor.u32 %v12803_v62, %v10864_v60  ;;  %7517 = vmatpush.bf16.msra.mxu3 %v10497_v6  ;;  %7479 = vmatmul.bf16.vlgmr.msra.gmra.mxu0 %v14422_v20 }
 0x209   : > { %v11120_v3 = vld [vmem:[%s14184_s10 + $0xfe0] sm:$0xf]  ;;  %v10993_v12 = vor.u32 %v12835_v0, %v10992_v63  ;;  %v12767_v14 = vld [vmem:[%s14184_s10 + $0xccc] sm:$0xf0]  ;;  %7523 = vmatpush.bf16.msrb.mxu0 %v10737_v7 }
 0x20a   : > { %v10720_v13 = vld [vmem:[%s14184_s10 + $0xcc0] sm:$0xf]  ;;  %v11121_v16 = vor.u32 %v12867_v5, %v11120_v3  ;;  %v12799_v17 = vld [vmem:[%s14184_s10 + $0xdcc] sm:$0xf0]  ;;  %7536 = vmatpush.bf16.msrb.mxu1 %v10865_v11 }
 0x20b   : > { %v10848_v15 = vld [vmem:[%s14184_s10 + $0xdc0] sm:$0xf]  ;;  %v12831_v19 = vld [vmem:[%s14184_s10 + $0xecc] sm:$0xf0]  ;;  %v10721_v26 = vor.u32 %v12767_v14, %v10720_v13  ;;  %7549 = vmatpush.bf16.msrb.mxu2 %v10993_v12 }
 0x20c   : > { %v10976_v18 = vld [vmem:[%s14184_s10 + $0xec0] sm:$0xf]  ;;  %v12863_v22 = vld [vmem:[%s14184_s10 + $0xfcc] sm:$0xf0]  ;;  %v10849_v27 = vor.u32 %v12799_v17, %v10848_v15  ;;  %7562 = vmatpush.bf16.msrb.mxu3 %v11121_v16 }
 0x20d   : > { %v11104_v21 = vld [vmem:[%s14184_s10 + $0xfc0] sm:$0xf]  ;;  %v14426_v23 = vld [vmem:[#allocation1 + $0x12] sm:$0xff]  ;;  %v14430_v25 = vld [vmem:[#allocation1 + $0x1b] sm:$0xff]  ;;  %v10977_v31 = vor.u32 %v12831_v19, %v10976_v18  ;;  %7524 = vmatpush.bf16.msrb.mxu0 %v10721_v26 }
 0x20e   : > { %v14428_v24 = vld [vmem:[#allocation1 + $0x9] sm:$0xff]  ;;  %v12763_v33 = vld [vmem:[%s14184_s10 + $0xcac] sm:$0xf0]  ;;  %v11105_v36 = vor.u32 %v12863_v22, %v11104_v21  ;;  %7505 = vmatmul.bf16.vlgmr.msra.gmra.mxu2 %v14426_v23  ;;  %7518 = vmatmul.bf16.vlgmr.msra.gmra.mxu3 %v14430_v25 }
 0x20f   : > { %v10704_v32 = vld [vmem:[%s14184_s10 + $0xca0] sm:$0xf]  ;;  %v12795_v37 = vld [vmem:[%s14184_s10 + $0xdac] sm:$0xf0]  ;;  %7492 = vmatmul.bf16.vlgmr.msra.gmra.mxu1 %v14428_v24  ;;  %7550 = vmatpush.bf16.msrb.mxu2 %v10977_v31 }
 0x210   : > { %v10832_v35 = vld [vmem:[%s14184_s10 + $0xda0] sm:$0xf]  ;;  %v12827_v39 = vld [vmem:[%s14184_s10 + $0xeac] sm:$0xf0]  ;;  %v10705_v42 = vor.u32 %v12763_v33, %v10704_v32  ;;  %7537 = vmatpush.bf16.msrb.mxu1 %v10849_v27  ;;  %7563 = vmatpush.bf16.msrb.mxu3 %v11105_v36 }
 0x211   : > { %v10960_v38 = vld [vmem:[%s14184_s10 + $0xea0] sm:$0xf]  ;;  %v12859_v41 = vld [vmem:[%s14184_s10 + $0xfac] sm:$0xf0]  ;;  %v10833_v43 = vor.u32 %v12795_v37, %v10832_v35 }
 0x212   : > { %v11088_v40 = vld [vmem:[%s14184_s10 + $0xfa0] sm:$0xf]  ;;  %v10961_v44 = vor.u32 %v12827_v39, %v10960_v38  ;;  %v12759_v46 = vld [vmem:[%s14184_s10 + $0xc8c] sm:$0xf0]  ;;  %7525 = vmatpush.bf16.msrb.mxu0 %v10705_v42 }
 0x213   : > { %v10688_v45 = vld [vmem:[%s14184_s10 + $0xc80] sm:$0xf]  ;;  %v11089_v48 = vor.u32 %v12859_v41, %v11088_v40  ;;  %v12791_v49 = vld [vmem:[%s14184_s10 + $0xd8c] sm:$0xf0] }
 0x214   : > { %v10816_v47 = vld [vmem:[%s14184_s10 + $0xd80] sm:$0xf]  ;;  %v12823_v51 = vld [vmem:[%s14184_s10 + $0xe8c] sm:$0xf0]  ;;  %v10689_v54 = vor.u32 %v12759_v46, %v10688_v45  ;;  %7538 = vmatpush.bf16.msrb.mxu1 %v10833_v43  ;;  %7551 = vmatpush.bf16.msrb.mxu2 %v10961_v44 }
 0x215   : > { %v10944_v50 = vld [vmem:[%s14184_s10 + $0xe80] sm:$0xf]  ;;  %v12855_v53 = vld [vmem:[%s14184_s10 + $0xf8c] sm:$0xf0]  ;;  %v10817_v55 = vor.u32 %v12791_v49, %v10816_v47  ;;  %7564 = vmatpush.bf16.msrb.mxu3 %v11089_v48 }
 0x216   : > { %v11072_v52 = vld [vmem:[%s14184_s10 + $0xf80] sm:$0xf]  ;;  %v10945_v56 = vor.u32 %v12823_v51, %v10944_v50  ;;  %v12755_v58 = vld [vmem:[%s14184_s10 + $0xc6c] sm:$0xf0]  ;;  %7526 = vmatpush.bf16.msrb.mxu0 %v10689_v54 }
 0x217   : > { %v10672_v57 = vld [vmem:[%s14184_s10 + $0xc60] sm:$0xf]  ;;  %v11073_v60 = vor.u32 %v12855_v53, %v11072_v52  ;;  %v12787_v61 = vld [vmem:[%s14184_s10 + $0xd6c] sm:$0xf0] }
 0x218   : > { %v10800_v59 = vld [vmem:[%s14184_s10 + $0xd60] sm:$0xf]  ;;  %v12819_v63 = vld [vmem:[%s14184_s10 + $0xe6c] sm:$0xf0]  ;;  %v10673_v2 = vor.u32 %v12755_v58, %v10672_v57  ;;  %7539 = vmatpush.bf16.msrb.mxu1 %v10817_v55  ;;  %7552 = vmatpush.bf16.msrb.mxu2 %v10945_v56  ;;  %v14492_v56 = vld [vmem:[#allocation1 + $0x2d] sm:$0xff] }
 0x219   : > { %v10928_v62 = vld [vmem:[%s14184_s10 + $0xe60] sm:$0xf]  ;;  %v12851_v1 = vld [vmem:[%s14184_s10 + $0xf6c] sm:$0xf0]  ;;  %v10801_v3 = vor.u32 %v12787_v61, %v10800_v59  ;;  %7565 = vmatpush.bf16.msrb.mxu3 %v11073_v60  ;;  %v14494_v57 = vld [vmem:[#allocation1 + $0x3f] sm:$0xff] }
 0x21a   : > { %v11056_v0 = vld [vmem:[%s14184_s10 + $0xf60] sm:$0xf]  ;;  %v10929_v5 = vor.u32 %v12819_v63, %v10928_v62  ;;  %v12751_v7 = vld [vmem:[%s14184_s10 + $0xc4c] sm:$0xf0]  ;;  %7527 = vmatpush.bf16.msrb.mxu0 %v10673_v2  ;;  %v2601_v58 = vld [vmem:[%s16037_s0 + $0x10] sm:$0xff] }
 0x21b   : > { %v10656_v6 = vld [vmem:[%s14184_s10 + $0xc40] sm:$0xf]  ;;  %v11057_v12 = vor.u32 %v12851_v1, %v11056_v0  ;;  %v12783_v13 = vld [vmem:[%s14184_s10 + $0xd4c] sm:$0xf0] }
 0x21c   : > { %v10784_v11 = vld [vmem:[%s14184_s10 + $0xd40] sm:$0xf]  ;;  %v12815_v15 = vld [vmem:[%s14184_s10 + $0xe4c] sm:$0xf0]  ;;  %v10657_v18 = vor.u32 %v12751_v7, %v10656_v6  ;;  %7540 = vmatpush.bf16.msrb.mxu1 %v10801_v3  ;;  %7553 = vmatpush.bf16.msrb.mxu2 %v10929_v5 }
 0x21d   : > { %v10912_v14 = vld [vmem:[%s14184_s10 + $0xe40] sm:$0xf]  ;;  %v12847_v17 = vld [vmem:[%s14184_s10 + $0xf4c] sm:$0xf0]  ;;  %v10785_v21 = vor.u32 %v12783_v13, %v10784_v11  ;;  %7566 = vmatpush.bf16.msrb.mxu3 %v11057_v12 }
 0x21e   : > { %v11040_v16 = vld [vmem:[%s14184_s10 + $0xf40] sm:$0xf]  ;;  %v10913_v22 = vor.u32 %v12815_v15, %v10912_v14  ;;  %v12747_v26 = vld [vmem:[%s14184_s10 + $0xc2c] sm:$0xf0]  ;;  %7528 = vmatpush.bf16.msrb.mxu0 %v10657_v18 }
 0x21f   : > { %v10640_v19 = vld [vmem:[%s14184_s10 + $0xc20] sm:$0xf]  ;;  %v12779_v31 = vld [vmem:[%s14184_s10 + $0xd2c] sm:$0xf0]  ;;  %v11041_v32 = vor.u32 %v12847_v17, %v11040_v16 }
 0x220   : > { %v10768_v27 = vld [vmem:[%s14184_s10 + $0xd20] sm:$0xf]  ;;  %v12811_v35 = vld [vmem:[%s14184_s10 + $0xe2c] sm:$0xf0]  ;;  %v10641_v40 = vor.u32 %v12747_v26, %v10640_v19  ;;  %7541 = vmatpush.bf16.msrb.mxu1 %v10785_v21  ;;  %7554 = vmatpush.bf16.msrb.mxu2 %v10913_v22 }
 0x221   : > { %v10896_v33 = vld [vmem:[%s14184_s10 + $0xe20] sm:$0xf]  ;;  %v12843_v37 = vld [vmem:[%s14184_s10 + $0xf2c] sm:$0xf0]  ;;  %v10769_v45 = vor.u32 %v12779_v31, %v10768_v27  ;;  %7567 = vmatpush.bf16.msrb.mxu3 %v11041_v32 }
 0x222   : > { %v11024_v36 = vld [vmem:[%s14184_s10 + $0xf20] sm:$0xf]  ;;  %v12743_v39 = vld [vmem:[%s14184_s10 + $0xc0c] sm:$0xf0]  ;;  %v10897_v46 = vor.u32 %v12811_v35, %v10896_v33  ;;  %7529 = vmatpush.bf16.msrb.mxu0 %v10641_v40 }
 0x223   : > { %v10624_v38 = vld [vmem:[%s14184_s10 + $0xc00] sm:$0xf]  ;;  %v12775_v42 = vld [vmem:[%s14184_s10 + $0xd0c] sm:$0xf0]  ;;  %v11025_v51 = vor.u32 %v12843_v37, %v11024_v36 }
 0x224   : > { %v10752_v41 = vld [vmem:[%s14184_s10 + $0xd00] sm:$0xf]  ;;  %v12807_v44 = vld [vmem:[%s14184_s10 + $0xe0c] sm:$0xf0]  ;;  %v10625_v59 = vor.u32 %v12743_v39, %v10624_v38  ;;  %7542 = vmatpush.bf16.msrb.mxu1 %v10769_v45  ;;  %7555 = vmatpush.bf16.msrb.mxu2 %v10897_v46 }
 0x225   : > { %v10880_v43 = vld [vmem:[%s14184_s10 + $0xe00] sm:$0xf]  ;;  %v12839_v48 = vld [vmem:[%s14184_s10 + $0xf0c] sm:$0xf0]  ;;  %v10753_v62 = vor.u32 %v12775_v42, %v10752_v41  ;;  %7568 = vmatpush.bf16.msrb.mxu3 %v11025_v51 }
 0x226   : > { %v11008_v47 = vld [vmem:[%s14184_s10 + $0xf00] sm:$0xf]  ;;  %v12899_v50 = vld [vmem:[%s14184_s10 + $0x10ec] sm:$0xf0]  ;;  %v10881_v63 = vor.u32 %v12807_v44, %v10880_v43  ;;  %7530 = vmatpush.bf16.msrb.mxu0 %v10625_v59 }
 0x227   : > { %v11248_v49 = vld [vmem:[%s14184_s10 + $0x10e0] sm:$0xf]  ;;  %v12931_v53 = vld [vmem:[%s14184_s10 + $0x11ec] sm:$0xf0]  ;;  %v11009_v2 = vor.u32 %v12839_v48, %v11008_v47 }
 0x228   : > { %v11376_v52 = vld [vmem:[%s14184_s10 + $0x11e0] sm:$0xf]  ;;  %v14490_v55 = vld [vmem:[#allocation1 + $0x36] sm:$0xff]  ;;  %v11249_v3 = vor.u32 %v12899_v50, %v11248_v49  ;;  %7543 = vmatpush.bf16.msrb.mxu1 %v10753_v62  ;;  %7556 = vmatpush.bf16.msrb.mxu2 %v10881_v63 }
 0x229   : > { %v14488_v54 = vld [vmem:[#allocation1 + $0x24] sm:$0xff]  ;;  %v12963_v61 = vld [vmem:[%s14184_s10 + $0x12ec] sm:$0xf0]  ;;  %v11377_v5 = vor.u32 %v12931_v53, %v11376_v52  ;;  %7569 = vmatpush.bf16.msrb.mxu3 %v11009_v2 }
 0x22a   : > { %v11504_v60 = vld [vmem:[%s14184_s10 + $0x12e0] sm:$0xf]  ;;  %3408 = vst [vmem:[#allocation1] ss:$9 sm:$0xff] %v2601_v58  ;;  %v12995_v1 = vld [vmem:[%s14184_s10 + $0x13ec] sm:$0xf0]  ;;  %7575 = vmatpush.bf16.msra.mxu0 %v11249_v3 }
 0x22b   : > { %v11632_v0 = vld [vmem:[%s14184_s10 + $0x13e0] sm:$0xf]  ;;  %v11505_v6 = vor.u32 %v12963_v61, %v11504_v60  ;;  %v12895_v11 = vld [vmem:[%s14184_s10 + $0x10cc] sm:$0xf0]  ;;  %7531 = vmatmul.bf16.vlgmr.msrb.gmra.mxu0 %v14488_v54  ;;  %7557 = vmatmul.bf16.vlgmr.msrb.gmra.mxu2 %v14490_v55 }
 0x22c   : > { %v11232_v7 = vld [vmem:[%s14184_s10 + $0x10c0] sm:$0xf]  ;;  %v11633_v13 = vor.u32 %v12995_v1, %v11632_v0  ;;  %v12927_v14 = vld [vmem:[%s14184_s10 + $0x11cc] sm:$0xf0]  ;;  %7588 = vmatpush.bf16.msra.mxu1 %v11377_v5  ;;  %7570 = vmatmul.bf16.vlgmr.msrb.gmra.mxu3 %v14494_v57 }
 0x22d   : > { %v11360_v12 = vld [vmem:[%s14184_s10 + $0x11c0] sm:$0xf]  ;;  %v12959_v16 = vld [vmem:[%s14184_s10 + $0x12cc] sm:$0xf0]  ;;  %v11233_v19 = vor.u32 %v12895_v11, %v11232_v7  ;;  %7601 = vmatpush.bf16.msra.mxu2 %v11505_v6  ;;  %7544 = vmatmul.bf16.vlgmr.msrb.gmra.mxu1 %v14492_v56 }
 0x22e   : > { %v11488_v15 = vld [vmem:[%s14184_s10 + $0x12c0] sm:$0xf]  ;;  %v12991_v18 = vld [vmem:[%s14184_s10 + $0x13cc] sm:$0xf0]  ;;  %v11361_v21 = vor.u32 %v12927_v14, %v11360_v12  ;;  %7614 = vmatpush.bf16.msra.mxu3 %v11633_v13 }
 0x22f   : > { %v11616_v17 = vld [vmem:[%s14184_s10 + $0x13c0] sm:$0xf]  ;;  %v11489_v22 = vor.u32 %v12959_v16, %v11488_v15  ;;  %v12891_v27 = vld [vmem:[%s14184_s10 + $0x10ac] sm:$0xf0]  ;;  %7576 = vmatpush.bf16.msra.mxu0 %v11233_v19 }
 0x230   : > { %v11216_v26 = vld [vmem:[%s14184_s10 + $0x10a0] sm:$0xf]  ;;  %v11617_v32 = vor.u32 %v12991_v18, %v11616_v17  ;;  %v12923_v33 = vld [vmem:[%s14184_s10 + $0x11ac] sm:$0xf0]  ;;  %7589 = vmatpush.bf16.msra.mxu1 %v11361_v21 }
 0x231   : > { %v11344_v31 = vld [vmem:[%s14184_s10 + $0x11a0] sm:$0xf]  ;;  %v12955_v36 = vld [vmem:[%s14184_s10 + $0x12ac] sm:$0xf0]  ;;  %v11217_v39 = vor.u32 %v12891_v27, %v11216_v26  ;;  %7602 = vmatpush.bf16.msra.mxu2 %v11489_v22 }
 0x232   : > { %v11472_v35 = vld [vmem:[%s14184_s10 + $0x12a0] sm:$0xf]  ;;  %v12987_v38 = vld [vmem:[%s14184_s10 + $0x13ac] sm:$0xf0]  ;;  %v11345_v40 = vor.u32 %v12923_v33, %v11344_v31  ;;  %7615 = vmatpush.bf16.msra.mxu3 %v11617_v32 }
 0x233   : > { %v11600_v37 = vld [vmem:[%s14184_s10 + $0x13a0] sm:$0xf]  ;;  %v11473_v41 = vor.u32 %v12955_v36, %v11472_v35  ;;  %v12887_v43 = vld [vmem:[%s14184_s10 + $0x108c] sm:$0xf0]  ;;  %7577 = vmatpush.bf16.msra.mxu0 %v11217_v39 }
 0x234   : > { %v11200_v42 = vld [vmem:[%s14184_s10 + $0x1080] sm:$0xf]  ;;  %v11601_v45 = vor.u32 %v12987_v38, %v11600_v37  ;;  %v12919_v46 = vld [vmem:[%s14184_s10 + $0x118c] sm:$0xf0]  ;;  %7590 = vmatpush.bf16.msra.mxu1 %v11345_v40 }
 0x235   : > { %v11328_v44 = vld [vmem:[%s14184_s10 + $0x1180] sm:$0xf]  ;;  %v12951_v48 = vld [vmem:[%s14184_s10 + $0x128c] sm:$0xf0]  ;;  %v11201_v51 = vor.u32 %v12887_v43, %v11200_v42  ;;  %7603 = vmatpush.bf16.msra.mxu2 %v11473_v41 }
 0x236   : > { %v11456_v47 = vld [vmem:[%s14184_s10 + $0x1280] sm:$0xf]  ;;  %v12983_v50 = vld [vmem:[%s14184_s10 + $0x138c] sm:$0xf0]  ;;  %v11329_v52 = vor.u32 %v12919_v46, %v11328_v44  ;;  %7616 = vmatpush.bf16.msra.mxu3 %v11601_v45 }
 0x237   : > { %v11584_v49 = vld [vmem:[%s14184_s10 + $0x1380] sm:$0xf]  ;;  %v11457_v53 = vor.u32 %v12951_v48, %v11456_v47  ;;  %v12883_v59 = vld [vmem:[%s14184_s10 + $0x106c] sm:$0xf0]  ;;  %7578 = vmatpush.bf16.msra.mxu0 %v11201_v51 }
 0x238   : > { %v11184_v58 = vld [vmem:[%s14184_s10 + $0x1060] sm:$0xf]  ;;  %v11585_v61 = vor.u32 %v12983_v50, %v11584_v49  ;;  %v12915_v62 = vld [vmem:[%s14184_s10 + $0x116c] sm:$0xf0]  ;;  %7591 = vmatpush.bf16.msra.mxu1 %v11329_v52 }
 0x239   : > { %v11312_v60 = vld [vmem:[%s14184_s10 + $0x1160] sm:$0xf]  ;;  %v12947_v0 = vld [vmem:[%s14184_s10 + $0x126c] sm:$0xf0]  ;;  %v11185_v3 = vor.u32 %v12883_v59, %v11184_v58  ;;  %7604 = vmatpush.bf16.msra.mxu2 %v11457_v53 }
 0x23a   : > { %v11440_v63 = vld [vmem:[%s14184_s10 + $0x1260] sm:$0xf]  ;;  %v12979_v2 = vld [vmem:[%s14184_s10 + $0x136c] sm:$0xf0]  ;;  %v11313_v5 = vor.u32 %v12915_v62, %v11312_v60  ;;  %7617 = vmatpush.bf16.msra.mxu3 %v11585_v61 }
 0x23b   : > { %v11568_v1 = vld [vmem:[%s14184_s10 + $0x1360] sm:$0xf]  ;;  %v11441_v6 = vor.u32 %v12947_v0, %v11440_v63  ;;  %v12879_v11 = vld [vmem:[%s14184_s10 + $0x104c] sm:$0xf0]  ;;  %7579 = vmatpush.bf16.msra.mxu0 %v11185_v3 }
 0x23c   : > { %v11168_v7 = vld [vmem:[%s14184_s10 + $0x1040] sm:$0xf]  ;;  %v11569_v13 = vor.u32 %v12979_v2, %v11568_v1  ;;  %v12911_v14 = vld [vmem:[%s14184_s10 + $0x114c] sm:$0xf0]  ;;  %7592 = vmatpush.bf16.msra.mxu1 %v11313_v5 }
 0x23d   : > { %v11296_v12 = vld [vmem:[%s14184_s10 + $0x1140] sm:$0xf]  ;;  %v12943_v16 = vld [vmem:[%s14184_s10 + $0x124c] sm:$0xf0]  ;;  %v11169_v19 = vor.u32 %v12879_v11, %v11168_v7  ;;  %7605 = vmatpush.bf16.msra.mxu2 %v11441_v6 }
 0x23e   : > { %v11424_v15 = vld [vmem:[%s14184_s10 + $0x1240] sm:$0xf]  ;;  %v12975_v18 = vld [vmem:[%s14184_s10 + $0x134c] sm:$0xf0]  ;;  %v11297_v21 = vor.u32 %v12911_v14, %v11296_v12  ;;  %7618 = vmatpush.bf16.msra.mxu3 %v11569_v13 }
 0x23f   : > { %v11552_v17 = vld [vmem:[%s14184_s10 + $0x1340] sm:$0xf]  ;;  %v11425_v22 = vor.u32 %v12943_v16, %v11424_v15  ;;  %v12875_v27 = vld [vmem:[%s14184_s10 + $0x102c] sm:$0xf0]  ;;  %7580 = vmatpush.bf16.msra.mxu0 %v11169_v19 }
 0x240   : > { %v11152_v26 = vld [vmem:[%s14184_s10 + $0x1020] sm:$0xf]  ;;  %v11553_v32 = vor.u32 %v12975_v18, %v11552_v17  ;;  %v12907_v33 = vld [vmem:[%s14184_s10 + $0x112c] sm:$0xf0]  ;;  %7593 = vmatpush.bf16.msra.mxu1 %v11297_v21  ;;  %v14577_v17 = vld [vmem:[#allocation1] sm:$0xff] }
 0x241   : > { %v11280_v31 = vld [vmem:[%s14184_s10 + $0x1120] sm:$0xf]  ;;  %v12939_v36 = vld [vmem:[%s14184_s10 + $0x122c] sm:$0xf0]  ;;  %v11153_v39 = vor.u32 %v12875_v27, %v11152_v26  ;;  %7606 = vmatpush.bf16.msra.mxu2 %v11425_v22 }
 0x242   : > { %v11408_v35 = vld [vmem:[%s14184_s10 + $0x1220] sm:$0xf]  ;;  %v12971_v38 = vld [vmem:[%s14184_s10 + $0x132c] sm:$0xf0]  ;;  %v11281_v42 = vor.u32 %v12907_v33, %v11280_v31  ;;  %7619 = vmatpush.bf16.msra.mxu3 %v11553_v32 }
 0x243   : > { %v11536_v37 = vld [vmem:[%s14184_s10 + $0x1320] sm:$0xf]  ;;  %v12871_v41 = vld [vmem:[%s14184_s10 + $0x100c] sm:$0xf0]  ;;  %v11409_v43 = vor.u32 %v12939_v36, %v11408_v35  ;;  %7581 = vmatpush.bf16.msra.mxu0 %v11153_v39 }
 0x244   : > { %v11136_v40 = vld [vmem:[%s14184_s10 + $0x1000] sm:$0xf]  ;;  %v12903_v45 = vld [vmem:[%s14184_s10 + $0x110c] sm:$0xf0]  ;;  %v11537_v47 = vor.u32 %v12971_v38, %v11536_v37  ;;  %7594 = vmatpush.bf16.msra.mxu1 %v11281_v42 }
 0x245   : > { %v11264_v44 = vld [vmem:[%s14184_s10 + $0x1100] sm:$0xf]  ;;  %v12935_v48 = vld [vmem:[%s14184_s10 + $0x120c] sm:$0xf0]  ;;  %v11137_v58 = vor.u32 %v12871_v41, %v11136_v40  ;;  %7607 = vmatpush.bf16.msra.mxu2 %v11409_v43 }
 0x246   : > { %v11392_v46 = vld [vmem:[%s14184_s10 + $0x1200] sm:$0xf]  ;;  %v12967_v50 = vld [vmem:[%s14184_s10 + $0x130c] sm:$0xf0]  ;;  %v11265_v62 = vor.u32 %v12903_v45, %v11264_v44  ;;  %7620 = vmatpush.bf16.msra.mxu3 %v11537_v47 }
 0x247   : > { %v11520_v49 = vld [vmem:[%s14184_s10 + $0x1300] sm:$0xf]  ;;  %v13027_v52 = vld [vmem:[%s14184_s10 + $0x14ec] sm:$0xf0]  ;;  %v11393_v63 = vor.u32 %v12935_v48, %v11392_v46  ;;  %7582 = vmatpush.bf16.msra.mxu0 %v11137_v58 }
 0x248   : > { %v11760_v51 = vld [vmem:[%s14184_s10 + $0x14e0] sm:$0xf]  ;;  %v13059_v59 = vld [vmem:[%s14184_s10 + $0x15ec] sm:$0xf0]  ;;  %v11521_v2 = vor.u32 %v12967_v50, %v11520_v49  ;;  %7595 = vmatpush.bf16.msra.mxu1 %v11265_v62 }
 0x249   : > { %v11888_v53 = vld [vmem:[%s14184_s10 + $0x15e0] sm:$0xf]  ;;  %v13091_v61 = vld [vmem:[%s14184_s10 + $0x16ec] sm:$0xf0]  ;;  %v11761_v3 = vor.u32 %v13027_v52, %v11760_v51  ;;  %7608 = vmatpush.bf16.msra.mxu2 %v11393_v63 }
 0x24a   : > { %v12016_v60 = vld [vmem:[%s14184_s10 + $0x16e0] sm:$0xf]  ;;  %v13123_v1 = vld [vmem:[%s14184_s10 + $0x17ec] sm:$0xf0]  ;;  %v11889_v5 = vor.u32 %v13059_v59, %v11888_v53  ;;  %7621 = vmatpush.bf16.msra.mxu3 %v11521_v2  ;;  %7583 = vmatmul.bf16.vlgmr.msra.gmra.mxu0 %v14577_v17 }
 0x24b   : > { %v12144_v0 = vld [vmem:[%s14184_s10 + $0x17e0] sm:$0xf]  ;;  %v12017_v6 = vor.u32 %v13091_v61, %v12016_v60  ;;  %v13023_v11 = vld [vmem:[%s14184_s10 + $0x14cc] sm:$0xf0]  ;;  %7627 = vmatpush.bf16.msrb.mxu0 %v11761_v3 }
 0x24c   : > { %v11744_v7 = vld [vmem:[%s14184_s10 + $0x14c0] sm:$0xf]  ;;  %v12145_v13 = vor.u32 %v13123_v1, %v12144_v0  ;;  %v13055_v14 = vld [vmem:[%s14184_s10 + $0x15cc] sm:$0xf0]  ;;  %7640 = vmatpush.bf16.msrb.mxu1 %v11889_v5 }
 0x24d   : > { %v11872_v12 = vld [vmem:[%s14184_s10 + $0x15c0] sm:$0xf]  ;;  %v13087_v16 = vld [vmem:[%s14184_s10 + $0x16cc] sm:$0xf0]  ;;  %v11745_v27 = vor.u32 %v13023_v11, %v11744_v7  ;;  %7653 = vmatpush.bf16.msrb.mxu2 %v12017_v6 }
 0x24e   : > { %v12000_v15 = vld [vmem:[%s14184_s10 + $0x16c0] sm:$0xf]  ;;  %v13119_v19 = vld [vmem:[%s14184_s10 + $0x17cc] sm:$0xf0]  ;;  %v11873_v31 = vor.u32 %v13055_v14, %v11872_v12  ;;  %7666 = vmatpush.bf16.msrb.mxu3 %v12145_v13  ;;  %v14619_v13 = vld [vmem:[#allocation1 + $0x2d] sm:$0xff] }
 0x24f   : > { %v12128_v18 = vld [vmem:[%s14184_s10 + $0x17c0] sm:$0xf]  ;;  %v14581_v21 = vld [vmem:[#allocation1 + $0x12] sm:$0xff]  ;;  %v14585_v26 = vld [vmem:[#allocation1 + $0x1b] sm:$0xff]  ;;  %v12001_v32 = vor.u32 %v13087_v16, %v12000_v15  ;;  %7628 = vmatpush.bf16.msrb.mxu0 %v11745_v27 }
 0x250   : > { %v14583_v22 = vld [vmem:[#allocation1 + $0x9] sm:$0xff]  ;;  %v13019_v35 = vld [vmem:[%s14184_s10 + $0x14ac] sm:$0xf0]  ;;  %v12129_v37 = vor.u32 %v13119_v19, %v12128_v18  ;;  %7609 = vmatmul.bf16.vlgmr.msra.gmra.mxu2 %v14581_v21  ;;  %7622 = vmatmul.bf16.vlgmr.msra.gmra.mxu3 %v14585_v26  ;;  %v14621_v14 = vld [vmem:[#allocation1 + $0x3f] sm:$0xff] }
 0x251   : > { %v11728_v33 = vld [vmem:[%s14184_s10 + $0x14a0] sm:$0xf]  ;;  %v13051_v38 = vld [vmem:[%s14184_s10 + $0x15ac] sm:$0xf0]  ;;  %7596 = vmatmul.bf16.vlgmr.msra.gmra.mxu1 %v14583_v22  ;;  %7654 = vmatpush.bf16.msrb.mxu2 %v12001_v32 }
 0x252   : > { %v11856_v36 = vld [vmem:[%s14184_s10 + $0x15a0] sm:$0xf]  ;;  %v13083_v40 = vld [vmem:[%s14184_s10 + $0x16ac] sm:$0xf0]  ;;  %v11729_v43 = vor.u32 %v13019_v35, %v11728_v33  ;;  %7641 = vmatpush.bf16.msrb.mxu1 %v11873_v31  ;;  %7667 = vmatpush.bf16.msrb.mxu3 %v12129_v37 }
 0x253   : > { %v11984_v39 = vld [vmem:[%s14184_s10 + $0x16a0] sm:$0xf]  ;;  %v13115_v42 = vld [vmem:[%s14184_s10 + $0x17ac] sm:$0xf0]  ;;  %v11857_v44 = vor.u32 %v13051_v38, %v11856_v36 }
 0x254   : > { %v12112_v41 = vld [vmem:[%s14184_s10 + $0x17a0] sm:$0xf]  ;;  %v11985_v45 = vor.u32 %v13083_v40, %v11984_v39  ;;  %v13015_v47 = vld [vmem:[%s14184_s10 + $0x148c] sm:$0xf0]  ;;  %7629 = vmatpush.bf16.msrb.mxu0 %v11729_v43 }
 0x255   : > { %v11712_v46 = vld [vmem:[%s14184_s10 + $0x1480] sm:$0xf]  ;;  %v12113_v49 = vor.u32 %v13115_v42, %v12112_v41  ;;  %v13047_v50 = vld [vmem:[%s14184_s10 + $0x158c] sm:$0xf0]  ;;  %v7376_v41 = vpop.f32.mrf.mxu0 }
 0x256   : > { %v11840_v48 = vld [vmem:[%s14184_s10 + $0x1580] sm:$0xf]  ;;  %v13079_v52 = vld [vmem:[%s14184_s10 + $0x168c] sm:$0xf0]  ;;  %v11713_v60 = vor.u32 %v13015_v47, %v11712_v46  ;;  %7642 = vmatpush.bf16.msrb.mxu1 %v11857_v44  ;;  %7655 = vmatpush.bf16.msrb.mxu2 %v11985_v45  ;;  %v7389_v47 = vpop.f32.mrf.mxu1 }
 0x257   : > { %v11968_v51 = vld [vmem:[%s14184_s10 + $0x1680] sm:$0xf]  ;;  %v13111_v58 = vld [vmem:[%s14184_s10 + $0x178c] sm:$0xf0]  ;;  %v11841_v0 = vor.u32 %v13047_v50, %v11840_v48  ;;  %7668 = vmatpush.bf16.msrb.mxu3 %v12113_v49 }
 0x258   : > { %v12096_v53 = vld [vmem:[%s14184_s10 + $0x1780] sm:$0xf]  ;;  %v13011_v61 = vld [vmem:[%s14184_s10 + $0x146c] sm:$0xf0]  ;;  %v11969_v1 = vor.u32 %v13079_v52, %v11968_v51  ;;  %7630 = vmatpush.bf16.msrb.mxu0 %v11713_v60  ;;  %v7390_v52 = vadd.f32 %v7389_v47, %v7376_v41  ;;  %v12449_v41 = vld [vmem:[%s14184_s10 + $0x2e4] sm:$0xf] }
 0x259   : > { %v11696_v59 = vld [vmem:[%s14184_s10 + $0x1460] sm:$0xf]  ;;  %v13043_v63 = vld [vmem:[%s14184_s10 + $0x156c] sm:$0xf0]  ;;  %v12097_v6 = vor.u32 %v13111_v58, %v12096_v53 }
 0x25a   : > { %v11824_v62 = vld [vmem:[%s14184_s10 + $0x1560] sm:$0xf]  ;;  %v13075_v3 = vld [vmem:[%s14184_s10 + $0x166c] sm:$0xf0]  ;;  %v11697_v16 = vor.u32 %v13011_v61, %v11696_v59  ;;  %7643 = vmatpush.bf16.msrb.mxu1 %v11841_v0  ;;  %7656 = vmatpush.bf16.msrb.mxu2 %v11969_v1 }
 0x25b   : > { %v11952_v2 = vld [vmem:[%s14184_s10 + $0x1660] sm:$0xf]  ;;  %v13107_v7 = vld [vmem:[%s14184_s10 + $0x176c] sm:$0xf0]  ;;  %v11825_v18 = vor.u32 %v13043_v63, %v11824_v62  ;;  %7669 = vmatpush.bf16.msrb.mxu3 %v12097_v6 }
 0x25c   : > { %v12080_v5 = vld [vmem:[%s14184_s10 + $0x1760] sm:$0xf]  ;;  %v14617_v12 = vld [vmem:[#allocation1 + $0x36] sm:$0xff]  ;;  %v11953_v19 = vor.u32 %v13075_v3, %v11952_v2  ;;  %7631 = vmatpush.bf16.msrb.mxu0 %v11697_v16  ;;  %v7402_v3 = vpop.f32.mrf.mxu2 }
 0x25d   : > { %v14615_v11 = vld [vmem:[#allocation1 + $0x24] sm:$0xff]  ;;  %v2602_v15 = vld [vmem:[%s16037_s0 + $0x18] sm:$0x1]  ;;  %v12081_v33 = vor.u32 %v13107_v7, %v12080_v5  ;;  %v7403_v16 = vadd.f32 %v7402_v3, %v7390_v52  ;;  %v9186_v52 = vld [vmem:[%s14184_s10 + $0xd0] sm:$0xf0] }
 0x25e   : > { %3418 = vst [vmem:[#allocation1] ss:$9 sm:$0xff] %v2602_v15  ;;  %v11680_v27 = vld [vmem:[%s14184_s10 + $0x1440] sm:$0xf]  ;;  %v13007_v31 = vld [vmem:[%s14184_s10 + $0x144c] sm:$0xf0]  ;;  %7644 = vmatpush.bf16.msrb.mxu1 %v11825_v18  ;;  %7657 = vmatpush.bf16.msrb.mxu2 %v11953_v19  ;;  %v7415_v18 = vpop.f32.mrf.mxu3 }
 0x25f   : > { %v11808_v32 = vld [vmem:[%s14184_s10 + $0x1540] sm:$0xf]  ;;  %v13039_v35 = vld [vmem:[%s14184_s10 + $0x154c] sm:$0xf0]  ;;  %v11681_v40 = vor.u32 %v13007_v31, %v11680_v27  ;;  %7670 = vmatpush.bf16.msrb.mxu3 %v12081_v33  ;;  %v12385_v31 = vld [vmem:[%s14184_s10 + $0xe4] sm:$0xf] }
 0x260   : > { %v11936_v36 = vld [vmem:[%s14184_s10 + $0x1640] sm:$0xf]  ;;  %v13071_v37 = vld [vmem:[%s14184_s10 + $0x164c] sm:$0xf0]  ;;  %v11809_v42 = vor.u32 %v13039_v35, %v11808_v32  ;;  %v9202_v33 = vld [vmem:[%s14184_s10 + $0xf0] sm:$0xf0] }
 0x261   : > { %v12064_v38 = vld [vmem:[%s14184_s10 + $0x1740] sm:$0xf]  ;;  %v13103_v39 = vld [vmem:[%s14184_s10 + $0x174c] sm:$0xf0]  ;;  %v11937_v43 = vor.u32 %v13071_v37, %v11936_v36  ;;  %7632 = vmatpush.bf16.msrb.mxu0 %v11681_v40  ;;  %v12417_v35 = vld [vmem:[%s14184_s10 + $0x1e4] sm:$0xf]  ;;  %v14656_v37 = vadd.f32 %v7415_v18, %v7403_v16 }
 0x262   : > { %v11664_v44 = vld [vmem:[%s14184_s10 + $0x1420] sm:$0xf]  ;;  %v13003_v45 = vld [vmem:[%s14184_s10 + $0x142c] sm:$0xf0]  ;;  %v12065_v48 = vor.u32 %v13103_v39, %v12064_v38  ;;  %7645 = vmatpush.bf16.msrb.mxu1 %v11809_v42  ;;  %v9330_v36 = vld [vmem:[%s14184_s10 + $0x1f0] sm:$0xf0]  ;;  %v7378_v38 = vpop.f32.mrf.mxu0 }
 0x263   : > { %v11792_v46 = vld [vmem:[%s14184_s10 + $0x1520] sm:$0xf]  ;;  %v13035_v49 = vld [vmem:[%s14184_s10 + $0x152c] sm:$0xf0]  ;;  %v11665_v59 = vor.u32 %v13003_v45, %v11664_v44  ;;  %7658 = vmatpush.bf16.msrb.mxu2 %v11937_v43  ;;  %v9458_v42 = vld [vmem:[%s14184_s10 + $0x2f0] sm:$0xf0]  ;;  %v7391_v43 = vpop.f32.mrf.mxu1  ;;  %v9333_v47 = vor.u32 %v12417_v35, %v9330_v36 }
 0x264   : > { %v11920_v50 = vld [vmem:[%s14184_s10 + $0x1620] sm:$0xf]  ;;  %v13067_v51 = vld [vmem:[%s14184_s10 + $0x162c] sm:$0xf0]  ;;  %v11793_v62 = vor.u32 %v13035_v49, %v11792_v46  ;;  %7671 = vmatpush.bf16.msrb.mxu3 %v12065_v48  ;;  %v9205_v46 = vor.u32 %v12385_v31, %v9202_v33  ;;  %v9298_v16 = vld [vmem:[%s14184_s10 + $0x1b0] sm:$0xf0] }
 0x265   : > { %v12048_v53 = vld [vmem:[%s14184_s10 + $0x1720] sm:$0xf]  ;;  %v13099_v58 = vld [vmem:[%s14184_s10 + $0x172c] sm:$0xf0]  ;;  %v11921_v63 = vor.u32 %v13067_v51, %v11920_v50  ;;  %7633 = vmatpush.bf16.msrb.mxu0 %v11665_v59  ;;  %v12381_v50 = vld [vmem:[%s14184_s10 + $0xc4] sm:$0xf]  ;;  %v9461_v51 = vor.u32 %v12449_v41, %v9458_v42 }
 0x266   : > { %v11648_v60 = vld [vmem:[%s14184_s10 + $0x1400] sm:$0xf]  ;;  %v12999_v61 = vld [vmem:[%s14184_s10 + $0x140c] sm:$0xf0]  ;;  %v12049_v5 = vor.u32 %v13099_v58, %v12048_v53  ;;  %7646 = vmatpush.bf16.msrb.mxu1 %v11793_v62  ;;  %v12413_v53 = vld [vmem:[%s14184_s10 + $0x1c4] sm:$0xf] }
 0x267   : > { %v11776_v0 = vld [vmem:[%s14184_s10 + $0x1500] sm:$0xf]  ;;  %v13031_v1 = vld [vmem:[%s14184_s10 + $0x150c] sm:$0xf0]  ;;  %v11649_v32 = vor.u32 %v12999_v61, %v11648_v60  ;;  %7659 = vmatpush.bf16.msrb.mxu2 %v11921_v63  ;;  %v9314_v58 = vld [vmem:[%s14184_s10 + $0x1d0] sm:$0xf0]  ;;  %v7404_v61 = vpop.f32.mrf.mxu2  ;;  %v7417_v63 = vpop.f32.mrf.mxu3 }
 0x268   : > { %v11904_v2 = vld [vmem:[%s14184_s10 + $0x1600] sm:$0xf]  ;;  %v13063_v6 = vld [vmem:[%s14184_s10 + $0x160c] sm:$0xf0]  ;;  %v11777_v39 = vor.u32 %v13031_v1, %v11776_v0  ;;  %7672 = vmatpush.bf16.msrb.mxu3 %v12049_v5  ;;  %v12445_v59 = vld [vmem:[%s14184_s10 + $0x2c4] sm:$0xf]  ;;  %v9189_v0 = vor.u32 %v12381_v50, %v9186_v52  ;;  %v9317_v1 = vor.u32 %v12413_v53, %v9314_v58 }
 0x269   : > { %v12032_v7 = vld [vmem:[%s14184_s10 + $0x1700] sm:$0xf]  ;;  %v13095_v15 = vld [vmem:[%s14184_s10 + $0x170c] sm:$0xf0]  ;;  %v11905_v40 = vor.u32 %v13063_v6, %v11904_v2  ;;  %7634 = vmatpush.bf16.msrb.mxu0 %v11649_v32  ;;  %v9442_v60 = vld [vmem:[%s14184_s10 + $0x2d0] sm:$0xf0] }
 0x26a   : > { %v12208_v19 = vld [vmem:[%s14184_s10 + $0x1860] sm:$0xf]  ;;  %v13139_v27 = vld [vmem:[%s14184_s10 + $0x186c] sm:$0xf0]  ;;  %v12033_v44 = vor.u32 %v13095_v15, %v12032_v7  ;;  %7647 = vmatpush.bf16.msrb.mxu1 %v11777_v39  ;;  %v12377_v5 = vld [vmem:[%s14184_s10 + $0xa4] sm:$0xf]  ;;  %v9445_v6 = vor.u32 %v12445_v59, %v9442_v60 }
 0x26b   : > { %v12209_v45 = vor.u32 %v13139_v27, %v12208_v19  ;;  %v12192_v48 = vld [vmem:[%s14184_s10 + $0x1840] sm:$0xf]  ;;  %v13135_v49 = vld [vmem:[%s14184_s10 + $0x184c] sm:$0xf0]  ;;  %7660 = vmatpush.bf16.msrb.mxu2 %v11905_v40  ;;  %v9170_v7 = vld [vmem:[%s14184_s10 + $0xb0] sm:$0xf0]  ;;  %v7441_v53 = vpop.f32.mrf.mxu1 }
 0x26c   : > { %7673 = vmatpush.bf16.msrb.mxu3 %v12033_v44  ;;  %v12193_v62 = vor.u32 %v13135_v49, %v12192_v48  ;;  %v12176_v2 = vld [vmem:[%s14184_s10 + $0x1820] sm:$0xf]  ;;  %v13131_v3 = vld [vmem:[%s14184_s10 + $0x182c] sm:$0xf0]  ;;  %7635 = vmatmul.bf16.vlgmr.msrb.gmra.mxu0 %v14615_v11  ;;  %v12409_v15 = vld [vmem:[%s14184_s10 + $0x1a4] sm:$0xf]  ;;  %v9173_v32 = vor.u32 %v12377_v5, %v9170_v7 }
 0x26d   : > { %7683 = vmatpush.bf16.msra.mxu0 %v12209_v45  ;;  %7648 = vmatmul.bf16.vlgmr.msrb.gmra.mxu1 %v14619_v13  ;;  %v12441_v18 = vld [vmem:[%s14184_s10 + $0x2a4] sm:$0xf]  ;;  %v9426_v19 = vld [vmem:[%s14184_s10 + $0x2b0] sm:$0xf0]  ;;  %v12177_v27 = vor.u32 %v13131_v3, %v12176_v2  ;;  %v12160_v31 = vld [vmem:[%s14184_s10 + $0x1800] sm:$0xf]  ;;  %v9301_v33 = vor.u32 %v12409_v15, %v9298_v16 }
 0x26e   : > { %7692 = vmatpush.bf16.msra.mxu1 %v9205_v46  ;;  %7661 = vmatmul.bf16.vlgmr.msrb.gmra.mxu2 %v14617_v12  ;;  %v13127_v35 = vld [vmem:[%s14184_s10 + $0x180c] sm:$0xf0]  ;;  %v12373_v36 = vld [vmem:[%s14184_s10 + $0x84] sm:$0xf]  ;;  %v9154_v38 = vld [vmem:[%s14184_s10 + $0x90] sm:$0xf0]  ;;  %v9429_v39 = vor.u32 %v12441_v18, %v9426_v19 }
 0x26f   : > { %7705 = vmatpush.bf16.msra.mxu2 %v9333_v47  ;;  %7674 = vmatmul.bf16.vlgmr.msrb.gmra.mxu3 %v14621_v14  ;;  %v12405_v40 = vld [vmem:[%s14184_s10 + $0x184] sm:$0xf]  ;;  %v9282_v41 = vld [vmem:[%s14184_s10 + $0x190] sm:$0xf0]  ;;  %v12161_v46 = vor.u32 %v13127_v35, %v12160_v31  ;;  %v7428_v47 = vpop.f32.mrf.mxu0  ;;  %v9157_v48 = vor.u32 %v12373_v36, %v9154_v38  ;;  %v7454_v7 = vpop.f32.mrf.mxu2  ;;  %v3419_v38 = vld [vmem:[#allocation1] sm:$0xff] }
 0x270   : > { %7718 = vmatpush.bf16.msra.mxu3 %v9461_v51  ;;  %v12437_v42 = vld [vmem:[%s14184_s10 + $0x284] sm:$0xf]  ;;  %v9410_v43 = vld [vmem:[%s14184_s10 + $0x290] sm:$0xf0]  ;;  %v9285_v49 = vor.u32 %v12405_v40, %v9282_v41  ;;  %v7429_v52 = vadd.f32 %v7428_v47, %v14656_v37 }
 0x271   : > { %7684 = vmatpush.bf16.msra.mxu0 %v12193_v62  ;;  %v12481_v44 = vld [vmem:[%s14184_s10 + $0x3e4] sm:$0xf]  ;;  %v9586_v45 = vld [vmem:[%s14184_s10 + $0x3f0] sm:$0xf0]  ;;  %v9413_v58 = vor.u32 %v12437_v42, %v9410_v43 }
 0x272   : > { %7693 = vmatpush.bf16.msra.mxu1 %v9189_v0  ;;  %v12369_v50 = vld [vmem:[%s14184_s10 + $0x64] sm:$0xf]  ;;  %v9138_v51 = vld [vmem:[%s14184_s10 + $0x70] sm:$0xf0]  ;;  %v9589_v59 = vor.u32 %v12481_v44, %v9586_v45  ;;  %v7442_v2 = vadd.f32 %v7441_v53, %v7429_v52 }
 0x273   : > { %7706 = vmatpush.bf16.msra.mxu2 %v9317_v1  ;;  %v12401_v60 = vld [vmem:[%s14184_s10 + $0x164] sm:$0xf]  ;;  %v9266_v61 = vld [vmem:[%s14184_s10 + $0x170] sm:$0xf0]  ;;  %v9141_v37 = vor.u32 %v12369_v50, %v9138_v51  ;;  %v7443_v45 = vpop.f32.mrf.mxu1 }
 0x274   : > { %7719 = vmatpush.bf16.msra.mxu3 %v9445_v6  ;;  %v12433_v62 = vld [vmem:[%s14184_s10 + $0x264] sm:$0xf]  ;;  %v9394_v63 = vld [vmem:[%s14184_s10 + $0x270] sm:$0xf0]  ;;  %v9269_v3 = vor.u32 %v12401_v60, %v9266_v61  ;;  %v7455_v31 = vadd.f32 %v7454_v7, %v7442_v2 }
 0x275   : > { %7685 = vmatpush.bf16.msra.mxu0 %v12177_v27  ;;  %v12477_v0 = vld [vmem:[%s14184_s10 + $0x3c4] sm:$0xf]  ;;  %v9570_v1 = vld [vmem:[%s14184_s10 + $0x3d0] sm:$0xf0]  ;;  %v9397_v15 = vor.u32 %v12433_v62, %v9394_v63 }
 0x276   : > { %7694 = vmatpush.bf16.msra.mxu1 %v9173_v32  ;;  %v12365_v5 = vld [vmem:[%s14184_s10 + $0x44] sm:$0xf]  ;;  %v9122_v6 = vld [vmem:[%s14184_s10 + $0x50] sm:$0xf0]  ;;  %v9573_v16 = vor.u32 %v12477_v0, %v9570_v1  ;;  %v7467_v32 = vpop.f32.mrf.mxu3 }
 0x277   : > { %7707 = vmatpush.bf16.msra.mxu2 %v9301_v33  ;;  %v12397_v18 = vld [vmem:[%s14184_s10 + $0x144] sm:$0xf]  ;;  %v9250_v19 = vld [vmem:[%s14184_s10 + $0x150] sm:$0xf0]  ;;  %v7430_v40 = vpop.f32.mrf.mxu0  ;;  %v9125_v41 = vor.u32 %v12365_v5, %v9122_v6  ;;  %v7456_v63 = vpop.f32.mrf.mxu2 }
 0x278   : > { %7720 = vmatpush.bf16.msra.mxu3 %v9429_v39  ;;  %v12429_v27 = vld [vmem:[%s14184_s10 + $0x244] sm:$0xf]  ;;  %v9378_v33 = vld [vmem:[%s14184_s10 + $0x250] sm:$0xf0]  ;;  %v14707_v39 = vadd.f32 %v7467_v32, %v7455_v31  ;;  %v9253_v42 = vor.u32 %v12397_v18, %v9250_v19 }
 0x279   : > { %7686 = vmatpush.bf16.msra.mxu0 %v12161_v46  ;;  %v12473_v35 = vld [vmem:[%s14184_s10 + $0x3a4] sm:$0xf]  ;;  %v9554_v36 = vld [vmem:[%s14184_s10 + $0x3b0] sm:$0xf0]  ;;  %v9381_v46 = vor.u32 %v12429_v27, %v9378_v33 }
 0x27a   : > { %7695 = vmatpush.bf16.msra.mxu1 %v9157_v48  ;;  %v12361_v43 = vld [vmem:[%s14184_s10 + $0x24] sm:$0xf]  ;;  %v9106_v44 = vld [vmem:[%s14184_s10 + $0x30] sm:$0xf0]  ;;  %v9557_v47 = vor.u32 %v12473_v35, %v9554_v36 }
 0x27b   : > { %7708 = vmatpush.bf16.msra.mxu2 %v9285_v49  ;;  %v12393_v48 = vld [vmem:[%s14184_s10 + $0x124] sm:$0xf]  ;;  %v9234_v49 = vld [vmem:[%s14184_s10 + $0x130] sm:$0xf0] }
 0x27c   : > { %7721 = vmatpush.bf16.msra.mxu3 %v9413_v58  ;;  %v12425_v50 = vld [vmem:[%s14184_s10 + $0x224] sm:$0xf]  ;;  %12222 = vmatmul.msk.bf16.vlgmr.msra.gmra.mxu0 %vm7364_vm0, %v3419_v38  ;;  %v9362_v51 = vld [vmem:[%s14184_s10 + $0x230] sm:$0xf0]  ;;  %v9109_v58 = vor.u32 %v12361_v43, %v9106_v44 }
 0x27d   : > { %7731 = vmatpush.bf16.msrb.mxu0 %v9589_v59  ;;  %v12469_v52 = vld [vmem:[%s14184_s10 + $0x384] sm:$0xf]  ;;  %v9538_v53 = vld [vmem:[%s14184_s10 + $0x390] sm:$0xf0]  ;;  %v9237_v59 = vor.u32 %v12393_v48, %v9234_v49  ;;  %v9365_v0 = vor.u32 %v12425_v50, %v9362_v51 }
 0x27e   : > { %7696 = vmatpush.bf16.msra.mxu1 %v9141_v37  ;;  %v12357_v60 = vld [vmem:[%s14184_s10 + $0x4] sm:$0xf]  ;;  %v9090_v61 = vld [vmem:[%s14184_s10 + $0x10] sm:$0xf0]  ;;  %v9541_v1 = vor.u32 %v12469_v52, %v9538_v53  ;;  %v7469_v5 = vpop.f32.mrf.mxu3 }
 0x27f   : > { %7709 = vmatpush.bf16.msra.mxu2 %v9269_v3  ;;  %v12389_v62 = vld [vmem:[%s14184_s10 + $0x104] sm:$0xf]  ;;  %v9218_v2 = vld [vmem:[%s14184_s10 + $0x110] sm:$0xf0]  ;;  %v9093_v27 = vor.u32 %v12357_v60, %v9090_v61 }
 0x280   : > { %7722 = vmatpush.bf16.msra.mxu3 %v9397_v15  ;;  %v12421_v37 = vld [vmem:[%s14184_s10 + $0x204] sm:$0xf]  ;;  %v9346_v3 = vld [vmem:[%s14184_s10 + $0x210] sm:$0xf0]  ;;  %v9221_v31 = vor.u32 %v12389_v62, %v9218_v2 }
 0x281   : > { %7732 = vmatpush.bf16.msrb.mxu0 %v9573_v16  ;;  %v12465_v6 = vld [vmem:[%s14184_s10 + $0x364] sm:$0xf]  ;;  %v9522_v7 = vld [vmem:[%s14184_s10 + $0x370] sm:$0xf0]  ;;  %v9349_v35 = vor.u32 %v12421_v37, %v9346_v3 }
 0x282   : > { %7697 = vmatpush.bf16.msra.mxu1 %v9125_v41  ;;  %v12513_v15 = vld [vmem:[%s14184_s10 + $0x4e4] sm:$0xf]  ;;  %v9714_v16 = vld [vmem:[%s14184_s10 + $0x4f0] sm:$0xf0]  ;;  %v9525_v36 = vor.u32 %v12465_v6, %v9522_v7 }
 0x283   : > { %7710 = vmatpush.bf16.msra.mxu2 %v9253_v42  ;;  %v12545_v18 = vld [vmem:[%s14184_s10 + $0x5e4] sm:$0xf]  ;;  %v9842_v19 = vld [vmem:[%s14184_s10 + $0x5f0] sm:$0xf0]  ;;  %v9717_v38 = vor.u32 %v12513_v15, %v9714_v16 }
 0x284   : > { %7723 = vmatpush.bf16.msra.mxu3 %v9381_v46  ;;  %v12577_v32 = vld [vmem:[%s14184_s10 + $0x6e4] sm:$0xf]  ;;  %v9970_v33 = vld [vmem:[%s14184_s10 + $0x6f0] sm:$0xf0]  ;;  %v9845_v40 = vor.u32 %v12545_v18, %v9842_v19 }
 0x285   : > { %7733 = vmatpush.bf16.msrb.mxu0 %v9557_v47  ;;  %v12461_v41 = vld [vmem:[%s14184_s10 + $0x344] sm:$0xf]  ;;  %v9506_v42 = vld [vmem:[%s14184_s10 + $0x350] sm:$0xf0]  ;;  %v9973_v44 = vor.u32 %v12577_v32, %v9970_v33 }
 0x286   : > { %7698 = vmatpush.bf16.msra.mxu1 %v9109_v58  ;;  %v12509_v43 = vld [vmem:[%s14184_s10 + $0x4c4] sm:$0xf]  ;;  %v9698_v45 = vld [vmem:[%s14184_s10 + $0x4d0] sm:$0xf0]  ;;  %v9509_v50 = vor.u32 %v12461_v41, %v9506_v42 }
 0x287   : > { %7711 = vmatpush.bf16.msra.mxu2 %v9237_v59  ;;  %v12541_v46 = vld [vmem:[%s14184_s10 + $0x5c4] sm:$0xf]  ;;  %v9826_v47 = vld [vmem:[%s14184_s10 + $0x5d0] sm:$0xf0]  ;;  %v9701_v51 = vor.u32 %v12509_v43, %v9698_v45 }
 0x288   : > { %7724 = vmatpush.bf16.msra.mxu3 %v9365_v0  ;;  %v12573_v48 = vld [vmem:[%s14184_s10 + $0x6c4] sm:$0xf]  ;;  %v9954_v49 = vld [vmem:[%s14184_s10 + $0x6d0] sm:$0xf0]  ;;  %v9829_v52 = vor.u32 %v12541_v46, %v9826_v47 }
 0x289   : > { %7734 = vmatpush.bf16.msrb.mxu0 %v9541_v1  ;;  %v12457_v53 = vld [vmem:[%s14184_s10 + $0x324] sm:$0xf]  ;;  %v9490_v58 = vld [vmem:[%s14184_s10 + $0x330] sm:$0xf0]  ;;  %v9957_v60 = vor.u32 %v12573_v48, %v9954_v49 }
 0x28a   : > { %7699 = vmatpush.bf16.msra.mxu1 %v9093_v27  ;;  %v12505_v59 = vld [vmem:[%s14184_s10 + $0x4a4] sm:$0xf]  ;;  %v9682_v61 = vld [vmem:[%s14184_s10 + $0x4b0] sm:$0xf0]  ;;  %v9493_v2 = vor.u32 %v12457_v53, %v9490_v58 }
 0x28b   : > { %7712 = vmatpush.bf16.msra.mxu2 %v9221_v31  ;;  %v12537_v62 = vld [vmem:[%s14184_s10 + $0x5a4] sm:$0xf]  ;;  %v9810_v63 = vld [vmem:[%s14184_s10 + $0x5b0] sm:$0xf0]  ;;  %v9685_v3 = vor.u32 %v12505_v59, %v9682_v61  ;;  %v7480_v31 = vpop.f32.mrf.mxu0 }
 0x28c   : > { %7725 = vmatpush.bf16.msra.mxu3 %v9349_v35  ;;  %v12569_v0 = vld [vmem:[%s14184_s10 + $0x6a4] sm:$0xf]  ;;  %v9938_v1 = vld [vmem:[%s14184_s10 + $0x6b0] sm:$0xf0]  ;;  %v9813_v5 = vor.u32 %v12537_v62, %v9810_v63 }
 0x28d   : > { %7735 = vmatpush.bf16.msrb.mxu0 %v9525_v36  ;;  %7700 = vmatmul.bf16.vlgmr.msra.gmra.mxu1 %v14291_v29  ;;  %v12453_v37 = vld [vmem:[%s14184_s10 + $0x304] sm:$0xf]  ;;  %v9474_v6 = vld [vmem:[%s14184_s10 + $0x310] sm:$0xf0]  ;;  %v9941_v16 = vor.u32 %v12569_v0, %v9938_v1  ;;  %v7481_v36 = vadd.f32 %v7480_v31, %v14707_v39 }
 0x28e   : > { %7744 = vmatpush.bf16.msrb.mxu1 %v9717_v38  ;;  %7713 = vmatmul.bf16.vlgmr.msra.gmra.mxu2 %v14298_v34  ;;  %v12501_v7 = vld [vmem:[%s14184_s10 + $0x484] sm:$0xf]  ;;  %v9666_v15 = vld [vmem:[%s14184_s10 + $0x490] sm:$0xf0]  ;;  %v9477_v38 = vor.u32 %v12453_v37, %v9474_v6 }
 0x28f   : > { %7757 = vmatpush.bf16.msrb.mxu2 %v9845_v40  ;;  %7726 = vmatmul.bf16.vlgmr.msra.gmra.mxu3 %v14289_v28  ;;  %v12533_v18 = vld [vmem:[%s14184_s10 + $0x584] sm:$0xf]  ;;  %v9794_v19 = vld [vmem:[%s14184_s10 + $0x590] sm:$0xf0]  ;;  %v7493_v40 = vpop.f32.mrf.mxu1  ;;  %v9669_v41 = vor.u32 %v12501_v7, %v9666_v15 }
 0x290   : > { %7770 = vmatpush.bf16.msrb.mxu3 %v9973_v44  ;;  %v12565_v27 = vld [vmem:[%s14184_s10 + $0x684] sm:$0xf]  ;;  %v9922_v32 = vld [vmem:[%s14184_s10 + $0x690] sm:$0xf0]  ;;  %v9797_v42 = vor.u32 %v12533_v18, %v9794_v19  ;;  %v7494_v46 = vadd.f32 %v7493_v40, %v7481_v36 }
 0x291   : > { %7736 = vmatpush.bf16.msrb.mxu0 %v9509_v50  ;;  %v12609_v33 = vld [vmem:[%s14184_s10 + $0x7e4] sm:$0xf]  ;;  %v10098_v35 = vld [vmem:[%s14184_s10 + $0x7f0] sm:$0xf0]  ;;  %v9925_v45 = vor.u32 %v12565_v27, %v9922_v32  ;;  %v7506_v62 = vpop.f32.mrf.mxu2 }
 0x292   : > { %7745 = vmatpush.bf16.msrb.mxu1 %v9701_v51  ;;  %v12497_v43 = vld [vmem:[%s14184_s10 + $0x464] sm:$0xf]  ;;  %v9650_v44 = vld [vmem:[%s14184_s10 + $0x470] sm:$0xf0]  ;;  %v10101_v47 = vor.u32 %v12609_v33, %v10098_v35  ;;  %v7507_v37 = vadd.f32 %v7506_v62, %v7494_v46 }
 0x293   : > { %7758 = vmatpush.bf16.msrb.mxu2 %v9829_v52  ;;  %v12529_v48 = vld [vmem:[%s14184_s10 + $0x564] sm:$0xf]  ;;  %v9778_v49 = vld [vmem:[%s14184_s10 + $0x570] sm:$0xf0]  ;;  %v9653_v53 = vor.u32 %v12497_v43, %v9650_v44  ;;  %v7482_v15 = vpop.f32.mrf.mxu0 }
 0x294   : > { %7771 = vmatpush.bf16.msrb.mxu3 %v9957_v60  ;;  %v12561_v39 = vld [vmem:[%s14184_s10 + $0x664] sm:$0xf]  ;;  %v9906_v50 = vld [vmem:[%s14184_s10 + $0x670] sm:$0xf0]  ;;  %v9781_v58 = vor.u32 %v12529_v48, %v9778_v49 }
 0x295   : > { %7737 = vmatpush.bf16.msrb.mxu0 %v9493_v2  ;;  %v12605_v51 = vld [vmem:[%s14184_s10 + $0x7c4] sm:$0xf]  ;;  %v10082_v52 = vld [vmem:[%s14184_s10 + $0x7d0] sm:$0xf0]  ;;  %v9909_v61 = vor.u32 %v12561_v39, %v9906_v50 }
 0x296   : > { %7746 = vmatpush.bf16.msrb.mxu1 %v9685_v3  ;;  %v12493_v59 = vld [vmem:[%s14184_s10 + $0x444] sm:$0xf]  ;;  %v9634_v60 = vld [vmem:[%s14184_s10 + $0x450] sm:$0xf0]  ;;  %v10085_v63 = vor.u32 %v12605_v51, %v10082_v52  ;;  %v7519_v3 = vpop.f32.mrf.mxu3 }
 0x297   : > { %7759 = vmatpush.bf16.msrb.mxu2 %v9813_v5  ;;  %v12525_v0 = vld [vmem:[%s14184_s10 + $0x544] sm:$0xf]  ;;  %v9762_v1 = vld [vmem:[%s14184_s10 + $0x550] sm:$0xf0]  ;;  %v14779_v18 = vadd.f32 %v7519_v3, %v7507_v37  ;;  %v9637_v19 = vor.u32 %v12493_v59, %v9634_v60 }
 0x298   : > { %7772 = vmatpush.bf16.msrb.mxu3 %v9941_v16  ;;  %v12557_v2 = vld [vmem:[%s14184_s10 + $0x644] sm:$0xf]  ;;  %v9890_v5 = vld [vmem:[%s14184_s10 + $0x650] sm:$0xf0]  ;;  %v7495_v16 = vpop.f32.mrf.mxu1  ;;  %v9765_v27 = vor.u32 %v12525_v0, %v9762_v1 }
 0x299   : > { %7738 = vmatpush.bf16.msrb.mxu0 %v9477_v38  ;;  %v12601_v6 = vld [vmem:[%s14184_s10 + $0x7a4] sm:$0xf]  ;;  %v10066_v7 = vld [vmem:[%s14184_s10 + $0x7b0] sm:$0xf0]  ;;  %v9893_v33 = vor.u32 %v12557_v2, %v9890_v5 }
 0x29a   : > { %7747 = vmatpush.bf16.msrb.mxu1 %v9669_v41  ;;  %v12489_v31 = vld [vmem:[%s14184_s10 + $0x424] sm:$0xf]  ;;  %v9618_v32 = vld [vmem:[%s14184_s10 + $0x430] sm:$0xf0]  ;;  %v10069_v35 = vor.u32 %v12601_v6, %v10066_v7 }
 0x29b   : > { %7760 = vmatpush.bf16.msrb.mxu2 %v9797_v42  ;;  %v12521_v36 = vld [vmem:[%s14184_s10 + $0x524] sm:$0xf]  ;;  %v9746_v38 = vld [vmem:[%s14184_s10 + $0x530] sm:$0xf0]  ;;  %v9621_v44 = vor.u32 %v12489_v31, %v9618_v32 }
 0x29c   : > { %7773 = vmatpush.bf16.msrb.mxu3 %v9925_v45  ;;  %7739 = vmatmul.bf16.vlgmr.msrb.gmra.mxu0 %v14293_v30  ;;  %v12553_v40 = vld [vmem:[%s14184_s10 + $0x624] sm:$0xf]  ;;  %v9874_v41 = vld [vmem:[%s14184_s10 + $0x630] sm:$0xf0]  ;;  %v9749_v45 = vor.u32 %v12521_v36, %v9746_v38 }
 0x29d   : > { %7783 = vmatpush.bf16.msra.mxu0 %v10101_v47  ;;  %v12597_v42 = vld [vmem:[%s14184_s10 + $0x784] sm:$0xf]  ;;  %v10050_v43 = vld [vmem:[%s14184_s10 + $0x790] sm:$0xf0]  ;;  %v9877_v49 = vor.u32 %v12553_v40, %v9874_v41 }
 0x29e   : > { %7748 = vmatpush.bf16.msrb.mxu1 %v9653_v53  ;;  %v12485_v46 = vld [vmem:[%s14184_s10 + $0x404] sm:$0xf]  ;;  %v9602_v47 = vld [vmem:[%s14184_s10 + $0x410] sm:$0xf0]  ;;  %v10053_v39 = vor.u32 %v12597_v42, %v10050_v43  ;;  %v7508_v53 = vpop.f32.mrf.mxu2 }
 0x29f   : > { %7761 = vmatpush.bf16.msrb.mxu2 %v9781_v58  ;;  %v12517_v48 = vld [vmem:[%s14184_s10 + $0x504] sm:$0xf]  ;;  %v9730_v50 = vld [vmem:[%s14184_s10 + $0x510] sm:$0xf0]  ;;  %v9605_v1 = vor.u32 %v12485_v46, %v9602_v47 }
 0x2a0   : > { %7774 = vmatpush.bf16.msrb.mxu3 %v9909_v61  ;;  %v12549_v51 = vld [vmem:[%s14184_s10 + $0x604] sm:$0xf]  ;;  %v9858_v52 = vld [vmem:[%s14184_s10 + $0x610] sm:$0xf0]  ;;  %v7521_v61 = vpop.f32.mrf.mxu3  ;;  %v9733_v2 = vor.u32 %v12517_v48, %v9730_v50 }
 0x2a1   : > { %7784 = vmatpush.bf16.msra.mxu0 %v10085_v63  ;;  %v12593_v58 = vld [vmem:[%s14184_s10 + $0x764] sm:$0xf]  ;;  %v10034_v59 = vld [vmem:[%s14184_s10 + $0x770] sm:$0xf0]  ;;  %v9861_v5 = vor.u32 %v12549_v51, %v9858_v52 }
 0x2a2   : > { %7749 = vmatpush.bf16.msrb.mxu1 %v9637_v19  ;;  %v12641_v60 = vld [vmem:[%s14184_s10 + $0x8e4] sm:$0xf]  ;;  %v10226_v62 = vld [vmem:[%s14184_s10 + $0x8f0] sm:$0xf0]  ;;  %v10037_v6 = vor.u32 %v12593_v58, %v10034_v59 }
 0x2a3   : > { %7762 = vmatpush.bf16.msrb.mxu2 %v9765_v27  ;;  %v12673_v63 = vld [vmem:[%s14184_s10 + $0x9e4] sm:$0xf]  ;;  %v10354_v0 = vld [vmem:[%s14184_s10 + $0x9f0] sm:$0xf0]  ;;  %v10229_v7 = vor.u32 %v12641_v60, %v10226_v62 }
 0x2a4   : > { %7775 = vmatpush.bf16.msrb.mxu3 %v9893_v33  ;;  %v12705_v37 = vld [vmem:[%s14184_s10 + $0xae4] sm:$0xf]  ;;  %v10482_v3 = vld [vmem:[%s14184_s10 + $0xaf0] sm:$0xf0]  ;;  %v10357_v15 = vor.u32 %v12673_v63, %v10354_v0 }
 0x2a5   : > { %7785 = vmatpush.bf16.msra.mxu0 %v10069_v35  ;;  %v12589_v16 = vld [vmem:[%s14184_s10 + $0x744] sm:$0xf]  ;;  %v10018_v19 = vld [vmem:[%s14184_s10 + $0x750] sm:$0xf0]  ;;  %v10485_v31 = vor.u32 %v12705_v37, %v10482_v3 }
 0x2a6   : > { %7750 = vmatpush.bf16.msrb.mxu1 %v9621_v44  ;;  %v12637_v27 = vld [vmem:[%s14184_s10 + $0x8c4] sm:$0xf]  ;;  %v10210_v32 = vld [vmem:[%s14184_s10 + $0x8d0] sm:$0xf0]  ;;  %v10021_v40 = vor.u32 %v12589_v16, %v10018_v19 }
 0x2a7   : > { %7763 = vmatpush.bf16.msrb.mxu2 %v9749_v45  ;;  %v12669_v33 = vld [vmem:[%s14184_s10 + $0x9c4] sm:$0xf]  ;;  %v10338_v35 = vld [vmem:[%s14184_s10 + $0x9d0] sm:$0xf0]  ;;  %v10213_v41 = vor.u32 %v12637_v27, %v10210_v32 }
 0x2a8   : > { %7776 = vmatpush.bf16.msrb.mxu3 %v9877_v49  ;;  %v12701_v36 = vld [vmem:[%s14184_s10 + $0xac4] sm:$0xf]  ;;  %v10466_v38 = vld [vmem:[%s14184_s10 + $0xad0] sm:$0xf0]  ;;  %v10341_v42 = vor.u32 %v12669_v33, %v10338_v35 }
 0x2a9   : > { %7786 = vmatpush.bf16.msra.mxu0 %v10053_v39  ;;  %v12585_v43 = vld [vmem:[%s14184_s10 + $0x724] sm:$0xf]  ;;  %v10002_v44 = vld [vmem:[%s14184_s10 + $0x730] sm:$0xf0]  ;;  %v10469_v46 = vor.u32 %v12701_v36, %v10466_v38 }
 0x2aa   : > { %7751 = vmatpush.bf16.msrb.mxu1 %v9605_v1  ;;  %v12633_v45 = vld [vmem:[%s14184_s10 + $0x8a4] sm:$0xf]  ;;  %v10194_v47 = vld [vmem:[%s14184_s10 + $0x8b0] sm:$0xf0]  ;;  %v10005_v51 = vor.u32 %v12585_v43, %v10002_v44 }
 0x2ab   : > { %7764 = vmatpush.bf16.msrb.mxu2 %v9733_v2  ;;  %v12665_v48 = vld [vmem:[%s14184_s10 + $0x9a4] sm:$0xf]  ;;  %v10322_v49 = vld [vmem:[%s14184_s10 + $0x9b0] sm:$0xf0]  ;;  %v10197_v53 = vor.u32 %v12633_v45, %v10194_v47  ;;  %v7532_v2 = vpop.f32.mrf.mxu0 }
 0x2ac   : > { %7777 = vmatpush.bf16.msrb.mxu3 %v9861_v5  ;;  %v12697_v39 = vld [vmem:[%s14184_s10 + $0xaa4] sm:$0xf]  ;;  %v10450_v50 = vld [vmem:[%s14184_s10 + $0xab0] sm:$0xf0]  ;;  %v10325_v58 = vor.u32 %v12665_v48, %v10322_v49 }
 0x2ad   : > { %7787 = vmatpush.bf16.msra.mxu0 %v10037_v6  ;;  %7752 = vmatmul.bf16.vlgmr.msrb.gmra.mxu1 %v14332_v8  ;;  %v12581_v52 = vld [vmem:[%s14184_s10 + $0x704] sm:$0xf]  ;;  %v9986_v59 = vld [vmem:[%s14184_s10 + $0x710] sm:$0xf0]  ;;  %v10453_v62 = vor.u32 %v12697_v39, %v10450_v50  ;;  %v7533_v6 = vadd.f32 %v7532_v2, %v14779_v18 }
 0x2ae   : > { %7796 = vmatpush.bf16.msra.mxu1 %v10229_v7  ;;  %7765 = vmatmul.bf16.vlgmr.msrb.gmra.mxu2 %v14336_v10  ;;  %v12629_v60 = vld [vmem:[%s14184_s10 + $0x884] sm:$0xf]  ;;  %v10178_v61 = vld [vmem:[%s14184_s10 + $0x890] sm:$0xf0]  ;;  %v9989_v7 = vor.u32 %v12581_v52, %v9986_v59  ;;  %v7558_v48 = vpop.f32.mrf.mxu2 }
 0x2af   : > { %7809 = vmatpush.bf16.msra.mxu2 %v10357_v15  ;;  %7778 = vmatmul.bf16.vlgmr.msrb.gmra.mxu3 %v14327_v4  ;;  %v12661_v63 = vld [vmem:[%s14184_s10 + $0x984] sm:$0xf]  ;;  %v10306_v0 = vld [vmem:[%s14184_s10 + $0x990] sm:$0xf0]  ;;  %v7545_v15 = vpop.f32.mrf.mxu1  ;;  %v10181_v16 = vor.u32 %v12629_v60, %v10178_v61 }
 0x2b0   : > { %7822 = vmatpush.bf16.msra.mxu3 %v10485_v31  ;;  %v12693_v1 = vld [vmem:[%s14184_s10 + $0xa84] sm:$0xf]  ;;  %v10434_v37 = vld [vmem:[%s14184_s10 + $0xa90] sm:$0xf0]  ;;  %v10309_v19 = vor.u32 %v12661_v63, %v10306_v0  ;;  %v7546_v33 = vadd.f32 %v7545_v15, %v7533_v6 }
 0x2b1   : > { %7788 = vmatpush.bf16.msra.mxu0 %v10021_v40  ;;  %v12737_v3 = vld [vmem:[%s14184_s10 + $0xbe4] sm:$0xf]  ;;  %v10610_v5 = vld [vmem:[%s14184_s10 + $0xbf0] sm:$0xf0]  ;;  %v10437_v32 = vor.u32 %v12693_v1, %v10434_v37 }
 0x2b2   : > { %7797 = vmatpush.bf16.msra.mxu1 %v10213_v41  ;;  %v12625_v27 = vld [vmem:[%s14184_s10 + $0x864] sm:$0xf]  ;;  %v10162_v31 = vld [vmem:[%s14184_s10 + $0x870] sm:$0xf0]  ;;  %v10613_v35 = vor.u32 %v12737_v3, %v10610_v5  ;;  %v7559_v52 = vadd.f32 %v7558_v48, %v7546_v33 }
 0x2b3   : > { %7810 = vmatpush.bf16.msra.mxu2 %v10341_v42  ;;  %v12657_v36 = vld [vmem:[%s14184_s10 + $0x964] sm:$0xf]  ;;  %v10290_v38 = vld [vmem:[%s14184_s10 + $0x970] sm:$0xf0]  ;;  %v10165_v43 = vor.u32 %v12625_v27, %v10162_v31  ;;  %v7534_v61 = vpop.f32.mrf.mxu0 }
 0x2b4   : > { %7823 = vmatpush.bf16.msra.mxu3 %v10469_v46  ;;  %v12689_v18 = vld [vmem:[%s14184_s10 + $0xa64] sm:$0xf]  ;;  %v10418_v40 = vld [vmem:[%s14184_s10 + $0xa70] sm:$0xf0]  ;;  %v10293_v44 = vor.u32 %v12657_v36, %v10290_v38 }
 0x2b5   : > { %7789 = vmatpush.bf16.msra.mxu0 %v10005_v51  ;;  %v12733_v41 = vld [vmem:[%s14184_s10 + $0xbc4] sm:$0xf]  ;;  %v10594_v42 = vld [vmem:[%s14184_s10 + $0xbd0] sm:$0xf0]  ;;  %v10421_v47 = vor.u32 %v12689_v18, %v10418_v40 }
 0x2b6   : > { %7798 = vmatpush.bf16.msra.mxu1 %v10197_v53  ;;  %v12621_v45 = vld [vmem:[%s14184_s10 + $0x844] sm:$0xf]  ;;  %v10146_v46 = vld [vmem:[%s14184_s10 + $0x850] sm:$0xf0]  ;;  %v10597_v49 = vor.u32 %v12733_v41, %v10594_v42  ;;  %v7571_v53 = vpop.f32.mrf.mxu3 }
 0x2b7   : > { %7811 = vmatpush.bf16.msra.mxu2 %v10325_v58  ;;  %v12653_v39 = vld [vmem:[%s14184_s10 + $0x944] sm:$0xf]  ;;  %v10274_v50 = vld [vmem:[%s14184_s10 + $0x950] sm:$0xf0]  ;;  %v14850_v63 = vadd.f32 %v7571_v53, %v7559_v52  ;;  %v10149_v0 = vor.u32 %v12621_v45, %v10146_v46 }
 0x2b8   : > { %7824 = vmatpush.bf16.msra.mxu3 %v10453_v62  ;;  %v12685_v51 = vld [vmem:[%s14184_s10 + $0xa44] sm:$0xf]  ;;  %v10402_v58 = vld [vmem:[%s14184_s10 + $0xa50] sm:$0xf0]  ;;  %v7547_v62 = vpop.f32.mrf.mxu1  ;;  %v10277_v1 = vor.u32 %v12653_v39, %v10274_v50 }
 0x2b9   : > { %7790 = vmatpush.bf16.msra.mxu0 %v9989_v7  ;;  %v12729_v59 = vld [vmem:[%s14184_s10 + $0xba4] sm:$0xf]  ;;  %v10578_v60 = vld [vmem:[%s14184_s10 + $0xbb0] sm:$0xf0]  ;;  %v10405_v3 = vor.u32 %v12685_v51, %v10402_v58 }
 0x2ba   : > { %7799 = vmatpush.bf16.msra.mxu1 %v10181_v16  ;;  %v12617_v2 = vld [vmem:[%s14184_s10 + $0x824] sm:$0xf]  ;;  %v10130_v37 = vld [vmem:[%s14184_s10 + $0x830] sm:$0xf0]  ;;  %v10581_v5 = vor.u32 %v12729_v59, %v10578_v60 }
 0x2bb   : > { %7812 = vmatpush.bf16.msra.mxu2 %v10309_v19  ;;  %v12649_v6 = vld [vmem:[%s14184_s10 + $0x924] sm:$0xf]  ;;  %v10258_v7 = vld [vmem:[%s14184_s10 + $0x930] sm:$0xf0]  ;;  %v10133_v31 = vor.u32 %v12617_v2, %v10130_v37 }
 0x2bc   : > { %7825 = vmatpush.bf16.msra.mxu3 %v10437_v32  ;;  %7791 = vmatmul.bf16.vlgmr.msra.gmra.mxu0 %v14334_v9  ;;  %v12681_v15 = vld [vmem:[%s14184_s10 + $0xa24] sm:$0xf]  ;;  %v10386_v16 = vld [vmem:[%s14184_s10 + $0xa30] sm:$0xf0]  ;;  %v10261_v32 = vor.u32 %v12649_v6, %v10258_v7 }
 0x2bd   : > { %7835 = vmatpush.bf16.msrb.mxu0 %v10613_v35  ;;  %v12725_v19 = vld [vmem:[%s14184_s10 + $0xb84] sm:$0xf]  ;;  %v10562_v27 = vld [vmem:[%s14184_s10 + $0xb90] sm:$0xf0]  ;;  %v10389_v38 = vor.u32 %v12681_v15, %v10386_v16 }
 0x2be   : > { %7800 = vmatpush.bf16.msra.mxu1 %v10165_v43  ;;  %v12613_v33 = vld [vmem:[%s14184_s10 + $0x804] sm:$0xf]  ;;  %v10114_v35 = vld [vmem:[%s14184_s10 + $0x810] sm:$0xf0]  ;;  %v10565_v18 = vor.u32 %v12725_v19, %v10562_v27  ;;  %v7560_v43 = vpop.f32.mrf.mxu2 }
 0x2bf   : > { %7813 = vmatpush.bf16.msra.mxu2 %v10293_v44  ;;  %v12645_v36 = vld [vmem:[%s14184_s10 + $0x904] sm:$0xf]  ;;  %v10242_v40 = vld [vmem:[%s14184_s10 + $0x910] sm:$0xf0]  ;;  %v10117_v50 = vor.u32 %v12613_v33, %v10114_v35 }
 0x2c0   : > { %7826 = vmatpush.bf16.msra.mxu3 %v10421_v47  ;;  %v12677_v41 = vld [vmem:[%s14184_s10 + $0xa04] sm:$0xf]  ;;  %v10370_v42 = vld [vmem:[%s14184_s10 + $0xa10] sm:$0xf0]  ;;  %v7573_v47 = vpop.f32.mrf.mxu3  ;;  %v10245_v51 = vor.u32 %v12645_v36, %v10242_v40 }
 0x2c1   : > { %7836 = vmatpush.bf16.msrb.mxu0 %v10597_v49  ;;  %v12721_v44 = vld [vmem:[%s14184_s10 + $0xb64] sm:$0xf]  ;;  %v10546_v45 = vld [vmem:[%s14184_s10 + $0xb70] sm:$0xf0]  ;;  %v10373_v58 = vor.u32 %v12677_v41, %v10370_v42 }
 0x2c2   : > { %7801 = vmatpush.bf16.msra.mxu1 %v10149_v0  ;;  %v12769_v46 = vld [vmem:[%s14184_s10 + $0xce4] sm:$0xf]  ;;  %v10738_v48 = vld [vmem:[%s14184_s10 + $0xcf0] sm:$0xf0]  ;;  %v10549_v59 = vor.u32 %v12721_v44, %v10546_v45 }
 0x2c3   : > { %7814 = vmatpush.bf16.msra.mxu2 %v10277_v1  ;;  %v12801_v49 = vld [vmem:[%s14184_s10 + $0xde4] sm:$0xf]  ;;  %v10866_v39 = vld [vmem:[%s14184_s10 + $0xdf0] sm:$0xf0]  ;;  %v10741_v60 = vor.u32 %v12769_v46, %v10738_v48 }
 0x2c4   : > { %7827 = vmatpush.bf16.msra.mxu3 %v10405_v3  ;;  %v12833_v52 = vld [vmem:[%s14184_s10 + $0xee4] sm:$0xf]  ;;  %v10994_v53 = vld [vmem:[%s14184_s10 + $0xef0] sm:$0xf0]  ;;  %v10869_v61 = vor.u32 %v12801_v49, %v10866_v39 }
 0x2c5   : > { %7837 = vmatpush.bf16.msrb.mxu0 %v10581_v5  ;;  %v12717_v62 = vld [vmem:[%s14184_s10 + $0xb44] sm:$0xf]  ;;  %v10530_v0 = vld [vmem:[%s14184_s10 + $0xb50] sm:$0xf0]  ;;  %v10997_v2 = vor.u32 %v12833_v52, %v10994_v53 }
 0x2c6   : > { %7802 = vmatpush.bf16.msra.mxu1 %v10133_v31  ;;  %v12765_v1 = vld [vmem:[%s14184_s10 + $0xcc4] sm:$0xf]  ;;  %v10722_v37 = vld [vmem:[%s14184_s10 + $0xcd0] sm:$0xf0]  ;;  %v10533_v15 = vor.u32 %v12717_v62, %v10530_v0 }
 0x2c7   : > { %7815 = vmatpush.bf16.msra.mxu2 %v10261_v32  ;;  %v12797_v3 = vld [vmem:[%s14184_s10 + $0xdc4] sm:$0xf]  ;;  %v10850_v5 = vld [vmem:[%s14184_s10 + $0xdd0] sm:$0xf0]  ;;  %v10725_v16 = vor.u32 %v12765_v1, %v10722_v37 }
 0x2c8   : > { %7828 = vmatpush.bf16.msra.mxu3 %v10389_v38  ;;  %v12829_v6 = vld [vmem:[%s14184_s10 + $0xec4] sm:$0xf]  ;;  %v10978_v7 = vld [vmem:[%s14184_s10 + $0xed0] sm:$0xf0]  ;;  %v10853_v19 = vor.u32 %v12797_v3, %v10850_v5 }
 0x2c9   : > { %7838 = vmatpush.bf16.msrb.mxu0 %v10565_v18  ;;  %v12713_v27 = vld [vmem:[%s14184_s10 + $0xb24] sm:$0xf]  ;;  %v10514_v31 = vld [vmem:[%s14184_s10 + $0xb30] sm:$0xf0]  ;;  %v10981_v33 = vor.u32 %v12829_v6, %v10978_v7 }
 0x2ca   : > { %7803 = vmatpush.bf16.msra.mxu1 %v10117_v50  ;;  %v12761_v32 = vld [vmem:[%s14184_s10 + $0xca4] sm:$0xf]  ;;  %v10706_v35 = vld [vmem:[%s14184_s10 + $0xcb0] sm:$0xf0]  ;;  %v10517_v41 = vor.u32 %v12713_v27, %v10514_v31 }
 0x2cb   : > { %7816 = vmatpush.bf16.msra.mxu2 %v10245_v51  ;;  %v12793_v36 = vld [vmem:[%s14184_s10 + $0xda4] sm:$0xf]  ;;  %v10834_v38 = vld [vmem:[%s14184_s10 + $0xdb0] sm:$0xf0]  ;;  %v10709_v43 = vor.u32 %v12761_v32, %v10706_v35  ;;  %v7584_v51 = vpop.f32.mrf.mxu0 }
 0x2cc   : > { %7829 = vmatpush.bf16.msra.mxu3 %v10373_v58  ;;  %v12825_v18 = vld [vmem:[%s14184_s10 + $0xea4] sm:$0xf]  ;;  %v10962_v40 = vld [vmem:[%s14184_s10 + $0xeb0] sm:$0xf0]  ;;  %v10837_v44 = vor.u32 %v12793_v36, %v10834_v38 }
 0x2cd   : > { %7839 = vmatpush.bf16.msrb.mxu0 %v10549_v59  ;;  %7804 = vmatmul.bf16.vlgmr.msra.gmra.mxu1 %v14422_v20  ;;  %v12709_v42 = vld [vmem:[%s14184_s10 + $0xb04] sm:$0xf]  ;;  %v10498_v45 = vld [vmem:[%s14184_s10 + $0xb10] sm:$0xf0]  ;;  %v10965_v48 = vor.u32 %v12825_v18, %v10962_v40  ;;  %v7585_v59 = vadd.f32 %v7584_v51, %v14850_v63 }
 0x2ce   : > { %7848 = vmatpush.bf16.msrb.mxu1 %v10741_v60  ;;  %7817 = vmatmul.bf16.vlgmr.msra.gmra.mxu2 %v14428_v24  ;;  %v12757_v46 = vld [vmem:[%s14184_s10 + $0xc84] sm:$0xf]  ;;  %v10690_v47 = vld [vmem:[%s14184_s10 + $0xc90] sm:$0xf0]  ;;  %v10501_v60 = vor.u32 %v12709_v42, %v10498_v45 }
 0x2cf   : > { %7861 = vmatpush.bf16.msrb.mxu2 %v10869_v61  ;;  %7830 = vmatmul.bf16.vlgmr.msra.gmra.mxu3 %v14426_v23  ;;  %v12789_v49 = vld [vmem:[%s14184_s10 + $0xd84] sm:$0xf]  ;;  %v10818_v39 = vld [vmem:[%s14184_s10 + $0xd90] sm:$0xf0]  ;;  %v7597_v61 = vpop.f32.mrf.mxu1  ;;  %v10693_v62 = vor.u32 %v12757_v46, %v10690_v47 }
 0x2d0   : > { %7874 = vmatpush.bf16.msrb.mxu3 %v10997_v2  ;;  %v12821_v50 = vld [vmem:[%s14184_s10 + $0xe84] sm:$0xf]  ;;  %v10946_v52 = vld [vmem:[%s14184_s10 + $0xe90] sm:$0xf0]  ;;  %v10821_v0 = vor.u32 %v12789_v49, %v10818_v39  ;;  %v7598_v3 = vadd.f32 %v7597_v61, %v7585_v59 }
 0x2d1   : > { %7840 = vmatpush.bf16.msrb.mxu0 %v10533_v15  ;;  %v12865_v53 = vld [vmem:[%s14184_s10 + $0xfe4] sm:$0xf]  ;;  %v11122_v58 = vld [vmem:[%s14184_s10 + $0xff0] sm:$0xf0]  ;;  %v10949_v37 = vor.u32 %v12821_v50, %v10946_v52 }
 0x2d2   : > { %7849 = vmatpush.bf16.msrb.mxu1 %v10725_v16  ;;  %v12753_v1 = vld [vmem:[%s14184_s10 + $0xc64] sm:$0xf]  ;;  %v10674_v2 = vld [vmem:[%s14184_s10 + $0xc70] sm:$0xf0]  ;;  %v11125_v5 = vor.u32 %v12865_v53, %v11122_v58 }
 0x2d3   : > { %7862 = vmatpush.bf16.msrb.mxu2 %v10853_v19  ;;  %v12785_v6 = vld [vmem:[%s14184_s10 + $0xd64] sm:$0xf]  ;;  %v10802_v7 = vld [vmem:[%s14184_s10 + $0xd70] sm:$0xf0]  ;;  %v10677_v27 = vor.u32 %v12753_v1, %v10674_v2  ;;  %v7610_v36 = vpop.f32.mrf.mxu2  ;;  %v7586_v47 = vpop.f32.mrf.mxu0 }
 0x2d4   : > { %7875 = vmatpush.bf16.msrb.mxu3 %v10981_v33  ;;  %v12817_v63 = vld [vmem:[%s14184_s10 + $0xe64] sm:$0xf]  ;;  %v10930_v15 = vld [vmem:[%s14184_s10 + $0xe70] sm:$0xf0]  ;;  %v10805_v31 = vor.u32 %v12785_v6, %v10802_v7  ;;  %v7611_v42 = vadd.f32 %v7610_v36, %v7598_v3 }
 0x2d5   : > { %7841 = vmatpush.bf16.msrb.mxu0 %v10517_v41  ;;  %v12861_v16 = vld [vmem:[%s14184_s10 + $0xfc4] sm:$0xf]  ;;  %v11106_v19 = vld [vmem:[%s14184_s10 + $0xfd0] sm:$0xf0]  ;;  %v10933_v35 = vor.u32 %v12817_v63, %v10930_v15 }
 0x2d6   : > { %7850 = vmatpush.bf16.msrb.mxu1 %v10709_v43  ;;  %v12749_v32 = vld [vmem:[%s14184_s10 + $0xc44] sm:$0xf]  ;;  %v10658_v33 = vld [vmem:[%s14184_s10 + $0xc50] sm:$0xf0]  ;;  %v11109_v38 = vor.u32 %v12861_v16, %v11106_v19  ;;  %v7623_v43 = vpop.f32.mrf.mxu3 }
 0x2d7   : > { %7863 = vmatpush.bf16.msrb.mxu2 %v10837_v44  ;;  %v12781_v18 = vld [vmem:[%s14184_s10 + $0xd44] sm:$0xf]  ;;  %v10786_v40 = vld [vmem:[%s14184_s10 + $0xd50] sm:$0xf0]  ;;  %v14921_v49 = vadd.f32 %v7623_v43, %v7611_v42  ;;  %v10661_v39 = vor.u32 %v12749_v32, %v10658_v33 }
 0x2d8   : > { %7876 = vmatpush.bf16.msrb.mxu3 %v10965_v48  ;;  %v12813_v41 = vld [vmem:[%s14184_s10 + $0xe44] sm:$0xf]  ;;  %v10914_v44 = vld [vmem:[%s14184_s10 + $0xe50] sm:$0xf0]  ;;  %v7599_v48 = vpop.f32.mrf.mxu1  ;;  %v10789_v50 = vor.u32 %v12781_v18, %v10786_v40 }
 0x2d9   : > { %7842 = vmatpush.bf16.msrb.mxu0 %v10501_v60  ;;  %v12857_v45 = vld [vmem:[%s14184_s10 + $0xfa4] sm:$0xf]  ;;  %v11090_v46 = vld [vmem:[%s14184_s10 + $0xfb0] sm:$0xf0]  ;;  %v10917_v53 = vor.u32 %v12813_v41, %v10914_v44 }
 0x2da   : > { %7851 = vmatpush.bf16.msrb.mxu1 %v10693_v62  ;;  %v12745_v51 = vld [vmem:[%s14184_s10 + $0xc24] sm:$0xf]  ;;  %v10642_v52 = vld [vmem:[%s14184_s10 + $0xc30] sm:$0xf0]  ;;  %v11093_v58 = vor.u32 %v12857_v45, %v11090_v46 }
 0x2db   : > { %7864 = vmatpush.bf16.msrb.mxu2 %v10821_v0  ;;  %v12777_v59 = vld [vmem:[%s14184_s10 + $0xd24] sm:$0xf]  ;;  %v10770_v60 = vld [vmem:[%s14184_s10 + $0xd30] sm:$0xf0]  ;;  %v10645_v2 = vor.u32 %v12745_v51, %v10642_v52 }
 0x2dc   : > { %7877 = vmatpush.bf16.msrb.mxu3 %v10949_v37  ;;  %7843 = vmatmul.bf16.vlgmr.msrb.gmra.mxu0 %v14430_v25  ;;  %v12809_v61 = vld [vmem:[%s14184_s10 + $0xe24] sm:$0xf]  ;;  %v10898_v62 = vld [vmem:[%s14184_s10 + $0xe30] sm:$0xf0]  ;;  %v10773_v37 = vor.u32 %v12777_v59, %v10770_v60 }
 0x2dd   : > { %7887 = vmatpush.bf16.msra.mxu0 %v11125_v5  ;;  %v12853_v0 = vld [vmem:[%s14184_s10 + $0xf84] sm:$0xf]  ;;  %v11074_v1 = vld [vmem:[%s14184_s10 + $0xf90] sm:$0xf0]  ;;  %v10901_v7 = vor.u32 %v12809_v61, %v10898_v62 }
 0x2de   : > { %7852 = vmatpush.bf16.msrb.mxu1 %v10677_v27  ;;  %v12741_v3 = vld [vmem:[%s14184_s10 + $0xc04] sm:$0xf]  ;;  %v10626_v5 = vld [vmem:[%s14184_s10 + $0xc10] sm:$0xf0]  ;;  %v11077_v63 = vor.u32 %v12853_v0, %v11074_v1  ;;  %v7612_v27 = vpop.f32.mrf.mxu2 }
 0x2df   : > { %7865 = vmatpush.bf16.msrb.mxu2 %v10805_v31  ;;  %v12773_v6 = vld [vmem:[%s14184_s10 + $0xd04] sm:$0xf]  ;;  %v10754_v15 = vld [vmem:[%s14184_s10 + $0xd10] sm:$0xf0]  ;;  %v10629_v40 = vor.u32 %v12741_v3, %v10626_v5 }
 0x2e0   : > { %7878 = vmatpush.bf16.msrb.mxu3 %v10933_v35  ;;  %v12805_v16 = vld [vmem:[%s14184_s10 + $0xe04] sm:$0xf]  ;;  %v10882_v19 = vld [vmem:[%s14184_s10 + $0xe10] sm:$0xf0]  ;;  %v7625_v35 = vpop.f32.mrf.mxu3  ;;  %v10757_v41 = vor.u32 %v12773_v6, %v10754_v15 }
 0x2e1   : > { %7888 = vmatpush.bf16.msra.mxu0 %v11109_v38  ;;  %v12849_v31 = vld [vmem:[%s14184_s10 + $0xf64] sm:$0xf]  ;;  %v11058_v32 = vld [vmem:[%s14184_s10 + $0xf70] sm:$0xf0]  ;;  %v10885_v44 = vor.u32 %v12805_v16, %v10882_v19 }
 0x2e2   : > { %7853 = vmatpush.bf16.msrb.mxu1 %v10661_v39  ;;  %v12897_v33 = vld [vmem:[%s14184_s10 + $0x10e4] sm:$0xf]  ;;  %v11250_v36 = vld [vmem:[%s14184_s10 + $0x10f0] sm:$0xf0]  ;;  %v11061_v45 = vor.u32 %v12849_v31, %v11058_v32 }
 0x2e3   : > { %7866 = vmatpush.bf16.msrb.mxu2 %v10789_v50  ;;  %v12929_v38 = vld [vmem:[%s14184_s10 + $0x11e4] sm:$0xf]  ;;  %v11378_v18 = vld [vmem:[%s14184_s10 + $0x11f0] sm:$0xf0]  ;;  %v11253_v46 = vor.u32 %v12897_v33, %v11250_v36 }
 0x2e4   : > { %7879 = vmatpush.bf16.msrb.mxu3 %v10917_v53  ;;  %v12961_v42 = vld [vmem:[%s14184_s10 + $0x12e4] sm:$0xf]  ;;  %v11506_v43 = vld [vmem:[%s14184_s10 + $0x12f0] sm:$0xf0]  ;;  %v11381_v47 = vor.u32 %v12929_v38, %v11378_v18 }
 0x2e5   : > { %7889 = vmatpush.bf16.msra.mxu0 %v11093_v58  ;;  %v12845_v48 = vld [vmem:[%s14184_s10 + $0xf44] sm:$0xf]  ;;  %v11042_v39 = vld [vmem:[%s14184_s10 + $0xf50] sm:$0xf0]  ;;  %v11509_v51 = vor.u32 %v12961_v42, %v11506_v43 }
 0x2e6   : > { %7854 = vmatpush.bf16.msrb.mxu1 %v10645_v2  ;;  %v12893_v50 = vld [vmem:[%s14184_s10 + $0x10c4] sm:$0xf]  ;;  %v11234_v52 = vld [vmem:[%s14184_s10 + $0x10d0] sm:$0xf0]  ;;  %v11045_v61 = vor.u32 %v12845_v48, %v11042_v39 }
 0x2e7   : > { %7867 = vmatpush.bf16.msrb.mxu2 %v10773_v37  ;;  %v12925_v53 = vld [vmem:[%s14184_s10 + $0x11c4] sm:$0xf]  ;;  %v11362_v58 = vld [vmem:[%s14184_s10 + $0x11d0] sm:$0xf0]  ;;  %v11237_v62 = vor.u32 %v12893_v50, %v11234_v52 }
 0x2e8   : > { %7880 = vmatpush.bf16.msrb.mxu3 %v10901_v7  ;;  %v12957_v59 = vld [vmem:[%s14184_s10 + $0x12c4] sm:$0xf]  ;;  %v11490_v60 = vld [vmem:[%s14184_s10 + $0x12d0] sm:$0xf0]  ;;  %v11365_v0 = vor.u32 %v12925_v53, %v11362_v58 }
 0x2e9   : > { %7890 = vmatpush.bf16.msra.mxu0 %v11077_v63  ;;  %v12841_v1 = vld [vmem:[%s14184_s10 + $0xf24] sm:$0xf]  ;;  %v11026_v2 = vld [vmem:[%s14184_s10 + $0xf30] sm:$0xf0]  ;;  %v11493_v3 = vor.u32 %v12957_v59, %v11490_v60 }
 0x2ea   : > { %7855 = vmatpush.bf16.msrb.mxu1 %v10629_v40  ;;  %v12889_v37 = vld [vmem:[%s14184_s10 + $0x10a4] sm:$0xf]  ;;  %v11218_v5 = vld [vmem:[%s14184_s10 + $0x10b0] sm:$0xf0]  ;;  %v11029_v16 = vor.u32 %v12841_v1, %v11026_v2 }
 0x2eb   : > { %7868 = vmatpush.bf16.msrb.mxu2 %v10757_v41  ;;  %v12921_v6 = vld [vmem:[%s14184_s10 + $0x11a4] sm:$0xf]  ;;  %v11346_v7 = vld [vmem:[%s14184_s10 + $0x11b0] sm:$0xf0]  ;;  %v11221_v27 = vor.u32 %v12889_v37, %v11218_v5  ;;  %v7636_v41 = vpop.f32.mrf.mxu0 }
 0x2ec   : > { %7881 = vmatpush.bf16.msrb.mxu3 %v10885_v44  ;;  %v12953_v63 = vld [vmem:[%s14184_s10 + $0x12a4] sm:$0xf]  ;;  %v11474_v15 = vld [vmem:[%s14184_s10 + $0x12b0] sm:$0xf0]  ;;  %v11349_v31 = vor.u32 %v12921_v6, %v11346_v7 }
 0x2ed   : > { %7891 = vmatpush.bf16.msra.mxu0 %v11061_v45  ;;  %7856 = vmatmul.bf16.vlgmr.msrb.gmra.mxu1 %v14488_v54  ;;  %v12837_v19 = vld [vmem:[%s14184_s10 + $0xf04] sm:$0xf]  ;;  %v11010_v32 = vld [vmem:[%s14184_s10 + $0xf10] sm:$0xf0]  ;;  %v11477_v36 = vor.u32 %v12953_v63, %v11474_v15  ;;  %v7637_v45 = vadd.f32 %v7636_v41, %v14921_v49 }
 0x2ee   : > { %7900 = vmatpush.bf16.msra.mxu1 %v11253_v46  ;;  %7869 = vmatmul.bf16.vlgmr.msrb.gmra.mxu2 %v14492_v56  ;;  %v12885_v33 = vld [vmem:[%s14184_s10 + $0x1084] sm:$0xf]  ;;  %v11202_v35 = vld [vmem:[%s14184_s10 + $0x1090] sm:$0xf0]  ;;  %v11013_v46 = vor.u32 %v12837_v19, %v11010_v32 }
 0x2ef   : > { %7913 = vmatpush.bf16.msra.mxu2 %v11381_v47  ;;  %7882 = vmatmul.bf16.vlgmr.msrb.gmra.mxu3 %v14490_v55  ;;  %v12917_v38 = vld [vmem:[%s14184_s10 + $0x1184] sm:$0xf]  ;;  %v11330_v18 = vld [vmem:[%s14184_s10 + $0x1190] sm:$0xf0]  ;;  %v7649_v47 = vpop.f32.mrf.mxu1  ;;  %v11205_v48 = vor.u32 %v12885_v33, %v11202_v35 }
 0x2f0   : > { %7926 = vmatpush.bf16.msra.mxu3 %v11509_v51  ;;  %v12949_v40 = vld [vmem:[%s14184_s10 + $0x1284] sm:$0xf]  ;;  %v11458_v42 = vld [vmem:[%s14184_s10 + $0x1290] sm:$0xf0]  ;;  %v11333_v39 = vor.u32 %v12917_v38, %v11330_v18  ;;  %v7650_v53 = vadd.f32 %v7649_v47, %v7637_v45 }
 0x2f1   : > { %7892 = vmatpush.bf16.msra.mxu0 %v11045_v61  ;;  %v12993_v43 = vld [vmem:[%s14184_s10 + $0x13e4] sm:$0xf]  ;;  %v11634_v44 = vld [vmem:[%s14184_s10 + $0x13f0] sm:$0xf0]  ;;  %v11461_v52 = vor.u32 %v12949_v40, %v11458_v42  ;;  %v7662_v6 = vpop.f32.mrf.mxu2 }
 0x2f2   : > { %7901 = vmatpush.bf16.msra.mxu1 %v11237_v62  ;;  %v12881_v50 = vld [vmem:[%s14184_s10 + $0x1064] sm:$0xf]  ;;  %v11186_v51 = vld [vmem:[%s14184_s10 + $0x1070] sm:$0xf0]  ;;  %v11637_v58 = vor.u32 %v12993_v43, %v11634_v44  ;;  %v7663_v19 = vadd.f32 %v7662_v6, %v7650_v53 }
 0x2f3   : > { %7914 = vmatpush.bf16.msra.mxu2 %v11365_v0  ;;  %v12913_v59 = vld [vmem:[%s14184_s10 + $0x1164] sm:$0xf]  ;;  %v11314_v60 = vld [vmem:[%s14184_s10 + $0x1170] sm:$0xf0]  ;;  %v11189_v1 = vor.u32 %v12881_v50, %v11186_v51 }
 0x2f4   : > { %7927 = vmatpush.bf16.msra.mxu3 %v11493_v3  ;;  %v12945_v49 = vld [vmem:[%s14184_s10 + $0x1264] sm:$0xf]  ;;  %v11442_v61 = vld [vmem:[%s14184_s10 + $0x1270] sm:$0xf0]  ;;  %v11317_v2 = vor.u32 %v12913_v59, %v11314_v60 }
 0x2f5   : > { %7893 = vmatpush.bf16.msra.mxu0 %v11029_v16  ;;  %v12989_v62 = vld [vmem:[%s14184_s10 + $0x13c4] sm:$0xf]  ;;  %v11618_v0 = vld [vmem:[%s14184_s10 + $0x13d0] sm:$0xf0]  ;;  %v11445_v5 = vor.u32 %v12945_v49, %v11442_v61 }
 0x2f6   : > { %7902 = vmatpush.bf16.msra.mxu1 %v11221_v27  ;;  %v12877_v37 = vld [vmem:[%s14184_s10 + $0x1044] sm:$0xf]  ;;  %v11170_v3 = vld [vmem:[%s14184_s10 + $0x1050] sm:$0xf0]  ;;  %v11621_v7 = vor.u32 %v12989_v62, %v11618_v0  ;;  %v7638_v27 = vpop.f32.mrf.mxu0 }
 0x2f7   : > { %7915 = vmatpush.bf16.msra.mxu2 %v11349_v31  ;;  %v12909_v63 = vld [vmem:[%s14184_s10 + $0x1144] sm:$0xf]  ;;  %v11298_v15 = vld [vmem:[%s14184_s10 + $0x1150] sm:$0xf0]  ;;  %v7675_v31 = vpop.f32.mrf.mxu3  ;;  %v11173_v18 = vor.u32 %v12877_v37, %v11170_v3 }
 0x2f8   : > { %7928 = vmatpush.bf16.msra.mxu3 %v11477_v36  ;;  %v12941_v16 = vld [vmem:[%s14184_s10 + $0x1244] sm:$0xf]  ;;  %v11426_v32 = vld [vmem:[%s14184_s10 + $0x1250] sm:$0xf0]  ;;  %v7651_v36 = vpop.f32.mrf.mxu1  ;;  %v7676_v38 = vadd.f32 %v7675_v31, %v7663_v19  ;;  %v11301_v40 = vor.u32 %v12909_v63, %v11298_v15 }
 0x2f9   : > { %7894 = vmatpush.bf16.msra.mxu0 %v11013_v46  ;;  %v12985_v33 = vld [vmem:[%s14184_s10 + $0x13a4] sm:$0xf]  ;;  %v11602_v35 = vld [vmem:[%s14184_s10 + $0x13b0] sm:$0xf0]  ;;  %v11429_v43 = vor.u32 %v12941_v16, %v11426_v32 }
 0x2fa   : > { %7903 = vmatpush.bf16.msra.mxu1 %v11205_v48  ;;  %v12873_v41 = vld [vmem:[%s14184_s10 + $0x1024] sm:$0xf]  ;;  %v11154_v42 = vld [vmem:[%s14184_s10 + $0x1030] sm:$0xf0]  ;;  %v11605_v44 = vor.u32 %v12985_v33, %v11602_v35 }
 0x2fb   : > { %7916 = vmatpush.bf16.msra.mxu2 %v11333_v39  ;;  %v12905_v45 = vld [vmem:[%s14184_s10 + $0x1124] sm:$0xf]  ;;  %v11282_v46 = vld [vmem:[%s14184_s10 + $0x1130] sm:$0xf0]  ;;  %v11157_v51 = vor.u32 %v12873_v41, %v11154_v42 }
 0x2fc   : > { %7929 = vmatpush.bf16.msra.mxu3 %v11461_v52  ;;  %7895 = vmatmul.bf16.vlgmr.msra.gmra.mxu0 %v14494_v57  ;;  %v12937_v47 = vld [vmem:[%s14184_s10 + $0x1224] sm:$0xf]  ;;  %v11410_v48 = vld [vmem:[%s14184_s10 + $0x1230] sm:$0xf0]  ;;  %v11285_v52 = vor.u32 %v12905_v45, %v11282_v46 }
 0x2fd   : > { %7939 = vmatpush.bf16.msrb.mxu0 %v11637_v58  ;;  %v12981_v39 = vld [vmem:[%s14184_s10 + $0x1384] sm:$0xf]  ;;  %v11586_v50 = vld [vmem:[%s14184_s10 + $0x1390] sm:$0xf0]  ;;  %v11413_v60 = vor.u32 %v12937_v47, %v11410_v48 }
 0x2fe   : > { %7904 = vmatpush.bf16.msra.mxu1 %v11189_v1  ;;  %v12869_v53 = vld [vmem:[%s14184_s10 + $0x1004] sm:$0xf]  ;;  %v11138_v58 = vld [vmem:[%s14184_s10 + $0x1010] sm:$0xf0]  ;;  %v11589_v49 = vor.u32 %v12981_v39, %v11586_v50  ;;  %v7664_v1 = vpop.f32.mrf.mxu2  ;;  %v7688_v6 = vpop.f32.mrf.mxu0 }
 0x2ff   : > { %7917 = vmatpush.bf16.msra.mxu2 %v11317_v2  ;;  %v12901_v59 = vld [vmem:[%s14184_s10 + $0x1104] sm:$0xf]  ;;  %v11266_v61 = vld [vmem:[%s14184_s10 + $0x1110] sm:$0xf0]  ;;  %v15012_v16 = vadd.f32 %v7688_v6, %v7676_v38  ;;  %v11141_v19 = vor.u32 %v12869_v53, %v11138_v58 }
 0x300   : > { %7930 = vmatpush.bf16.msra.mxu3 %v11445_v5  ;;  %v12933_v62 = vld [vmem:[%s14184_s10 + $0x1204] sm:$0xf]  ;;  %v11394_v0 = vld [vmem:[%s14184_s10 + $0x1210] sm:$0xf0]  ;;  %v7677_v5 = vpop.f32.mrf.mxu3  ;;  %v11269_v27 = vor.u32 %v12901_v59, %v11266_v61 }
 0x301   : > { %7940 = vmatpush.bf16.msrb.mxu0 %v11621_v7  ;;  %v12977_v2 = vld [vmem:[%s14184_s10 + $0x1364] sm:$0xf]  ;;  %v11570_v37 = vld [vmem:[%s14184_s10 + $0x1370] sm:$0xf0]  ;;  %v11397_v33 = vor.u32 %v12933_v62, %v11394_v0 }
 0x302   : > { %7905 = vmatpush.bf16.msra.mxu1 %v11173_v18  ;;  %v13025_v3 = vld [vmem:[%s14184_s10 + $0x14e4] sm:$0xf]  ;;  %v11762_v7 = vld [vmem:[%s14184_s10 + $0x14f0] sm:$0xf0]  ;;  %v11573_v35 = vor.u32 %v12977_v2, %v11570_v37 }
 0x303   : > { %7918 = vmatpush.bf16.msra.mxu2 %v11301_v40  ;;  %v13057_v63 = vld [vmem:[%s14184_s10 + $0x15e4] sm:$0xf]  ;;  %v11890_v15 = vld [vmem:[%s14184_s10 + $0x15f0] sm:$0xf0]  ;;  %v11765_v36 = vor.u32 %v13025_v3, %v11762_v7 }
 0x304   : > { %7931 = vmatpush.bf16.msra.mxu3 %v11429_v43  ;;  %v13089_v31 = vld [vmem:[%s14184_s10 + $0x16e4] sm:$0xf]  ;;  %v12018_v32 = vld [vmem:[%s14184_s10 + $0x16f0] sm:$0xf0]  ;;  %v11893_v18 = vor.u32 %v13057_v63, %v11890_v15 }
 0x305   : > { %7941 = vmatpush.bf16.msrb.mxu0 %v11605_v44  ;;  %v12973_v40 = vld [vmem:[%s14184_s10 + $0x1344] sm:$0xf]  ;;  %v11554_v41 = vld [vmem:[%s14184_s10 + $0x1350] sm:$0xf0]  ;;  %v12021_v38 = vor.u32 %v13089_v31, %v12018_v32 }
 0x306   : > { %7906 = vmatpush.bf16.msra.mxu1 %v11157_v51  ;;  %v13021_v42 = vld [vmem:[%s14184_s10 + $0x14c4] sm:$0xf]  ;;  %v11746_v43 = vld [vmem:[%s14184_s10 + $0x14d0] sm:$0xf0]  ;;  %v11557_v48 = vor.u32 %v12973_v40, %v11554_v41  ;;  %v7690_v61 = vpop.f32.mrf.mxu0 }
 0x307   : > { %7919 = vmatpush.bf16.msra.mxu2 %v11285_v52  ;;  %v13053_v44 = vld [vmem:[%s14184_s10 + $0x15c4] sm:$0xf]  ;;  %v11874_v45 = vld [vmem:[%s14184_s10 + $0x15d0] sm:$0xf0]  ;;  %v11749_v39 = vor.u32 %v13021_v42, %v11746_v43 }
 0x308   : > { %7932 = vmatpush.bf16.msra.mxu3 %v11413_v60  ;;  %v13085_v46 = vld [vmem:[%s14184_s10 + $0x16c4] sm:$0xf]  ;;  %v12002_v47 = vld [vmem:[%s14184_s10 + $0x16d0] sm:$0xf0]  ;;  %v11877_v50 = vor.u32 %v13053_v44, %v11874_v45 }
 0x309   : > { %7942 = vmatpush.bf16.msrb.mxu0 %v11589_v49  ;;  %v12969_v51 = vld [vmem:[%s14184_s10 + $0x1324] sm:$0xf]  ;;  %v11538_v52 = vld [vmem:[%s14184_s10 + $0x1330] sm:$0xf0]  ;;  %v12005_v58 = vor.u32 %v13085_v46, %v12002_v47 }
 0x30a   : > { %7907 = vmatpush.bf16.msra.mxu1 %v11141_v19  ;;  %v13017_v53 = vld [vmem:[%s14184_s10 + $0x14a4] sm:$0xf]  ;;  %v11730_v59 = vld [vmem:[%s14184_s10 + $0x14b0] sm:$0xf0]  ;;  %v11541_v1 = vor.u32 %v12969_v51, %v11538_v52 }
 0x30b   : > { %7920 = vmatpush.bf16.msra.mxu2 %v11269_v27  ;;  %v13049_v60 = vld [vmem:[%s14184_s10 + $0x15a4] sm:$0xf]  ;;  %v11858_v49 = vld [vmem:[%s14184_s10 + $0x15b0] sm:$0xf0]  ;;  %v11733_v37 = vor.u32 %v13017_v53, %v11730_v59 }
 0x30c   : > { %7933 = vmatpush.bf16.msra.mxu3 %v11397_v33  ;;  %v13081_v62 = vld [vmem:[%s14184_s10 + $0x16a4] sm:$0xf]  ;;  %v11986_v0 = vld [vmem:[%s14184_s10 + $0x16b0] sm:$0xf0]  ;;  %v11861_v3 = vor.u32 %v13049_v60, %v11858_v49 }
 0x30d   : > { %7943 = vmatpush.bf16.msrb.mxu0 %v11573_v35  ;;  %7908 = vmatmul.bf16.vlgmr.msra.gmra.mxu1 %v14577_v17  ;;  %v12965_v2 = vld [vmem:[%s14184_s10 + $0x1304] sm:$0xf]  ;;  %v11522_v5 = vld [vmem:[%s14184_s10 + $0x1310] sm:$0xf0]  ;;  %v11989_v63 = vor.u32 %v13081_v62, %v11986_v0 }
 0x30e   : > { %7952 = vmatpush.bf16.msrb.mxu1 %v11765_v36  ;;  %7921 = vmatmul.bf16.vlgmr.msra.gmra.mxu2 %v14583_v22  ;;  %v13013_v6 = vld [vmem:[%s14184_s10 + $0x1484] sm:$0xf]  ;;  %v11714_v7 = vld [vmem:[%s14184_s10 + $0x1490] sm:$0xf0]  ;;  %v11525_v35 = vor.u32 %v12965_v2, %v11522_v5  ;;  %v7701_v36 = vpop.f32.mrf.mxu1 }
 0x30f   : > { %7965 = vmatpush.bf16.msrb.mxu2 %v11893_v18  ;;  %7934 = vmatmul.bf16.vlgmr.msra.gmra.mxu3 %v14581_v21  ;;  %v13045_v15 = vld [vmem:[%s14184_s10 + $0x1584] sm:$0xf]  ;;  %v11842_v19 = vld [vmem:[%s14184_s10 + $0x1590] sm:$0xf0]  ;;  %v11717_v18 = vor.u32 %v13013_v6, %v11714_v7 }
 0x310   : > { %7978 = vmatpush.bf16.msrb.mxu3 %v12021_v38  ;;  %v13077_v27 = vld [vmem:[%s14184_s10 + $0x1684] sm:$0xf]  ;;  %v11970_v31 = vld [vmem:[%s14184_s10 + $0x1690] sm:$0xf0]  ;;  %v11845_v40 = vor.u32 %v13045_v15, %v11842_v19 }
 0x311   : > { %7944 = vmatpush.bf16.msrb.mxu0 %v11557_v48  ;;  %v13121_v32 = vld [vmem:[%s14184_s10 + $0x17e4] sm:$0xf]  ;;  %v12146_v33 = vld [vmem:[%s14184_s10 + $0x17f0] sm:$0xf0]  ;;  %v11973_v38 = vor.u32 %v13077_v27, %v11970_v31 }
 0x312   : > { %7953 = vmatpush.bf16.msrb.mxu1 %v11749_v39  ;;  %v13009_v41 = vld [vmem:[%s14184_s10 + $0x1464] sm:$0xf]  ;;  %v11698_v42 = vld [vmem:[%s14184_s10 + $0x1470] sm:$0xf0]  ;;  %v12149_v43 = vor.u32 %v13121_v32, %v12146_v33 }
 0x313   : > { %7966 = vmatpush.bf16.msrb.mxu2 %v11877_v50  ;;  %v13041_v44 = vld [vmem:[%s14184_s10 + $0x1564] sm:$0xf]  ;;  %v11826_v45 = vld [vmem:[%s14184_s10 + $0x1570] sm:$0xf0]  ;;  %v11701_v50 = vor.u32 %v13009_v41, %v11698_v42 }
 0x314   : > { %7979 = vmatpush.bf16.msrb.mxu3 %v12005_v58  ;;  %v13073_v46 = vld [vmem:[%s14184_s10 + $0x1664] sm:$0xf]  ;;  %v11954_v47 = vld [vmem:[%s14184_s10 + $0x1670] sm:$0xf0]  ;;  %v11829_v51 = vor.u32 %v13041_v44, %v11826_v45  ;;  %v7714_v58 = vpop.f32.mrf.mxu2 }
 0x315   : > { %7945 = vmatpush.bf16.msrb.mxu0 %v11541_v1  ;;  %v13117_v48 = vld [vmem:[%s14184_s10 + $0x17c4] sm:$0xf]  ;;  %v12130_v39 = vld [vmem:[%s14184_s10 + $0x17d0] sm:$0xf0]  ;;  %v11957_v59 = vor.u32 %v13073_v46, %v11954_v47  ;;  %v7715_v0 = vadd.f32 %v7714_v58, %v7701_v36  ;;  %v7727_v1 = vpop.f32.mrf.mxu3 }
 0x316   : > { %7954 = vmatpush.bf16.msrb.mxu1 %v11733_v37  ;;  %v13005_v52 = vld [vmem:[%s14184_s10 + $0x1444] sm:$0xf]  ;;  %v11682_v53 = vld [vmem:[%s14184_s10 + $0x1450] sm:$0xf0]  ;;  %v12133_v60 = vor.u32 %v13117_v48, %v12130_v39  ;;  %v7703_v6 = vpop.f32.mrf.mxu1 }
 0x317   : > { %7967 = vmatpush.bf16.msrb.mxu2 %v11861_v3  ;;  %v13037_v49 = vld [vmem:[%s14184_s10 + $0x1544] sm:$0xf]  ;;  %v11810_v61 = vld [vmem:[%s14184_s10 + $0x1550] sm:$0xf0]  ;;  %v7728_v5 = vadd.f32 %v7727_v1, %v7715_v0  ;;  %v11685_v7 = vor.u32 %v13005_v52, %v11682_v53 }
 0x318   : > { %7980 = vmatpush.bf16.msrb.mxu3 %v11989_v63  ;;  %v13069_v62 = vld [vmem:[%s14184_s10 + $0x1644] sm:$0xf]  ;;  %v11938_v2 = vld [vmem:[%s14184_s10 + $0x1650] sm:$0xf0]  ;;  %v11813_v63 = vor.u32 %v13037_v49, %v11810_v61  ;;  %v9208_v61 = vld [vmem:[%s14184_s10 + $0xe8] sm:$0xf] }
 0x319   : > { %7946 = vmatpush.bf16.msrb.mxu0 %v11525_v35  ;;  %v13113_v37 = vld [vmem:[%s14184_s10 + $0x17a4] sm:$0xf]  ;;  %v12114_v3 = vld [vmem:[%s14184_s10 + $0x17b0] sm:$0xf0]  ;;  %v11941_v27 = vor.u32 %v13069_v62, %v11938_v2  ;;  %v7740_v41 = vpop.f32.mrf.mxu0  ;;  %v12388_v62 = vld [vmem:[%s14184_s10 + $0xf4] sm:$0xf0] }
 0x31a   : > { %7955 = vmatpush.bf16.msrb.mxu1 %v11717_v18  ;;  %v13001_v15 = vld [vmem:[%s14184_s10 + $0x1424] sm:$0xf]  ;;  %v11666_v19 = vld [vmem:[%s14184_s10 + $0x1430] sm:$0xf0]  ;;  %v12117_v31 = vor.u32 %v13113_v37, %v12114_v3  ;;  %v15073_v46 = vadd.f32 %v7740_v41, %v7728_v5  ;;  %v9336_v2 = vld [vmem:[%s14184_s10 + $0x1e8] sm:$0xf] }
 0x31b   : > { %7968 = vmatpush.bf16.msrb.mxu2 %v11845_v40  ;;  %v13033_v32 = vld [vmem:[%s14184_s10 + $0x1524] sm:$0xf]  ;;  %v11794_v33 = vld [vmem:[%s14184_s10 + $0x1530] sm:$0xf0]  ;;  %v11669_v42 = vor.u32 %v13001_v15, %v11666_v19  ;;  %v12420_v37 = vld [vmem:[%s14184_s10 + $0x1f4] sm:$0xf0] }
 0x31c   : > { %7981 = vmatpush.bf16.msrb.mxu3 %v11973_v38  ;;  %7947 = vmatmul.bf16.vlgmr.msrb.gmra.mxu0 %v14585_v26  ;;  %v13065_v35 = vld [vmem:[%s14184_s10 + $0x1624] sm:$0xf]  ;;  %v11922_v36 = vld [vmem:[%s14184_s10 + $0x1630] sm:$0xf0]  ;;  %v11797_v38 = vor.u32 %v13033_v32, %v11794_v33  ;;  %v7716_v47 = vpop.f32.mrf.mxu2  ;;  %v9192_v32 = vld [vmem:[%s14184_s10 + $0xc8] sm:$0xf] }
 0x31d   : > { %7991 = vmatpush.bf16.msra.mxu0 %v12149_v43  ;;  %v13109_v18 = vld [vmem:[%s14184_s10 + $0x1784] sm:$0xf]  ;;  %v12098_v40 = vld [vmem:[%s14184_s10 + $0x1790] sm:$0xf0]  ;;  %v11925_v48 = vor.u32 %v13065_v35, %v11922_v36  ;;  %v7729_v53 = vpop.f32.mrf.mxu3  ;;  %v12384_v33 = vld [vmem:[%s14184_s10 + $0xd4] sm:$0xf0] }
 0x31e   : > { %7956 = vmatpush.bf16.msrb.mxu1 %v11701_v50  ;;  %v12997_v43 = vld [vmem:[%s14184_s10 + $0x1404] sm:$0xf]  ;;  %v11650_v44 = vld [vmem:[%s14184_s10 + $0x1410] sm:$0xf0]  ;;  %v12101_v39 = vor.u32 %v13109_v18, %v12098_v40  ;;  %v9320_v36 = vld [vmem:[%s14184_s10 + $0x1c8] sm:$0xf] }
 0x31f   : > { %7969 = vmatpush.bf16.msrb.mxu2 %v11829_v51  ;;  %v13029_v45 = vld [vmem:[%s14184_s10 + $0x1504] sm:$0xf]  ;;  %v11778_v50 = vld [vmem:[%s14184_s10 + $0x1510] sm:$0xf0]  ;;  %v11653_v0 = vor.u32 %v12997_v43, %v11650_v44  ;;  %v12416_v18 = vld [vmem:[%s14184_s10 + $0x1d4] sm:$0xf0] }
 0x320   : > { %7982 = vmatpush.bf16.msrb.mxu3 %v11957_v59  ;;  %v13061_v51 = vld [vmem:[%s14184_s10 + $0x1604] sm:$0xf]  ;;  %v11906_v52 = vld [vmem:[%s14184_s10 + $0x1610] sm:$0xf0]  ;;  %v11781_v1 = vor.u32 %v13029_v45, %v11778_v50  ;;  %v9321_v45 = vor.u32 %v12416_v18, %v9320_v36  ;;  %v9304_v50 = vld [vmem:[%s14184_s10 + $0x1a8] sm:$0xf] }
 0x321   : > { %7992 = vmatpush.bf16.msra.mxu0 %v12133_v60  ;;  %v13105_v58 = vld [vmem:[%s14184_s10 + $0x1764] sm:$0xf]  ;;  %v12082_v59 = vld [vmem:[%s14184_s10 + $0x1770] sm:$0xf0]  ;;  %v11909_v3 = vor.u32 %v13061_v51, %v11906_v52  ;;  %v7742_v35 = vpop.f32.mrf.mxu0  ;;  %v12412_v51 = vld [vmem:[%s14184_s10 + $0x1b4] sm:$0xf0] }
 0x322   : > { %7957 = vmatpush.bf16.msrb.mxu1 %v11685_v7  ;;  %v13137_v60 = vld [vmem:[%s14184_s10 + $0x1864] sm:$0xf]  ;;  %v12210_v49 = vld [vmem:[%s14184_s10 + $0x1870] sm:$0xf0]  ;;  %v12085_v5 = vor.u32 %v13105_v58, %v12082_v59  ;;  %v9209_v7 = vor.u32 %v12388_v62, %v9208_v61  ;;  %v9305_v62 = vor.u32 %v12412_v51, %v9304_v50  ;;  %v9144_v35 = vld [vmem:[%s14184_s10 + $0x68] sm:$0xf] }
 0x323   : > { %7970 = vmatpush.bf16.msrb.mxu2 %v11813_v63  ;;  %v12213_v6 = vor.u32 %v13137_v60, %v12210_v49  ;;  %v13101_v63 = vld [vmem:[%s14184_s10 + $0x1744] sm:$0xf]  ;;  %v12066_v15 = vld [vmem:[%s14184_s10 + $0x1750] sm:$0xf0]  ;;  %v12372_v36 = vld [vmem:[%s14184_s10 + $0x74] sm:$0xf0] }
 0x324   : > { %7983 = vmatpush.bf16.msrb.mxu3 %v11941_v27  ;;  %v13133_v19 = vld [vmem:[%s14184_s10 + $0x1844] sm:$0xf]  ;;  %v9337_v27 = vor.u32 %v12420_v37, %v9336_v2  ;;  %v12069_v40 = vor.u32 %v13101_v63, %v12066_v15  ;;  %v12050_v43 = vld [vmem:[%s14184_s10 + $0x1730] sm:$0xf0]  ;;  %v9288_v2 = vld [vmem:[%s14184_s10 + $0x188] sm:$0xf] }
 0x325   : > { %7993 = vmatpush.bf16.msra.mxu0 %v12117_v31  ;;  %v12194_v31 = vld [vmem:[%s14184_s10 + $0x1850] sm:$0xf0]  ;;  %v13129_v44 = vld [vmem:[%s14184_s10 + $0x1824] sm:$0xf]  ;;  %v12408_v37 = vld [vmem:[%s14184_s10 + $0x194] sm:$0xf0] }
 0x326   : > { %7958 = vmatpush.bf16.msrb.mxu1 %v11669_v42  ;;  %v12197_v41 = vor.u32 %v13133_v19, %v12194_v31  ;;  %v9193_v42 = vor.u32 %v12384_v33, %v9192_v32  ;;  %v12178_v47 = vld [vmem:[%s14184_s10 + $0x1830] sm:$0xf0]  ;;  %v13093_v53 = vld [vmem:[%s14184_s10 + $0x1704] sm:$0xf]  ;;  %v12484_v63 = vld [vmem:[%s14184_s10 + $0x3f4] sm:$0xf0]  ;;  %v9289_v32 = vor.u32 %v12408_v37, %v9288_v2 }
 0x327   : > { %7971 = vmatpush.bf16.msrb.mxu2 %v11797_v38  ;;  %v13097_v38 = vld [vmem:[%s14184_s10 + $0x1724] sm:$0xf]  ;;  %v12181_v58 = vor.u32 %v13129_v44, %v12178_v47  ;;  %v12034_v60 = vld [vmem:[%s14184_s10 + $0x1710] sm:$0xf0]  ;;  %v9272_v18 = vld [vmem:[%s14184_s10 + $0x168] sm:$0xf] }
 0x328   : > { %7984 = vmatpush.bf16.msrb.mxu3 %v11925_v48  ;;  %v9176_v48 = vld [vmem:[%s14184_s10 + $0xa8] sm:$0xf]  ;;  %v12053_v52 = vor.u32 %v13097_v38, %v12050_v43  ;;  %v13125_v49 = vld [vmem:[%s14184_s10 + $0x1804] sm:$0xf]  ;;  %v12162_v61 = vld [vmem:[%s14184_s10 + $0x1810] sm:$0xf0] }
 0x329   : > { %7994 = vmatpush.bf16.msra.mxu0 %v12101_v39  ;;  %v12380_v39 = vld [vmem:[%s14184_s10 + $0xb4] sm:$0xf0]  ;;  %v12165_v19 = vor.u32 %v13125_v49, %v12162_v61  ;;  %v9576_v43 = vld [vmem:[%s14184_s10 + $0x3c8] sm:$0xf] }
 0x32a   : > { %7959 = vmatpush.bf16.msrb.mxu1 %v11653_v0  ;;  %v9177_v59 = vor.u32 %v12380_v39, %v9176_v48  ;;  %v9160_v0 = vld [vmem:[%s14184_s10 + $0x88] sm:$0xf]  ;;  %v7753_v15 = vpop.f32.mrf.mxu1  ;;  %v12448_v38 = vld [vmem:[%s14184_s10 + $0x2d4] sm:$0xf0] }
 0x32b   : > { %7972 = vmatpush.bf16.msrb.mxu2 %v11781_v1  ;;  %v12376_v1 = vld [vmem:[%s14184_s10 + $0x94] sm:$0xf0]  ;;  %v7754_v31 = vadd.f32 %v7753_v15, %v15073_v46  ;;  %v9145_v46 = vor.u32 %v12372_v36, %v9144_v35  ;;  %v9128_v39 = vld [vmem:[%s14184_s10 + $0x48] sm:$0xf] }
 0x32c   : > { %7985 = vmatpush.bf16.msrb.mxu3 %v11909_v3  ;;  %v9464_v3 = vld [vmem:[%s14184_s10 + $0x2e8] sm:$0xf]  ;;  %v12480_v44 = vld [vmem:[%s14184_s10 + $0x3d4] sm:$0xf0] }
 0x32d   : > { %7995 = vmatpush.bf16.msra.mxu0 %v12085_v5  ;;  %7960 = vmatmul.bf16.vlgmr.msrb.gmra.mxu1 %v14615_v11  ;;  %v12452_v5 = vld [vmem:[%s14184_s10 + $0x2f4] sm:$0xf0]  ;;  %v9256_v51 = vld [vmem:[%s14184_s10 + $0x148] sm:$0xf] }
 0x32e   : > { %8008 = vmatpush.bf16.msra.mxu1 %v12213_v6  ;;  %7973 = vmatmul.bf16.vlgmr.msrb.gmra.mxu2 %v14619_v13  ;;  %v12037_v6 = vor.u32 %v13093_v53, %v12034_v60  ;;  %v9465_v33 = vor.u32 %v12452_v5, %v9464_v3  ;;  %v12368_v50 = vld [vmem:[%s14184_s10 + $0x54] sm:$0xf0]  ;;  %v9432_v60 = vld [vmem:[%s14184_s10 + $0x2a8] sm:$0xf] }
 0x32f   : > { %8017 = vmatpush.bf16.msra.mxu2 %v9209_v7  ;;  %7986 = vmatmul.bf16.vlgmr.msrb.gmra.mxu3 %v14617_v12  ;;  %v9592_v7 = vld [vmem:[%s14184_s10 + $0x3e8] sm:$0xf]  ;;  %v12444_v49 = vld [vmem:[%s14184_s10 + $0x2b4] sm:$0xf0]  ;;  %v9129_v2 = vor.u32 %v12368_v50, %v9128_v39 }
 0x330   : > { %8030 = vmatpush.bf16.msra.mxu3 %v9337_v27  ;;  %v9161_v27 = vor.u32 %v12376_v1, %v9160_v0  ;;  %v9560_v61 = vld [vmem:[%s14184_s10 + $0x3a8] sm:$0xf]  ;;  %v9433_v3 = vor.u32 %v12444_v49, %v9432_v60  ;;  %v12396_v15 = vld [vmem:[%s14184_s10 + $0x134] sm:$0xf0] }
 0x331   : > { %7996 = vmatpush.bf16.msra.mxu0 %v12069_v40  ;;  %v9593_v40 = vor.u32 %v12484_v63, %v9592_v7  ;;  %v9112_v5 = vld [vmem:[%s14184_s10 + $0x28] sm:$0xf]  ;;  %v12472_v35 = vld [vmem:[%s14184_s10 + $0x394] sm:$0xf0] }
 0x332   : > { %8009 = vmatpush.bf16.msra.mxu1 %v12197_v41  ;;  %v12404_v41 = vld [vmem:[%s14184_s10 + $0x174] sm:$0xf0]  ;;  %v7779_v53 = vpop.f32.mrf.mxu3  ;;  %v7755_v1 = vpop.f32.mrf.mxu1  ;;  %v9240_v7 = vld [vmem:[%s14184_s10 + $0x128] sm:$0xf] }
 0x333   : > { %8018 = vmatpush.bf16.msra.mxu2 %v9193_v42  ;;  %v9448_v42 = vld [vmem:[%s14184_s10 + $0x2c8] sm:$0xf]  ;;  %v9273_v47 = vor.u32 %v12404_v41, %v9272_v18  ;;  %v12436_v39 = vld [vmem:[%s14184_s10 + $0x274] sm:$0xf0] }
 0x334   : > { %8031 = vmatpush.bf16.msra.mxu3 %v9321_v45  ;;  %v7766_v45 = vpop.f32.mrf.mxu2  ;;  %v9449_v48 = vor.u32 %v12448_v38, %v9448_v42  ;;  %v9241_v42 = vor.u32 %v12396_v15, %v9240_v7  ;;  %v9528_v50 = vld [vmem:[%s14184_s10 + $0x368] sm:$0xf]  ;;  %v12548_v60 = vld [vmem:[%s14184_s10 + $0x5f4] sm:$0xf0] }
 0x335   : > { %7997 = vmatpush.bf16.msra.mxu0 %v12053_v52  ;;  %v7767_v52 = vadd.f32 %v7766_v45, %v7754_v31  ;;  %v13231_v31 = vld [vmem:[#allocation1] sm:$0xff]  ;;  %v9384_v1 = vld [vmem:[%s14184_s10 + $0x248] sm:$0xf] }
 0x336   : > { %8010 = vmatpush.bf16.msra.mxu1 %v12181_v58  ;;  %v9577_v58 = vor.u32 %v12480_v44, %v9576_v43  ;;  %v12360_v43 = vld [vmem:[%s14184_s10 + $0x14] sm:$0xf0]  ;;  %v9224_v44 = vld [vmem:[%s14184_s10 + $0x108] sm:$0xf] }
 0x337   : > { %8019 = vmatpush.bf16.msra.mxu2 %v9177_v59  ;;  %v12400_v59 = vld [vmem:[%s14184_s10 + $0x154] sm:$0xf0]  ;;  %v7780_v0 = vadd.f32 %v7779_v53, %v7767_v52  ;;  %v9720_v52 = vld [vmem:[%s14184_s10 + $0x4e8] sm:$0xf] }
 0x338   : > { %8032 = vmatpush.bf16.msra.mxu3 %v9305_v62  ;;  %v12476_v62 = vld [vmem:[%s14184_s10 + $0x3b4] sm:$0xf0]  ;;  %v9257_v37 = vor.u32 %v12400_v59, %v9256_v51  ;;  %v9848_v59 = vld [vmem:[%s14184_s10 + $0x5e8] sm:$0xf] }
 0x339   : > { %7998 = vmatpush.bf16.msra.mxu0 %v12037_v6  ;;  %v12364_v6 = vld [vmem:[%s14184_s10 + $0x34] sm:$0xf0]  ;;  %v9561_v63 = vor.u32 %v12476_v62, %v9560_v61  ;;  %v9832_v15 = vld [vmem:[%s14184_s10 + $0x5c8] sm:$0xf] }
 0x33a   : > { %8011 = vmatpush.bf16.msra.mxu1 %v12165_v19  ;;  %v9416_v19 = vld [vmem:[%s14184_s10 + $0x288] sm:$0xf]  ;;  %v9113_v36 = vor.u32 %v12364_v6, %v9112_v5  ;;  %v7781_v45 = vpop.f32.mrf.mxu3  ;;  %v12468_v51 = vld [vmem:[%s14184_s10 + $0x374] sm:$0xf0] }
 0x33b   : > { %8020 = vmatpush.bf16.msra.mxu2 %v9161_v27  ;;  %v12440_v27 = vld [vmem:[%s14184_s10 + $0x294] sm:$0xf0]  ;;  %v9529_v62 = vor.u32 %v12468_v51, %v9528_v50  ;;  %v9704_v6 = vld [vmem:[%s14184_s10 + $0x4c8] sm:$0xf] }
 0x33c   : > { %8033 = vmatpush.bf16.msra.mxu3 %v9289_v32  ;;  %7999 = vmatmul.bf16.vlgmr.msra.gmra.mxu0 %v14621_v14  ;;  %v7792_v32 = vpop.f32.mrf.mxu0  ;;  %v7768_v41 = vpop.f32.mrf.mxu2  ;;  %v9417_v38 = vor.u32 %v12440_v27, %v9416_v19  ;;  %v12516_v53 = vld [vmem:[%s14184_s10 + $0x4f4] sm:$0xf0]  ;;  %v9352_v45 = vld [vmem:[%s14184_s10 + $0x208] sm:$0xf] }
 0x33d   : > { %8043 = vmatpush.bf16.msrb.mxu0 %v9465_v33  ;;  %12223 = vmatmul.msk.bf16.vlgmr.msra.gmra.mxu1 %vm7364_vm0, %v13231_v31  ;;  %v9544_v33 = vld [vmem:[%s14184_s10 + $0x388] sm:$0xf]  ;;  %v15144_v18 = vadd.f32 %v7792_v32, %v7780_v0  ;;  %v9721_v0 = vor.u32 %v12516_v53, %v9720_v52  ;;  %v12464_v5 = vld [vmem:[%s14184_s10 + $0x354] sm:$0xf0] }
 0x33e   : > { %8056 = vmatpush.bf16.msrb.mxu1 %v9593_v40  ;;  %v9096_v40 = vld [vmem:[%s14184_s10 + $0x8] sm:$0xf]  ;;  %v12512_v7 = vld [vmem:[%s14184_s10 + $0x4d4] sm:$0xf0] }
 0x33f   : > { %8021 = vmatpush.bf16.msra.mxu2 %v9145_v46  ;;  %v12392_v46 = vld [vmem:[%s14184_s10 + $0x114] sm:$0xf0]  ;;  %v9705_v32 = vor.u32 %v12512_v7, %v9704_v6  ;;  %v9480_v50 = vld [vmem:[%s14184_s10 + $0x308] sm:$0xf] }
 0x340   : > { %8034 = vmatpush.bf16.msra.mxu3 %v9273_v47  ;;  %v9545_v47 = vor.u32 %v12472_v35, %v9544_v33  ;;  %v9225_v49 = vor.u32 %v12392_v46, %v9224_v44  ;;  %v12544_v19 = vld [vmem:[%s14184_s10 + $0x5d4] sm:$0xf0]  ;;  %v9368_v33 = vld [vmem:[%s14184_s10 + $0x228] sm:$0xf] }
 0x341   : > { %8044 = vmatpush.bf16.msrb.mxu0 %v9449_v48  ;;  %v9400_v48 = vld [vmem:[%s14184_s10 + $0x268] sm:$0xf]  ;;  %v12428_v35 = vld [vmem:[%s14184_s10 + $0x234] sm:$0xf0] }
 0x342   : > { %8057 = vmatpush.bf16.msrb.mxu1 %v9577_v58  ;;  %v9097_v58 = vor.u32 %v12360_v43, %v9096_v40  ;;  %v9401_v61 = vor.u32 %v12436_v39, %v9400_v48  ;;  %v9833_v40 = vor.u32 %v12544_v19, %v9832_v15  ;;  %v12460_v41 = vld [vmem:[%s14184_s10 + $0x334] sm:$0xf0]  ;;  %v9816_v43 = vld [vmem:[%s14184_s10 + $0x5a8] sm:$0xf]  ;;  %v9369_v46 = vor.u32 %v12428_v35, %v9368_v33 }
 0x343   : > { %8022 = vmatpush.bf16.msra.mxu2 %v9129_v2  ;;  %v12432_v2 = vld [vmem:[%s14184_s10 + $0x254] sm:$0xf0]  ;;  %v9672_v53 = vld [vmem:[%s14184_s10 + $0x488] sm:$0xf] }
 0x344   : > { %8035 = vmatpush.bf16.msra.mxu3 %v9257_v37  ;;  %v9512_v37 = vld [vmem:[%s14184_s10 + $0x348] sm:$0xf]  ;;  %v9385_v27 = vor.u32 %v12432_v2, %v9384_v1  ;;  %v12540_v44 = vld [vmem:[%s14184_s10 + $0x5b4] sm:$0xf0] }
 0x345   : > { %8045 = vmatpush.bf16.msrb.mxu0 %v9433_v3  ;;  %v9849_v3 = vor.u32 %v12548_v60, %v9848_v59  ;;  %v9513_v31 = vor.u32 %v12464_v5, %v9512_v37  ;;  %v12424_v39 = vld [vmem:[%s14184_s10 + $0x214] sm:$0xf0]  ;;  %v9817_v52 = vor.u32 %v12540_v44, %v9816_v43  ;;  %v9800_v59 = vld [vmem:[%s14184_s10 + $0x588] sm:$0xf] }
 0x346   : > { %8058 = vmatpush.bf16.msrb.mxu1 %v9561_v63  ;;  %v7794_v63 = vpop.f32.mrf.mxu0  ;;  %v12456_v51 = vld [vmem:[%s14184_s10 + $0x314] sm:$0xf0]  ;;  %v9353_v1 = vor.u32 %v12424_v39, %v9352_v45  ;;  %v10104_v2 = vld [vmem:[%s14184_s10 + $0x7e8] sm:$0xf] }
 0x347   : > { %8023 = vmatpush.bf16.msra.mxu2 %v9113_v36  ;;  %v9496_v36 = vld [vmem:[%s14184_s10 + $0x328] sm:$0xf]  ;;  %v12612_v37 = vld [vmem:[%s14184_s10 + $0x7f4] sm:$0xf0] }
 0x348   : > { %8036 = vmatpush.bf16.msra.mxu3 %v9241_v42  ;;  %v9688_v42 = vld [vmem:[%s14184_s10 + $0x4a8] sm:$0xf]  ;;  %v12500_v15 = vld [vmem:[%s14184_s10 + $0x474] sm:$0xf0] }
 0x349   : > { %8046 = vmatpush.bf16.msrb.mxu0 %v9417_v38  ;;  %v12508_v38 = vld [vmem:[%s14184_s10 + $0x4b4] sm:$0xf0]  ;;  %v9656_v63 = vld [vmem:[%s14184_s10 + $0x468] sm:$0xf] }
 0x34a   : > { %8059 = vmatpush.bf16.msrb.mxu1 %v9545_v47  ;;  %v9497_v47 = vor.u32 %v12460_v41, %v9496_v36  ;;  %v9689_v48 = vor.u32 %v12508_v38, %v9688_v42  ;;  %v7805_v60 = vpop.f32.mrf.mxu1  ;;  %v9784_v19 = vld [vmem:[%s14184_s10 + $0x568] sm:$0xf]  ;;  %v12608_v35 = vld [vmem:[%s14184_s10 + $0x7d4] sm:$0xf0]  ;;  %v9657_v36 = vor.u32 %v12500_v15, %v9656_v63 }
 0x34b   : > { %8024 = vmatpush.bf16.msra.mxu2 %v9097_v58  ;;  %v12504_v58 = vld [vmem:[%s14184_s10 + $0x494] sm:$0xf0]  ;;  %v10088_v33 = vld [vmem:[%s14184_s10 + $0x7c8] sm:$0xf] }
 0x34c   : > { %8037 = vmatpush.bf16.msra.mxu3 %v9225_v49  ;;  %v12536_v49 = vld [vmem:[%s14184_s10 + $0x594] sm:$0xf0]  ;;  %v9673_v5 = vor.u32 %v12504_v58, %v9672_v53  ;;  %v9640_v43 = vld [vmem:[%s14184_s10 + $0x448] sm:$0xf] }
 0x34d   : > { %8047 = vmatpush.bf16.msrb.mxu0 %v9401_v61  ;;  %v9976_v61 = vld [vmem:[%s14184_s10 + $0x6e8] sm:$0xf]  ;;  %v9801_v6 = vor.u32 %v12536_v49, %v9800_v59  ;;  %v12496_v44 = vld [vmem:[%s14184_s10 + $0x454] sm:$0xf0] }
 0x34e   : > { %8060 = vmatpush.bf16.msrb.mxu1 %v9529_v62  ;;  %8025 = vmatmul.bf16.vlgmr.msra.gmra.mxu2 %v14291_v29  ;;  %v12580_v62 = vld [vmem:[%s14184_s10 + $0x6f4] sm:$0xf0]  ;;  %v9944_v39 = vld [vmem:[%s14184_s10 + $0x6a8] sm:$0xf]  ;;  %v9641_v59 = vor.u32 %v12496_v44, %v9640_v43 }
 0x34f   : > { %8069 = vmatpush.bf16.msrb.mxu2 %v9721_v0  ;;  %8038 = vmatmul.bf16.vlgmr.msra.gmra.mxu3 %v14298_v34  ;;  %v7806_v0 = vadd.f32 %v7805_v60, %v15144_v18  ;;  %v9977_v7 = vor.u32 %v12580_v62, %v9976_v61  ;;  %v12532_v18 = vld [vmem:[%s14184_s10 + $0x574] sm:$0xf0]  ;;  %v9624_v61 = vld [vmem:[%s14184_s10 + $0x428] sm:$0xf] }
 0x350   : > { %8082 = vmatpush.bf16.msrb.mxu3 %v9849_v3  ;;  %v9481_v3 = vor.u32 %v12456_v51, %v9480_v50  ;;  %v12572_v50 = vld [vmem:[%s14184_s10 + $0x6b4] sm:$0xf0]  ;;  %v10232_v44 = vld [vmem:[%s14184_s10 + $0x8e8] sm:$0xf] }
 0x351   : > { %8048 = vmatpush.bf16.msrb.mxu0 %v9385_v27  ;;  %v10105_v27 = vor.u32 %v12612_v37, %v10104_v2  ;;  %v7818_v41 = vpop.f32.mrf.mxu2  ;;  %v12604_v53 = vld [vmem:[%s14184_s10 + $0x7b4] sm:$0xf0]  ;;  %v9945_v49 = vor.u32 %v12572_v50, %v9944_v39  ;;  %v9928_v37 = vld [vmem:[%s14184_s10 + $0x688] sm:$0xf] }
 0x352   : > { %8061 = vmatpush.bf16.msrb.mxu1 %v9513_v31  ;;  %v9960_v31 = vld [vmem:[%s14184_s10 + $0x6c8] sm:$0xf]  ;;  %v7831_v38 = vpop.f32.mrf.mxu3  ;;  %v7819_v45 = vadd.f32 %v7818_v41, %v7806_v0  ;;  %v7807_v51 = vpop.f32.mrf.mxu1  ;;  %v12492_v62 = vld [vmem:[%s14184_s10 + $0x434] sm:$0xf0] }
 0x353   : > { %8070 = vmatpush.bf16.msrb.mxu2 %v9705_v32  ;;  %v12576_v32 = vld [vmem:[%s14184_s10 + $0x6d4] sm:$0xf0]  ;;  %v9752_v0 = vld [vmem:[%s14184_s10 + $0x528] sm:$0xf]  ;;  %v9625_v15 = vor.u32 %v12492_v62, %v9624_v61 }
 0x354   : > { %8083 = vmatpush.bf16.msrb.mxu3 %v9833_v40  ;;  %v9785_v40 = vor.u32 %v12532_v18, %v9784_v19  ;;  %v9961_v42 = vor.u32 %v12576_v32, %v9960_v31  ;;  %v7832_v58 = vadd.f32 %v7831_v38, %v7819_v45  ;;  %v12524_v2 = vld [vmem:[%s14184_s10 + $0x534] sm:$0xf0]  ;;  %v9608_v19 = vld [vmem:[%s14184_s10 + $0x408] sm:$0xf] }
 0x355   : > { %8049 = vmatpush.bf16.msrb.mxu0 %v9369_v46  ;;  %v9768_v46 = vld [vmem:[%s14184_s10 + $0x548] sm:$0xf]  ;;  %v12488_v31 = vld [vmem:[%s14184_s10 + $0x414] sm:$0xf0] }
 0x356   : > { %8062 = vmatpush.bf16.msrb.mxu1 %v9497_v47  ;;  %v10089_v47 = vor.u32 %v12608_v35, %v10088_v33  ;;  %v9736_v32 = vld [vmem:[%s14184_s10 + $0x508] sm:$0xf]  ;;  %v12520_v33 = vld [vmem:[%s14184_s10 + $0x514] sm:$0xf0]  ;;  %v9609_v45 = vor.u32 %v12488_v31, %v9608_v19 }
 0x357   : > { %8071 = vmatpush.bf16.msrb.mxu2 %v9689_v48  ;;  %v12528_v48 = vld [vmem:[%s14184_s10 + $0x554] sm:$0xf0]  ;;  %v9912_v41 = vld [vmem:[%s14184_s10 + $0x668] sm:$0xf]  ;;  %v9737_v39 = vor.u32 %v12520_v33, %v9736_v32 }
 0x358   : > { %8084 = vmatpush.bf16.msrb.mxu3 %v9817_v52  ;;  %v10072_v52 = vld [vmem:[%s14184_s10 + $0x7a8] sm:$0xf]  ;;  %v9769_v60 = vor.u32 %v12528_v48, %v9768_v46  ;;  %v12596_v43 = vld [vmem:[%s14184_s10 + $0x774] sm:$0xf0] }
 0x359   : > { %8050 = vmatpush.bf16.msrb.mxu0 %v9353_v1  ;;  %v10073_v1 = vor.u32 %v12604_v53, %v10072_v52  ;;  %v7820_v35 = vpop.f32.mrf.mxu2  ;;  %v10040_v38 = vld [vmem:[%s14184_s10 + $0x768] sm:$0xf]  ;;  %v12644_v46 = vld [vmem:[%s14184_s10 + $0x8f4] sm:$0xf0] }
 0x35a   : > { %8063 = vmatpush.bf16.msrb.mxu1 %v9481_v3  ;;  %v12568_v3 = vld [vmem:[%s14184_s10 + $0x694] sm:$0xf0]  ;;  %v10041_v51 = vor.u32 %v12596_v43, %v10040_v38  ;;  %v10233_v52 = vor.u32 %v12644_v46, %v10232_v44  ;;  %v9896_v53 = vld [vmem:[%s14184_s10 + $0x648] sm:$0xf] }
 0x35b   : > { %8072 = vmatpush.bf16.msrb.mxu2 %v9673_v5  ;;  %v7844_v5 = vpop.f32.mrf.mxu0  ;;  %v9929_v18 = vor.u32 %v12568_v3, %v9928_v37  ;;  %v12676_v48 = vld [vmem:[%s14184_s10 + $0x9f4] sm:$0xf0]  ;;  %v10216_v61 = vld [vmem:[%s14184_s10 + $0x8c8] sm:$0xf] }
 0x35c   : > { %8085 = vmatpush.bf16.msrb.mxu3 %v9801_v6  ;;  %8051 = vmatmul.bf16.vlgmr.msrb.gmra.mxu0 %v14289_v28  ;;  %v10056_v6 = vld [vmem:[%s14184_s10 + $0x788] sm:$0xf]  ;;  %v15215_v63 = vadd.f32 %v7844_v5, %v7832_v58  ;;  %v12560_v58 = vld [vmem:[%s14184_s10 + $0x654] sm:$0xf0] }
 0x35d   : > { %8095 = vmatpush.bf16.msra.mxu0 %v9977_v7  ;;  %8064 = vmatmul.bf16.vlgmr.msrb.gmra.mxu1 %v14293_v30  ;;  %v12600_v7 = vld [vmem:[%s14184_s10 + $0x794] sm:$0xf0]  ;;  %v9897_v37 = vor.u32 %v12560_v58, %v9896_v53  ;;  %v10328_v32 = vld [vmem:[%s14184_s10 + $0x9a8] sm:$0xf] }
 0x35e   : > { %8108 = vmatpush.bf16.msra.mxu1 %v10105_v27  ;;  %v9753_v27 = vor.u32 %v12524_v2, %v9752_v0  ;;  %v12640_v62 = vld [vmem:[%s14184_s10 + $0x8d4] sm:$0xf0]  ;;  %v9992_v38 = vld [vmem:[%s14184_s10 + $0x708] sm:$0xf] }
 0x35f   : > { %8073 = vmatpush.bf16.msrb.mxu2 %v9657_v36  ;;  %v7833_v36 = vpop.f32.mrf.mxu3  ;;  %v12672_v2 = vld [vmem:[%s14184_s10 + $0x9d4] sm:$0xf0]  ;;  %v10217_v5 = vor.u32 %v12640_v62, %v10216_v61  ;;  %v10184_v46 = vld [vmem:[%s14184_s10 + $0x888] sm:$0xf] }
 0x360   : > { %8086 = vmatpush.bf16.msrb.mxu3 %v9785_v40  ;;  %v10057_v40 = vor.u32 %v12600_v7, %v10056_v6  ;;  %v9880_v6 = vld [vmem:[%s14184_s10 + $0x628] sm:$0xf]  ;;  %v12556_v7 = vld [vmem:[%s14184_s10 + $0x634] sm:$0xf0] }
 0x361   : > { %8096 = vmatpush.bf16.msra.mxu0 %v9961_v42  ;;  %v12564_v42 = vld [vmem:[%s14184_s10 + $0x674] sm:$0xf0]  ;;  %v9881_v35 = vor.u32 %v12556_v7, %v9880_v6  ;;  %v9864_v36 = vld [vmem:[%s14184_s10 + $0x608] sm:$0xf] }
 0x362   : > { %8109 = vmatpush.bf16.msra.mxu1 %v10089_v47  ;;  %v10360_v47 = vld [vmem:[%s14184_s10 + $0x9e8] sm:$0xf]  ;;  %v9913_v50 = vor.u32 %v12564_v42, %v9912_v41  ;;  %v12636_v31 = vld [vmem:[%s14184_s10 + $0x8b4] sm:$0xf0] }
 0x363   : > { %8074 = vmatpush.bf16.msrb.mxu2 %v9641_v59  ;;  %v10024_v59 = vld [vmem:[%s14184_s10 + $0x748] sm:$0xf]  ;;  %v7846_v0 = vpop.f32.mrf.mxu0  ;;  %v12668_v33 = vld [vmem:[%s14184_s10 + $0x9b4] sm:$0xf0] }
 0x364   : > { %8087 = vmatpush.bf16.msrb.mxu3 %v9769_v60  ;;  %v10361_v60 = vor.u32 %v12676_v48, %v10360_v47  ;;  %v12552_v42 = vld [vmem:[%s14184_s10 + $0x614] sm:$0xf0]  ;;  %v10329_v44 = vor.u32 %v12668_v33, %v10328_v32  ;;  %v10312_v47 = vld [vmem:[%s14184_s10 + $0x988] sm:$0xf] }
 0x365   : > { %8097 = vmatpush.bf16.msra.mxu0 %v9945_v49  ;;  %v12592_v49 = vld [vmem:[%s14184_s10 + $0x754] sm:$0xf0]  ;;  %v9865_v53 = vor.u32 %v12552_v42, %v9864_v36  ;;  %v10616_v58 = vld [vmem:[%s14184_s10 + $0xbe8] sm:$0xf] }
 0x366   : > { %8110 = vmatpush.bf16.msra.mxu1 %v10073_v1  ;;  %v10344_v1 = vld [vmem:[%s14184_s10 + $0x9c8] sm:$0xf]  ;;  %v10025_v3 = vor.u32 %v12592_v49, %v10024_v59  ;;  %v12584_v43 = vld [vmem:[%s14184_s10 + $0x714] sm:$0xf0] }
 0x367   : > { %8075 = vmatpush.bf16.msrb.mxu2 %v9625_v15  ;;  %v10008_v15 = vld [vmem:[%s14184_s10 + $0x728] sm:$0xf]  ;;  %v10345_v19 = vor.u32 %v12672_v2, %v10344_v1  ;;  %v12740_v59 = vld [vmem:[%s14184_s10 + $0xbf4] sm:$0xf0] }
 0x368   : > { %8088 = vmatpush.bf16.msrb.mxu3 %v9753_v27  ;;  %v12588_v27 = vld [vmem:[%s14184_s10 + $0x734] sm:$0xf0]  ;;  %v10168_v0 = vld [vmem:[%s14184_s10 + $0x868] sm:$0xf] }
 0x369   : > { %8098 = vmatpush.bf16.msra.mxu0 %v9929_v18  ;;  %v10200_v18 = vld [vmem:[%s14184_s10 + $0x8a8] sm:$0xf]  ;;  %v12628_v1 = vld [vmem:[%s14184_s10 + $0x874] sm:$0xf0] }
 0x36a   : > { %8111 = vmatpush.bf16.msra.mxu1 %v10057_v40  ;;  %v10009_v40 = vor.u32 %v12588_v27, %v10008_v15  ;;  %v10201_v41 = vor.u32 %v12636_v31, %v10200_v18  ;;  %v7857_v48 = vpop.f32.mrf.mxu1  ;;  %v10296_v2 = vld [vmem:[%s14184_s10 + $0x968] sm:$0xf]  ;;  %v12736_v7 = vld [vmem:[%s14184_s10 + $0xbd4] sm:$0xf0]  ;;  %v10169_v15 = vor.u32 %v12628_v1, %v10168_v0 }
 0x36b   : > { %8076 = vmatpush.bf16.msrb.mxu2 %v9609_v45  ;;  %v12632_v45 = vld [vmem:[%s14184_s10 + $0x894] sm:$0xf0]  ;;  %v10600_v6 = vld [vmem:[%s14184_s10 + $0xbc8] sm:$0xf] }
 0x36c   : > { %8089 = vmatpush.bf16.msrb.mxu3 %v9737_v39  ;;  %v12664_v39 = vld [vmem:[%s14184_s10 + $0x994] sm:$0xf0]  ;;  %v10185_v49 = vor.u32 %v12632_v45, %v10184_v46  ;;  %v10152_v32 = vld [vmem:[%s14184_s10 + $0x848] sm:$0xf] }
 0x36d   : > { %8099 = vmatpush.bf16.msra.mxu0 %v9913_v50  ;;  %v10488_v50 = vld [vmem:[%s14184_s10 + $0xae8] sm:$0xf]  ;;  %v10313_v61 = vor.u32 %v12664_v39, %v10312_v47  ;;  %v12624_v33 = vld [vmem:[%s14184_s10 + $0x854] sm:$0xf0] }
 0x36e   : > { %8112 = vmatpush.bf16.msra.mxu1 %v10041_v51  ;;  %8077 = vmatmul.bf16.vlgmr.msrb.gmra.mxu2 %v14332_v8  ;;  %v12708_v51 = vld [vmem:[%s14184_s10 + $0xaf4] sm:$0xf0]  ;;  %v10456_v42 = vld [vmem:[%s14184_s10 + $0xaa8] sm:$0xf]  ;;  %v10153_v47 = vor.u32 %v12624_v33, %v10152_v32 }
 0x36f   : > { %8121 = vmatpush.bf16.msra.mxu2 %v10233_v52  ;;  %8090 = vmatmul.bf16.vlgmr.msrb.gmra.mxu3 %v14336_v10  ;;  %v7858_v52 = vadd.f32 %v7857_v48, %v15215_v63  ;;  %v10489_v62 = vor.u32 %v12708_v51, %v10488_v50  ;;  %v12660_v63 = vld [vmem:[%s14184_s10 + $0x974] sm:$0xf0]  ;;  %v10136_v50 = vld [vmem:[%s14184_s10 + $0x828] sm:$0xf] }
 0x370   : > { %8134 = vmatpush.bf16.msra.mxu3 %v10361_v60  ;;  %v9993_v60 = vor.u32 %v12584_v43, %v9992_v38  ;;  %v12700_v38 = vld [vmem:[%s14184_s10 + $0xab4] sm:$0xf0]  ;;  %v10744_v33 = vld [vmem:[%s14184_s10 + $0xce8] sm:$0xf] }
 0x371   : > { %8100 = vmatpush.bf16.msra.mxu0 %v9897_v37  ;;  %v10617_v37 = vor.u32 %v12740_v59, %v10616_v58  ;;  %v7870_v27 = vpop.f32.mrf.mxu2  ;;  %v12732_v46 = vld [vmem:[%s14184_s10 + $0xbb4] sm:$0xf0]  ;;  %v10457_v39 = vor.u32 %v12700_v38, %v10456_v42  ;;  %v10440_v59 = vld [vmem:[%s14184_s10 + $0xa88] sm:$0xf] }
 0x372   : > { %8113 = vmatpush.bf16.msra.mxu1 %v10025_v3  ;;  %v10472_v3 = vld [vmem:[%s14184_s10 + $0xac8] sm:$0xf]  ;;  %v7883_v31 = vpop.f32.mrf.mxu3  ;;  %v7871_v36 = vadd.f32 %v7870_v27, %v7858_v52  ;;  %v7859_v43 = vpop.f32.mrf.mxu1  ;;  %v12620_v51 = vld [vmem:[%s14184_s10 + $0x834] sm:$0xf0] }
 0x373   : > { %8122 = vmatpush.bf16.msra.mxu2 %v10217_v5  ;;  %v12704_v5 = vld [vmem:[%s14184_s10 + $0xad4] sm:$0xf0]  ;;  %v10264_v52 = vld [vmem:[%s14184_s10 + $0x928] sm:$0xf]  ;;  %v10137_v1 = vor.u32 %v12620_v51, %v10136_v50 }
 0x374   : > { %8135 = vmatpush.bf16.msra.mxu3 %v10345_v19  ;;  %v10297_v19 = vor.u32 %v12660_v63, %v10296_v2  ;;  %v10473_v18 = vor.u32 %v12704_v5, %v10472_v3  ;;  %v7884_v45 = vadd.f32 %v7883_v31, %v7871_v36  ;;  %v12652_v58 = vld [vmem:[%s14184_s10 + $0x934] sm:$0xf0]  ;;  %v10120_v2 = vld [vmem:[%s14184_s10 + $0x808] sm:$0xf] }
 0x375   : > { %8101 = vmatpush.bf16.msra.mxu0 %v9881_v35  ;;  %v10280_v35 = vld [vmem:[%s14184_s10 + $0x948] sm:$0xf]  ;;  %v12616_v3 = vld [vmem:[%s14184_s10 + $0x814] sm:$0xf0] }
 0x376   : > { %8114 = vmatpush.bf16.msra.mxu1 %v10009_v40  ;;  %v10601_v40 = vor.u32 %v12736_v7, %v10600_v6  ;;  %v10248_v5 = vld [vmem:[%s14184_s10 + $0x908] sm:$0xf]  ;;  %v12648_v6 = vld [vmem:[%s14184_s10 + $0x914] sm:$0xf0]  ;;  %v10121_v36 = vor.u32 %v12616_v3, %v10120_v2 }
 0x377   : > { %8123 = vmatpush.bf16.msra.mxu2 %v10201_v41  ;;  %v12656_v41 = vld [vmem:[%s14184_s10 + $0x954] sm:$0xf0]  ;;  %v10424_v27 = vld [vmem:[%s14184_s10 + $0xa68] sm:$0xf]  ;;  %v10249_v42 = vor.u32 %v12648_v6, %v10248_v5 }
 0x378   : > { %8136 = vmatpush.bf16.msra.mxu3 %v10329_v44  ;;  %v10584_v44 = vld [vmem:[%s14184_s10 + $0xba8] sm:$0xf]  ;;  %v10281_v48 = vor.u32 %v12656_v41, %v10280_v35  ;;  %v12724_v32 = vld [vmem:[%s14184_s10 + $0xb74] sm:$0xf0] }
 0x379   : > { %8102 = vmatpush.bf16.msra.mxu0 %v9865_v53  ;;  %v10585_v53 = vor.u32 %v12732_v46, %v10584_v44  ;;  %v7872_v7 = vpop.f32.mrf.mxu2  ;;  %v10552_v31 = vld [vmem:[%s14184_s10 + $0xb68] sm:$0xf]  ;;  %v12772_v35 = vld [vmem:[%s14184_s10 + $0xcf4] sm:$0xf0] }
 0x37a   : > { %8115 = vmatpush.bf16.msra.mxu1 %v9993_v60  ;;  %v12696_v60 = vld [vmem:[%s14184_s10 + $0xa94] sm:$0xf0]  ;;  %v10553_v43 = vor.u32 %v12724_v32, %v10552_v31  ;;  %v10745_v44 = vor.u32 %v12772_v35, %v10744_v33  ;;  %v10408_v46 = vld [vmem:[%s14184_s10 + $0xa48] sm:$0xf] }
 0x37b   : > { %8124 = vmatpush.bf16.msra.mxu2 %v10185_v49  ;;  %v7896_v49 = vpop.f32.mrf.mxu0  ;;  %v10441_v63 = vor.u32 %v12696_v60, %v10440_v59  ;;  %v12804_v41 = vld [vmem:[%s14184_s10 + $0xdf4] sm:$0xf0]  ;;  %v10728_v50 = vld [vmem:[%s14184_s10 + $0xcc8] sm:$0xf] }
 0x37c   : > { %8137 = vmatpush.bf16.msra.mxu3 %v10313_v61  ;;  %8103 = vmatmul.bf16.vlgmr.msra.gmra.mxu0 %v14327_v4  ;;  %v10568_v61 = vld [vmem:[%s14184_s10 + $0xb88] sm:$0xf]  ;;  %v15286_v0 = vadd.f32 %v7896_v49, %v7884_v45  ;;  %v12688_v45 = vld [vmem:[%s14184_s10 + $0xa54] sm:$0xf0] }
 0x37d   : > { %8147 = vmatpush.bf16.msrb.mxu0 %v10489_v62  ;;  %8116 = vmatmul.bf16.vlgmr.msra.gmra.mxu1 %v14334_v9  ;;  %v12728_v62 = vld [vmem:[%s14184_s10 + $0xb94] sm:$0xf0]  ;;  %v10409_v59 = vor.u32 %v12688_v45, %v10408_v46  ;;  %v10840_v5 = vld [vmem:[%s14184_s10 + $0xda8] sm:$0xf] }
 0x37e   : > { %8160 = vmatpush.bf16.msrb.mxu1 %v10617_v37  ;;  %v10265_v37 = vor.u32 %v12652_v58, %v10264_v52  ;;  %v12768_v51 = vld [vmem:[%s14184_s10 + $0xcd4] sm:$0xf0]  ;;  %v10504_v31 = vld [vmem:[%s14184_s10 + $0xb08] sm:$0xf] }
 0x37f   : > { %8125 = vmatpush.bf16.msra.mxu2 %v10169_v15  ;;  %v7885_v15 = vpop.f32.mrf.mxu3  ;;  %v12800_v58 = vld [vmem:[%s14184_s10 + $0xdd4] sm:$0xf0]  ;;  %v10729_v49 = vor.u32 %v12768_v51, %v10728_v50  ;;  %v10696_v35 = vld [vmem:[%s14184_s10 + $0xc88] sm:$0xf] }
 0x380   : > { %8138 = vmatpush.bf16.msra.mxu3 %v10297_v19  ;;  %v10569_v19 = vor.u32 %v12728_v62, %v10568_v61  ;;  %v10392_v61 = vld [vmem:[%s14184_s10 + $0xa28] sm:$0xf]  ;;  %v12684_v62 = vld [vmem:[%s14184_s10 + $0xa34] sm:$0xf0] }
 0x381   : > { %8148 = vmatpush.bf16.msrb.mxu0 %v10473_v18  ;;  %v12692_v18 = vld [vmem:[%s14184_s10 + $0xa74] sm:$0xf0]  ;;  %v10393_v7 = vor.u32 %v12684_v62, %v10392_v61  ;;  %v10376_v15 = vld [vmem:[%s14184_s10 + $0xa08] sm:$0xf] }
 0x382   : > { %8161 = vmatpush.bf16.msrb.mxu1 %v10601_v40  ;;  %v10872_v40 = vld [vmem:[%s14184_s10 + $0xde8] sm:$0xf]  ;;  %v10425_v38 = vor.u32 %v12692_v18, %v10424_v27  ;;  %v12764_v3 = vld [vmem:[%s14184_s10 + $0xcb4] sm:$0xf0] }
 0x383   : > { %8126 = vmatpush.bf16.msra.mxu2 %v10153_v47  ;;  %v10536_v47 = vld [vmem:[%s14184_s10 + $0xb48] sm:$0xf]  ;;  %v7898_v52 = vpop.f32.mrf.mxu0  ;;  %v12796_v6 = vld [vmem:[%s14184_s10 + $0xdb4] sm:$0xf0] }
 0x384   : > { %8139 = vmatpush.bf16.msra.mxu3 %v10281_v48  ;;  %v10873_v48 = vor.u32 %v12804_v41, %v10872_v40  ;;  %v12680_v18 = vld [vmem:[%s14184_s10 + $0xa14] sm:$0xf0]  ;;  %v10841_v33 = vor.u32 %v12796_v6, %v10840_v5  ;;  %v10824_v40 = vld [vmem:[%s14184_s10 + $0xd88] sm:$0xf] }
 0x385   : > { %8149 = vmatpush.bf16.msrb.mxu0 %v10457_v39  ;;  %v12720_v39 = vld [vmem:[%s14184_s10 + $0xb54] sm:$0xf0]  ;;  %v10377_v46 = vor.u32 %v12680_v18, %v10376_v15  ;;  %v11128_v45 = vld [vmem:[%s14184_s10 + $0xfe8] sm:$0xf] }
 0x386   : > { %8162 = vmatpush.bf16.msrb.mxu1 %v10585_v53  ;;  %v10856_v53 = vld [vmem:[%s14184_s10 + $0xdc8] sm:$0xf]  ;;  %v10537_v60 = vor.u32 %v12720_v39, %v10536_v47  ;;  %v12712_v32 = vld [vmem:[%s14184_s10 + $0xb14] sm:$0xf0] }
 0x387   : > { %8127 = vmatpush.bf16.msra.mxu2 %v10137_v1  ;;  %v10520_v1 = vld [vmem:[%s14184_s10 + $0xb28] sm:$0xf]  ;;  %v10857_v2 = vor.u32 %v12800_v58, %v10856_v53  ;;  %v12868_v47 = vld [vmem:[%s14184_s10 + $0xff4] sm:$0xf0] }
 0x388   : > { %8140 = vmatpush.bf16.msra.mxu3 %v10265_v37  ;;  %v12716_v37 = vld [vmem:[%s14184_s10 + $0xb34] sm:$0xf0]  ;;  %v10680_v52 = vld [vmem:[%s14184_s10 + $0xc68] sm:$0xf] }
 0x389   : > { %8150 = vmatpush.bf16.msrb.mxu0 %v10441_v63  ;;  %v10712_v63 = vld [vmem:[%s14184_s10 + $0xca8] sm:$0xf]  ;;  %v12756_v53 = vld [vmem:[%s14184_s10 + $0xc74] sm:$0xf0] }
 0x38a   : > { %8163 = vmatpush.bf16.msrb.mxu1 %v10569_v19  ;;  %v10521_v19 = vor.u32 %v12716_v37, %v10520_v1  ;;  %v10713_v27 = vor.u32 %v12764_v3, %v10712_v63  ;;  %v7909_v41 = vpop.f32.mrf.mxu1  ;;  %v10808_v58 = vld [vmem:[%s14184_s10 + $0xd68] sm:$0xf]  ;;  %v12864_v62 = vld [vmem:[%s14184_s10 + $0xfd4] sm:$0xf0]  ;;  %v10681_v1 = vor.u32 %v12756_v53, %v10680_v52 }
 0x38b   : > { %8128 = vmatpush.bf16.msra.mxu2 %v10121_v36  ;;  %v12760_v36 = vld [vmem:[%s14184_s10 + $0xc94] sm:$0xf0]  ;;  %v11112_v61 = vld [vmem:[%s14184_s10 + $0xfc8] sm:$0xf] }
 0x38c   : > { %8141 = vmatpush.bf16.msra.mxu3 %v10249_v42  ;;  %v12792_v42 = vld [vmem:[%s14184_s10 + $0xd94] sm:$0xf0]  ;;  %v10697_v39 = vor.u32 %v12760_v36, %v10696_v35  ;;  %v10664_v5 = vld [vmem:[%s14184_s10 + $0xc48] sm:$0xf] }
 0x38d   : > { %8151 = vmatpush.bf16.msrb.mxu0 %v10425_v38  ;;  %v11000_v38 = vld [vmem:[%s14184_s10 + $0xee8] sm:$0xf]  ;;  %v10825_v50 = vor.u32 %v12792_v42, %v10824_v40  ;;  %v12752_v6 = vld [vmem:[%s14184_s10 + $0xc54] sm:$0xf0] }
 0x38e   : > { %8164 = vmatpush.bf16.msrb.mxu1 %v10553_v43  ;;  %8129 = vmatmul.bf16.vlgmr.msra.gmra.mxu2 %v14422_v20  ;;  %v12836_v43 = vld [vmem:[%s14184_s10 + $0xef4] sm:$0xf0]  ;;  %v10968_v18 = vld [vmem:[%s14184_s10 + $0xea8] sm:$0xf]  ;;  %v10665_v40 = vor.u32 %v12752_v6, %v10664_v5 }
 0x38f   : > { %8173 = vmatpush.bf16.msrb.mxu2 %v10745_v44  ;;  %8142 = vmatmul.bf16.vlgmr.msra.gmra.mxu3 %v14428_v24  ;;  %v7910_v44 = vadd.f32 %v7909_v41, %v15286_v0  ;;  %v11001_v51 = vor.u32 %v12836_v43, %v11000_v38  ;;  %v12788_v0 = vld [vmem:[%s14184_s10 + $0xd74] sm:$0xf0]  ;;  %v10648_v38 = vld [vmem:[%s14184_s10 + $0xc28] sm:$0xf] }
 0x390   : > { %8186 = vmatpush.bf16.msrb.mxu3 %v10873_v48  ;;  %v10505_v48 = vor.u32 %v12712_v32, %v10504_v31  ;;  %v12828_v31 = vld [vmem:[%s14184_s10 + $0xeb4] sm:$0xf0]  ;;  %v11256_v6 = vld [vmem:[%s14184_s10 + $0x10e8] sm:$0xf] }
 0x391   : > { %8152 = vmatpush.bf16.msrb.mxu0 %v10409_v59  ;;  %v11129_v59 = vor.u32 %v12868_v47, %v11128_v45  ;;  %v7922_v37 = vpop.f32.mrf.mxu2  ;;  %v12860_v35 = vld [vmem:[%s14184_s10 + $0xfb4] sm:$0xf0]  ;;  %v10969_v42 = vor.u32 %v12828_v31, %v10968_v18  ;;  %v10952_v47 = vld [vmem:[%s14184_s10 + $0xe88] sm:$0xf] }
 0x392   : > { %8165 = vmatpush.bf16.msrb.mxu1 %v10537_v60  ;;  %v10984_v60 = vld [vmem:[%s14184_s10 + $0xec8] sm:$0xf]  ;;  %v7935_v3 = vpop.f32.mrf.mxu3  ;;  %v7923_v15 = vadd.f32 %v7922_v37, %v7910_v44  ;;  %v7911_v32 = vpop.f32.mrf.mxu1  ;;  %v12748_v43 = vld [vmem:[%s14184_s10 + $0xc34] sm:$0xf0] }
 0x393   : > { %8174 = vmatpush.bf16.msrb.mxu2 %v10729_v49  ;;  %v12832_v49 = vld [vmem:[%s14184_s10 + $0xed4] sm:$0xf0]  ;;  %v10776_v44 = vld [vmem:[%s14184_s10 + $0xd28] sm:$0xf]  ;;  %v10649_v53 = vor.u32 %v12748_v43, %v10648_v38 }
 0x394   : > { %8187 = vmatpush.bf16.msrb.mxu3 %v10857_v2  ;;  %v10809_v2 = vor.u32 %v12788_v0, %v10808_v58  ;;  %v10985_v63 = vor.u32 %v12832_v49, %v10984_v60  ;;  %v7936_v36 = vadd.f32 %v7935_v3, %v7923_v15  ;;  %v12780_v45 = vld [vmem:[%s14184_s10 + $0xd34] sm:$0xf0]  ;;  %v10632_v58 = vld [vmem:[%s14184_s10 + $0xc08] sm:$0xf] }
 0x395   : > { %8153 = vmatpush.bf16.msrb.mxu0 %v10393_v7  ;;  %v10792_v7 = vld [vmem:[%s14184_s10 + $0xd48] sm:$0xf]  ;;  %v12744_v60 = vld [vmem:[%s14184_s10 + $0xc14] sm:$0xf0] }
 0x396   : > { %8166 = vmatpush.bf16.msrb.mxu1 %v10521_v19  ;;  %v11113_v19 = vor.u32 %v12864_v62, %v11112_v61  ;;  %v10760_v49 = vld [vmem:[%s14184_s10 + $0xd08] sm:$0xf]  ;;  %v12776_v61 = vld [vmem:[%s14184_s10 + $0xd14] sm:$0xf0]  ;;  %v10633_v15 = vor.u32 %v12744_v60, %v10632_v58 }
 0x397   : > { %8175 = vmatpush.bf16.msrb.mxu2 %v10713_v27  ;;  %v12784_v27 = vld [vmem:[%s14184_s10 + $0xd54] sm:$0xf0]  ;;  %v10936_v37 = vld [vmem:[%s14184_s10 + $0xe68] sm:$0xf]  ;;  %v10761_v18 = vor.u32 %v12776_v61, %v10760_v49 }
 0x398   : > { %8188 = vmatpush.bf16.msrb.mxu3 %v10841_v33  ;;  %v11096_v33 = vld [vmem:[%s14184_s10 + $0xfa8] sm:$0xf]  ;;  %v10793_v41 = vor.u32 %v12784_v27, %v10792_v7  ;;  %v12852_v5 = vld [vmem:[%s14184_s10 + $0xf74] sm:$0xf0] }
 0x399   : > { %8154 = vmatpush.bf16.msrb.mxu0 %v10377_v46  ;;  %v11097_v46 = vor.u32 %v12860_v35, %v11096_v33  ;;  %v7924_v62 = vpop.f32.mrf.mxu2  ;;  %v11064_v3 = vld [vmem:[%s14184_s10 + $0xf68] sm:$0xf]  ;;  %v12900_v7 = vld [vmem:[%s14184_s10 + $0x10f4] sm:$0xf0] }
 0x39a   : > { %8167 = vmatpush.bf16.msrb.mxu1 %v10505_v48  ;;  %v12824_v48 = vld [vmem:[%s14184_s10 + $0xe94] sm:$0xf0]  ;;  %v11065_v32 = vor.u32 %v12852_v5, %v11064_v3  ;;  %v11257_v33 = vor.u32 %v12900_v7, %v11256_v6  ;;  %v10920_v35 = vld [vmem:[%s14184_s10 + $0xe48] sm:$0xf] }
 0x39b   : > { %8176 = vmatpush.bf16.msrb.mxu2 %v10697_v39  ;;  %v7948_v39 = vpop.f32.mrf.mxu0  ;;  %v10953_v0 = vor.u32 %v12824_v48, %v10952_v47  ;;  %v12932_v27 = vld [vmem:[%s14184_s10 + $0x11f4] sm:$0xf0]  ;;  %v11240_v38 = vld [vmem:[%s14184_s10 + $0x10c8] sm:$0xf] }
 0x39c   : > { %8189 = vmatpush.bf16.msrb.mxu3 %v10825_v50  ;;  %8155 = vmatmul.bf16.vlgmr.msrb.gmra.mxu0 %v14426_v23  ;;  %v11080_v50 = vld [vmem:[%s14184_s10 + $0xf88] sm:$0xf]  ;;  %v15357_v52 = vadd.f32 %v7948_v39, %v7936_v36  ;;  %v12816_v36 = vld [vmem:[%s14184_s10 + $0xe54] sm:$0xf0] }
 0x39d   : > { %8199 = vmatpush.bf16.msra.mxu0 %v11001_v51  ;;  %8168 = vmatmul.bf16.vlgmr.msrb.gmra.mxu1 %v14430_v25  ;;  %v12856_v51 = vld [vmem:[%s14184_s10 + $0xf94] sm:$0xf0]  ;;  %v10921_v47 = vor.u32 %v12816_v36, %v10920_v35  ;;  %v11352_v49 = vld [vmem:[%s14184_s10 + $0x11a8] sm:$0xf] }
 0x39e   : > { %8212 = vmatpush.bf16.msra.mxu1 %v11129_v59  ;;  %v10777_v59 = vor.u32 %v12780_v45, %v10776_v44  ;;  %v12896_v43 = vld [vmem:[%s14184_s10 + $0x10d4] sm:$0xf0]  ;;  %v11016_v3 = vld [vmem:[%s14184_s10 + $0xf08] sm:$0xf] }
 0x39f   : > { %8177 = vmatpush.bf16.msrb.mxu2 %v10681_v1  ;;  %v7937_v1 = vpop.f32.mrf.mxu3  ;;  %v12928_v45 = vld [vmem:[%s14184_s10 + $0x11d4] sm:$0xf0]  ;;  %v11241_v39 = vor.u32 %v12896_v43, %v11240_v38  ;;  %v11208_v7 = vld [vmem:[%s14184_s10 + $0x1088] sm:$0xf] }
 0x3a0   : > { %8190 = vmatpush.bf16.msrb.mxu3 %v10809_v2  ;;  %v11081_v2 = vor.u32 %v12856_v51, %v11080_v50  ;;  %v10904_v50 = vld [vmem:[%s14184_s10 + $0xe28] sm:$0xf]  ;;  %v12812_v51 = vld [vmem:[%s14184_s10 + $0xe34] sm:$0xf0] }
 0x3a1   : > { %8200 = vmatpush.bf16.msra.mxu0 %v10985_v63  ;;  %v12820_v63 = vld [vmem:[%s14184_s10 + $0xe74] sm:$0xf0]  ;;  %v10905_v62 = vor.u32 %v12812_v51, %v10904_v50  ;;  %v10888_v1 = vld [vmem:[%s14184_s10 + $0xe08] sm:$0xf] }
 0x3a2   : > { %8213 = vmatpush.bf16.msra.mxu1 %v11113_v19  ;;  %v11384_v19 = vld [vmem:[%s14184_s10 + $0x11e8] sm:$0xf]  ;;  %v10937_v31 = vor.u32 %v12820_v63, %v10936_v37  ;;  %v12892_v60 = vld [vmem:[%s14184_s10 + $0x10b4] sm:$0xf0] }
 0x3a3   : > { %8178 = vmatpush.bf16.msrb.mxu2 %v10665_v40  ;;  %v11048_v40 = vld [vmem:[%s14184_s10 + $0xf48] sm:$0xf]  ;;  %v7950_v44 = vpop.f32.mrf.mxu0  ;;  %v12924_v61 = vld [vmem:[%s14184_s10 + $0x11b4] sm:$0xf0] }
 0x3a4   : > { %8191 = vmatpush.bf16.msrb.mxu3 %v10793_v41  ;;  %v11385_v41 = vor.u32 %v12932_v27, %v11384_v19  ;;  %v12808_v63 = vld [vmem:[%s14184_s10 + $0xe14] sm:$0xf0]  ;;  %v11353_v6 = vor.u32 %v12924_v61, %v11352_v49  ;;  %v11336_v19 = vld [vmem:[%s14184_s10 + $0x1188] sm:$0xf] }
 0x3a5   : > { %8201 = vmatpush.bf16.msra.mxu0 %v10969_v42  ;;  %v12848_v42 = vld [vmem:[%s14184_s10 + $0xf54] sm:$0xf0]  ;;  %v10889_v35 = vor.u32 %v12808_v63, %v10888_v1  ;;  %v11640_v36 = vld [vmem:[%s14184_s10 + $0x13e8] sm:$0xf] }
 0x3a6   : > { %8214 = vmatpush.bf16.msra.mxu1 %v11097_v46  ;;  %v11368_v46 = vld [vmem:[%s14184_s10 + $0x11c8] sm:$0xf]  ;;  %v11049_v48 = vor.u32 %v12848_v42, %v11048_v40  ;;  %v12840_v5 = vld [vmem:[%s14184_s10 + $0xf14] sm:$0xf0] }
 0x3a7   : > { %8179 = vmatpush.bf16.msrb.mxu2 %v10649_v53  ;;  %v11032_v53 = vld [vmem:[%s14184_s10 + $0xf28] sm:$0xf]  ;;  %v11369_v58 = vor.u32 %v12928_v45, %v11368_v46  ;;  %v12996_v40 = vld [vmem:[%s14184_s10 + $0x13f4] sm:$0xf0] }
 0x3a8   : > { %8192 = vmatpush.bf16.msrb.mxu3 %v10777_v59  ;;  %v12844_v59 = vld [vmem:[%s14184_s10 + $0xf34] sm:$0xf0]  ;;  %v11192_v44 = vld [vmem:[%s14184_s10 + $0x1068] sm:$0xf] }
 0x3a9   : > { %8202 = vmatpush.bf16.msra.mxu0 %v10953_v0  ;;  %v11224_v0 = vld [vmem:[%s14184_s10 + $0x10a8] sm:$0xf]  ;;  %v12884_v46 = vld [vmem:[%s14184_s10 + $0x1074] sm:$0xf0] }
 0x3aa   : > { %8215 = vmatpush.bf16.msra.mxu1 %v11081_v2  ;;  %v11033_v2 = vor.u32 %v12844_v59, %v11032_v53  ;;  %v11225_v37 = vor.u32 %v12892_v60, %v11224_v0  ;;  %v7961_v27 = vpop.f32.mrf.mxu1  ;;  %v11320_v45 = vld [vmem:[%s14184_s10 + $0x1168] sm:$0xf]  ;;  %v12992_v51 = vld [vmem:[%s14184_s10 + $0x13d4] sm:$0xf0]  ;;  %v11193_v53 = vor.u32 %v12884_v46, %v11192_v44 }
 0x3ab   : > { %8180 = vmatpush.bf16.msrb.mxu2 %v10633_v15  ;;  %v12888_v15 = vld [vmem:[%s14184_s10 + $0x1094] sm:$0xf0]  ;;  %v11624_v50 = vld [vmem:[%s14184_s10 + $0x13c8] sm:$0xf] }
 0x3ac   : > { %8193 = vmatpush.bf16.msrb.mxu3 %v10761_v18  ;;  %v12920_v18 = vld [vmem:[%s14184_s10 + $0x1194] sm:$0xf0]  ;;  %v11209_v42 = vor.u32 %v12888_v15, %v11208_v7  ;;  %v11176_v49 = vld [vmem:[%s14184_s10 + $0x1048] sm:$0xf] }
 0x3ad   : > { %8203 = vmatpush.bf16.msra.mxu0 %v10937_v31  ;;  %v11512_v31 = vld [vmem:[%s14184_s10 + $0x12e8] sm:$0xf]  ;;  %v11337_v38 = vor.u32 %v12920_v18, %v11336_v19  ;;  %v12880_v61 = vld [vmem:[%s14184_s10 + $0x1054] sm:$0xf0] }
 0x3ae   : > { %8216 = vmatpush.bf16.msra.mxu1 %v11065_v32  ;;  %8181 = vmatmul.bf16.vlgmr.msrb.gmra.mxu2 %v14488_v54  ;;  %v12964_v32 = vld [vmem:[%s14184_s10 + $0x12f4] sm:$0xf0]  ;;  %v11177_v19 = vor.u32 %v12880_v61, %v11176_v49  ;;  %v11768_v61 = vld [vmem:[%s14184_s10 + $0x14e8] sm:$0xf] }
 0x3af   : > { %8225 = vmatpush.bf16.msra.mxu2 %v11257_v33  ;;  %8194 = vmatmul.bf16.vlgmr.msrb.gmra.mxu3 %v14492_v56  ;;  %v7962_v33 = vadd.f32 %v7961_v27, %v15357_v52  ;;  %v11513_v43 = vor.u32 %v12964_v32, %v11512_v31  ;;  %v12916_v52 = vld [vmem:[%s14184_s10 + $0x1174] sm:$0xf0]  ;;  %v11160_v31 = vld [vmem:[%s14184_s10 + $0x1028] sm:$0xf] }
 0x3b0   : > { %8238 = vmatpush.bf16.msra.mxu3 %v11385_v41  ;;  %v11017_v41 = vor.u32 %v12840_v5, %v11016_v3  ;;  %v12912_v63 = vld [vmem:[%s14184_s10 + $0x1154] sm:$0xf0]  ;;  %v11480_v3 = vld [vmem:[%s14184_s10 + $0x12a8] sm:$0xf] }
 0x3b1   : > { %8204 = vmatpush.bf16.msra.mxu0 %v10921_v47  ;;  %v11641_v47 = vor.u32 %v12996_v40, %v11640_v36  ;;  %v7974_v59 = vpop.f32.mrf.mxu2  ;;  %v12956_v5 = vld [vmem:[%s14184_s10 + $0x12b4] sm:$0xf0]  ;;  %v11464_v40 = vld [vmem:[%s14184_s10 + $0x1288] sm:$0xf] }
 0x3b2   : > { %8217 = vmatpush.bf16.msra.mxu1 %v11049_v48  ;;  %v11496_v48 = vld [vmem:[%s14184_s10 + $0x12c8] sm:$0xf]  ;;  %v7987_v60 = vpop.f32.mrf.mxu3  ;;  %v7975_v1 = vadd.f32 %v7974_v59, %v7962_v33  ;;  %v12988_v7 = vld [vmem:[%s14184_s10 + $0x13b4] sm:$0xf0]  ;;  %v11481_v18 = vor.u32 %v12956_v5, %v11480_v3 }
 0x3b3   : > { %8226 = vmatpush.bf16.msra.mxu2 %v11241_v39  ;;  %v12960_v39 = vld [vmem:[%s14184_s10 + $0x12d4] sm:$0xf0]  ;;  %v11288_v33 = vld [vmem:[%s14184_s10 + $0x1128] sm:$0xf] }
 0x3b4   : > { %8239 = vmatpush.bf16.msra.mxu3 %v11369_v58  ;;  %v11321_v58 = vor.u32 %v12916_v52, %v11320_v45  ;;  %v11497_v0 = vor.u32 %v12960_v39, %v11496_v48  ;;  %v7988_v15 = vadd.f32 %v7987_v60, %v7975_v1  ;;  %v12876_v32 = vld [vmem:[%s14184_s10 + $0x1034] sm:$0xf0]  ;;  %v11144_v45 = vld [vmem:[%s14184_s10 + $0x1008] sm:$0xf] }
 0x3b5   : > { %8205 = vmatpush.bf16.msra.mxu0 %v10905_v62  ;;  %v11304_v62 = vld [vmem:[%s14184_s10 + $0x1148] sm:$0xf]  ;;  %v12908_v36 = vld [vmem:[%s14184_s10 + $0x1134] sm:$0xf0]  ;;  %v11161_v46 = vor.u32 %v12876_v32, %v11160_v31 }
 0x3b6   : > { %8218 = vmatpush.bf16.msra.mxu1 %v11033_v2  ;;  %v11625_v2 = vor.u32 %v12992_v51, %v11624_v50  ;;  %v11305_v27 = vor.u32 %v12912_v63, %v11304_v62  ;;  %v12872_v48 = vld [vmem:[%s14184_s10 + $0x1014] sm:$0xf0]  ;;  %v11272_v39 = vld [vmem:[%s14184_s10 + $0x1108] sm:$0xf] }
 0x3b7   : > { %8227 = vmatpush.bf16.msra.mxu2 %v11225_v37  ;;  %v7963_v37 = vpop.f32.mrf.mxu1  ;;  %v12904_v50 = vld [vmem:[%s14184_s10 + $0x1114] sm:$0xf0]  ;;  %v11448_v59 = vld [vmem:[%s14184_s10 + $0x1268] sm:$0xf] }
 0x3b8   : > { %8240 = vmatpush.bf16.msra.mxu3 %v11353_v6  ;;  %v11608_v6 = vld [vmem:[%s14184_s10 + $0x13a8] sm:$0xf]  ;;  %v12980_v49 = vld [vmem:[%s14184_s10 + $0x1374] sm:$0xf0]  ;;  %v11273_v5 = vor.u32 %v12904_v50, %v11272_v39 }
 0x3b9   : > { %8206 = vmatpush.bf16.msra.mxu0 %v10889_v35  ;;  %v11609_v35 = vor.u32 %v12988_v7, %v11608_v6  ;;  %v11576_v60 = vld [vmem:[%s14184_s10 + $0x1368] sm:$0xf]  ;;  %v13028_v62 = vld [vmem:[%s14184_s10 + $0x14f4] sm:$0xf0] }
 0x3ba   : > { %8219 = vmatpush.bf16.msra.mxu1 %v11017_v41  ;;  %v12952_v41 = vld [vmem:[%s14184_s10 + $0x1294] sm:$0xf0]  ;;  %v7989_v51 = vpop.f32.mrf.mxu3  ;;  %v11896_v37 = vld [vmem:[%s14184_s10 + $0x15e8] sm:$0xf]  ;;  %v11577_v7 = vor.u32 %v12980_v49, %v11576_v60 }
 0x3bb   : > { %8228 = vmatpush.bf16.msra.mxu2 %v11209_v42  ;;  %v8000_v42 = vpop.f32.mrf.mxu0  ;;  %v11465_v52 = vor.u32 %v12952_v41, %v11464_v40  ;;  %v13060_v63 = vld [vmem:[%s14184_s10 + $0x15f4] sm:$0xf0]  ;;  %v11880_v40 = vld [vmem:[%s14184_s10 + $0x15c8] sm:$0xf] }
 0x3bc   : > { %8241 = vmatpush.bf16.msra.mxu3 %v11337_v38  ;;  %8207 = vmatmul.bf16.vlgmr.msra.gmra.mxu0 %v14490_v55  ;;  %v11592_v38 = vld [vmem:[%s14184_s10 + $0x1388] sm:$0xf]  ;;  %v8001_v44 = vadd.f32 %v8000_v42, %v7988_v15  ;;  %v11769_v15 = vor.u32 %v13028_v62, %v11768_v61  ;;  %v11897_v31 = vor.u32 %v13060_v63, %v11896_v37  ;;  %v12976_v32 = vld [vmem:[%s14184_s10 + $0x1354] sm:$0xf0] }
 0x3bd   : > { %8251 = vmatpush.bf16.msrb.mxu0 %v11513_v43  ;;  %8220 = vmatmul.bf16.vlgmr.msra.gmra.mxu1 %v14494_v57  ;;  %v12984_v43 = vld [vmem:[%s14184_s10 + $0x1394] sm:$0xf0]  ;;  %v11864_v50 = vld [vmem:[%s14184_s10 + $0x15a8] sm:$0xf] }
 0x3be   : > { %8264 = vmatpush.bf16.msrb.mxu1 %v11641_v47  ;;  %v11289_v47 = vor.u32 %v12908_v36, %v11288_v33  ;;  %v11752_v33 = vld [vmem:[%s14184_s10 + $0x14c8] sm:$0xf]  ;;  %v13056_v41 = vld [vmem:[%s14184_s10 + $0x15d4] sm:$0xf0] }
 0x3bf   : > { %8229 = vmatpush.bf16.msra.mxu2 %v11193_v53  ;;  %v7976_v53 = vpop.f32.mrf.mxu2  ;;  %v8013_v1 = vpop.f32.mrf.mxu1  ;;  %v13020_v39 = vld [vmem:[%s14184_s10 + $0x14b4] sm:$0xf0]  ;;  %v11528_v61 = vld [vmem:[%s14184_s10 + $0x1308] sm:$0xf] }
 0x3c0   : > { %8242 = vmatpush.bf16.msra.mxu3 %v11321_v58  ;;  %v11593_v58 = vor.u32 %v12984_v43, %v11592_v38  ;;  %v15440_v3 = vadd.f32 %v8013_v1, %v8001_v44  ;;  %v11416_v44 = vld [vmem:[%s14184_s10 + $0x1228] sm:$0xf]  ;;  %v13052_v51 = vld [vmem:[%s14184_s10 + $0x15b4] sm:$0xf0] }
 0x3c1   : > { %8252 = vmatpush.bf16.msrb.mxu0 %v11497_v0  ;;  %v12948_v0 = vld [vmem:[%s14184_s10 + $0x1274] sm:$0xf0]  ;;  %v11865_v1 = vor.u32 %v13052_v51, %v11864_v50  ;;  %v11848_v63 = vld [vmem:[%s14184_s10 + $0x1588] sm:$0xf] }
 0x3c2   : > { %8265 = vmatpush.bf16.msrb.mxu1 %v11625_v2  ;;  %v11145_v2 = vor.u32 %v12872_v48, %v11144_v45  ;;  %v11449_v6 = vor.u32 %v12948_v0, %v11448_v59  ;;  %v11544_v45 = vld [vmem:[%s14184_s10 + $0x1328] sm:$0xf]  ;;  %v12936_v49 = vld [vmem:[%s14184_s10 + $0x1214] sm:$0xf0] }
 0x3c3   : > { %8230 = vmatpush.bf16.msra.mxu2 %v11177_v19  ;;  %v11432_v19 = vld [vmem:[%s14184_s10 + $0x1248] sm:$0xf]  ;;  %v8002_v36 = vpop.f32.mrf.mxu0  ;;  %v12968_v62 = vld [vmem:[%s14184_s10 + $0x1314] sm:$0xf0] }
 0x3c4   : > { %8243 = vmatpush.bf16.msra.mxu3 %v11305_v27  ;;  %v12944_v27 = vld [vmem:[%s14184_s10 + $0x1254] sm:$0xf0]  ;;  %v11736_v48 = vld [vmem:[%s14184_s10 + $0x14a8] sm:$0xf] }
 0x3c5   : > { %8253 = vmatpush.bf16.msrb.mxu0 %v11481_v18  ;;  %v11560_v18 = vld [vmem:[%s14184_s10 + $0x1348] sm:$0xf]  ;;  %v11433_v42 = vor.u32 %v12944_v27, %v11432_v19  ;;  %v11737_v60 = vor.u32 %v13020_v39, %v11736_v48  ;;  %v13016_v37 = vld [vmem:[%s14184_s10 + $0x1494] sm:$0xf0] }
 0x3c6   : > { %8266 = vmatpush.bf16.msrb.mxu1 %v11609_v35  ;;  %v13024_v35 = vld [vmem:[%s14184_s10 + $0x14d4] sm:$0xf0]  ;;  %v11561_v38 = vor.u32 %v12976_v32, %v11560_v18  ;;  %v11400_v59 = vld [vmem:[%s14184_s10 + $0x1208] sm:$0xf]  ;;  %v11529_v18 = vor.u32 %v12968_v62, %v11528_v61 }
 0x3c7   : > { %8231 = vmatpush.bf16.msra.mxu2 %v11161_v46  ;;  %v11753_v43 = vor.u32 %v13024_v35, %v11752_v33  ;;  %v12940_v46 = vld [vmem:[%s14184_s10 + $0x1234] sm:$0xf0]  ;;  %v8015_v53 = vpop.f32.mrf.mxu1  ;;  %v12152_v19 = vld [vmem:[%s14184_s10 + $0x17e8] sm:$0xf] }
 0x3c8   : > { %8244 = vmatpush.bf16.msra.mxu3 %v11289_v47  ;;  %v11881_v47 = vor.u32 %v13056_v41, %v11880_v40  ;;  %v13124_v27 = vld [vmem:[%s14184_s10 + $0x17f4] sm:$0xf0]  ;;  %v11704_v35 = vld [vmem:[%s14184_s10 + $0x1468] sm:$0xf] }
 0x3c9   : > { %8254 = vmatpush.bf16.msrb.mxu0 %v11465_v52  ;;  %v12972_v52 = vld [vmem:[%s14184_s10 + $0x1334] sm:$0xf0]  ;;  %v11832_v40 = vld [vmem:[%s14184_s10 + $0x1568] sm:$0xf]  ;;  %v12153_v41 = vor.u32 %v13124_v27, %v12152_v19 }
 0x3ca   : > { %8267 = vmatpush.bf16.msrb.mxu1 %v11593_v58  ;;  %v11417_v58 = vor.u32 %v12940_v46, %v11416_v44  ;;  %v11545_v0 = vor.u32 %v12972_v52, %v11544_v45  ;;  %v13012_v36 = vld [vmem:[%s14184_s10 + $0x1474] sm:$0xf0]  ;;  %v12136_v44 = vld [vmem:[%s14184_s10 + $0x17c8] sm:$0xf] }
 0x3cb   : > { %8232 = vmatpush.bf16.msra.mxu2 %v11145_v2  ;;  %v11720_v2 = vld [vmem:[%s14184_s10 + $0x1488] sm:$0xf]  ;;  %v13120_v46 = vld [vmem:[%s14184_s10 + $0x17d4] sm:$0xf0]  ;;  %v11705_v45 = vor.u32 %v13012_v36, %v11704_v35 }
 0x3cc   : > { %8245 = vmatpush.bf16.msra.mxu3 %v11273_v5  ;;  %v13048_v5 = vld [vmem:[%s14184_s10 + $0x1594] sm:$0xf0]  ;;  %v11688_v39 = vld [vmem:[%s14184_s10 + $0x1448] sm:$0xf] }
 0x3cd   : > { %8255 = vmatpush.bf16.msrb.mxu0 %v11449_v6  ;;  %v12024_v6 = vld [vmem:[%s14184_s10 + $0x16e8] sm:$0xf]  ;;  %v11849_v32 = vor.u32 %v13048_v5, %v11848_v63  ;;  %v13008_v50 = vld [vmem:[%s14184_s10 + $0x1454] sm:$0xf0] }
 0x3ce   : > { %8268 = vmatpush.bf16.msrb.mxu1 %v11577_v7  ;;  %8233 = vmatmul.bf16.vlgmr.msra.gmra.mxu2 %v14577_v17  ;;  %v13092_v7 = vld [vmem:[%s14184_s10 + $0x16f4] sm:$0xf0]  ;;  %v11816_v51 = vld [vmem:[%s14184_s10 + $0x1548] sm:$0xf] }
 0x3cf   : > { %8277 = vmatpush.bf16.msrb.mxu2 %v11769_v15  ;;  %8246 = vmatmul.bf16.vlgmr.msra.gmra.mxu3 %v14583_v22  ;;  %v11401_v15 = vor.u32 %v12936_v49, %v11400_v59  ;;  %v12025_v33 = vor.u32 %v13092_v7, %v12024_v6  ;;  %v13040_v59 = vld [vmem:[%s14184_s10 + $0x1554] sm:$0xf0]  ;;  %v12120_v61 = vld [vmem:[%s14184_s10 + $0x17a8] sm:$0xf] }
 0x3d0   : > { %8290 = vmatpush.bf16.msrb.mxu3 %v11897_v31  ;;  %v11721_v31 = vor.u32 %v13016_v37, %v11720_v2  ;;  %v13116_v62 = vld [vmem:[%s14184_s10 + $0x17b4] sm:$0xf0]  ;;  %v11817_v2 = vor.u32 %v13040_v59, %v11816_v51  ;;  %v11672_v63 = vld [vmem:[%s14184_s10 + $0x1428] sm:$0xf] }
 0x3d1   : > { %8256 = vmatpush.bf16.msrb.mxu0 %v11433_v42  ;;  %v13044_v42 = vld [vmem:[%s14184_s10 + $0x1574] sm:$0xf0]  ;;  %v11800_v6 = vld [vmem:[%s14184_s10 + $0x1528] sm:$0xf]  ;;  %v12121_v7 = vor.u32 %v13116_v62, %v12120_v61 }
 0x3d2   : > { %8269 = vmatpush.bf16.msrb.mxu1 %v11561_v38  ;;  %v12008_v38 = vld [vmem:[%s14184_s10 + $0x16c8] sm:$0xf]  ;;  %v11833_v52 = vor.u32 %v13044_v42, %v11832_v40  ;;  %v8039_v53 = vpop.f32.mrf.mxu3  ;;  %v13004_v5 = vld [vmem:[%s14184_s10 + $0x1434] sm:$0xf0] }
 0x3d3   : > { %8278 = vmatpush.bf16.msrb.mxu2 %v11753_v43  ;;  %v13088_v43 = vld [vmem:[%s14184_s10 + $0x16d4] sm:$0xf0]  ;;  %v11976_v19 = vld [vmem:[%s14184_s10 + $0x1688] sm:$0xf] }
 0x3d4   : > { %8291 = vmatpush.bf16.msrb.mxu3 %v11881_v47  ;;  %v8026_v47 = vpop.f32.mrf.mxu2  ;;  %v12009_v48 = vor.u32 %v13088_v43, %v12008_v38  ;;  %v13080_v27 = vld [vmem:[%s14184_s10 + $0x1694] sm:$0xf0]  ;;  %v11656_v35 = vld [vmem:[%s14184_s10 + $0x1408] sm:$0xf] }
 0x3d5   : > { %8257 = vmatpush.bf16.msrb.mxu0 %v11417_v58  ;;  %v12137_v58 = vor.u32 %v13120_v46, %v12136_v44  ;;  %v8040_v49 = vadd.f32 %v8039_v53, %v8026_v47  ;;  %v11977_v38 = vor.u32 %v13080_v27, %v11976_v19  ;;  %v13000_v43 = vld [vmem:[%s14184_s10 + $0x1414] sm:$0xf0]  ;;  %v11784_v44 = vld [vmem:[%s14184_s10 + $0x1508] sm:$0xf]  ;;  %v12382_v27 = vld [vmem:[%s14184_s10 + $0xcc] sm:$0xf] }
 0x3d6   : > { %8270 = vmatpush.bf16.msrb.mxu1 %v11545_v0  ;;  %v11992_v0 = vld [vmem:[%s14184_s10 + $0x16a8] sm:$0xf]  ;;  %v13032_v46 = vld [vmem:[%s14184_s10 + $0x1514] sm:$0xf0]  ;;  %v11657_v59 = vor.u32 %v13000_v43, %v11656_v35 }
 0x3d7   : > { %8279 = vmatpush.bf16.msrb.mxu2 %v11737_v60  ;;  %v13084_v60 = vld [vmem:[%s14184_s10 + $0x16b4] sm:$0xf0]  ;;  %v12216_v53 = vld [vmem:[%s14184_s10 + $0x1868] sm:$0xf] }
 0x3d8   : > { %8292 = vmatpush.bf16.msrb.mxu3 %v11865_v1  ;;  %v11689_v1 = vor.u32 %v13008_v50, %v11688_v39  ;;  %v11993_v37 = vor.u32 %v13084_v60, %v11992_v0  ;;  %v12088_v39 = vld [vmem:[%s14184_s10 + $0x1768] sm:$0xf]  ;;  %v13108_v51 = vld [vmem:[%s14184_s10 + $0x1774] sm:$0xf0]  ;;  %v12386_v0 = vld [vmem:[%s14184_s10 + $0xec] sm:$0xf] }
 0x3d9   : > { %8258 = vmatpush.bf16.msrb.mxu0 %v11401_v15  ;;  %v13036_v15 = vld [vmem:[%s14184_s10 + $0x1534] sm:$0xf0]  ;;  %v9210_v60 = vld [vmem:[%s14184_s10 + $0xf8] sm:$0xf0]  ;;  %v12089_v62 = vor.u32 %v13108_v51, %v12088_v39  ;;  %v12184_v43 = vld [vmem:[%s14184_s10 + $0x1828] sm:$0xf] }
 0x3da   : > { %8271 = vmatpush.bf16.msrb.mxu1 %v11529_v18  ;;  %v12104_v18 = vld [vmem:[%s14184_s10 + $0x1788] sm:$0xf]  ;;  %v8065_v40 = vpop.f32.mrf.mxu1  ;;  %v11801_v42 = vor.u32 %v13036_v15, %v11800_v6  ;;  %v13104_v6 = vld [vmem:[%s14184_s10 + $0x1754] sm:$0xf0] }
 0x3db   : > { %8280 = vmatpush.bf16.msrb.mxu2 %v11721_v31  ;;  %v13112_v31 = vld [vmem:[%s14184_s10 + $0x1794] sm:$0xf0] }
 0x3dc   : > { %8293 = vmatpush.bf16.msrb.mxu3 %v11849_v32  ;;  %8259 = vmatmul.bf16.vlgmr.msrb.gmra.mxu0 %v14581_v21  ;;  %v8052_v32 = vpop.f32.mrf.mxu0  ;;  %v12105_v47 = vor.u32 %v13112_v31, %v12104_v18  ;;  %v13136_v15 = vld [vmem:[%s14184_s10 + $0x1854] sm:$0xf0]  ;;  %v9194_v18 = vld [vmem:[%s14184_s10 + $0xd8] sm:$0xf0] }
 0x3dd   : > { %8303 = vmatpush.bf16.msra.mxu0 %v12025_v33  ;;  %8272 = vmatmul.bf16.vlgmr.msrb.gmra.mxu1 %v14585_v26  ;;  %v11673_v33 = vor.u32 %v13004_v5, %v11672_v63  ;;  %v8053_v36 = vadd.f32 %v8052_v32, %v8040_v49  ;;  %v11785_v49 = vor.u32 %v13032_v46, %v11784_v44  ;;  %v12072_v63 = vld [vmem:[%s14184_s10 + $0x1748] sm:$0xf]  ;;  %v13132_v44 = vld [vmem:[%s14184_s10 + $0x1834] sm:$0xf0]  ;;  %v12378_v46 = vld [vmem:[%s14184_s10 + $0xac] sm:$0xf] }
 0x3de   : > { %8316 = vmatpush.bf16.msra.mxu1 %v12153_v41  ;;  %v8028_v41 = vpop.f32.mrf.mxu2  ;;  %v9213_v5 = vor.u32 %v12386_v0, %v9210_v60  ;;  %v12185_v51 = vor.u32 %v13132_v44, %v12184_v43  ;;  %v13128_v60 = vld [vmem:[%s14184_s10 + $0x1814] sm:$0xf0] }
 0x3df   : > { %8281 = vmatpush.bf16.msrb.mxu2 %v11705_v45  ;;  %v8041_v45 = vpop.f32.mrf.mxu3  ;;  %v15505_v50 = vadd.f32 %v8065_v40, %v8053_v36  ;;  %v11928_v36 = vld [vmem:[%s14184_s10 + $0x1628] sm:$0xf]  ;;  %v13068_v40 = vld [vmem:[%s14184_s10 + $0x1634] sm:$0xf0] }
 0x3e0   : > { %8294 = vmatpush.bf16.msrb.mxu3 %v11833_v52  ;;  %v11960_v52 = vld [vmem:[%s14184_s10 + $0x1668] sm:$0xf]  ;;  %v9178_v45 = vld [vmem:[%s14184_s10 + $0xb8] sm:$0xf0] }
 0x3e1   : > { %8304 = vmatpush.bf16.msra.mxu0 %v12009_v48  ;;  %v13076_v48 = vld [vmem:[%s14184_s10 + $0x1674] sm:$0xf0]  ;;  %v12056_v41 = vld [vmem:[%s14184_s10 + $0x1728] sm:$0xf]  ;;  %v9181_v0 = vor.u32 %v12378_v46, %v9178_v45  ;;  %v12366_v45 = vld [vmem:[%s14184_s10 + $0x4c] sm:$0xf] }
 0x3e2   : > { %8317 = vmatpush.bf16.msra.mxu1 %v12137_v58  ;;  %v13140_v58 = vld [vmem:[%s14184_s10 + $0x1874] sm:$0xf0]  ;;  %v11961_v61 = vor.u32 %v13076_v48, %v11960_v52  ;;  %v8067_v31 = vpop.f32.mrf.mxu1  ;;  %v11912_v52 = vld [vmem:[%s14184_s10 + $0x1608] sm:$0xf] }
 0x3e3   : > { %8282 = vmatpush.bf16.msrb.mxu2 %v11689_v1  ;;  %v12217_v1 = vor.u32 %v13140_v58, %v12216_v53  ;;  %v13064_v48 = vld [vmem:[%s14184_s10 + $0x1614] sm:$0xf0]  ;;  %v12040_v53 = vld [vmem:[%s14184_s10 + $0x1708] sm:$0xf]  ;;  %v9146_v31 = vld [vmem:[%s14184_s10 + $0x78] sm:$0xf0] }
 0x3e4   : > { %8295 = vmatpush.bf16.msrb.mxu3 %v11817_v2  ;;  %v11944_v2 = vld [vmem:[%s14184_s10 + $0x1648] sm:$0xf]  ;;  %v8054_v19 = vpop.f32.mrf.mxu0  ;;  %v13096_v58 = vld [vmem:[%s14184_s10 + $0x1714] sm:$0xf0] }
 0x3e5   : > { %8305 = vmatpush.bf16.msra.mxu0 %v11993_v37  ;;  %v13072_v37 = vld [vmem:[%s14184_s10 + $0x1654] sm:$0xf0] }
 0x3e6   : > { %8318 = vmatpush.bf16.msra.mxu1 %v12121_v7  ;;  %v12200_v7 = vld [vmem:[%s14184_s10 + $0x1848] sm:$0xf]  ;;  %v11945_v32 = vor.u32 %v13072_v37, %v11944_v2  ;;  %v12450_v2 = vld [vmem:[%s14184_s10 + $0x2ec] sm:$0xf]  ;;  %v11913_v37 = vor.u32 %v13064_v48, %v11912_v52 }
 0x3e7   : > { %8283 = vmatpush.bf16.msrb.mxu2 %v11673_v33  ;;  %v12073_v33 = vor.u32 %v13104_v6, %v12072_v63  ;;  %v12201_v35 = vor.u32 %v13136_v15, %v12200_v7  ;;  %v9466_v63 = vld [vmem:[%s14184_s10 + $0x2f8] sm:$0xf0]  ;;  %v12041_v7 = vor.u32 %v13096_v58, %v12040_v53  ;;  %v12410_v53 = vld [vmem:[%s14184_s10 + $0x1ac] sm:$0xf] }
 0x3e8   : > { %8296 = vmatpush.bf16.msrb.mxu3 %v11801_v42  ;;  %v9197_v42 = vor.u32 %v12382_v27, %v9194_v18  ;;  %v9594_v6 = vld [vmem:[%s14184_s10 + $0x3f8] sm:$0xf0]  ;;  %v12370_v18 = vld [vmem:[%s14184_s10 + $0x6c] sm:$0xf] }
 0x3e9   : > { %8306 = vmatpush.bf16.msra.mxu0 %v11977_v38  ;;  %v13100_v38 = vld [vmem:[%s14184_s10 + $0x1734] sm:$0xf0]  ;;  %v9149_v44 = vor.u32 %v12370_v18, %v9146_v31  ;;  %v9306_v58 = vld [vmem:[%s14184_s10 + $0x1b8] sm:$0xf0]  ;;  %v12470_v18 = vld [vmem:[%s14184_s10 + $0x38c] sm:$0xf] }
 0x3ea   : > { %8319 = vmatpush.bf16.msra.mxu1 %v12105_v47  ;;  %v11929_v47 = vor.u32 %v13068_v40, %v11928_v36  ;;  %v12057_v39 = vor.u32 %v13100_v38, %v12056_v41  ;;  %v9322_v36 = vld [vmem:[%s14184_s10 + $0x1d8] sm:$0xf0]  ;;  %v12446_v40 = vld [vmem:[%s14184_s10 + $0x2cc] sm:$0xf] }
 0x3eb   : > { %8284 = vmatpush.bf16.msrb.mxu2 %v11657_v59  ;;  %v12168_v59 = vld [vmem:[%s14184_s10 + $0x1808] sm:$0xf]  ;;  %v9450_v41 = vld [vmem:[%s14184_s10 + $0x2d8] sm:$0xf0] }
 0x3ec   : > { %8297 = vmatpush.bf16.msrb.mxu3 %v11785_v49  ;;  %v12374_v49 = vld [vmem:[%s14184_s10 + $0x8c] sm:$0xf]  ;;  %v12169_v15 = vor.u32 %v13128_v60, %v12168_v59  ;;  %v9578_v38 = vld [vmem:[%s14184_s10 + $0x3d8] sm:$0xf0] }
 0x3ed   : > { %8307 = vmatpush.bf16.msra.mxu0 %v11961_v61  ;;  %v9162_v61 = vld [vmem:[%s14184_s10 + $0x98] sm:$0xf0]  ;;  %v12442_v59 = vld [vmem:[%s14184_s10 + $0x2ac] sm:$0xf] }
 0x3ee   : > { %8320 = vmatpush.bf16.msra.mxu1 %v12089_v62  ;;  %8285 = vmatmul.bf16.vlgmr.msrb.gmra.mxu2 %v14615_v11  ;;  %v12418_v62 = vld [vmem:[%s14184_s10 + $0x1ec] sm:$0xf]  ;;  %v9165_v19 = vor.u32 %v12374_v49, %v9162_v61  ;;  %v9546_v31 = vld [vmem:[%s14184_s10 + $0x398] sm:$0xf0] }
 0x3ef   : > { %8333 = vmatpush.bf16.msra.mxu2 %v12217_v1  ;;  %8298 = vmatmul.bf16.vlgmr.msrb.gmra.mxu3 %v14619_v13  ;;  %v9338_v1 = vld [vmem:[%s14184_s10 + $0x1f8] sm:$0xf0]  ;;  %v12474_v60 = vld [vmem:[%s14184_s10 + $0x3ac] sm:$0xf] }
 0x3f0   : > { %8342 = vmatpush.bf16.msra.mxu3 %v9213_v5  ;;  %v12482_v5 = vld [vmem:[%s14184_s10 + $0x3ec] sm:$0xf]  ;;  %v9341_v27 = vor.u32 %v12418_v62, %v9338_v1  ;;  %v9309_v62 = vor.u32 %v12410_v53, %v9306_v58  ;;  %v9722_v58 = vld [vmem:[%s14184_s10 + $0x4f8] sm:$0xf0] }
 0x3f1   : > { %8308 = vmatpush.bf16.msra.mxu0 %v11945_v32  ;;  %v9469_v32 = vor.u32 %v12450_v2, %v9466_v63  ;;  %v8078_v43 = vpop.f32.mrf.mxu2  ;;  %v12362_v1 = vld [vmem:[%s14184_s10 + $0x2c] sm:$0xf]  ;;  %v9114_v2 = vld [vmem:[%s14184_s10 + $0x38] sm:$0xf0] }
 0x3f2   : > { %8321 = vmatpush.bf16.msra.mxu1 %v12073_v33  ;;  %v9597_v33 = vor.u32 %v12482_v5, %v9594_v6  ;;  %v8079_v52 = vadd.f32 %v8078_v43, %v15505_v50  ;;  %v8091_v48 = vpop.f32.mrf.mxu3  ;;  %v9562_v50 = vld [vmem:[%s14184_s10 + $0x3b8] sm:$0xf0]  ;;  %v12406_v5 = vld [vmem:[%s14184_s10 + $0x18c] sm:$0xf] }
 0x3f3   : > { %8334 = vmatpush.bf16.msra.mxu2 %v12201_v35  ;;  %v12414_v35 = vld [vmem:[%s14184_s10 + $0x1cc] sm:$0xf]  ;;  %v9565_v63 = vor.u32 %v12474_v60, %v9562_v50  ;;  %v9290_v6 = vld [vmem:[%s14184_s10 + $0x198] sm:$0xf0] }
 0x3f4   : > { %8343 = vmatpush.bf16.msra.mxu3 %v9197_v42  ;;  %v12478_v42 = vld [vmem:[%s14184_s10 + $0x3cc] sm:$0xf]  ;;  %v9325_v46 = vor.u32 %v12414_v35, %v9322_v36  ;;  %v8092_v49 = vadd.f32 %v8091_v48, %v8079_v52  ;;  %v9117_v36 = vor.u32 %v12362_v1, %v9114_v2  ;;  %v9402_v48 = vld [vmem:[%s14184_s10 + $0x278] sm:$0xf0] }
 0x3f5   : > { %8309 = vmatpush.bf16.msra.mxu0 %v11929_v47  ;;  %v9130_v47 = vld [vmem:[%s14184_s10 + $0x58] sm:$0xf0]  ;;  %v12434_v52 = vld [vmem:[%s14184_s10 + $0x26c] sm:$0xf] }
 0x3f6   : > { %8322 = vmatpush.bf16.msra.mxu1 %v12057_v39  ;;  %v9453_v39 = vor.u32 %v12446_v40, %v9450_v41  ;;  %v9133_v61 = vor.u32 %v12366_v45, %v9130_v47  ;;  %v9293_v40 = vor.u32 %v12406_v5, %v9290_v6  ;;  %v12358_v41 = vld [vmem:[%s14184_s10 + $0xc] sm:$0xf]  ;;  %v9274_v47 = vld [vmem:[%s14184_s10 + $0x178] sm:$0xf0]  ;;  %v9405_v60 = vor.u32 %v12434_v52, %v9402_v48 }
 0x3f7   : > { %8335 = vmatpush.bf16.msra.mxu2 %v12185_v51  ;;  %v9581_v51 = vor.u32 %v12478_v42, %v9578_v38  ;;  %v9098_v42 = vld [vmem:[%s14184_s10 + $0x18] sm:$0xf0]  ;;  %v12402_v45 = vld [vmem:[%s14184_s10 + $0x16c] sm:$0xf] }
 0x3f8   : > { %8344 = vmatpush.bf16.msra.mxu3 %v9181_v0  ;;  %v9434_v0 = vld [vmem:[%s14184_s10 + $0x2b8] sm:$0xf0]  ;;  %v12514_v53 = vld [vmem:[%s14184_s10 + $0x4ec] sm:$0xf] }
 0x3f9   : > { %8310 = vmatpush.bf16.msra.mxu0 %v11913_v37  ;;  %v9437_v37 = vor.u32 %v12442_v59, %v9434_v0  ;;  %v8080_v35 = vpop.f32.mrf.mxu2  ;;  %v9101_v59 = vor.u32 %v12358_v41, %v9098_v42  ;;  %v9277_v0 = vor.u32 %v12402_v45, %v9274_v47  ;;  %v9725_v1 = vor.u32 %v12514_v53, %v9722_v58  ;;  %v9386_v2 = vld [vmem:[%s14184_s10 + $0x258] sm:$0xf0]  ;;  %v12510_v6 = vld [vmem:[%s14184_s10 + $0x4cc] sm:$0xf] }
 0x3fa   : > { %8323 = vmatpush.bf16.msra.mxu1 %v12041_v7  ;;  %v12438_v7 = vld [vmem:[%s14184_s10 + $0x28c] sm:$0xf]  ;;  %v8093_v38 = vpop.f32.mrf.mxu3  ;;  %v9498_v41 = vld [vmem:[%s14184_s10 + $0x338] sm:$0xf0] }
 0x3fb   : > { %8336 = vmatpush.bf16.msra.mxu2 %v12169_v15  ;;  %v13232_v15 = vld [vmem:[#allocation1] sm:$0xff]  ;;  %v12506_v42 = vld [vmem:[%s14184_s10 + $0x4ac] sm:$0xf] }
 0x3fc   : > { %8345 = vmatpush.bf16.msra.mxu3 %v9165_v19  ;;  %8311 = vmatmul.bf16.vlgmr.msra.gmra.mxu0 %v14617_v12  ;;  %v8104_v19 = vpop.f32.mrf.mxu0  ;;  %v9690_v38 = vld [vmem:[%s14184_s10 + $0x4b8] sm:$0xf0]  ;;  %v12422_v48 = vld [vmem:[%s14184_s10 + $0x20c] sm:$0xf] }
 0x3fd   : > { %8355 = vmatpush.bf16.msrb.mxu0 %v9341_v27  ;;  %8324 = vmatmul.bf16.vlgmr.msra.gmra.mxu1 %v14621_v14  ;;  %v9418_v27 = vld [vmem:[%s14184_s10 + $0x298] sm:$0xf0]  ;;  %v12502_v58 = vld [vmem:[%s14184_s10 + $0x48c] sm:$0xf] }
 0x3fe   : > { %8368 = vmatpush.bf16.msrb.mxu1 %v9469_v32  ;;  %12224 = vmatmul.msk.bf16.vlgmr.msra.gmra.mxu2 %vm7364_vm0, %v13232_v15  ;;  %v8105_v32 = vadd.f32 %v8104_v19, %v8092_v49  ;;  %v9421_v43 = vor.u32 %v12438_v7, %v9418_v27  ;;  %v12398_v49 = vld [vmem:[%s14184_s10 + $0x14c] sm:$0xf]  ;;  %v9706_v7 = vld [vmem:[%s14184_s10 + $0x4d8] sm:$0xf0] }
 0x3ff   : > { %8381 = vmatpush.bf16.msrb.mxu2 %v9597_v33  ;;  %v8117_v33 = vpop.f32.mrf.mxu1  ;;  %v9709_v35 = vor.u32 %v12510_v6, %v9706_v7  ;;  %v9226_v45 = vld [vmem:[%s14184_s10 + $0x118] sm:$0xf0]  ;;  %v12498_v6 = vld [vmem:[%s14184_s10 + $0x46c] sm:$0xf] }
 0x400   : > { %8346 = vmatpush.bf16.msra.mxu3 %v9149_v44  ;;  %v9549_v44 = vor.u32 %v12470_v18, %v9546_v31  ;;  %v12394_v31 = vld [vmem:[%s14184_s10 + $0x12c] sm:$0xf]  ;;  %v9482_v53 = vld [vmem:[%s14184_s10 + $0x318] sm:$0xf0] }
 0x401   : > { %8356 = vmatpush.bf16.msrb.mxu0 %v9325_v46  ;;  %v15574_v46 = vadd.f32 %v8117_v33, %v8105_v32  ;;  %v9242_v32 = vld [vmem:[%s14184_s10 + $0x138] sm:$0xf0]  ;;  %v12426_v33 = vld [vmem:[%s14184_s10 + $0x22c] sm:$0xf] }
 0x402   : > { %8369 = vmatpush.bf16.msrb.mxu1 %v9453_v39  ;;  %v12466_v39 = vld [vmem:[%s14184_s10 + $0x36c] sm:$0xf]  ;;  %v9658_v7 = vld [vmem:[%s14184_s10 + $0x478] sm:$0xf0] }
 0x403   : > { %8382 = vmatpush.bf16.msrb.mxu2 %v9581_v51  ;;  %v9530_v51 = vld [vmem:[%s14184_s10 + $0x378] sm:$0xf0] }
 0x404   : > { %8347 = vmatpush.bf16.msra.mxu3 %v9133_v61  ;;  %v9533_v50 = vor.u32 %v12466_v39, %v9530_v51  ;;  %v9258_v61 = vld [vmem:[%s14184_s10 + $0x158] sm:$0xf0]  ;;  %v8106_v5 = vpop.f32.mrf.mxu0  ;;  %v12454_v51 = vld [vmem:[%s14184_s10 + $0x30c] sm:$0xf] }
 0x405   : > { %8357 = vmatpush.bf16.msrb.mxu0 %v9309_v62  ;;  %v12430_v62 = vld [vmem:[%s14184_s10 + $0x24c] sm:$0xf]  ;;  %v9261_v19 = vor.u32 %v12398_v49, %v9258_v61  ;;  %v9354_v39 = vld [vmem:[%s14184_s10 + $0x218] sm:$0xf0] }
 0x406   : > { %8370 = vmatpush.bf16.msrb.mxu1 %v9437_v37  ;;  %v12462_v37 = vld [vmem:[%s14184_s10 + $0x34c] sm:$0xf]  ;;  %v9389_v27 = vor.u32 %v12430_v62, %v9386_v2  ;;  %v9978_v61 = vld [vmem:[%s14184_s10 + $0x6f8] sm:$0xf0]  ;;  %v9357_v2 = vor.u32 %v12422_v48, %v9354_v39 }
 0x407   : > { %8383 = vmatpush.bf16.msrb.mxu2 %v9565_v63  ;;  %v9514_v63 = vld [vmem:[%s14184_s10 + $0x358] sm:$0xf0]  ;;  %v8119_v15 = vpop.f32.mrf.mxu1  ;;  %v12610_v62 = vld [vmem:[%s14184_s10 + $0x7ec] sm:$0xf] }
 0x408   : > { %8348 = vmatpush.bf16.msra.mxu3 %v9117_v36  ;;  %v9517_v18 = vor.u32 %v12462_v37, %v9514_v63  ;;  %v9370_v36 = vld [vmem:[%s14184_s10 + $0x238] sm:$0xf0]  ;;  %v9485_v37 = vor.u32 %v12454_v51, %v9482_v53  ;;  %v12570_v39 = vld [vmem:[%s14184_s10 + $0x6ac] sm:$0xf] }
 0x409   : > { %8358 = vmatpush.bf16.msrb.mxu0 %v9293_v40  ;;  %v12458_v40 = vld [vmem:[%s14184_s10 + $0x32c] sm:$0xf]  ;;  %v9373_v47 = vor.u32 %v12426_v33, %v9370_v36  ;;  %v9818_v48 = vld [vmem:[%s14184_s10 + $0x5b8] sm:$0xf0] }
 0x40a   : > { %8371 = vmatpush.bf16.msrb.mxu1 %v9421_v43  ;;  %v9245_v43 = vor.u32 %v12394_v31, %v9242_v32  ;;  %v9501_v52 = vor.u32 %v12458_v40, %v9498_v41  ;;  %v12574_v31 = vld [vmem:[%s14184_s10 + $0x6cc] sm:$0xf]  ;;  %v9962_v32 = vld [vmem:[%s14184_s10 + $0x6d8] sm:$0xf0]  ;;  %v9661_v40 = vor.u32 %v12498_v6, %v9658_v7 }
 0x40b   : > { %8384 = vmatpush.bf16.msrb.mxu2 %v9549_v44  ;;  %v12390_v44 = vld [vmem:[%s14184_s10 + $0x10c] sm:$0xf] }
 0x40c   : > { %8349 = vmatpush.bf16.msra.mxu3 %v9101_v59  ;;  %v9674_v59 = vld [vmem:[%s14184_s10 + $0x498] sm:$0xf0]  ;;  %v9229_v49 = vor.u32 %v12390_v44, %v9226_v45  ;;  %v12606_v33 = vld [vmem:[%s14184_s10 + $0x7cc] sm:$0xf]  ;;  %v9965_v45 = vor.u32 %v12574_v31, %v9962_v32 }
 0x40d   : > { %8359 = vmatpush.bf16.msrb.mxu0 %v9277_v0  ;;  %v12546_v0 = vld [vmem:[%s14184_s10 + $0x5ec] sm:$0xf]  ;;  %v9677_v63 = vor.u32 %v12502_v58, %v9674_v59  ;;  %v9642_v44 = vld [vmem:[%s14184_s10 + $0x458] sm:$0xf0] }
 0x40e   : > { %8372 = vmatpush.bf16.msrb.mxu1 %v9405_v60  ;;  %v9850_v60 = vld [vmem:[%s14184_s10 + $0x5f8] sm:$0xf0]  ;;  %v12602_v53 = vld [vmem:[%s14184_s10 + $0x7ac] sm:$0xf] }
 0x40f   : > { %8385 = vmatpush.bf16.msrb.mxu2 %v9533_v50  ;;  %8350 = vmatmul.bf16.vlgmr.msra.gmra.mxu3 %v14291_v29  ;;  %v9693_v29 = vor.u32 %v12506_v42, %v9690_v38  ;;  %v12578_v50 = vld [vmem:[%s14184_s10 + $0x6ec] sm:$0xf]  ;;  %v9853_v5 = vor.u32 %v12546_v0, %v9850_v60  ;;  %v10074_v58 = vld [vmem:[%s14184_s10 + $0x7b8] sm:$0xf0] }
 0x410   : > { %8394 = vmatpush.bf16.msrb.mxu3 %v9725_v1  ;;  %v10106_v1 = vld [vmem:[%s14184_s10 + $0x7f8] sm:$0xf0]  ;;  %v9981_v15 = vor.u32 %v12578_v50, %v9978_v61  ;;  %v12490_v0 = vld [vmem:[%s14184_s10 + $0x42c] sm:$0xf] }
 0x411   : > { %8360 = vmatpush.bf16.msrb.mxu0 %v9261_v19  ;;  %v10109_v19 = vor.u32 %v12610_v62, %v10106_v1  ;;  %v8130_v36 = vpop.f32.mrf.mxu2  ;;  %v9626_v60 = vld [vmem:[%s14184_s10 + $0x438] sm:$0xf0] }
 0x412   : > { %8373 = vmatpush.bf16.msrb.mxu1 %v9389_v27  ;;  %v12542_v27 = vld [vmem:[%s14184_s10 + $0x5cc] sm:$0xf]  ;;  %v8131_v41 = vadd.f32 %v8130_v36, %v15574_v46  ;;  %v8143_v38 = vpop.f32.mrf.mxu3  ;;  %v9802_v61 = vld [vmem:[%s14184_s10 + $0x598] sm:$0xf0]  ;;  %v9629_v6 = vor.u32 %v12490_v0, %v9626_v60 }
 0x413   : > { %8386 = vmatpush.bf16.msrb.mxu2 %v9517_v18  ;;  %v9834_v18 = vld [vmem:[%s14184_s10 + $0x5d8] sm:$0xf0]  ;;  %v12562_v36 = vld [vmem:[%s14184_s10 + $0x66c] sm:$0xf] }
 0x414   : > { %8395 = vmatpush.bf16.msrb.mxu3 %v9709_v35  ;;  %v10090_v35 = vld [vmem:[%s14184_s10 + $0x7d8] sm:$0xf0]  ;;  %v9837_v42 = vor.u32 %v12542_v27, %v9834_v18  ;;  %v8144_v51 = vadd.f32 %v8143_v38, %v8131_v41  ;;  %v12594_v41 = vld [vmem:[%s14184_s10 + $0x76c] sm:$0xf] }
 0x415   : > { %8361 = vmatpush.bf16.msrb.mxu0 %v9245_v43  ;;  %v12494_v43 = vld [vmem:[%s14184_s10 + $0x44c] sm:$0xf]  ;;  %v9930_v1 = vld [vmem:[%s14184_s10 + $0x698] sm:$0xf0] }
 0x416   : > { %8374 = vmatpush.bf16.msrb.mxu1 %v9373_v47  ;;  %v10093_v47 = vor.u32 %v12606_v33, %v10090_v35  ;;  %v9645_v46 = vor.u32 %v12494_v43, %v9642_v44  ;;  %v12530_v33 = vld [vmem:[%s14184_s10 + $0x56c] sm:$0xf]  ;;  %v9786_v35 = vld [vmem:[%s14184_s10 + $0x578] sm:$0xf0] }
 0x417   : > { %8387 = vmatpush.bf16.msrb.mxu2 %v9501_v52  ;;  %v12538_v52 = vld [vmem:[%s14184_s10 + $0x5ac] sm:$0xf]  ;;  %v10234_v43 = vld [vmem:[%s14184_s10 + $0x8f8] sm:$0xf0] }
 0x418   : > { %8396 = vmatpush.bf16.msrb.mxu3 %v9693_v29  ;;  %v9946_v29 = vld [vmem:[%s14184_s10 + $0x6b8] sm:$0xf0]  ;;  %v9821_v59 = vor.u32 %v12538_v52, %v9818_v48  ;;  %v12642_v38 = vld [vmem:[%s14184_s10 + $0x8ec] sm:$0xf] }
 0x419   : > { %8362 = vmatpush.bf16.msrb.mxu0 %v9229_v49  ;;  %v9949_v50 = vor.u32 %v12570_v39, %v9946_v29  ;;  %v10077_v49 = vor.u32 %v12602_v53, %v10074_v58  ;;  %v8156_v62 = vpop.f32.mrf.mxu0  ;;  %v12526_v48 = vld [vmem:[%s14184_s10 + $0x54c] sm:$0xf]  ;;  %v9770_v39 = vld [vmem:[%s14184_s10 + $0x558] sm:$0xf0]  ;;  %v10237_v29 = vor.u32 %v12642_v38, %v10234_v43 }
 0x41a   : > { %8375 = vmatpush.bf16.msrb.mxu1 %v9357_v2  ;;  %v10058_v2 = vld [vmem:[%s14184_s10 + $0x798] sm:$0xf0]  ;;  %v8145_v27 = vpop.f32.mrf.mxu3  ;;  %v12590_v58 = vld [vmem:[%s14184_s10 + $0x74c] sm:$0xf] }
 0x41b   : > { %8388 = vmatpush.bf16.msrb.mxu2 %v9485_v37  ;;  %v8157_v37 = vadd.f32 %v8156_v62, %v8144_v51  ;;  %v12558_v51 = vld [vmem:[%s14184_s10 + $0x64c] sm:$0xf]  ;;  %v9898_v53 = vld [vmem:[%s14184_s10 + $0x658] sm:$0xf0] }
 0x41c   : > { %8397 = vmatpush.bf16.msrb.mxu3 %v9677_v63  ;;  %8363 = vmatmul.bf16.vlgmr.msrb.gmra.mxu0 %v14298_v34  ;;  %v12534_v34 = vld [vmem:[%s14184_s10 + $0x58c] sm:$0xf]  ;;  %v8169_v63 = vpop.f32.mrf.mxu1  ;;  %v10218_v60 = vld [vmem:[%s14184_s10 + $0x8d8] sm:$0xf0] }
 0x41d   : > { %8407 = vmatpush.bf16.msra.mxu0 %v9853_v5  ;;  %8376 = vmatmul.bf16.vlgmr.msrb.gmra.mxu1 %v14289_v28  ;;  %v12598_v28 = vld [vmem:[%s14184_s10 + $0x78c] sm:$0xf]  ;;  %v8132_v5 = vpop.f32.mrf.mxu2  ;;  %v9805_v7 = vor.u32 %v12534_v34, %v9802_v61  ;;  %v15645_v32 = vadd.f32 %v8169_v63, %v8157_v37  ;;  %v9901_v34 = vor.u32 %v12558_v51, %v9898_v53  ;;  %v9754_v62 = vld [vmem:[%s14184_s10 + $0x538] sm:$0xf0] }
 0x41e   : > { %8420 = vmatpush.bf16.msra.mxu1 %v9981_v15  ;;  %8389 = vmatmul.bf16.vlgmr.msrb.gmra.mxu2 %v14293_v30  ;;  %v12566_v30 = vld [vmem:[%s14184_s10 + $0x68c] sm:$0xf]  ;;  %v10061_v31 = vor.u32 %v12598_v28, %v10058_v2  ;;  %v9882_v2 = vld [vmem:[%s14184_s10 + $0x638] sm:$0xf0] }
 0x41f   : > { %8433 = vmatpush.bf16.msra.mxu2 %v10109_v19  ;;  %v12486_v15 = vld [vmem:[%s14184_s10 + $0x40c] sm:$0xf]  ;;  %v9610_v19 = vld [vmem:[%s14184_s10 + $0x418] sm:$0xf0]  ;;  %v9933_v18 = vor.u32 %v12566_v30, %v9930_v1 }
 0x420   : > { %8398 = vmatpush.bf16.msrb.mxu3 %v9661_v40  ;;  %v9914_v40 = vld [vmem:[%s14184_s10 + $0x678] sm:$0xf0]  ;;  %v9613_v44 = vor.u32 %v12486_v15, %v9610_v19  ;;  %v12638_v0 = vld [vmem:[%s14184_s10 + $0x8cc] sm:$0xf] }
 0x421   : > { %8408 = vmatpush.bf16.msra.mxu0 %v9837_v42  ;;  %v10042_v42 = vld [vmem:[%s14184_s10 + $0x778] sm:$0xf0]  ;;  %v12522_v30 = vld [vmem:[%s14184_s10 + $0x52c] sm:$0xf]  ;;  %v10221_v28 = vor.u32 %v12638_v0, %v10218_v60 }
 0x422   : > { %8421 = vmatpush.bf16.msra.mxu1 %v9965_v45  ;;  %v9789_v45 = vor.u32 %v12530_v33, %v9786_v35  ;;  %v10045_v52 = vor.u32 %v12594_v41, %v10042_v42  ;;  %v12554_v1 = vld [vmem:[%s14184_s10 + $0x62c] sm:$0xf]  ;;  %v10010_v63 = vld [vmem:[%s14184_s10 + $0x738] sm:$0xf0] }
 0x423   : > { %8434 = vmatpush.bf16.msra.mxu2 %v10093_v47  ;;  %v9917_v47 = vor.u32 %v12562_v36, %v9914_v40  ;;  %v12586_v37 = vld [vmem:[%s14184_s10 + $0x72c] sm:$0xf]  ;;  %v9738_v19 = vld [vmem:[%s14184_s10 + $0x518] sm:$0xf0]  ;;  %v9885_v27 = vor.u32 %v12554_v1, %v9882_v2 }
 0x424   : > { %8399 = vmatpush.bf16.msrb.mxu3 %v9645_v46  ;;  %v10026_v46 = vld [vmem:[%s14184_s10 + $0x758] sm:$0xf0]  ;;  %v12634_v5 = vld [vmem:[%s14184_s10 + $0x8ac] sm:$0xf] }
 0x425   : > { %8409 = vmatpush.bf16.msra.mxu0 %v9821_v59  ;;  %v8158_v59 = vpop.f32.mrf.mxu0  ;;  %v10029_v61 = vor.u32 %v12590_v58, %v10026_v46  ;;  %v12518_v15 = vld [vmem:[%s14184_s10 + $0x50c] sm:$0xf]  ;;  %v9994_v36 = vld [vmem:[%s14184_s10 + $0x718] sm:$0xf0] }
 0x426   : > { %8422 = vmatpush.bf16.msra.mxu1 %v9949_v50  ;;  %v8171_v50 = vpop.f32.mrf.mxu1  ;;  %v12582_v33 = vld [vmem:[%s14184_s10 + $0x70c] sm:$0xf]  ;;  %v10186_v41 = vld [vmem:[%s14184_s10 + $0x898] sm:$0xf0] }
 0x427   : > { %8435 = vmatpush.bf16.msra.mxu2 %v10077_v49  ;;  %v9773_v49 = vor.u32 %v12526_v48, %v9770_v39  ;;  %v12630_v40 = vld [vmem:[%s14184_s10 + $0x88c] sm:$0xf]  ;;  %v10362_v38 = vld [vmem:[%s14184_s10 + $0x9f8] sm:$0xf0]  ;;  %v9997_v39 = vor.u32 %v12582_v33, %v9994_v36 }
 0x428   : > { %8400 = vmatpush.bf16.msrb.mxu3 %v9629_v6  ;;  %v10202_v6 = vld [vmem:[%s14184_s10 + $0x8b8] sm:$0xf0]  ;;  %v12674_v42 = vld [vmem:[%s14184_s10 + $0x9ec] sm:$0xf]  ;;  %v10189_v51 = vor.u32 %v12630_v40, %v10186_v41 }
 0x429   : > { %8410 = vmatpush.bf16.msra.mxu0 %v9805_v7  ;;  %v9757_v7 = vor.u32 %v12522_v30, %v9754_v62  ;;  %v10205_v35 = vor.u32 %v12634_v5, %v10202_v6  ;;  %v12706_v43 = vld [vmem:[%s14184_s10 + $0xaec] sm:$0xf]  ;;  %v10170_v58 = vld [vmem:[%s14184_s10 + $0x878] sm:$0xf0] }
 0x42a   : > { %8423 = vmatpush.bf16.msra.mxu1 %v9933_v18  ;;  %v10013_v18 = vor.u32 %v12586_v37, %v10010_v63  ;;  %v12626_v53 = vld [vmem:[%s14184_s10 + $0x86c] sm:$0xf]  ;;  %v10346_v60 = vld [vmem:[%s14184_s10 + $0x9d8] sm:$0xf0] }
 0x42b   : > { %8436 = vmatpush.bf16.msra.mxu2 %v10061_v31  ;;  %v9866_v31 = vld [vmem:[%s14184_s10 + $0x618] sm:$0xf0]  ;;  %v12670_v0 = vld [vmem:[%s14184_s10 + $0x9cc] sm:$0xf]  ;;  %v10173_v62 = vor.u32 %v12626_v53, %v10170_v58 }
 0x42c   : > { %8401 = vmatpush.bf16.msrb.mxu3 %v9613_v44  ;;  %v9741_v44 = vor.u32 %v12518_v15, %v9738_v19  ;;  %v12702_v50 = vld [vmem:[%s14184_s10 + $0xacc] sm:$0xf]  ;;  %v10154_v63 = vld [vmem:[%s14184_s10 + $0x858] sm:$0xf0] }
 0x42d   : > { %8411 = vmatpush.bf16.msra.mxu0 %v9789_v45  ;;  %v10490_v45 = vld [vmem:[%s14184_s10 + $0xaf8] sm:$0xf0]  ;;  %v12622_v37 = vld [vmem:[%s14184_s10 + $0x84c] sm:$0xf] }
 0x42e   : > { %8424 = vmatpush.bf16.msra.mxu1 %v9917_v47  ;;  %v12738_v47 = vld [vmem:[%s14184_s10 + $0xbec] sm:$0xf]  ;;  %v10493_v46 = vor.u32 %v12706_v43, %v10490_v45  ;;  %v10330_v15 = vld [vmem:[%s14184_s10 + $0x9b8] sm:$0xf0] }
 0x42f   : > { %8437 = vmatpush.bf16.msra.mxu2 %v10045_v52  ;;  %8402 = vmatmul.bf16.vlgmr.msrb.gmra.mxu3 %v14332_v8  ;;  %v12550_v8 = vld [vmem:[%s14184_s10 + $0x60c] sm:$0xf]  ;;  %v10618_v52 = vld [vmem:[%s14184_s10 + $0xbf8] sm:$0xf0] }
 0x430   : > { %8446 = vmatpush.bf16.msra.mxu3 %v10237_v29  ;;  %v9869_v48 = vor.u32 %v12550_v8, %v9866_v31  ;;  %v10365_v29 = vor.u32 %v12674_v42, %v10362_v38  ;;  %v10621_v59 = vor.u32 %v12738_v47, %v10618_v52  ;;  %v12698_v19 = vld [vmem:[%s14184_s10 + $0xaac] sm:$0xf]  ;;  %v10586_v8 = vld [vmem:[%s14184_s10 + $0xbb8] sm:$0xf0]  ;;  %v10157_v31 = vor.u32 %v12622_v37, %v10154_v63 }
 0x431   : > { %8412 = vmatpush.bf16.msra.mxu0 %v9773_v49  ;;  %v10474_v49 = vld [vmem:[%s14184_s10 + $0xad8] sm:$0xf0]  ;;  %v8182_v30 = vpop.f32.mrf.mxu2  ;;  %v12662_v40 = vld [vmem:[%s14184_s10 + $0x98c] sm:$0xf] }
 0x432   : > { %8425 = vmatpush.bf16.msra.mxu1 %v9901_v34  ;;  %v12734_v34 = vld [vmem:[%s14184_s10 + $0xbcc] sm:$0xf]  ;;  %v8183_v1 = vadd.f32 %v8182_v30, %v15645_v32  ;;  %v8195_v2 = vpop.f32.mrf.mxu3  ;;  %v10477_v5 = vor.u32 %v12702_v50, %v10474_v49  ;;  %v10314_v41 = vld [vmem:[%s14184_s10 + $0x998] sm:$0xf0] }
 0x433   : > { %8438 = vmatpush.bf16.msra.mxu2 %v10029_v61  ;;  %v10602_v61 = vld [vmem:[%s14184_s10 + $0xbd8] sm:$0xf0]  ;;  %v12694_v42 = vld [vmem:[%s14184_s10 + $0xa8c] sm:$0xf] }
 0x434   : > { %8447 = vmatpush.bf16.msra.mxu3 %v10221_v28  ;;  %v10349_v28 = vor.u32 %v12670_v0, %v10346_v60  ;;  %v10605_v6 = vor.u32 %v12734_v34, %v10602_v61  ;;  %v8196_v32 = vadd.f32 %v8195_v2, %v8183_v1  ;;  %v10442_v43 = vld [vmem:[%s14184_s10 + $0xa98] sm:$0xf0]  ;;  %v12658_v0 = vld [vmem:[%s14184_s10 + $0x96c] sm:$0xf] }
 0x435   : > { %8413 = vmatpush.bf16.msra.mxu0 %v9757_v7  ;;  %v12666_v7 = vld [vmem:[%s14184_s10 + $0x9ac] sm:$0xf]  ;;  %v10445_v58 = vor.u32 %v12694_v42, %v10442_v43  ;;  %v10298_v60 = vld [vmem:[%s14184_s10 + $0x978] sm:$0xf0] }
 0x436   : > { %8426 = vmatpush.bf16.msra.mxu1 %v9885_v27  ;;  %v10458_v27 = vld [vmem:[%s14184_s10 + $0xab8] sm:$0xf0]  ;;  %v10333_v33 = vor.u32 %v12666_v7, %v10330_v15  ;;  %v12690_v50 = vld [vmem:[%s14184_s10 + $0xa6c] sm:$0xf] }
 0x437   : > { %8439 = vmatpush.bf16.msra.mxu2 %v10013_v18  ;;  %v12730_v18 = vld [vmem:[%s14184_s10 + $0xbac] sm:$0xf]  ;;  %v10426_v49 = vld [vmem:[%s14184_s10 + $0xa78] sm:$0xf0] }
 0x438   : > { %8448 = vmatpush.bf16.msra.mxu3 %v10205_v35  ;;  %v12618_v35 = vld [vmem:[%s14184_s10 + $0x82c] sm:$0xf]  ;;  %v10589_v36 = vor.u32 %v12730_v18, %v10586_v8  ;;  %v10554_v61 = vld [vmem:[%s14184_s10 + $0xb78] sm:$0xf0]  ;;  %v10429_v2 = vor.u32 %v12690_v50, %v10426_v49 }
 0x439   : > { %8414 = vmatpush.bf16.msra.mxu0 %v9741_v44  ;;  %v8208_v38 = vpop.f32.mrf.mxu0  ;;  %v10570_v44 = vld [vmem:[%s14184_s10 + $0xb98] sm:$0xf0]  ;;  %v8184_v52 = vpop.f32.mrf.mxu2  ;;  %v12722_v34 = vld [vmem:[%s14184_s10 + $0xb6c] sm:$0xf] }
 0x43a   : > { %8427 = vmatpush.bf16.msra.mxu1 %v9869_v48  ;;  %v8209_v45 = vadd.f32 %v8208_v38, %v8196_v32  ;;  %v8221_v47 = vpop.f32.mrf.mxu1  ;;  %v8197_v53 = vpop.f32.mrf.mxu3  ;;  %v12770_v30 = vld [vmem:[%s14184_s10 + $0xcec] sm:$0xf]  ;;  %v10557_v37 = vor.u32 %v12722_v34, %v10554_v61  ;;  %v10410_v15 = vld [vmem:[%s14184_s10 + $0xa58] sm:$0xf0] }
 0x43b   : > { %8440 = vmatpush.bf16.msra.mxu2 %v9997_v39  ;;  %v10317_v39 = vor.u32 %v12662_v40, %v10314_v41  ;;  %v12654_v63 = vld [vmem:[%s14184_s10 + $0x94c] sm:$0xf]  ;;  %v10538_v32 = vld [vmem:[%s14184_s10 + $0xb58] sm:$0xf0] }
 0x43c   : > { %8449 = vmatpush.bf16.msra.mxu3 %v10189_v51  ;;  %8415 = vmatmul.bf16.vlgmr.msra.gmra.mxu0 %v14336_v10  ;;  %v10138_v10 = vld [vmem:[%s14184_s10 + $0x838] sm:$0xf0]  ;;  %v12614_v51 = vld [vmem:[%s14184_s10 + $0x80c] sm:$0xf] }
 0x43d   : > { %8459 = vmatpush.bf16.msrb.mxu0 %v10365_v29  ;;  %8428 = vmatmul.bf16.vlgmr.msra.gmra.mxu1 %v14327_v4  ;;  %v12726_v4 = vld [vmem:[%s14184_s10 + $0xb8c] sm:$0xf]  ;;  %v10141_v48 = vor.u32 %v12618_v35, %v10138_v10  ;;  %v10122_v29 = vld [vmem:[%s14184_s10 + $0x818] sm:$0xf0] }
 0x43e   : > { %8472 = vmatpush.bf16.msrb.mxu1 %v10493_v46  ;;  %8441 = vmatmul.bf16.vlgmr.msra.gmra.mxu2 %v14334_v9  ;;  %v10461_v9 = vor.u32 %v12698_v19, %v10458_v27  ;;  %v10573_v46 = vor.u32 %v12726_v4, %v10570_v44  ;;  %v10125_v1 = vor.u32 %v12614_v51, %v10122_v29  ;;  %v12718_v19 = vld [vmem:[%s14184_s10 + $0xb4c] sm:$0xf]  ;;  %v10730_v8 = vld [vmem:[%s14184_s10 + $0xcd8] sm:$0xf0] }
 0x43f   : > { %8485 = vmatpush.bf16.msrb.mxu2 %v10621_v59  ;;  %v15716_v59 = vadd.f32 %v8221_v47, %v8209_v45  ;;  %v12766_v18 = vld [vmem:[%s14184_s10 + $0xccc] sm:$0xf]  ;;  %v10541_v10 = vor.u32 %v12718_v19, %v10538_v32  ;;  %v10394_v42 = vld [vmem:[%s14184_s10 + $0xa38] sm:$0xf0] }
 0x440   : > { %8450 = vmatpush.bf16.msra.mxu3 %v10173_v62  ;;  %v10746_v62 = vld [vmem:[%s14184_s10 + $0xcf8] sm:$0xf0]  ;;  %v12682_v40 = vld [vmem:[%s14184_s10 + $0xa2c] sm:$0xf]  ;;  %v10733_v41 = vor.u32 %v12766_v18, %v10730_v8 }
 0x441   : > { %8460 = vmatpush.bf16.msrb.mxu0 %v10349_v28  ;;  %v10301_v28 = vor.u32 %v12658_v0, %v10298_v60  ;;  %v10749_v7 = vor.u32 %v12770_v30, %v10746_v62  ;;  %v8210_v27 = vpop.f32.mrf.mxu0  ;;  %v12714_v38 = vld [vmem:[%s14184_s10 + $0xb2c] sm:$0xf]  ;;  %v10522_v43 = vld [vmem:[%s14184_s10 + $0xb38] sm:$0xf0] }
 0x442   : > { %8473 = vmatpush.bf16.msrb.mxu1 %v10477_v5  ;;  %v10282_v5 = vld [vmem:[%s14184_s10 + $0x958] sm:$0xf0]  ;;  %v12762_v4 = vld [vmem:[%s14184_s10 + $0xcac] sm:$0xf] }
 0x443   : > { %8486 = vmatpush.bf16.msrb.mxu2 %v10605_v6  ;;  %v12686_v6 = vld [vmem:[%s14184_s10 + $0xa4c] sm:$0xf]  ;;  %v10714_v44 = vld [vmem:[%s14184_s10 + $0xcb8] sm:$0xf0] }
 0x444   : > { %8451 = vmatpush.bf16.msra.mxu3 %v10157_v31  ;;  %v8223_v31 = vpop.f32.mrf.mxu1  ;;  %v10413_v35 = vor.u32 %v12686_v6, %v10410_v15  ;;  %v12646_v47 = vld [vmem:[%s14184_s10 + $0x90c] sm:$0xf]  ;;  %v10250_v52 = vld [vmem:[%s14184_s10 + $0x918] sm:$0xf0]  ;;  %v10717_v53 = vor.u32 %v12762_v4, %v10714_v44 }
 0x445   : > { %8461 = vmatpush.bf16.msrb.mxu0 %v10333_v33  ;;  %v10285_v33 = vor.u32 %v12654_v63, %v10282_v5  ;;  %v10378_v51 = vld [vmem:[%s14184_s10 + $0xa18] sm:$0xf0]  ;;  %v12710_v29 = vld [vmem:[%s14184_s10 + $0xb0c] sm:$0xf]  ;;  %v10253_v34 = vor.u32 %v12646_v47, %v10250_v52 }
 0x446   : > { %8474 = vmatpush.bf16.msrb.mxu1 %v10461_v9  ;;  %v12650_v9 = vld [vmem:[%s14184_s10 + $0x92c] sm:$0xf]  ;;  %v10698_v0 = vld [vmem:[%s14184_s10 + $0xc98] sm:$0xf0] }
 0x447   : > { %8487 = vmatpush.bf16.msrb.mxu2 %v10589_v36  ;;  %v10266_v36 = vld [vmem:[%s14184_s10 + $0x938] sm:$0xf0]  ;;  %v12802_v60 = vld [vmem:[%s14184_s10 + $0xdec] sm:$0xf] }
 0x448   : > { %8452 = vmatpush.bf16.msra.mxu3 %v10141_v48  ;;  %v10269_v45 = vor.u32 %v12650_v9, %v10266_v36  ;;  %v10397_v48 = vor.u32 %v12682_v40, %v10394_v42  ;;  %v10874_v50 = vld [vmem:[%s14184_s10 + $0xdf8] sm:$0xf0]  ;;  %v12834_v49 = vld [vmem:[%s14184_s10 + $0xeec] sm:$0xf] }
 0x449   : > { %8462 = vmatpush.bf16.msrb.mxu0 %v10317_v39  ;;  %v10525_v39 = vor.u32 %v12714_v38, %v10522_v43  ;;  %v11002_v61 = vld [vmem:[%s14184_s10 + $0xef8] sm:$0xf0]  ;;  %v12866_v30 = vld [vmem:[%s14184_s10 + $0xfec] sm:$0xf] }
 0x44a   : > { %8475 = vmatpush.bf16.msrb.mxu1 %v10445_v58  ;;  %v10506_v58 = vld [vmem:[%s14184_s10 + $0xb18] sm:$0xf0]  ;;  %v12754_v63 = vld [vmem:[%s14184_s10 + $0xc6c] sm:$0xf]  ;;  %v11005_v6 = vor.u32 %v12834_v49, %v11002_v61 }
 0x44b   : > { %8488 = vmatpush.bf16.msrb.mxu2 %v10573_v46  ;;  %v12758_v46 = vld [vmem:[%s14184_s10 + $0xc8c] sm:$0xf]  ;;  %v11130_v62 = vld [vmem:[%s14184_s10 + $0xff8] sm:$0xf0] }
 0x44c   : > { %8453 = vmatpush.bf16.msra.mxu3 %v10125_v1  ;;  %v10682_v5 = vld [vmem:[%s14184_s10 + $0xc78] sm:$0xf0]  ;;  %v12798_v15 = vld [vmem:[%s14184_s10 + $0xdcc] sm:$0xf] }
 0x44d   : > { %8463 = vmatpush.bf16.msrb.mxu0 %v10301_v28  ;;  %v10509_v28 = vor.u32 %v12710_v29, %v10506_v58  ;;  %v10858_v19 = vld [vmem:[%s14184_s10 + $0xdd8] sm:$0xf0]  ;;  %v12830_v32 = vld [vmem:[%s14184_s10 + $0xecc] sm:$0xf] }
 0x44e   : > { %8476 = vmatpush.bf16.msrb.mxu1 %v10429_v2  ;;  %v10701_v2 = vor.u32 %v12758_v46, %v10698_v0  ;;  %v10986_v27 = vld [vmem:[%s14184_s10 + $0xed8] sm:$0xf0]  ;;  %v12862_v18 = vld [vmem:[%s14184_s10 + $0xfcc] sm:$0xf] }
 0x44f   : > { %8489 = vmatpush.bf16.msrb.mxu2 %v10557_v37  ;;  %8454 = vmatmul.bf16.vlgmr.msra.gmra.mxu3 %v14422_v20  ;;  %v12678_v20 = vld [vmem:[%s14184_s10 + $0xa0c] sm:$0xf]  ;;  %v10877_v37 = vor.u32 %v12802_v60, %v10874_v50  ;;  %v11114_v8 = vld [vmem:[%s14184_s10 + $0xfd8] sm:$0xf0] }
 0x450   : > { %8498 = vmatpush.bf16.msrb.mxu3 %v10749_v7  ;;  %v10381_v1 = vor.u32 %v12678_v20, %v10378_v51  ;;  %v11133_v7 = vor.u32 %v12866_v30, %v11130_v62  ;;  %v12750_v36 = vld [vmem:[%s14184_s10 + $0xc4c] sm:$0xf]  ;;  %v10666_v40 = vld [vmem:[%s14184_s10 + $0xc58] sm:$0xf0]  ;;  %v11117_v42 = vor.u32 %v12862_v18, %v11114_v8 }
 0x451   : > { %8464 = vmatpush.bf16.msrb.mxu0 %v10285_v33  ;;  %v8234_v31 = vpop.f32.mrf.mxu2  ;;  %v10685_v33 = vor.u32 %v12754_v63, %v10682_v5  ;;  %v12794_v38 = vld [vmem:[%s14184_s10 + $0xdac] sm:$0xf]  ;;  %v10842_v43 = vld [vmem:[%s14184_s10 + $0xdb8] sm:$0xf0]  ;;  %v10669_v52 = vor.u32 %v12750_v36, %v10666_v40 }
 0x452   : > { %8477 = vmatpush.bf16.msrb.mxu1 %v10413_v35  ;;  %v8235_v35 = vadd.f32 %v8234_v31, %v15716_v59  ;;  %v8247_v9 = vpop.f32.mrf.mxu3  ;;  %v12826_v4 = vld [vmem:[%s14184_s10 + $0xeac] sm:$0xf]  ;;  %v10970_v44 = vld [vmem:[%s14184_s10 + $0xeb8] sm:$0xf0] }
 0x453   : > { %8490 = vmatpush.bf16.msrb.mxu2 %v10541_v10  ;;  %v10861_v10 = vor.u32 %v12798_v15, %v10858_v19  ;;  %v11098_v47 = vld [vmem:[%s14184_s10 + $0xfb8] sm:$0xf0]  ;;  %v12790_v51 = vld [vmem:[%s14184_s10 + $0xd8c] sm:$0xf] }
 0x454   : > { %8499 = vmatpush.bf16.msrb.mxu3 %v10733_v41  ;;  %v10989_v41 = vor.u32 %v12830_v32, %v10986_v27  ;;  %v8248_v59 = vadd.f32 %v8247_v9, %v8235_v35  ;;  %v10826_v29 = vld [vmem:[%s14184_s10 + $0xd98] sm:$0xf0]  ;;  %v12742_v30 = vld [vmem:[%s14184_s10 + $0xc0c] sm:$0xf] }
 0x455   : > { %8465 = vmatpush.bf16.msrb.mxu0 %v10269_v45  ;;  %v12858_v45 = vld [vmem:[%s14184_s10 + $0xfac] sm:$0xf]  ;;  %v10954_v46 = vld [vmem:[%s14184_s10 + $0xe98] sm:$0xf0]  ;;  %v10829_v61 = vor.u32 %v12790_v51, %v10826_v29 }
 0x456   : > { %8478 = vmatpush.bf16.msrb.mxu1 %v10397_v48  ;;  %v10845_v48 = vor.u32 %v12794_v38, %v10842_v43  ;;  %v11101_v20 = vor.u32 %v12858_v45, %v11098_v47  ;;  %v11082_v0 = vld [vmem:[%s14184_s10 + $0xf98] sm:$0xf0]  ;;  %v12786_v63 = vld [vmem:[%s14184_s10 + $0xd6c] sm:$0xf] }
 0x457   : > { %8491 = vmatpush.bf16.msrb.mxu2 %v10525_v39  ;;  %v12746_v39 = vld [vmem:[%s14184_s10 + $0xc2c] sm:$0xf]  ;;  %v10634_v62 = vld [vmem:[%s14184_s10 + $0xc18] sm:$0xf0] }
 0x458   : > { %8500 = vmatpush.bf16.msrb.mxu3 %v10717_v53  ;;  %v12822_v53 = vld [vmem:[%s14184_s10 + $0xe8c] sm:$0xf]  ;;  %v10810_v5 = vld [vmem:[%s14184_s10 + $0xd78] sm:$0xf0]  ;;  %v10637_v18 = vor.u32 %v12742_v30, %v10634_v62 }
 0x459   : > { %8466 = vmatpush.bf16.msrb.mxu0 %v10253_v34  ;;  %v8260_v58 = vpop.f32.mrf.mxu0  ;;  %v8236_v49 = vpop.f32.mrf.mxu2  ;;  %v12850_v15 = vld [vmem:[%s14184_s10 + $0xf6c] sm:$0xf]  ;;  %v11066_v19 = vld [vmem:[%s14184_s10 + $0xf78] sm:$0xf0]  ;;  %v10813_v8 = vor.u32 %v12786_v63, %v10810_v5 }
 0x45a   : > { %8479 = vmatpush.bf16.msrb.mxu1 %v10381_v1  ;;  %v8261_v60 = vadd.f32 %v8260_v58, %v8248_v59  ;;  %v8273_v50 = vpop.f32.mrf.mxu1  ;;  %v8249_v1 = vpop.f32.mrf.mxu3  ;;  %v12898_v32 = vld [vmem:[%s14184_s10 + $0x10ec] sm:$0xf]  ;;  %v11258_v27 = vld [vmem:[%s14184_s10 + $0x10f8] sm:$0xf0] }
 0x45b   : > { %8492 = vmatpush.bf16.msrb.mxu2 %v10509_v28  ;;  %v10957_v28 = vor.u32 %v12822_v53, %v10954_v46  ;;  %v12782_v35 = vld [vmem:[%s14184_s10 + $0xd4c] sm:$0xf]  ;;  %v11261_v36 = vor.u32 %v12898_v32, %v11258_v27  ;;  %v10922_v40 = vld [vmem:[%s14184_s10 + $0xe58] sm:$0xf0] }
 0x45c   : > { %8501 = vmatpush.bf16.msrb.mxu3 %v10701_v2  ;;  %8467 = vmatmul.bf16.vlgmr.msrb.gmra.mxu0 %v14428_v24  ;;  %v10650_v24 = vld [vmem:[%s14184_s10 + $0xc38] sm:$0xf0]  ;;  %v12814_v9 = vld [vmem:[%s14184_s10 + $0xe4c] sm:$0xf] }
 0x45d   : > { %8511 = vmatpush.bf16.msra.mxu0 %v10877_v37  ;;  %8480 = vmatmul.bf16.vlgmr.msrb.gmra.mxu1 %v14426_v23  ;;  %v12854_v23 = vld [vmem:[%s14184_s10 + $0xf8c] sm:$0xf]  ;;  %v10653_v34 = vor.u32 %v12746_v39, %v10650_v24  ;;  %v15787_v37 = vadd.f32 %v8273_v50, %v8261_v60  ;;  %v10925_v45 = vor.u32 %v12814_v9, %v10922_v40  ;;  %v11034_v51 = vld [vmem:[%s14184_s10 + $0xf38] sm:$0xf0] }
 0x45e   : > { %8524 = vmatpush.bf16.msra.mxu1 %v11005_v6  ;;  %8493 = vmatmul.bf16.vlgmr.msrb.gmra.mxu2 %v14430_v25  ;;  %v10973_v25 = vor.u32 %v12826_v4, %v10970_v44  ;;  %v11085_v2 = vor.u32 %v12854_v23, %v11082_v0  ;;  %v12818_v6 = vld [vmem:[%s14184_s10 + $0xe6c] sm:$0xf]  ;;  %v11242_v4 = vld [vmem:[%s14184_s10 + $0x10d8] sm:$0xf0] }
 0x45f   : > { %8537 = vmatpush.bf16.msra.mxu2 %v11133_v7  ;;  %v10938_v7 = vld [vmem:[%s14184_s10 + $0xe78] sm:$0xf0]  ;;  %v12894_v43 = vld [vmem:[%s14184_s10 + $0x10cc] sm:$0xf] }
 0x460   : > { %8502 = vmatpush.bf16.msrb.mxu3 %v10685_v33  ;;  %v10941_v31 = vor.u32 %v12818_v6, %v10938_v7  ;;  %v11069_v33 = vor.u32 %v12850_v15, %v11066_v19  ;;  %v12810_v39 = vld [vmem:[%s14184_s10 + $0xe2c] sm:$0xf]  ;;  %v11245_v24 = vor.u32 %v12894_v43, %v11242_v4  ;;  %v11226_v53 = vld [vmem:[%s14184_s10 + $0x10b8] sm:$0xf0] }
 0x461   : > { %8512 = vmatpush.bf16.msra.mxu0 %v10861_v10  ;;  %v10794_v10 = vld [vmem:[%s14184_s10 + $0xd58] sm:$0xf0]  ;;  %v8262_v38 = vpop.f32.mrf.mxu0  ;;  %v12890_v29 = vld [vmem:[%s14184_s10 + $0x10ac] sm:$0xf] }
 0x462   : > { %8525 = vmatpush.bf16.msra.mxu1 %v10989_v41  ;;  %v12846_v41 = vld [vmem:[%s14184_s10 + $0xf4c] sm:$0xf]  ;;  %v8275_v59 = vpop.f32.mrf.mxu1  ;;  %v10797_v44 = vor.u32 %v12782_v35, %v10794_v10  ;;  %v10762_v23 = vld [vmem:[%s14184_s10 + $0xd18] sm:$0xf0] }
 0x463   : > { %8538 = vmatpush.bf16.msra.mxu2 %v11117_v42  ;;  %v11050_v42 = vld [vmem:[%s14184_s10 + $0xf58] sm:$0xf0]  ;;  %v12774_v46 = vld [vmem:[%s14184_s10 + $0xd0c] sm:$0xf] }
 0x464   : > { %8503 = vmatpush.bf16.msrb.mxu3 %v10669_v52  ;;  %v11053_v47 = vor.u32 %v12846_v41, %v11050_v42  ;;  %v12778_v52 = vld [vmem:[%s14184_s10 + $0xd2c] sm:$0xf]  ;;  %v10890_v50 = vld [vmem:[%s14184_s10 + $0xe18] sm:$0xf0]  ;;  %v10765_v63 = vor.u32 %v12774_v46, %v10762_v23 }
 0x465   : > { %8513 = vmatpush.bf16.msra.mxu0 %v10845_v48  ;;  %v10778_v48 = vld [vmem:[%s14184_s10 + $0xd38] sm:$0xf0]  ;;  %v12838_v49 = vld [vmem:[%s14184_s10 + $0xf0c] sm:$0xf] }
 0x466   : > { %8526 = vmatpush.bf16.msra.mxu1 %v10973_v25  ;;  %v10906_v25 = vld [vmem:[%s14184_s10 + $0xe38] sm:$0xf0]  ;;  %v10781_v58 = vor.u32 %v12778_v52, %v10778_v48  ;;  %v12886_v30 = vld [vmem:[%s14184_s10 + $0x108c] sm:$0xf] }
 0x467   : > { %8539 = vmatpush.bf16.msra.mxu2 %v11101_v20  ;;  %v12842_v20 = vld [vmem:[%s14184_s10 + $0xf2c] sm:$0xf]  ;;  %v10909_v0 = vor.u32 %v12810_v39, %v10906_v25  ;;  %v11210_v62 = vld [vmem:[%s14184_s10 + $0x1098] sm:$0xf0] }
 0x468   : > { %8504 = vmatpush.bf16.msrb.mxu3 %v10653_v34  ;;  %v11037_v60 = vor.u32 %v12842_v20, %v11034_v51  ;;  %v11229_v34 = vor.u32 %v12890_v29, %v11226_v53  ;;  %v12930_v1 = vld [vmem:[%s14184_s10 + $0x11ec] sm:$0xf]  ;;  %v11514_v5 = vld [vmem:[%s14184_s10 + $0x12f8] sm:$0xf0]  ;;  %v11213_v32 = vor.u32 %v12886_v30, %v11210_v62 }
 0x469   : > { %8514 = vmatpush.bf16.msra.mxu0 %v10829_v61  ;;  %v11018_v61 = vld [vmem:[%s14184_s10 + $0xf18] sm:$0xf0]  ;;  %v12994_v6 = vld [vmem:[%s14184_s10 + $0x13ec] sm:$0xf] }
 0x46a   : > { %8527 = vmatpush.bf16.msra.mxu1 %v10957_v28  ;;  %v11386_v28 = vld [vmem:[%s14184_s10 + $0x11f8] sm:$0xf0]  ;;  %v11021_v19 = vor.u32 %v12838_v49, %v11018_v61  ;;  %v12926_v35 = vld [vmem:[%s14184_s10 + $0x11cc] sm:$0xf] }
 0x46b   : > { %8540 = vmatpush.bf16.msra.mxu2 %v11085_v2  ;;  %v12962_v2 = vld [vmem:[%s14184_s10 + $0x12ec] sm:$0xf]  ;;  %v11642_v7 = vld [vmem:[%s14184_s10 + $0x13f8] sm:$0xf0]  ;;  %v11389_v27 = vor.u32 %v12930_v1, %v11386_v28 }
 0x46c   : > { %8505 = vmatpush.bf16.msrb.mxu3 %v10637_v18  ;;  %v12882_v18 = vld [vmem:[%s14184_s10 + $0x106c] sm:$0xf]  ;;  %v11370_v10 = vld [vmem:[%s14184_s10 + $0x11d8] sm:$0xf0] }
 0x46d   : > { %8515 = vmatpush.bf16.msra.mxu0 %v10813_v8  ;;  %v11194_v8 = vld [vmem:[%s14184_s10 + $0x1078] sm:$0xf0]  ;;  %v12958_v9 = vld [vmem:[%s14184_s10 + $0x12cc] sm:$0xf]  ;;  %v11373_v4 = vor.u32 %v12926_v35, %v11370_v10 }
 0x46e   : > { %8528 = vmatpush.bf16.msra.mxu1 %v10941_v31  ;;  %v11517_v31 = vor.u32 %v12962_v2, %v11514_v5  ;;  %v12990_v40 = vld [vmem:[%s14184_s10 + $0x13cc] sm:$0xf]  ;;  %v11626_v41 = vld [vmem:[%s14184_s10 + $0x13d8] sm:$0xf0]  ;;  %v11197_v38 = vor.u32 %v12882_v18, %v11194_v8 }
 0x46f   : > { %8541 = vmatpush.bf16.msra.mxu2 %v11069_v33  ;;  %8506 = vmatmul.bf16.vlgmr.msrb.gmra.mxu3 %v14488_v54  ;;  %v12806_v54 = vld [vmem:[%s14184_s10 + $0xe0c] sm:$0xf]  ;;  %v11645_v33 = vor.u32 %v12994_v6, %v11642_v7  ;;  %v11629_v52 = vor.u32 %v12990_v40, %v11626_v41  ;;  %v11354_v39 = vld [vmem:[%s14184_s10 + $0x11b8] sm:$0xf0] }
 0x470   : > { %8550 = vmatpush.bf16.msra.mxu3 %v11261_v36  ;;  %v10893_v15 = vor.u32 %v12806_v54, %v10890_v50  ;;  %v11498_v36 = vld [vmem:[%s14184_s10 + $0x12d8] sm:$0xf0]  ;;  %v12922_v48 = vld [vmem:[%s14184_s10 + $0x11ac] sm:$0xf] }
 0x471   : > { %8516 = vmatpush.bf16.msra.mxu0 %v10797_v44  ;;  %v8286_v42 = vpop.f32.mrf.mxu2  ;;  %v12878_v44 = vld [vmem:[%s14184_s10 + $0x104c] sm:$0xf]  ;;  %v11482_v25 = vld [vmem:[%s14184_s10 + $0x12b8] sm:$0xf0]  ;;  %v11357_v53 = vor.u32 %v12922_v48, %v11354_v39 }
 0x472   : > { %8529 = vmatpush.bf16.msra.mxu1 %v10925_v45  ;;  %v8287_v43 = vadd.f32 %v8286_v42, %v15787_v37  ;;  %v8299_v59 = vpop.f32.mrf.mxu3  ;;  %v11178_v45 = vld [vmem:[%s14184_s10 + $0x1058] sm:$0xf0]  ;;  %v12986_v20 = vld [vmem:[%s14184_s10 + $0x13ac] sm:$0xf] }
 0x473   : > { %8542 = vmatpush.bf16.msra.mxu2 %v11053_v47  ;;  %v11501_v47 = vor.u32 %v12958_v9, %v11498_v36  ;;  %v11610_v51 = vld [vmem:[%s14184_s10 + $0x13b8] sm:$0xf0]  ;;  %v11181_v29 = vor.u32 %v12878_v44, %v11178_v45  ;;  %v12918_v23 = vld [vmem:[%s14184_s10 + $0x118c] sm:$0xf] }
 0x474   : > { %8551 = vmatpush.bf16.msra.mxu3 %v11245_v24  ;;  %v12954_v24 = vld [vmem:[%s14184_s10 + $0x12ac] sm:$0xf]  ;;  %v8300_v37 = vadd.f32 %v8299_v59, %v8287_v43  ;;  %v11613_v46 = vor.u32 %v12986_v20, %v11610_v51  ;;  %v11466_v54 = vld [vmem:[%s14184_s10 + $0x1298] sm:$0xf0] }
 0x475   : > { %8517 = vmatpush.bf16.msra.mxu0 %v10781_v58  ;;  %v12874_v58 = vld [vmem:[%s14184_s10 + $0x102c] sm:$0xf]  ;;  %v11594_v49 = vld [vmem:[%s14184_s10 + $0x1398] sm:$0xf0] }
 0x476   : > { %8530 = vmatpush.bf16.msra.mxu1 %v10909_v0  ;;  %v11338_v0 = vld [vmem:[%s14184_s10 + $0x1198] sm:$0xf0]  ;;  %v12982_v50 = vld [vmem:[%s14184_s10 + $0x138c] sm:$0xf] }
 0x477   : > { %8543 = vmatpush.bf16.msra.mxu2 %v11037_v60  ;;  %v12950_v60 = vld [vmem:[%s14184_s10 + $0x128c] sm:$0xf]  ;;  %v11341_v62 = vor.u32 %v12918_v23, %v11338_v0  ;;  %v11146_v2 = vld [vmem:[%s14184_s10 + $0x1018] sm:$0xf0]  ;;  %v11597_v6 = vor.u32 %v12982_v50, %v11594_v49 }
 0x478   : > { %8552 = vmatpush.bf16.msra.mxu3 %v11229_v34  ;;  %v12870_v28 = vld [vmem:[%s14184_s10 + $0x100c] sm:$0xf]  ;;  %v11469_v5 = vor.u32 %v12950_v60, %v11466_v54  ;;  %v11578_v8 = vld [vmem:[%s14184_s10 + $0x1378] sm:$0xf0] }
 0x479   : > { %8518 = vmatpush.bf16.msra.mxu0 %v10765_v63  ;;  %v8288_v34 = vpop.f32.mrf.mxu2  ;;  %v12914_v7 = vld [vmem:[%s14184_s10 + $0x116c] sm:$0xf]  ;;  %v11149_v35 = vor.u32 %v12870_v28, %v11146_v2  ;;  %v11306_v41 = vld [vmem:[%s14184_s10 + $0x1158] sm:$0xf0] }
 0x47a   : > { %8531 = vmatpush.bf16.msra.mxu1 %v10893_v15  ;;  %v8325_v1 = vpop.f32.mrf.mxu1  ;;  %v8301_v63 = vpop.f32.mrf.mxu3  ;;  %v11322_v15 = vld [vmem:[%s14184_s10 + $0x1178] sm:$0xf0]  ;;  %v12978_v18 = vld [vmem:[%s14184_s10 + $0x136c] sm:$0xf] }
 0x47b   : > { %8544 = vmatpush.bf16.msra.mxu2 %v11021_v19  ;;  %v12946_v19 = vld [vmem:[%s14184_s10 + $0x126c] sm:$0xf]  ;;  %v11325_v10 = vor.u32 %v12914_v7, %v11322_v15  ;;  %v11581_v36 = vor.u32 %v12978_v18, %v11578_v8  ;;  %v11434_v43 = vld [vmem:[%s14184_s10 + $0x1258] sm:$0xf0] }
 0x47c   : > { %8553 = vmatpush.bf16.msra.mxu3 %v11213_v32  ;;  %8519 = vmatmul.bf16.vlgmr.msra.gmra.mxu0 %v14492_v56  ;;  %v11162_v56 = vld [vmem:[%s14184_s10 + $0x1038] sm:$0xf0]  ;;  %v12910_v40 = vld [vmem:[%s14184_s10 + $0x114c] sm:$0xf] }
 0x47d   : > { %8563 = vmatpush.bf16.msrb.mxu0 %v11389_v27  ;;  %8532 = vmatmul.bf16.vlgmr.msra.gmra.mxu1 %v14490_v55  ;;  %v8312_v55 = vpop.f32.mrf.mxu0  ;;  %v11165_v30 = vor.u32 %v12874_v58, %v11162_v56  ;;  %v11450_v27 = vld [vmem:[%s14184_s10 + $0x1278] sm:$0xf0]  ;;  %v12942_v42 = vld [vmem:[%s14184_s10 + $0x124c] sm:$0xf] }
 0x47e   : > { %8576 = vmatpush.bf16.msrb.mxu1 %v11517_v31  ;;  %8545 = vmatmul.bf16.vlgmr.msra.gmra.mxu2 %v14494_v57  ;;  %v11485_v57 = vor.u32 %v12954_v24, %v11482_v25  ;;  %v8313_v61 = vadd.f32 %v8312_v55, %v8300_v37  ;;  %v13026_v31 = vld [vmem:[%s14184_s10 + $0x14ec] sm:$0xf]  ;;  %v11453_v9 = vor.u32 %v12946_v19, %v11450_v27  ;;  %v11562_v59 = vld [vmem:[%s14184_s10 + $0x1358] sm:$0xf0] }
 0x47f   : > { %8589 = vmatpush.bf16.msrb.mxu2 %v11645_v33  ;;  %v11770_v33 = vld [vmem:[%s14184_s10 + $0x14f8] sm:$0xf0]  ;;  %v13022_v44 = vld [vmem:[%s14184_s10 + $0x14cc] sm:$0xf]  ;;  %v11437_v24 = vor.u32 %v12942_v42, %v11434_v43 }
 0x480   : > { %8554 = vmatpush.bf16.msra.mxu3 %v11197_v38  ;;  %v8326_v32 = vadd.f32 %v8325_v1, %v8313_v61  ;;  %v11773_v38 = vor.u32 %v13026_v31, %v11770_v33  ;;  %v11754_v45 = vld [vmem:[%s14184_s10 + $0x14d8] sm:$0xf0]  ;;  %v12906_v25 = vld [vmem:[%s14184_s10 + $0x112c] sm:$0xf] }
 0x481   : > { %8564 = vmatpush.bf16.msrb.mxu0 %v11373_v4  ;;  %v12974_v4 = vld [vmem:[%s14184_s10 + $0x134c] sm:$0xf]  ;;  %v8338_v39 = vpop.f32.mrf.mxu2  ;;  %v11290_v20 = vld [vmem:[%s14184_s10 + $0x1138] sm:$0xf0] }
 0x482   : > { %8577 = vmatpush.bf16.msrb.mxu1 %v11501_v47  ;;  %v8327_v48 = vpop.f32.mrf.mxu1  ;;  %v11565_v37 = vor.u32 %v12974_v4, %v11562_v59  ;;  %v12938_v51 = vld [vmem:[%s14184_s10 + $0x122c] sm:$0xf]  ;;  %v11418_v58 = vld [vmem:[%s14184_s10 + $0x1238] sm:$0xf0]  ;;  %v11293_v0 = vor.u32 %v12906_v25, %v11290_v20 }
 0x483   : > { %8590 = vmatpush.bf16.msrb.mxu2 %v11629_v52  ;;  %v11309_v52 = vor.u32 %v12910_v40, %v11306_v41  ;;  %v12970_v56 = vld [vmem:[%s14184_s10 + $0x132c] sm:$0xf]  ;;  %v11738_v23 = vld [vmem:[%s14184_s10 + $0x14b8] sm:$0xf0]  ;;  %v11421_v50 = vor.u32 %v12938_v51, %v11418_v58 }
 0x484   : > { %8555 = vmatpush.bf16.msra.mxu3 %v11181_v29  ;;  %v15877_v29 = vadd.f32 %v8338_v39, %v8326_v32  ;;  %v12902_v60 = vld [vmem:[%s14184_s10 + $0x110c] sm:$0xf]  ;;  %v11274_v54 = vld [vmem:[%s14184_s10 + $0x1118] sm:$0xf0] }
 0x485   : > { %8565 = vmatpush.bf16.msrb.mxu0 %v11357_v53  ;;  %v8314_v47 = vpop.f32.mrf.mxu0  ;;  %v11757_v53 = vor.u32 %v13022_v44, %v11754_v45  ;;  %v11402_v55 = vld [vmem:[%s14184_s10 + $0x1218] sm:$0xf0]  ;;  %v12966_v34 = vld [vmem:[%s14184_s10 + $0x130c] sm:$0xf] }
 0x486   : > { %8578 = vmatpush.bf16.msrb.mxu1 %v11485_v57  ;;  %v11546_v57 = vld [vmem:[%s14184_s10 + $0x1338] sm:$0xf0]  ;;  %v13058_v28 = vld [vmem:[%s14184_s10 + $0x15ec] sm:$0xf] }
 0x487   : > { %8591 = vmatpush.bf16.msrb.mxu2 %v11613_v46  ;;  %v13018_v46 = vld [vmem:[%s14184_s10 + $0x14ac] sm:$0xf]  ;;  %v11549_v49 = vor.u32 %v12970_v56, %v11546_v57  ;;  %v11722_v1 = vld [vmem:[%s14184_s10 + $0x1498] sm:$0xf0] }
 0x488   : > { %8556 = vmatpush.bf16.msra.mxu3 %v11165_v30  ;;  %v11741_v61 = vor.u32 %v13018_v46, %v11738_v23  ;;  %v11530_v30 = vld [vmem:[%s14184_s10 + $0x1318] sm:$0xf0]  ;;  %v13090_v63 = vld [vmem:[%s14184_s10 + $0x16ec] sm:$0xf] }
 0x489   : > { %8566 = vmatpush.bf16.msrb.mxu0 %v11341_v62  ;;  %v13014_v62 = vld [vmem:[%s14184_s10 + $0x148c] sm:$0xf]  ;;  %v11898_v2 = vld [vmem:[%s14184_s10 + $0x15f8] sm:$0xf0]  ;;  %v11533_v32 = vor.u32 %v12966_v34, %v11530_v30  ;;  %v8340_v27 = vpop.f32.mrf.mxu2 }
 0x48a   : > { %8579 = vmatpush.bf16.msrb.mxu1 %v11469_v5  ;;  %v11277_v5 = vor.u32 %v12902_v60, %v11274_v54  ;;  %v13122_v7 = vld [vmem:[%s14184_s10 + $0x17ec] sm:$0xf]  ;;  %v12154_v15 = vld [vmem:[%s14184_s10 + $0x17f8] sm:$0xf0]  ;;  %v11725_v18 = vor.u32 %v13014_v62, %v11722_v1  ;;  %v11901_v8 = vor.u32 %v13058_v28, %v11898_v2 }
 0x48b   : > { %8592 = vmatpush.bf16.msrb.mxu2 %v11597_v6  ;;  %v12026_v6 = vld [vmem:[%s14184_s10 + $0x16f8] sm:$0xf0]  ;;  %v13010_v31 = vld [vmem:[%s14184_s10 + $0x146c] sm:$0xf] }
 0x48c   : > { %8557 = vmatpush.bf16.msra.mxu3 %v11149_v35  ;;  %v11706_v33 = vld [vmem:[%s14184_s10 + $0x1478] sm:$0xf0]  ;;  %v12029_v35 = vor.u32 %v13090_v63, %v12026_v6  ;;  %v13086_v40 = vld [vmem:[%s14184_s10 + $0x16cc] sm:$0xf] }
 0x48d   : > { %8567 = vmatpush.bf16.msrb.mxu0 %v11325_v10  ;;  %v12157_v10 = vor.u32 %v13122_v7, %v12154_v15  ;;  %v12010_v41 = vld [vmem:[%s14184_s10 + $0x16d8] sm:$0xf0]  ;;  %v13118_v42 = vld [vmem:[%s14184_s10 + $0x17cc] sm:$0xf]  ;;  %v11709_v43 = vor.u32 %v13010_v31, %v11706_v33 }
 0x48e   : > { %8580 = vmatpush.bf16.msrb.mxu1 %v11453_v9  ;;  %v13054_v9 = vld [vmem:[%s14184_s10 + $0x15cc] sm:$0xf]  ;;  %v11690_v44 = vld [vmem:[%s14184_s10 + $0x1458] sm:$0xf0]  ;;  %v12013_v47 = vor.u32 %v13086_v40, %v12010_v41 }
 0x48f   : > { %8593 = vmatpush.bf16.msrb.mxu2 %v11581_v36  ;;  %8558 = vmatmul.bf16.vlgmr.msra.gmra.mxu3 %v14577_v17  ;;  %v12934_v17 = vld [vmem:[%s14184_s10 + $0x120c] sm:$0xf]  ;;  %v11882_v36 = vld [vmem:[%s14184_s10 + $0x15d8] sm:$0xf0] }
 0x490   : > { %8602 = vmatpush.bf16.msrb.mxu3 %v11773_v38  ;;  %v11405_v19 = vor.u32 %v12934_v17, %v11402_v55  ;;  %v12138_v38 = vld [vmem:[%s14184_s10 + $0x17d8] sm:$0xf0]  ;;  %v11885_v4 = vor.u32 %v13054_v9, %v11882_v36  ;;  %v13006_v59 = vld [vmem:[%s14184_s10 + $0x144c] sm:$0xf] }
 0x491   : > { %8568 = vmatpush.bf16.msrb.mxu0 %v11309_v52  ;;  %v12141_v52 = vor.u32 %v13118_v42, %v12138_v38  ;;  %v13050_v48 = vld [vmem:[%s14184_s10 + $0x15ac] sm:$0xf]  ;;  %v11866_v39 = vld [vmem:[%s14184_s10 + $0x15b8] sm:$0xf0]  ;;  %v11693_v51 = vor.u32 %v13006_v59, %v11690_v44 }
 0x492   : > { %8581 = vmatpush.bf16.msrb.mxu1 %v11437_v24  ;;  %v8351_v45 = vpop.f32.mrf.mxu3  ;;  %v13082_v24 = vld [vmem:[%s14184_s10 + $0x16ac] sm:$0xf]  ;;  %v12122_v20 = vld [vmem:[%s14184_s10 + $0x17b8] sm:$0xf0] }
 0x493   : > { %8594 = vmatpush.bf16.msrb.mxu2 %v11565_v37  ;;  %v11994_v37 = vld [vmem:[%s14184_s10 + $0x16b8] sm:$0xf0]  ;;  %v13114_v25 = vld [vmem:[%s14184_s10 + $0x17ac] sm:$0xf] }
 0x494   : > { %8603 = vmatpush.bf16.msrb.mxu3 %v11757_v53  ;;  %v11869_v53 = vor.u32 %v13050_v48, %v11866_v39  ;;  %v13002_v58 = vld [vmem:[%s14184_s10 + $0x142c] sm:$0xf]  ;;  %v11674_v56 = vld [vmem:[%s14184_s10 + $0x1438] sm:$0xf0] }
 0x495   : > { %8569 = vmatpush.bf16.msrb.mxu0 %v11293_v0  ;;  %v13046_v57 = vld [vmem:[%s14184_s10 + $0x158c] sm:$0xf]  ;;  %v11850_v46 = vld [vmem:[%s14184_s10 + $0x1598] sm:$0xf0] }
 0x496   : > { %8582 = vmatpush.bf16.msrb.mxu1 %v11421_v50  ;;  %v13078_v23 = vld [vmem:[%s14184_s10 + $0x168c] sm:$0xf]  ;;  %v11978_v0 = vld [vmem:[%s14184_s10 + $0x1698] sm:$0xf0]  ;;  %v11677_v50 = vor.u32 %v13002_v58, %v11674_v56 }
 0x497   : > { %8595 = vmatpush.bf16.msrb.mxu2 %v11549_v49  ;;  %v13110_v60 = vld [vmem:[%s14184_s10 + $0x178c] sm:$0xf]  ;;  %v11853_v49 = vor.u32 %v13046_v57, %v11850_v46  ;;  %v11658_v55 = vld [vmem:[%s14184_s10 + $0x1418] sm:$0xf0]  ;;  %v11981_v62 = vor.u32 %v13078_v23, %v11978_v0 }
 0x498   : > { %8604 = vmatpush.bf16.msrb.mxu3 %v11741_v61  ;;  %v12998_v17 = vld [vmem:[%s14184_s10 + $0x140c] sm:$0xf]  ;;  %v11834_v2 = vld [vmem:[%s14184_s10 + $0x1578] sm:$0xf0] }
 0x499   : > { %8570 = vmatpush.bf16.msrb.mxu0 %v11277_v5  ;;  %v8364_v54 = vpop.f32.mrf.mxu0  ;;  %v13042_v28 = vld [vmem:[%s14184_s10 + $0x156c] sm:$0xf]  ;;  %v11962_v5 = vld [vmem:[%s14184_s10 + $0x1678] sm:$0xf0]  ;;  %v11661_v27 = vor.u32 %v12998_v17, %v11658_v55 }
 0x49a   : > { %8583 = vmatpush.bf16.msrb.mxu1 %v11405_v19  ;;  %v8365_v34 = vadd.f32 %v8364_v54, %v8351_v45  ;;  %v8377_v61 = vpop.f32.mrf.mxu1  ;;  %v8353_v30 = vpop.f32.mrf.mxu3  ;;  %v13074_v63 = vld [vmem:[%s14184_s10 + $0x166c] sm:$0xf]  ;;  %v12090_v7 = vld [vmem:[%s14184_s10 + $0x1778] sm:$0xf0] }
 0x49b   : > { %8596 = vmatpush.bf16.msrb.mxu2 %v11533_v32  ;;  %v13106_v6 = vld [vmem:[%s14184_s10 + $0x176c] sm:$0xf]  ;;  %v12218_v32 = vld [vmem:[%s14184_s10 + $0x1878] sm:$0xf0]  ;;  %v13156_v30 = vld [vmem:[%s15978_s28 + $0x78] sm:$0xff] }
 0x49c   : > { %8605 = vmatpush.bf16.msrb.mxu3 %v11725_v18  ;;  %8571 = vmatmul.bf16.vlgmr.msrb.gmra.mxu0 %v14583_v22  ;;  %v11997_v22 = vor.u32 %v13082_v24, %v11994_v37  ;;  %v8378_v15 = vadd.f32 %v8377_v61, %v8365_v34  ;;  %v13138_v19 = vld [vmem:[%s14184_s10 + $0x186c] sm:$0xf]  ;;  %v11837_v18 = vor.u32 %v13042_v28, %v11834_v2  ;;  %v11946_v40 = vld [vmem:[%s14184_s10 + $0x1658] sm:$0xf0]  ;;  %v13148_v61 = vld [vmem:[%s15978_s28 + $0x38] sm:$0xff] }
 0x49d   : > { %8615 = vmatpush.bf16.msra.mxu0 %v11901_v8  ;;  %8584 = vmatmul.bf16.vlgmr.msrb.gmra.mxu1 %v14581_v21  ;;  %v12106_v21 = vld [vmem:[%s14184_s10 + $0x1798] sm:$0xf0]  ;;  %v11965_v8 = vor.u32 %v13074_v63, %v11962_v5  ;;  %v12093_v31 = vor.u32 %v13106_v6, %v12090_v7  ;;  %v13038_v33 = vld [vmem:[%s14184_s10 + $0x154c] sm:$0xf]  ;;  %v12221_v36 = vor.u32 %v13138_v19, %v12218_v32  ;;  %v13146_v7 = vld [vmem:[%s15978_s28 + $0x28] sm:$0xff] }
 0x49e   : > { %8628 = vmatpush.bf16.msra.mxu1 %v12029_v35  ;;  %8597 = vmatmul.bf16.vlgmr.msrb.gmra.mxu2 %v14585_v26  ;;  %v12125_v26 = vor.u32 %v13114_v25, %v12122_v20  ;;  %v12109_v1 = vor.u32 %v13110_v60, %v12106_v21  ;;  %v11818_v35 = vld [vmem:[%s14184_s10 + $0x1558] sm:$0xf0]  ;;  %v13102_v41 = vld [vmem:[%s14184_s10 + $0x174c] sm:$0xf]  ;;  %v13162_v32 = vld [vmem:[%s15978_s28 + $0xa8] sm:$0xff] }
 0x49f   : > { %8641 = vmatpush.bf16.msra.mxu2 %v12157_v10  ;;  %v13070_v10 = vld [vmem:[%s14184_s10 + $0x164c] sm:$0xf]  ;;  %v12074_v42 = vld [vmem:[%s14184_s10 + $0x1758] sm:$0xf0]  ;;  %v11821_v44 = vor.u32 %v13038_v33, %v11818_v35  ;;  %v13144_v35 = vld [vmem:[%s15978_s28 + $0x18] sm:$0xff] }
 0x4a0   : > { %8606 = vmatpush.bf16.msrb.mxu3 %v11709_v43  ;;  %v13134_v43 = vld [vmem:[%s14184_s10 + $0x184c] sm:$0xf]  ;;  %v11802_v39 = vld [vmem:[%s14184_s10 + $0x1538] sm:$0xf0] }
 0x4a1   : > { %8616 = vmatpush.bf16.msra.mxu0 %v11885_v4  ;;  %v8390_v9 = vpop.f32.mrf.mxu2  ;;  %v12202_v4 = vld [vmem:[%s14184_s10 + $0x1858] sm:$0xf0]  ;;  %v8366_v59 = vpop.f32.mrf.mxu0  ;;  %v13034_v48 = vld [vmem:[%s14184_s10 + $0x152c] sm:$0xf] }
 0x4a2   : > { %8629 = vmatpush.bf16.msra.mxu1 %v12013_v47  ;;  %v15949_v38 = vadd.f32 %v8390_v9, %v8378_v15  ;;  %v8379_v45 = vpop.f32.mrf.mxu1  ;;  %v11949_v47 = vor.u32 %v13070_v10, %v11946_v40  ;;  %v13066_v24 = vld [vmem:[%s14184_s10 + $0x162c] sm:$0xf]  ;;  %v12205_v37 = vor.u32 %v13134_v43, %v12202_v4  ;;  %v11930_v25 = vld [vmem:[%s14184_s10 + $0x1638] sm:$0xf0]  ;;  %v11805_v56 = vor.u32 %v13034_v48, %v11802_v39  ;;  %v13154_v15 = vld [vmem:[%s15978_s28 + $0x68] sm:$0xff] }
 0x4a3   : > { %8642 = vmatpush.bf16.msra.mxu2 %v12141_v52  ;;  %v12077_v52 = vor.u32 %v13102_v41, %v12074_v42  ;;  %v13098_v20 = vld [vmem:[%s14184_s10 + $0x172c] sm:$0xf]  ;;  %v12186_v58 = vld [vmem:[%s14184_s10 + $0x1838] sm:$0xf0]  ;;  %v13152_v10 = vld [vmem:[%s15978_s28 + $0x58] sm:$0xff]  ;;  %v8667_v39 = vmax.f32 %v15012_v16, 0.0 }
 0x4a4   : > { %8607 = vmatpush.bf16.msrb.mxu3 %v11693_v51  ;;  %v12058_v51 = vld [vmem:[%s14184_s10 + $0x1738] sm:$0xf0]  ;;  %v13030_v57 = vld [vmem:[%s14184_s10 + $0x150c] sm:$0xf]  ;;  %v13160_v9 = vld [vmem:[%s15978_s28 + $0x98] sm:$0xff] }
 0x4a5   : > { %8617 = vmatpush.bf16.msra.mxu0 %v11869_v53  ;;  %v13130_v53 = vld [vmem:[%s14184_s10 + $0x182c] sm:$0xf]  ;;  %v11786_v46 = vld [vmem:[%s14184_s10 + $0x1518] sm:$0xf0]  ;;  %v13142_v59 = vld [vmem:[%s15978_s28 + $0x8] sm:$0xff] }
 0x4a6   : > { %8630 = vmatpush.bf16.msra.mxu1 %v11997_v22  ;;  %v11933_v22 = vor.u32 %v13066_v24, %v11930_v25  ;;  %v13062_v23 = vld [vmem:[%s14184_s10 + $0x160c] sm:$0xf]  ;;  %v11914_v60 = vld [vmem:[%s14184_s10 + $0x1618] sm:$0xf0]  ;;  %v13158_v45 = vld [vmem:[%s15978_s28 + $0x88] sm:$0xff]  ;;  %v8668_v24 = vmax.f32 %v15440_v3, 0.0 }
 0x4a7   : > { %8643 = vmatpush.bf16.msra.mxu2 %v12125_v26  ;;  %v12061_v26 = vor.u32 %v13098_v20, %v12058_v51  ;;  %v13094_v21 = vld [vmem:[%s14184_s10 + $0x170c] sm:$0xf]  ;;  %v12042_v54 = vld [vmem:[%s14184_s10 + $0x1718] sm:$0xf0]  ;;  %v11917_v55 = vor.u32 %v13062_v23, %v11914_v60  ;;  %v8669_v25 = vmax.f32 %v15877_v29, 0.0  ;;  %v8671_v20 = vpack.c.bf16 %v8667_v39, %v8667_v39 }
 0x4a8   : > { %8608 = vmatpush.bf16.msrb.mxu3 %v11677_v50  ;;  %v11789_v50 = vor.u32 %v13030_v57, %v11786_v46  ;;  %v12170_v17 = vld [vmem:[%s14184_s10 + $0x1818] sm:$0xf0]  ;;  %v12045_v34 = vor.u32 %v13094_v21, %v12042_v54  ;;  %v13147_v28 = vld [vmem:[%s15978_s28 + $0x30] sm:$0xff]  ;;  %v8672_v51 = vpack.c.bf16 %v8668_v24, %v8668_v24 }
 0x4a9   : > { %8618 = vmatpush.bf16.msra.mxu0 %v11853_v49  ;;  %v8392_v0 = vpop.f32.mrf.mxu2  ;;  %v13126_v49 = vld [vmem:[%s14184_s10 + $0x180c] sm:$0xf]  ;;  %v13233_v19 = vld [vmem:[#allocation1] sm:$0xff] }
 0x4aa   : > { %8631 = vmatpush.bf16.msra.mxu1 %v11981_v62  ;;  %v13164_v62 = vld [vmem:[%s15978_s28 + $0xb8] sm:$0xff]  ;;  %v13155_v2 = vld [vmem:[%s15978_s28 + $0x70] sm:$0xff]  ;;  %v13149_v48 = vld [vmem:[%s15978_s28 + $0x40] sm:$0xff] }
 0x4ab   : > { %8644 = vmatpush.bf16.msra.mxu2 %v12109_v1  ;;  %v12173_v1 = vor.u32 %v13126_v49, %v12170_v17  ;;  %v13163_v5 = vld [vmem:[%s15978_s28 + $0xb0] sm:$0xff]  ;;  %v13172_v49 = vld [vmem:[%s15978_s28 + $0xf8] sm:$0xff] }
 0x4ac   : > { %8609 = vmatpush.bf16.msrb.mxu3 %v11661_v27  ;;  %v13143_v42 = vld [vmem:[%s15978_s28 + $0x10] sm:$0xff] }
 0x4ad   : > { %8619 = vmatpush.bf16.msra.mxu0 %v11837_v18  ;;  %v13153_v18 = vld [vmem:[%s15978_s28 + $0x60] sm:$0xff]  ;;  %v13159_v4 = vld [vmem:[%s15978_s28 + $0x90] sm:$0xff] }
 0x4ae   : > { %8632 = vmatpush.bf16.msra.mxu1 %v11965_v8 }
 0x4af   : > { %8645 = vmatpush.bf16.msra.mxu2 %v12093_v31  ;;  %8610 = vmatmul.bf16.vlgmr.msrb.gmra.mxu3 %v14615_v11  ;;  %v12189_v11 = vor.u32 %v13130_v53, %v12186_v58  ;;  %v13161_v31 = vld [vmem:[%s15978_s28 + $0xa0] sm:$0xff]  ;;  %v8673_v53 = vpack.c.bf16 %v8669_v25, %v8669_v25 }
 0x4b0   : > { %8658 = vmatpush.bf16.msra.mxu3 %v12221_v36 }
 0x4b1   : > { %8620 = vmatpush.bf16.msra.mxu0 %v11821_v44  ;;  %v13150_v44 = vld [vmem:[%s15978_s28 + $0x48] sm:$0xff] }
 0x4b2   : > { %8633 = vmatpush.bf16.msra.mxu1 %v11949_v47  ;;  %v8403_v63 = vpop.f32.mrf.mxu3 }
 0x4b3   : > { %8646 = vmatpush.bf16.msra.mxu2 %v12077_v52  ;;  %v8404_v6 = vadd.f32 %v8403_v63, %v15949_v38  ;;  %v13151_v38 = vld [vmem:[%s15978_s28 + $0x50] sm:$0xff]  ;;  %v13141_v52 = vld [vmem:[%s15978_s28] sm:$0xff] }
 0x4b4   : > { %8659 = vmatpush.bf16.msra.mxu3 %v12205_v37  ;;  %v13157_v37 = vld [vmem:[%s15978_s28 + $0x80] sm:$0xff] }
 0x4b5   : > { %8621 = vmatpush.bf16.msra.mxu0 %v11805_v56 }
 0x4b6   : > { %8634 = vmatpush.bf16.msra.mxu1 %v11933_v22 }
 0x4b7   : > { %8647 = vmatpush.bf16.msra.mxu2 %v12061_v26 }
 0x4b8   : > { %8660 = vmatpush.bf16.msra.mxu3 %v12189_v11 }
 0x4b9   : > { %8622 = vmatpush.bf16.msra.mxu0 %v11789_v50  ;;  %v8416_v27 = vpop.f32.mrf.mxu0 }
 0x4ba   : > { %8635 = vmatpush.bf16.msra.mxu1 %v11917_v55  ;;  %v8405_v8 = vpop.f32.mrf.mxu3  ;;  %v13171_v55 = vld [vmem:[%s15978_s28 + $0xf0] sm:$0xff] }
 0x4bb   : > { %8648 = vmatpush.bf16.msra.mxu2 %v12045_v34 }
 0x4bc   : > { %8661 = vmatpush.bf16.msra.mxu3 %v12173_v1  ;;  %8623 = vmatmul.bf16.vlgmr.msra.gmra.mxu0 %v14619_v13  ;;  %v8417_v13 = vadd.f32 %v8416_v27, %v8404_v6  ;;  %v13169_v1 = vld [vmem:[%s15978_s28 + $0xe0] sm:$0xff] }
 0x4bd   : > { %8931 = vmatpush.bf16.msrb.mxu0 %v13148_v61  ;;  %8636 = vmatmul.bf16.vlgmr.msra.gmra.mxu1 %v14617_v12  ;;  %v13145_v12 = vld [vmem:[%s15978_s28 + $0x20] sm:$0xff] }
 0x4be   : > { %8944 = vmatpush.bf16.msrb.mxu1 %v13156_v30  ;;  %8649 = vmatmul.bf16.vlgmr.msra.gmra.mxu2 %v14621_v14  ;;  %v8429_v14 = vpop.f32.mrf.mxu1 }
 0x4bf   : > { %8957 = vmatpush.bf16.msrb.mxu2 %v13164_v62  ;;  %12225 = vmatmul.msk.bf16.vlgmr.msra.gmra.mxu3 %vm7364_vm0, %v13233_v19  ;;  %v8430_v33 = vadd.f32 %v8429_v14, %v8417_v13  ;;  %v13170_v62 = vld [vmem:[%s15978_s28 + $0xe8] sm:$0xff] }
 0x4c0   : > { %8970 = vmatpush.bf16.msrb.mxu3 %v13172_v49  ;;  %v13166_v19 = vld [vmem:[%s15978_s28 + $0xc8] sm:$0xff] }
 0x4c1   : > { %8932 = vmatpush.bf16.msrb.mxu0 %v13147_v28  ;;  %v8442_v36 = vpop.f32.mrf.mxu2  ;;  %v8418_v41 = vpop.f32.mrf.mxu0 }
 0x4c2   : > { %8945 = vmatpush.bf16.msrb.mxu1 %v13155_v2  ;;  %v8443_v40 = vadd.f32 %v8442_v36, %v8430_v33  ;;  %v13168_v2 = vld [vmem:[%s15978_s28 + $0xd8] sm:$0xff] }
 0x4c3   : > { %8958 = vmatpush.bf16.msrb.mxu2 %v13163_v5 }
 0x4c4   : > { %8971 = vmatpush.bf16.msrb.mxu3 %v13171_v55 }
 0x4c5   : > { %8933 = vmatpush.bf16.msrb.mxu0 %v13146_v7  ;;  %v13167_v7 = vld [vmem:[%s15978_s28 + $0xd0] sm:$0xff] }
 0x4c6   : > { %8946 = vmatpush.bf16.msrb.mxu1 %v13154_v15  ;;  %v8431_v43 = vpop.f32.mrf.mxu1 }
 0x4c7   : > { %8959 = vmatpush.bf16.msrb.mxu2 %v13162_v32 }
 0x4c8   : > { %8972 = vmatpush.bf16.msrb.mxu3 %v13170_v62 }
 0x4c9   : > { %8934 = vmatpush.bf16.msrb.mxu0 %v13145_v12  ;;  %v8444_v47 = vpop.f32.mrf.mxu2  ;;  %v13165_v12 = vld [vmem:[%s15978_s28 + $0xc0] sm:$0xff] }
 0x4ca   : > { %8947 = vmatpush.bf16.msrb.mxu1 %v13153_v18 }
 0x4cb   : > { %8960 = vmatpush.bf16.msrb.mxu2 %v13161_v31 }
 0x4cc   : > { %8973 = vmatpush.bf16.msrb.mxu3 %v13169_v1 }
 0x4cd   : > { %8935 = vmatpush.bf16.msrb.mxu0 %v13144_v35 }
 0x4ce   : > { %8948 = vmatpush.bf16.msrb.mxu1 %v13152_v10 }
 0x4cf   : > { %8961 = vmatpush.bf16.msrb.mxu2 %v13160_v9 }
 0x4d0   : > { %8974 = vmatpush.bf16.msrb.mxu3 %v13168_v2 }
 0x4d1   : > { %8936 = vmatpush.bf16.msrb.mxu0 %v13143_v42 }
 0x4d2   : > { %8949 = vmatpush.bf16.msrb.mxu1 %v13151_v38  ;;  %v8455_v58 = vpop.f32.mrf.mxu3 }
 0x4d3   : > { %8962 = vmatpush.bf16.msrb.mxu2 %v13159_v4  ;;  %v8456_v56 = vadd.f32 %v8455_v58, %v8443_v40 }
 0x4d4   : > { %8975 = vmatpush.bf16.msrb.mxu3 %v13167_v7 }
 0x4d5   : > { %8937 = vmatpush.bf16.msrb.mxu0 %v13142_v59 }
 0x4d6   : > { %8950 = vmatpush.bf16.msrb.mxu1 %v13150_v44 }
 0x4d7   : > { %8963 = vmatpush.bf16.msrb.mxu2 %v13158_v45 }
 0x4d8   : > { %8976 = vmatpush.bf16.msrb.mxu3 %v13166_v19 }
 0x4d9   : > { %8938 = vmatpush.bf16.msrb.mxu0 %v13141_v52  ;;  %v8468_v22 = vpop.f32.mrf.mxu0 }
 0x4da   : > { %8951 = vmatpush.bf16.msrb.mxu1 %v13149_v48  ;;  %v8469_v16 = vadd.f32 %v8468_v22, %v8456_v56  ;;  %v8481_v3 = vpop.f32.mrf.mxu1  ;;  %v8457_v26 = vpop.f32.mrf.mxu3 }
 0x4db   : > { %8964 = vmatpush.bf16.msrb.mxu2 %v13157_v37 }
 0x4dc   : > { %8939 = vmatmul.bf16.vlgmr.msrb.gmra.mxu0 %v8671_v20  ;;  %v8482_v57 = vadd.f32 %v8481_v3, %v8469_v16  ;;  %8977 = vmatpush.bf16.msrb.mxu3 %v13165_v12 }
 0x4dd   : > { %8952 = vmatmul.bf16.vlgmr.msrb.gmra.mxu1 %v8672_v51 }
 0x4de   : > { %8965 = vmatmul.bf16.vlgmr.msrb.gmra.mxu2 %v8673_v53 }
 0x4e1   : > { %v8494_v46 = vpop.f32.mrf.mxu2  ;;  %v8470_v23 = vpop.f32.mrf.mxu0 }
 0x4e2   : > { %v8495_v29 = vadd.f32 %v8494_v46, %v8482_v57  ;;  %v8483_v0 = vpop.f32.mrf.mxu1 }
 0x4e9   : > { %v8496_v11 = vpop.f32.mrf.mxu2 }
 0x4f2   : > { %v8507_v60 = vpop.f32.mrf.mxu3 }
 0x4f3   : > { %v8508_v13 = vadd.f32 %v8507_v60, %v8495_v29 }
 0x4f9   : > { %v8520_v21 = vpop.f32.mrf.mxu0 }
 0x4fa   : > { %v8533_v54 = vpop.f32.mrf.mxu1  ;;  %v8509_v50 = vpop.f32.mrf.mxu3  ;;  %v8521_v18 = vadd.f32 %v8520_v21, %v8508_v13 }
 0x4fc   : > { %v8534_v8 = vadd.f32 %v8533_v54, %v8521_v18 }
 0x501   : > { %v8546_v17 = vpop.f32.mrf.mxu2  ;;  %v8522_v34 = vpop.f32.mrf.mxu0 }
 0x502   : > { %v8535_v61 = vpop.f32.mrf.mxu1  ;;  %v8547_v31 = vadd.f32 %v8546_v17, %v8534_v8 }
 0x509   : > { %v8548_v30 = vpop.f32.mrf.mxu2 }
 0x512   : > { %v8559_v28 = vpop.f32.mrf.mxu3 }
 0x513   : > { %v8560_v33 = vadd.f32 %v8559_v28, %v8547_v31 }
 0x519   : > { %v8572_v63 = vpop.f32.mrf.mxu0 }
 0x51a   : > { %v8585_v5 = vpop.f32.mrf.mxu1  ;;  %v8561_v6 = vpop.f32.mrf.mxu3  ;;  %v8573_v35 = vadd.f32 %v8572_v63, %v8560_v33 }
 0x51c   : > { %v8586_v9 = vadd.f32 %v8585_v5, %v8573_v35 }
 0x521   : > { %v8598_v15 = vpop.f32.mrf.mxu2  ;;  %v8574_v32 = vpop.f32.mrf.mxu0 }
 0x522   : > { %v8587_v27 = vpop.f32.mrf.mxu1  ;;  %v8599_v36 = vadd.f32 %v8598_v15, %v8586_v9 }
 0x529   : > { %v8600_v14 = vpop.f32.mrf.mxu2 }
 0x532   : > { %v8611_v10 = vpop.f32.mrf.mxu3 }
 0x533   : > { %v8612_v40 = vadd.f32 %v8611_v10, %v8599_v36 }
 0x539   : > { %v8624_v41 = vpop.f32.mrf.mxu0 }
 0x53a   : > { %v8637_v42 = vpop.f32.mrf.mxu1  ;;  %v8613_v38 = vpop.f32.mrf.mxu3  ;;  %v8625_v43 = vadd.f32 %v8624_v41, %v8612_v40 }
 0x53c   : > { %v8638_v4 = vadd.f32 %v8637_v42, %v8625_v43 }
 0x541   : > { %v8650_v59 = vpop.f32.mrf.mxu2  ;;  %v8626_v45 = vpop.f32.mrf.mxu0 }
 0x542   : > { %v8651_v44 = vadd.f32 %v8650_v59, %v8638_v4  ;;  %v8639_v47 = vpop.f32.mrf.mxu1  ;;  %v8663_v52 = vpop.f32.mrf.mxu3 }
 0x544   : > { %v8664_v48 = vadd.f32 %v8663_v52, %v8651_v44 }
 0x546   : > { %v8670_v39 = vmax.f32 %v8664_v48, 0.0 }
 0x548   : > { %v8674_v24 = vpack.c.bf16 %v8670_v39, %v8670_v39 }
 0x549   : > { %v8652_v37 = vpop.f32.mrf.mxu2 }
 0x54a   : > { %8978 = vmatmul.bf16.vlgmr.msrb.gmra.mxu3 %v8674_v24  ;;  %v8665_v25 = vpop.f32.mrf.mxu3 }
 0x559   : > { %v8940_v20 = vpop.f32.mrf.mxu0 }
 0x55a   : > { %v8953_v51 = vpop.f32.mrf.mxu1 }
 0x55b   : > { %v8954_v53 = vadd.f32 %v8953_v51, %v8940_v20 }
 0x561   : > { %v8966_v58 = vpop.f32.mrf.mxu2  ;;  %v8942_v22 = vpop.f32.mrf.mxu0 }
 0x562   : > { %v8967_v56 = vadd.f32 %v8966_v58, %v8954_v53  ;;  %v8955_v16 = vpop.f32.mrf.mxu1 }
 0x569   : > { %v8968_v3 = vpop.f32.mrf.mxu2 }
 0x5cd   : > { %v8979_v26 = vpop.f32.mrf.mxu3 }
 0x5ce   : > { %v8980_v57 = vadd.f32 %v8979_v26, %v8967_v56 }
 0x5d0   : > { %8984 = vst.msk [vmem:[%s2597_s5] sm:$0x3] %vm8983_vm1, %v8980_v57 }
 0x5d5   : > { %v8981_v46 = vpop.f32.mrf.mxu3 }
 0x5d6 PF: > { %p10_p12 = scmp.ge.s32.totalorder %s13329_s16, 4   ;;  %s16047_s12 = smov %s13268_s13 }
 0x5d7   : > { %s16048_s13 = smov %s13338_s19  ;;  %s16049_s14 = smov %s13329_s16 }
 0x5d8   :  { %12 = sbr.rel (!%p10_p12) target bundleno = 2 (0x2), region = 120 }

</bundles_post_ra>
